<compile_context>
chip_gen: v5e
topology: v5e:2x2
jax: 0.10.0
libtpu: 0.0.40
codegen_flags: <defaults>
</compile_context>

<pallas_src>
import functools
import math

import jax
import jax.numpy as jnp
from jax.experimental import pallas as pl
from jax.experimental.pallas import tpu as pltpu


def _vmem_spec():
    return pl.BlockSpec(memory_space=pltpu.MemorySpace.VMEM)


# ---------------------------------------------------------------------------
# Fused kernel: conv1+bn+relu+pool -> conv2 -> conv3 -> fc1 -> fc2 -> fc3
# ---------------------------------------------------------------------------
def fused_cnn_kernel(x_ref,
                     w1_ref, b1_ref,
                     w2_ref, b2_ref,
                     w3_ref, b3_ref,
                     fw1_ref, fb1_ref,
                     fw2_ref, fb2_ref,
                     fw3_ref, fb3_ref,
                     o_ref,
                     xp_ref, h1p_ref, h2p_ref, h3f_ref,
                     *, B, L):
    """All activations are channels-last (B, length, channels) inside VMEM.

    x_ref : (B, L, 1)
    w1 : (7, 1, 1, 32)  BN-scale folded          b1 : (1, 1, 32)
    w2 : (5, 32, 64)  bf16, per-tap, BN folded   b2 : (1, 64)
    w3 : (3, 64, 128) bf16, per-tap, BN folded   b3 : (1, 128)
    fw1: (128*L/8, 256) bf16, rows = kernel (l*128+c) order, BN folded
    fw2: (256, 128) bf16, BN folded              fw3: (128, 1)   fb3: (1, 1)
    o_ref : (B, 1)
    scratch: xp (B, L+6, 1), h1p (B, L/2+4, 32), h2p (B, L/4+2, 64),
             h3f (B, 128*L/8) lane-aligned flatten buffer
    """
    f32 = jnp.float32
    L2, L4, L8 = L // 2, L // 4, L // 8

    # ---- conv1: Cin=1 -> 7 taps as VPU broadcast MACs (MXU would be ~0% used)
    xp_ref[:, 0:3, :] = jnp.zeros((B, 3, 1), f32)          # zero halos only
    xp_ref[:, 3 + L:6 + L, :] = jnp.zeros((B, 3, 1), f32)
    xp_ref[:, 3:3 + L, :] = x_ref[...]
    acc1 = jnp.zeros((B, L, 32), f32)
    for k in range(7):                                      # static unroll
        acc1 = acc1 + xp_ref[:, k:k + L, :] * w1_ref[k]     # (B,L,1)*(1,1,32)
    y1 = jnp.maximum(acc1 + b1_ref[...], 0.0)
    y1 = y1.reshape(B, L2, 2, 32)                           # MaxPool1d(2, 2)
    h1 = jnp.maximum(y1[:, :, 0, :], y1[:, :, 1, :])        # (B, L2, 32)

    # ---- conv2: per-tap matmuls (contraction 32), no concat relayouts --------
    h1p_ref[:, 0:2, :] = jnp.zeros((B, 2, 32), f32)
    h1p_ref[:, 2 + L2:4 + L2, :] = jnp.zeros((B, 2, 32), f32)
    h1p_ref[:, 2:2 + L2, :] = h1
    acc2 = jnp.zeros((B * L2, 64), f32)
    for k in range(5):                                      # static unroll
        a = h1p_ref[:, k:k + L2, :].reshape(B * L2, 32)
        acc2 = acc2 + jnp.dot(a, w2_ref[k].astype(f32),
                              preferred_element_type=f32)
    y2 = jnp.maximum(acc2 + b2_ref[...], 0.0)
    y2 = y2.reshape(B, L4, 2, 64)
    h2 = jnp.maximum(y2[:, :, 0, :], y2[:, :, 1, :])        # (B, L4, 64)

    # ---- conv3: per-tap matmuls (contraction 64) -----------------------------
    h2p_ref[:, 0:1, :] = jnp.zeros((B, 1, 64), f32)
    h2p_ref[:, 1 + L4:2 + L4, :] = jnp.zeros((B, 1, 64), f32)
    h2p_ref[:, 1:1 + L4, :] = h2
    acc3 = jnp.zeros((B * L4, 128), f32)
    for k in range(3):                                      # static unroll
        a = h2p_ref[:, k:k + L4, :].reshape(B * L4, 64)
        acc3 = acc3 + jnp.dot(a, w3_ref[k].astype(f32),
                              preferred_element_type=f32)
    y3 = jnp.maximum(acc3 + b3_ref[...], 0.0)
    y3 = y3.reshape(B, L8, 2, 128)
    h3 = jnp.maximum(y3[:, :, 0, :], y3[:, :, 1, :])        # (B, L8, 128)

    # TODO(synk): Dropout layers are identity (inference); no stochastic mask.

    # ---- flatten + fc1: single K = 128*L8 matmul. The flatten is staged via
    # 128-lane-aligned stores into VMEM scratch (row order l*128+c, matching
    # fw1's pre-permuted rows), so there is no XLU relayout of h3. -------------
    for l in range(L8):                                     # static unroll
        h3f_ref[:, l * 128:(l + 1) * 128] = h3[:, l, :]
    z = jnp.dot(h3f_ref[...], fw1_ref[...].astype(f32),
                preferred_element_type=f32)
    z = jnp.maximum(z + fb1_ref[...], 0.0)                  # (B, 256)

    # ---- fc2 ----
    z = jnp.dot(z, fw2_ref[...].astype(f32), preferred_element_type=f32)
    z = jnp.maximum(z + fb2_ref[...], 0.0)                  # (B, 128)

    # ---- fc3 (no BN) ----
    z = jnp.dot(z, fw3_ref[...], preferred_element_type=f32) + fb3_ref[...]
    o_ref[...] = z.astype(o_ref.dtype)                      # (B, 1)


# ---------------------------------------------------------------------------
# Wrapper: one pallas_call for the whole forward pass
# ---------------------------------------------------------------------------
def simple_cnn_forward(x, params):
    # x: (B, input_size). PyTorch does x.unsqueeze(1) -> NCL; our kernel is
    # channels-last, so the unit channel goes last.
    B, L = x.shape
    if L % 8 != 0:
        raise ValueError("input_size must be divisible by 8 (three stride-2 pools)")
    kern = functools.partial(fused_cnn_kernel, B=B, L=L)
    out = pl.pallas_call(
        kern,
        out_shape=jax.ShapeDtypeStruct((B, 1), jnp.float32),
        in_specs=[_vmem_spec()] * 13,
        out_specs=_vmem_spec(),
        scratch_shapes=[
            pltpu.VMEM((B, L + 6, 1), jnp.float32),          # conv1 padded input
            pltpu.VMEM((B, L // 2 + 4, 32), jnp.float32),    # conv2 padded input
            pltpu.VMEM((B, L // 4 + 2, 64), jnp.float32),    # conv3 padded input
            pltpu.VMEM((B, 128 * (L // 8)), jnp.float32),    # fc1 flatten buffer
        ],
    )(x[:, :, None],
      params['w1'], params['b1'],
      params['w2'], params['b2'],
      params['w3'], params['b3'],
      params['fw1'], params['fb1'],
      params['fw2'], params['fb2'],
      params['fw3'], params['fb3'])
    # Matches PyTorch x.squeeze() for B > 1 (B == 1 would give a 0-d scalar in torch).
    return jnp.squeeze(out, axis=-1)


# ---------------------------------------------------------------------------
# Parameter construction (deterministic, synthetic — mirrors module __init__),
# with BatchNorm folded *into the weights* and weights pre-laid-out / bf16.
# ---------------------------------------------------------------------------
def init_params(key, input_size):
    eps = 1e-5
    keys = iter(jax.random.split(key, 40))
    params = {}
    L8 = input_size // 8

    def bn_fold(bias, cout):
        gamma = jax.random.uniform(next(keys), (cout,), jnp.float32, 0.8, 1.2)
        beta = jax.random.uniform(next(keys), (cout,), jnp.float32, -0.1, 0.1)
        mean = jax.random.uniform(next(keys), (cout,), jnp.float32, -0.1, 0.1)
        var = jax.random.uniform(next(keys), (cout,), jnp.float32, 0.5, 1.5)
        s = gamma / jnp.sqrt(var + eps)
        return s, (bias - mean) * s + beta

    def conv_params(cin, cout, k):
        bound = 1.0 / math.sqrt(cin * k)
        w = jax.random.uniform(next(keys), (cout, cin, k), jnp.float32, -bound, bound)
        b = jax.random.uniform(next(keys), (cout,), jnp.float32, -bound, bound)
        s, sh = bn_fold(b, cout)
        # per-tap layout (k, cin, cout); BN scale folded into output channels
        w_tap = jnp.transpose(w, (2, 1, 0)) * s[None, None, :]
        return w_tap, sh

    def fc_params(fin, fout, with_bn):
        bound = 1.0 / math.sqrt(fin)
        w = jax.random.uniform(next(keys), (fout, fin), jnp.float32, -bound, bound)
        b = jax.random.uniform(next(keys), (fout,), jnp.float32, -bound, bound)
        if with_bn:
            s, sh = bn_fold(b, fout)
        else:
            s, sh = jnp.ones((fout,), jnp.float32), b
        return jnp.transpose(w) * s[None, :], sh.reshape(1, fout)

    # conv1 kept in per-tap VPU broadcast form (Cin = 1), f32 (tiny)
    w1, b1 = conv_params(1, 32, 7)
    params['w1'] = w1.reshape(7, 1, 1, 32)
    params['b1'] = b1.reshape(1, 1, 32)

    w2, b2 = conv_params(32, 64, 5)
    params['w2'] = w2.astype(jnp.bfloat16)          # (5, 32, 64)
    params['b2'] = b2.reshape(1, 64)

    w3, b3 = conv_params(64, 128, 3)
    params['w3'] = w3.astype(jnp.bfloat16)          # (3, 64, 128)
    params['b3'] = b3.reshape(1, 128)

    fc_in = 128 * L8
    fw1, params['fb1'] = fc_params(fc_in, 256, True)
    # Fold PyTorch's channel-major flatten (view on NCL: row = c*L8 + l) into
    # fc1's rows so the kernel consumes the (l*128 + c) flatten directly.
    fw1 = fw1.reshape(128, L8, 256).transpose(1, 0, 2).reshape(fc_in, 256)
    params['fw1'] = fw1.astype(jnp.bfloat16)        # (fc_in, 256)

    fw2, params['fb2'] = fc_params(256, 128, True)
    params['fw2'] = fw2.astype(jnp.bfloat16)        # (256, 128)

    fw3, fb3 = fc_params(128, 1, False)
    params['fw3'] = fw3                              # (128, 1) f32
    params['fb3'] = fb3                              # (1, 1)
    return params


if __name__ == "__main__":
    B, input_size = 4, 64  # input_size must be divisible by 8 (3x pool of 2)
    key = jax.random.PRNGKey(0)
    kx, kp = jax.random.split(key)
    x = jax.random.normal(kx, (B, input_size), jnp.float32)
    params = init_params(kp, input_size)

    fwd = jax.jit(simple_cnn_forward)
    out = fwd(x, params)
    jax.block_until_ready(out)
    assert out.shape == (B,), out.shape
    assert bool(jnp.all(jnp.isfinite(out)))
    print("KERNEL_OK")
</pallas_src>

<mosaic_0001>
module attributes {stable_mosaic.version = 11 : i64} {
  func.func @fused_cnn_kernel(%arg0: memref<4x64x1xf32, #tpu.memory_space<vmem>>, %arg1: memref<7x1x1x32xf32, #tpu.memory_space<vmem>>, %arg2: memref<1x1x32xf32, #tpu.memory_space<vmem>>, %arg3: memref<5x32x64xbf16, #tpu.memory_space<vmem>>, %arg4: memref<1x64xf32, #tpu.memory_space<vmem>>, %arg5: memref<3x64x128xbf16, #tpu.memory_space<vmem>>, %arg6: memref<1x128xf32, #tpu.memory_space<vmem>>, %arg7: memref<1024x256xbf16, #tpu.memory_space<vmem>>, %arg8: memref<1x256xf32, #tpu.memory_space<vmem>>, %arg9: memref<256x128xbf16, #tpu.memory_space<vmem>>, %arg10: memref<1x128xf32, #tpu.memory_space<vmem>>, %arg11: memref<128x1xf32, #tpu.memory_space<vmem>>, %arg12: memref<1x1xf32, #tpu.memory_space<vmem>>, %arg13: memref<4x1xf32, #tpu.memory_space<vmem>>, %arg14: memref<4x70x1xf32, #tpu.memory_space<vmem>>, %arg15: memref<4x36x32xf32, #tpu.memory_space<vmem>>, %arg16: memref<4x18x64xf32, #tpu.memory_space<vmem>>, %arg17: memref<4x1024xf32, #tpu.memory_space<vmem>>) attributes {dimension_semantics = [], scalar_prefetch = 0 : i64, scratch_operands = 4 : i64, tpu.core_type = #tpu.core_type<tc>} {
    %cst = arith.constant 0.000000e+00 : f32
    %0 = vector.broadcast %cst : f32 to vector<4x3x1xf32>
    %c0 = arith.constant 0 : index
    %c0_0 = arith.constant 0 : index
    %c0_1 = arith.constant 0 : index
    %1 = vector.load %arg14[%c0, %c0_0, %c0_1] : memref<4x70x1xf32, #tpu.memory_space<vmem>>, vector<4x3x1xf32>
    tpu.vector_store %arg14[%c0, %c0_0, %c0_1], %0 {strides = array<i32>} : memref<4x70x1xf32, #tpu.memory_space<vmem>>, vector<4x3x1xf32>,
    %cst_2 = arith.constant 0.000000e+00 : f32
    %2 = vector.broadcast %cst_2 : f32 to vector<4x3x1xf32>
    %c0_3 = arith.constant 0 : index
    %c67 = arith.constant 67 : index
    %c0_4 = arith.constant 0 : index
    %3 = vector.load %arg14[%c0_3, %c67, %c0_4] : memref<4x70x1xf32, #tpu.memory_space<vmem>>, vector<4x3x1xf32>
    tpu.vector_store %arg14[%c0_3, %c67, %c0_4], %2 {strides = array<i32>} : memref<4x70x1xf32, #tpu.memory_space<vmem>>, vector<4x3x1xf32>,
    %c0_5 = arith.constant 0 : index
    %c0_6 = arith.constant 0 : index
    %c0_7 = arith.constant 0 : index
    %4 = vector.load %arg0[%c0_5, %c0_6, %c0_7] : memref<4x64x1xf32, #tpu.memory_space<vmem>>, vector<4x64x1xf32>
    %c0_8 = arith.constant 0 : index
    %c3 = arith.constant 3 : index
    %c0_9 = arith.constant 0 : index
    %5 = vector.load %arg14[%c0_8, %c3, %c0_9] : memref<4x70x1xf32, #tpu.memory_space<vmem>>, vector<4x64x1xf32>
    tpu.vector_store %arg14[%c0_8, %c3, %c0_9], %4 {strides = array<i32>} : memref<4x70x1xf32, #tpu.memory_space<vmem>>, vector<4x64x1xf32>,
    %cst_10 = arith.constant 0.000000e+00 : f32
    %6 = vector.broadcast %cst_10 : f32 to vector<4x64x32xf32>
    %c0_11 = arith.constant 0 : index
    %c0_12 = arith.constant 0 : index
    %c0_13 = arith.constant 0 : index
    %7 = vector.load %arg14[%c0_11, %c0_12, %c0_13] : memref<4x70x1xf32, #tpu.memory_space<vmem>>, vector<4x64x1xf32>
    %c0_14 = arith.constant 0 : index
    %c0_15 = arith.constant 0 : index
    %c0_16 = arith.constant 0 : index
    %c0_17 = arith.constant 0 : index
    %8 = vector.load %arg1[%c0_14, %c0_15, %c0_16, %c0_17] : memref<7x1x1x32xf32, #tpu.memory_space<vmem>>, vector<1x1x1x32xf32>
    %9 = vector.shape_cast %8 : vector<1x1x1x32xf32> to vector<1x1x32xf32>
    %10 = vector.broadcast %7 : vector<4x64x1xf32> to vector<4x64x32xf32>
    %11 = vector.broadcast %9 : vector<1x1x32xf32> to vector<4x64x32xf32>
    %12 = arith.mulf %10, %11 : vector<4x64x32xf32>
    %13 = arith.addf %6, %12 : vector<4x64x32xf32>
    %c0_18 = arith.constant 0 : index
    %c1 = arith.constant 1 : index
    %c0_19 = arith.constant 0 : index
    %14 = vector.load %arg14[%c0_18, %c1, %c0_19] : memref<4x70x1xf32, #tpu.memory_space<vmem>>, vector<4x64x1xf32>
    %c1_20 = arith.constant 1 : index
    %c0_21 = arith.constant 0 : index
    %c0_22 = arith.constant 0 : index
    %c0_23 = arith.constant 0 : index
    %15 = vector.load %arg1[%c1_20, %c0_21, %c0_22, %c0_23] : memref<7x1x1x32xf32, #tpu.memory_space<vmem>>, vector<1x1x1x32xf32>
    %16 = vector.shape_cast %15 : vector<1x1x1x32xf32> to vector<1x1x32xf32>
    %17 = vector.broadcast %14 : vector<4x64x1xf32> to vector<4x64x32xf32>
    %18 = vector.broadcast %16 : vector<1x1x32xf32> to vector<4x64x32xf32>
    %19 = arith.mulf %17, %18 : vector<4x64x32xf32>
    %20 = arith.addf %13, %19 : vector<4x64x32xf32>
    %c0_24 = arith.constant 0 : index
    %c2 = arith.constant 2 : index
    %c0_25 = arith.constant 0 : index
    %21 = vector.load %arg14[%c0_24, %c2, %c0_25] : memref<4x70x1xf32, #tpu.memory_space<vmem>>, vector<4x64x1xf32>
    %c2_26 = arith.constant 2 : index
    %c0_27 = arith.constant 0 : index
    %c0_28 = arith.constant 0 : index
    %c0_29 = arith.constant 0 : index
    %22 = vector.load %arg1[%c2_26, %c0_27, %c0_28, %c0_29] : memref<7x1x1x32xf32, #tpu.memory_space<vmem>>, vector<1x1x1x32xf32>
    %23 = vector.shape_cast %22 : vector<1x1x1x32xf32> to vector<1x1x32xf32>
    %24 = vector.broadcast %21 : vector<4x64x1xf32> to vector<4x64x32xf32>
    %25 = vector.broadcast %23 : vector<1x1x32xf32> to vector<4x64x32xf32>
    %26 = arith.mulf %24, %25 : vector<4x64x32xf32>
    %27 = arith.addf %20, %26 : vector<4x64x32xf32>
    %c0_30 = arith.constant 0 : index
    %c3_31 = arith.constant 3 : index
    %c0_32 = arith.constant 0 : index
    %28 = vector.load %arg14[%c0_30, %c3_31, %c0_32] : memref<4x70x1xf32, #tpu.memory_space<vmem>>, vector<4x64x1xf32>
    %c3_33 = arith.constant 3 : index
    %c0_34 = arith.constant 0 : index
    %c0_35 = arith.constant 0 : index
    %c0_36 = arith.constant 0 : index
    %29 = vector.load %arg1[%c3_33, %c0_34, %c0_35, %c0_36] : memref<7x1x1x32xf32, #tpu.memory_space<vmem>>, vector<1x1x1x32xf32>
    %30 = vector.shape_cast %29 : vector<1x1x1x32xf32> to vector<1x1x32xf32>
    %31 = vector.broadcast %28 : vector<4x64x1xf32> to vector<4x64x32xf32>
    %32 = vector.broadcast %30 : vector<1x1x32xf32> to vector<4x64x32xf32>
    %33 = arith.mulf %31, %32 : vector<4x64x32xf32>
    %34 = arith.addf %27, %33 : vector<4x64x32xf32>
    %c0_37 = arith.constant 0 : index
    %c4 = arith.constant 4 : index
    %c0_38 = arith.constant 0 : index
    %35 = vector.load %arg14[%c0_37, %c4, %c0_38] : memref<4x70x1xf32, #tpu.memory_space<vmem>>, vector<4x64x1xf32>
    %c4_39 = arith.constant 4 : index
    %c0_40 = arith.constant 0 : index
    %c0_41 = arith.constant 0 : index
    %c0_42 = arith.constant 0 : index
    %36 = vector.load %arg1[%c4_39, %c0_40, %c0_41, %c0_42] : memref<7x1x1x32xf32, #tpu.memory_space<vmem>>, vector<1x1x1x32xf32>
    %37 = vector.shape_cast %36 : vector<1x1x1x32xf32> to vector<1x1x32xf32>
    %38 = vector.broadcast %35 : vector<4x64x1xf32> to vector<4x64x32xf32>
    %39 = vector.broadcast %37 : vector<1x1x32xf32> to vector<4x64x32xf32>
    %40 = arith.mulf %38, %39 : vector<4x64x32xf32>
    %41 = arith.addf %34, %40 : vector<4x64x32xf32>
    %c0_43 = arith.constant 0 : index
    %c5 = arith.constant 5 : index
    %c0_44 = arith.constant 0 : index
    %42 = vector.load %arg14[%c0_43, %c5, %c0_44] : memref<4x70x1xf32, #tpu.memory_space<vmem>>, vector<4x64x1xf32>
    %c5_45 = arith.constant 5 : index
    %c0_46 = arith.constant 0 : index
    %c0_47 = arith.constant 0 : index
    %c0_48 = arith.constant 0 : index
    %43 = vector.load %arg1[%c5_45, %c0_46, %c0_47, %c0_48] : memref<7x1x1x32xf32, #tpu.memory_space<vmem>>, vector<1x1x1x32xf32>
    %44 = vector.shape_cast %43 : vector<1x1x1x32xf32> to vector<1x1x32xf32>
    %45 = vector.broadcast %42 : vector<4x64x1xf32> to vector<4x64x32xf32>
    %46 = vector.broadcast %44 : vector<1x1x32xf32> to vector<4x64x32xf32>
    %47 = arith.mulf %45, %46 : vector<4x64x32xf32>
    %48 = arith.addf %41, %47 : vector<4x64x32xf32>
    %c0_49 = arith.constant 0 : index
    %c6 = arith.constant 6 : index
    %c0_50 = arith.constant 0 : index
    %49 = vector.load %arg14[%c0_49, %c6, %c0_50] : memref<4x70x1xf32, #tpu.memory_space<vmem>>, vector<4x64x1xf32>
    %c6_51 = arith.constant 6 : index
    %c0_52 = arith.constant 0 : index
    %c0_53 = arith.constant 0 : index
    %c0_54 = arith.constant 0 : index
    %50 = vector.load %arg1[%c6_51, %c0_52, %c0_53, %c0_54] : memref<7x1x1x32xf32, #tpu.memory_space<vmem>>, vector<1x1x1x32xf32>
    %51 = vector.shape_cast %50 : vector<1x1x1x32xf32> to vector<1x1x32xf32>
    %52 = vector.broadcast %49 : vector<4x64x1xf32> to vector<4x64x32xf32>
    %53 = vector.broadcast %51 : vector<1x1x32xf32> to vector<4x64x32xf32>
    %54 = arith.mulf %52, %53 : vector<4x64x32xf32>
    %55 = arith.addf %48, %54 : vector<4x64x32xf32>
    %c0_55 = arith.constant 0 : index
    %c0_56 = arith.constant 0 : index
    %c0_57 = arith.constant 0 : index
    %56 = vector.load %arg2[%c0_55, %c0_56, %c0_57] : memref<1x1x32xf32, #tpu.memory_space<vmem>>, vector<1x1x32xf32>
    %57 = vector.broadcast %56 : vector<1x1x32xf32> to vector<4x64x32xf32>
    %58 = arith.addf %55, %57 : vector<4x64x32xf32>
    %cst_58 = arith.constant 0.000000e+00 : f32
    %59 = vector.broadcast %cst_58 : f32 to vector<4x64x32xf32>
    %60 = arith.maximumf %58, %59 : vector<4x64x32xf32>
    %61 = vector.shape_cast %60 : vector<4x64x32xf32> to vector<4x32x2x32xf32>
    %62 = vector.extract_strided_slice %61 {offsets = [0, 0, 0, 0], sizes = [4, 32, 1, 32], strides = [1, 1, 1, 1]} : vector<4x32x2x32xf32> to vector<4x32x1x32xf32>
    %63 = vector.shape_cast %62 : vector<4x32x1x32xf32> to vector<4x32x32xf32>
    %64 = vector.extract_strided_slice %61 {offsets = [0, 0, 1, 0], sizes = [4, 32, 1, 32], strides = [1, 1, 1, 1]} : vector<4x32x2x32xf32> to vector<4x32x1x32xf32>
    %65 = vector.shape_cast %64 : vector<4x32x1x32xf32> to vector<4x32x32xf32>
    %66 = arith.maximumf %63, %65 : vector<4x32x32xf32>
    %cst_59 = arith.constant 0.000000e+00 : f32
    %67 = vector.broadcast %cst_59 : f32 to vector<4x2x32xf32>
    %c0_60 = arith.constant 0 : index
    %c0_61 = arith.constant 0 : index
    %c0_62 = arith.constant 0 : index
    %68 = vector.load %arg15[%c0_60, %c0_61, %c0_62] : memref<4x36x32xf32, #tpu.memory_space<vmem>>, vector<4x2x32xf32>
    tpu.vector_store %arg15[%c0_60, %c0_61, %c0_62], %67 {strides = array<i32>} : memref<4x36x32xf32, #tpu.memory_space<vmem>>, vector<4x2x32xf32>,
    %cst_63 = arith.constant 0.000000e+00 : f32
    %69 = vector.broadcast %cst_63 : f32 to vector<4x2x32xf32>
    %c0_64 = arith.constant 0 : index
    %c34 = arith.constant 34 : index
    %c0_65 = arith.constant 0 : index
    %70 = vector.load %arg15[%c0_64, %c34, %c0_65] : memref<4x36x32xf32, #tpu.memory_space<vmem>>, vector<4x2x32xf32>
    tpu.vector_store %arg15[%c0_64, %c34, %c0_65], %69 {strides = array<i32>} : memref<4x36x32xf32, #tpu.memory_space<vmem>>, vector<4x2x32xf32>,
    %c0_66 = arith.constant 0 : index
    %c2_67 = arith.constant 2 : index
    %c0_68 = arith.constant 0 : index
    %71 = vector.load %arg15[%c0_66, %c2_67, %c0_68] : memref<4x36x32xf32, #tpu.memory_space<vmem>>, vector<4x32x32xf32>
    tpu.vector_store %arg15[%c0_66, %c2_67, %c0_68], %66 {strides = array<i32>} : memref<4x36x32xf32, #tpu.memory_space<vmem>>, vector<4x32x32xf32>,
    %cst_69 = arith.constant 0.000000e+00 : f32
    %72 = vector.broadcast %cst_69 : f32 to vector<128x64xf32>
    %c0_70 = arith.constant 0 : index
    %c0_71 = arith.constant 0 : index
    %c0_72 = arith.constant 0 : index
    %73 = vector.load %arg15[%c0_70, %c0_71, %c0_72] : memref<4x36x32xf32, #tpu.memory_space<vmem>>, vector<4x32x32xf32>
    %74 = vector.shape_cast %73 : vector<4x32x32xf32> to vector<128x32xf32>
    %c0_73 = arith.constant 0 : index
    %c0_74 = arith.constant 0 : index
    %c0_75 = arith.constant 0 : index
    %75 = vector.load %arg3[%c0_73, %c0_74, %c0_75] : memref<5x32x64xbf16, #tpu.memory_space<vmem>>, vector<1x32x64xbf16>
    %76 = vector.shape_cast %75 : vector<1x32x64xbf16> to vector<32x64xbf16>
    %77 = arith.extf %76 : vector<32x64xbf16> to vector<32x64xf32>
    %cst_76 = arith.constant dense<0.000000e+00> : vector<128x64xf32>
    %78 = tpu.matmul %74, %77, %cst_76 {dimension_numbers = #tpu.dot_dimension_numbers<[1], [0], [0], [1], [0, 0, 1, 1], [], []>} : vector<128x32xf32>, vector<32x64xf32>, vector<128x64xf32> -> vector<128x64xf32>
    %79 = arith.addf %72, %78 : vector<128x64xf32>
    %c0_77 = arith.constant 0 : index
    %c1_78 = arith.constant 1 : index
    %c0_79 = arith.constant 0 : index
    %80 = vector.load %arg15[%c0_77, %c1_78, %c0_79] : memref<4x36x32xf32, #tpu.memory_space<vmem>>, vector<4x32x32xf32>
    %81 = vector.shape_cast %80 : vector<4x32x32xf32> to vector<128x32xf32>
    %c1_80 = arith.constant 1 : index
    %c0_81 = arith.constant 0 : index
    %c0_82 = arith.constant 0 : index
    %82 = vector.load %arg3[%c1_80, %c0_81, %c0_82] : memref<5x32x64xbf16, #tpu.memory_space<vmem>>, vector<1x32x64xbf16>
    %83 = vector.shape_cast %82 : vector<1x32x64xbf16> to vector<32x64xbf16>
    %84 = arith.extf %83 : vector<32x64xbf16> to vector<32x64xf32>
    %cst_83 = arith.constant dense<0.000000e+00> : vector<128x64xf32>
    %85 = tpu.matmul %81, %84, %cst_83 {dimension_numbers = #tpu.dot_dimension_numbers<[1], [0], [0], [1], [0, 0, 1, 1], [], []>} : vector<128x32xf32>, vector<32x64xf32>, vector<128x64xf32> -> vector<128x64xf32>
    %86 = arith.addf %79, %85 : vector<128x64xf32>
    %c0_84 = arith.constant 0 : index
    %c2_85 = arith.constant 2 : index
    %c0_86 = arith.constant 0 : index
    %87 = vector.load %arg15[%c0_84, %c2_85, %c0_86] : memref<4x36x32xf32, #tpu.memory_space<vmem>>, vector<4x32x32xf32>
    %88 = vector.shape_cast %87 : vector<4x32x32xf32> to vector<128x32xf32>
    %c2_87 = arith.constant 2 : index
    %c0_88 = arith.constant 0 : index
    %c0_89 = arith.constant 0 : index
    %89 = vector.load %arg3[%c2_87, %c0_88, %c0_89] : memref<5x32x64xbf16, #tpu.memory_space<vmem>>, vector<1x32x64xbf16>
    %90 = vector.shape_cast %89 : vector<1x32x64xbf16> to vector<32x64xbf16>
    %91 = arith.extf %90 : vector<32x64xbf16> to vector<32x64xf32>
    %cst_90 = arith.constant dense<0.000000e+00> : vector<128x64xf32>
    %92 = tpu.matmul %88, %91, %cst_90 {dimension_numbers = #tpu.dot_dimension_numbers<[1], [0], [0], [1], [0, 0, 1, 1], [], []>} : vector<128x32xf32>, vector<32x64xf32>, vector<128x64xf32> -> vector<128x64xf32>
    %93 = arith.addf %86, %92 : vector<128x64xf32>
    %c0_91 = arith.constant 0 : index
    %c3_92 = arith.constant 3 : index
    %c0_93 = arith.constant 0 : index
    %94 = vector.load %arg15[%c0_91, %c3_92, %c0_93] : memref<4x36x32xf32, #tpu.memory_space<vmem>>, vector<4x32x32xf32>
    %95 = vector.shape_cast %94 : vector<4x32x32xf32> to vector<128x32xf32>
    %c3_94 = arith.constant 3 : index
    %c0_95 = arith.constant 0 : index
    %c0_96 = arith.constant 0 : index
    %96 = vector.load %arg3[%c3_94, %c0_95, %c0_96] : memref<5x32x64xbf16, #tpu.memory_space<vmem>>, vector<1x32x64xbf16>
    %97 = vector.shape_cast %96 : vector<1x32x64xbf16> to vector<32x64xbf16>
    %98 = arith.extf %97 : vector<32x64xbf16> to vector<32x64xf32>
    %cst_97 = arith.constant dense<0.000000e+00> : vector<128x64xf32>
    %99 = tpu.matmul %95, %98, %cst_97 {dimension_numbers = #tpu.dot_dimension_numbers<[1], [0], [0], [1], [0, 0, 1, 1], [], []>} : vector<128x32xf32>, vector<32x64xf32>, vector<128x64xf32> -> vector<128x64xf32>
    %100 = arith.addf %93, %99 : vector<128x64xf32>
    %c0_98 = arith.constant 0 : index
    %c4_99 = arith.constant 4 : index
    %c0_100 = arith.constant 0 : index
    %101 = vector.load %arg15[%c0_98, %c4_99, %c0_100] : memref<4x36x32xf32, #tpu.memory_space<vmem>>, vector<4x32x32xf32>
    %102 = vector.shape_cast %101 : vector<4x32x32xf32> to vector<128x32xf32>
    %c4_101 = arith.constant 4 : index
    %c0_102 = arith.constant 0 : index
    %c0_103 = arith.constant 0 : index
    %103 = vector.load %arg3[%c4_101, %c0_102, %c0_103] : memref<5x32x64xbf16, #tpu.memory_space<vmem>>, vector<1x32x64xbf16>
    %104 = vector.shape_cast %103 : vector<1x32x64xbf16> to vector<32x64xbf16>
    %105 = arith.extf %104 : vector<32x64xbf16> to vector<32x64xf32>
    %cst_104 = arith.constant dense<0.000000e+00> : vector<128x64xf32>
    %106 = tpu.matmul %102, %105, %cst_104 {dimension_numbers = #tpu.dot_dimension_numbers<[1], [0], [0], [1], [0, 0, 1, 1], [], []>} : vector<128x32xf32>, vector<32x64xf32>, vector<128x64xf32> -> vector<128x64xf32>
    %107 = arith.addf %100, %106 : vector<128x64xf32>
    %c0_105 = arith.constant 0 : index
    %c0_106 = arith.constant 0 : index
    %108 = vector.load %arg4[%c0_105, %c0_106] : memref<1x64xf32, #tpu.memory_space<vmem>>, vector<1x64xf32>
    %109 = vector.broadcast %108 : vector<1x64xf32> to vector<128x64xf32>
    %110 = arith.addf %107, %109 : vector<128x64xf32>
    %cst_107 = arith.constant 0.000000e+00 : f32
    %111 = vector.broadcast %cst_107 : f32 to vector<128x64xf32>
    %112 = arith.maximumf %110, %111 : vector<128x64xf32>
    %113 = vector.shape_cast %112 : vector<128x64xf32> to vector<4x16x2x64xf32>
    %114 = vector.extract_strided_slice %113 {offsets = [0, 0, 0, 0], sizes = [4, 16, 1, 64], strides = [1, 1, 1, 1]} : vector<4x16x2x64xf32> to vector<4x16x1x64xf32>
    %115 = vector.shape_cast %114 : vector<4x16x1x64xf32> to vector<4x16x64xf32>
    %116 = vector.extract_strided_slice %113 {offsets = [0, 0, 1, 0], sizes = [4, 16, 1, 64], strides = [1, 1, 1, 1]} : vector<4x16x2x64xf32> to vector<4x16x1x64xf32>
    %117 = vector.shape_cast %116 : vector<4x16x1x64xf32> to vector<4x16x64xf32>
    %118 = arith.maximumf %115, %117 : vector<4x16x64xf32>
    %cst_108 = arith.constant 0.000000e+00 : f32
    %119 = vector.broadcast %cst_108 : f32 to vector<4x1x64xf32>
    %c0_109 = arith.constant 0 : index
    %c0_110 = arith.constant 0 : index
    %c0_111 = arith.constant 0 : index
    %120 = vector.load %arg16[%c0_109, %c0_110, %c0_111] : memref<4x18x64xf32, #tpu.memory_space<vmem>>, vector<4x1x64xf32>
    tpu.vector_store %arg16[%c0_109, %c0_110, %c0_111], %119 {strides = array<i32>} : memref<4x18x64xf32, #tpu.memory_space<vmem>>, vector<4x1x64xf32>,
    %cst_112 = arith.constant 0.000000e+00 : f32
    %121 = vector.broadcast %cst_112 : f32 to vector<4x1x64xf32>
    %c0_113 = arith.constant 0 : index
    %c17 = arith.constant 17 : index
    %c0_114 = arith.constant 0 : index
    %122 = vector.load %arg16[%c0_113, %c17, %c0_114] : memref<4x18x64xf32, #tpu.memory_space<vmem>>, vector<4x1x64xf32>
    tpu.vector_store %arg16[%c0_113, %c17, %c0_114], %121 {strides = array<i32>} : memref<4x18x64xf32, #tpu.memory_space<vmem>>, vector<4x1x64xf32>,
    %c0_115 = arith.constant 0 : index
    %c1_116 = arith.constant 1 : index
    %c0_117 = arith.constant 0 : index
    %123 = vector.load %arg16[%c0_115, %c1_116, %c0_117] : memref<4x18x64xf32, #tpu.memory_space<vmem>>, vector<4x16x64xf32>
    tpu.vector_store %arg16[%c0_115, %c1_116, %c0_117], %118 {strides = array<i32>} : memref<4x18x64xf32, #tpu.memory_space<vmem>>, vector<4x16x64xf32>,
    %cst_118 = arith.constant 0.000000e+00 : f32
    %124 = vector.broadcast %cst_118 : f32 to vector<64x128xf32>
    %c0_119 = arith.constant 0 : index
    %c0_120 = arith.constant 0 : index
    %c0_121 = arith.constant 0 : index
    %125 = vector.load %arg16[%c0_119, %c0_120, %c0_121] : memref<4x18x64xf32, #tpu.memory_space<vmem>>, vector<4x16x64xf32>
    %126 = vector.shape_cast %125 : vector<4x16x64xf32> to vector<64x64xf32>
    %c0_122 = arith.constant 0 : index
    %c0_123 = arith.constant 0 : index
    %c0_124 = arith.constant 0 : index
    %127 = vector.load %arg5[%c0_122, %c0_123, %c0_124] : memref<3x64x128xbf16, #tpu.memory_space<vmem>>, vector<1x64x128xbf16>
    %128 = vector.shape_cast %127 : vector<1x64x128xbf16> to vector<64x128xbf16>
    %129 = arith.extf %128 : vector<64x128xbf16> to vector<64x128xf32>
    %cst_125 = arith.constant dense<0.000000e+00> : vector<64x128xf32>
    %130 = tpu.matmul %126, %129, %cst_125 {dimension_numbers = #tpu.dot_dimension_numbers<[1], [0], [0], [1], [0, 0, 1, 1], [], []>} : vector<64x64xf32>, vector<64x128xf32>, vector<64x128xf32> -> vector<64x128xf32>
    %131 = arith.addf %124, %130 : vector<64x128xf32>
    %c0_126 = arith.constant 0 : index
    %c1_127 = arith.constant 1 : index
    %c0_128 = arith.constant 0 : index
    %132 = vector.load %arg16[%c0_126, %c1_127, %c0_128] : memref<4x18x64xf32, #tpu.memory_space<vmem>>, vector<4x16x64xf32>
    %133 = vector.shape_cast %132 : vector<4x16x64xf32> to vector<64x64xf32>
    %c1_129 = arith.constant 1 : index
    %c0_130 = arith.constant 0 : index
    %c0_131 = arith.constant 0 : index
    %134 = vector.load %arg5[%c1_129, %c0_130, %c0_131] : memref<3x64x128xbf16, #tpu.memory_space<vmem>>, vector<1x64x128xbf16>
    %135 = vector.shape_cast %134 : vector<1x64x128xbf16> to vector<64x128xbf16>
    %136 = arith.extf %135 : vector<64x128xbf16> to vector<64x128xf32>
    %cst_132 = arith.constant dense<0.000000e+00> : vector<64x128xf32>
    %137 = tpu.matmul %133, %136, %cst_132 {dimension_numbers = #tpu.dot_dimension_numbers<[1], [0], [0], [1], [0, 0, 1, 1], [], []>} : vector<64x64xf32>, vector<64x128xf32>, vector<64x128xf32> -> vector<64x128xf32>
    %138 = arith.addf %131, %137 : vector<64x128xf32>
    %c0_133 = arith.constant 0 : index
    %c2_134 = arith.constant 2 : index
    %c0_135 = arith.constant 0 : index
    %139 = vector.load %arg16[%c0_133, %c2_134, %c0_135] : memref<4x18x64xf32, #tpu.memory_space<vmem>>, vector<4x16x64xf32>
    %140 = vector.shape_cast %139 : vector<4x16x64xf32> to vector<64x64xf32>
    %c2_136 = arith.constant 2 : index
    %c0_137 = arith.constant 0 : index
    %c0_138 = arith.constant 0 : index
    %141 = vector.load %arg5[%c2_136, %c0_137, %c0_138] : memref<3x64x128xbf16, #tpu.memory_space<vmem>>, vector<1x64x128xbf16>
    %142 = vector.shape_cast %141 : vector<1x64x128xbf16> to vector<64x128xbf16>
    %143 = arith.extf %142 : vector<64x128xbf16> to vector<64x128xf32>
    %cst_139 = arith.constant dense<0.000000e+00> : vector<64x128xf32>
    %144 = tpu.matmul %140, %143, %cst_139 {dimension_numbers = #tpu.dot_dimension_numbers<[1], [0], [0], [1], [0, 0, 1, 1], [], []>} : vector<64x64xf32>, vector<64x128xf32>, vector<64x128xf32> -> vector<64x128xf32>
    %145 = arith.addf %138, %144 : vector<64x128xf32>
    %c0_140 = arith.constant 0 : index
    %c0_141 = arith.constant 0 : index
    %146 = vector.load %arg6[%c0_140, %c0_141] : memref<1x128xf32, #tpu.memory_space<vmem>>, vector<1x128xf32>
    %147 = vector.broadcast %146 : vector<1x128xf32> to vector<64x128xf32>
    %148 = arith.addf %145, %147 : vector<64x128xf32>
    %cst_142 = arith.constant 0.000000e+00 : f32
    %149 = vector.broadcast %cst_142 : f32 to vector<64x128xf32>
    %150 = arith.maximumf %148, %149 : vector<64x128xf32>
    %151 = vector.shape_cast %150 : vector<64x128xf32> to vector<4x8x2x128xf32>
    %152 = vector.extract_strided_slice %151 {offsets = [0, 0, 0, 0], sizes = [4, 8, 1, 128], strides = [1, 1, 1, 1]} : vector<4x8x2x128xf32> to vector<4x8x1x128xf32>
    %153 = vector.shape_cast %152 : vector<4x8x1x128xf32> to vector<4x8x128xf32>
    %154 = vector.extract_strided_slice %151 {offsets = [0, 0, 1, 0], sizes = [4, 8, 1, 128], strides = [1, 1, 1, 1]} : vector<4x8x2x128xf32> to vector<4x8x1x128xf32>
    %155 = vector.shape_cast %154 : vector<4x8x1x128xf32> to vector<4x8x128xf32>
    %156 = arith.maximumf %153, %155 : vector<4x8x128xf32>
    %157 = vector.extract_strided_slice %156 {offsets = [0, 0, 0], sizes = [4, 1, 128], strides = [1, 1, 1]} : vector<4x8x128xf32> to vector<4x1x128xf32>
    %158 = vector.shape_cast %157 : vector<4x1x128xf32> to vector<4x128xf32>
    %c0_143 = arith.constant 0 : index
    %c0_144 = arith.constant 0 : index
    %159 = vector.load %arg17[%c0_143, %c0_144] : memref<4x1024xf32, #tpu.memory_space<vmem>>, vector<4x128xf32>
    tpu.vector_store %arg17[%c0_143, %c0_144], %158 {strides = array<i32>} : memref<4x1024xf32, #tpu.memory_space<vmem>>, vector<4x128xf32>,
    %160 = vector.extract_strided_slice %156 {offsets = [0, 1, 0], sizes = [4, 1, 128], strides = [1, 1, 1]} : vector<4x8x128xf32> to vector<4x1x128xf32>
    %161 = vector.shape_cast %160 : vector<4x1x128xf32> to vector<4x128xf32>
    %c0_145 = arith.constant 0 : index
    %c128 = arith.constant 128 : index
    %162 = vector.load %arg17[%c0_145, %c128] : memref<4x1024xf32, #tpu.memory_space<vmem>>, vector<4x128xf32>
    tpu.vector_store %arg17[%c0_145, %c128], %161 {strides = array<i32>} : memref<4x1024xf32, #tpu.memory_space<vmem>>, vector<4x128xf32>,
    %163 = vector.extract_strided_slice %156 {offsets = [0, 2, 0], sizes = [4, 1, 128], strides = [1, 1, 1]} : vector<4x8x128xf32> to vector<4x1x128xf32>
    %164 = vector.shape_cast %163 : vector<4x1x128xf32> to vector<4x128xf32>
    %c0_146 = arith.constant 0 : index
    %c256 = arith.constant 256 : index
    %165 = vector.load %arg17[%c0_146, %c256] : memref<4x1024xf32, #tpu.memory_space<vmem>>, vector<4x128xf32>
    tpu.vector_store %arg17[%c0_146, %c256], %164 {strides = array<i32>} : memref<4x1024xf32, #tpu.memory_space<vmem>>, vector<4x128xf32>,
    %166 = vector.extract_strided_slice %156 {offsets = [0, 3, 0], sizes = [4, 1, 128], strides = [1, 1, 1]} : vector<4x8x128xf32> to vector<4x1x128xf32>
    %167 = vector.shape_cast %166 : vector<4x1x128xf32> to vector<4x128xf32>
    %c0_147 = arith.constant 0 : index
    %c384 = arith.constant 384 : index
    %168 = vector.load %arg17[%c0_147, %c384] : memref<4x1024xf32, #tpu.memory_space<vmem>>, vector<4x128xf32>
    tpu.vector_store %arg17[%c0_147, %c384], %167 {strides = array<i32>} : memref<4x1024xf32, #tpu.memory_space<vmem>>, vector<4x128xf32>,
    %169 = vector.extract_strided_slice %156 {offsets = [0, 4, 0], sizes = [4, 1, 128], strides = [1, 1, 1]} : vector<4x8x128xf32> to vector<4x1x128xf32>
    %170 = vector.shape_cast %169 : vector<4x1x128xf32> to vector<4x128xf32>
    %c0_148 = arith.constant 0 : index
    %c512 = arith.constant 512 : index
    %171 = vector.load %arg17[%c0_148, %c512] : memref<4x1024xf32, #tpu.memory_space<vmem>>, vector<4x128xf32>
    tpu.vector_store %arg17[%c0_148, %c512], %170 {strides = array<i32>} : memref<4x1024xf32, #tpu.memory_space<vmem>>, vector<4x128xf32>,
    %172 = vector.extract_strided_slice %156 {offsets = [0, 5, 0], sizes = [4, 1, 128], strides = [1, 1, 1]} : vector<4x8x128xf32> to vector<4x1x128xf32>
    %173 = vector.shape_cast %172 : vector<4x1x128xf32> to vector<4x128xf32>
    %c0_149 = arith.constant 0 : index
    %c640 = arith.constant 640 : index
    %174 = vector.load %arg17[%c0_149, %c640] : memref<4x1024xf32, #tpu.memory_space<vmem>>, vector<4x128xf32>
    tpu.vector_store %arg17[%c0_149, %c640], %173 {strides = array<i32>} : memref<4x1024xf32, #tpu.memory_space<vmem>>, vector<4x128xf32>,
    %175 = vector.extract_strided_slice %156 {offsets = [0, 6, 0], sizes = [4, 1, 128], strides = [1, 1, 1]} : vector<4x8x128xf32> to vector<4x1x128xf32>
    %176 = vector.shape_cast %175 : vector<4x1x128xf32> to vector<4x128xf32>
    %c0_150 = arith.constant 0 : index
    %c768 = arith.constant 768 : index
    %177 = vector.load %arg17[%c0_150, %c768] : memref<4x1024xf32, #tpu.memory_space<vmem>>, vector<4x128xf32>
    tpu.vector_store %arg17[%c0_150, %c768], %176 {strides = array<i32>} : memref<4x1024xf32, #tpu.memory_space<vmem>>, vector<4x128xf32>,
    %178 = vector.extract_strided_slice %156 {offsets = [0, 7, 0], sizes = [4, 1, 128], strides = [1, 1, 1]} : vector<4x8x128xf32> to vector<4x1x128xf32>
    %179 = vector.shape_cast %178 : vector<4x1x128xf32> to vector<4x128xf32>
    %c0_151 = arith.constant 0 : index
    %c896 = arith.constant 896 : index
    %180 = vector.load %arg17[%c0_151, %c896] : memref<4x1024xf32, #tpu.memory_space<vmem>>, vector<4x128xf32>
    tpu.vector_store %arg17[%c0_151, %c896], %179 {strides = array<i32>} : memref<4x1024xf32, #tpu.memory_space<vmem>>, vector<4x128xf32>,
    %c0_152 = arith.constant 0 : index
    %c0_153 = arith.constant 0 : index
    %181 = vector.load %arg17[%c0_152, %c0_153] : memref<4x1024xf32, #tpu.memory_space<vmem>>, vector<4x1024xf32>
    %c0_154 = arith.constant 0 : index
    %c0_155 = arith.constant 0 : index
    %182 = vector.load %arg7[%c0_154, %c0_155] : memref<1024x256xbf16, #tpu.memory_space<vmem>>, vector<1024x256xbf16>
    %183 = arith.extf %182 : vector<1024x256xbf16> to vector<1024x256xf32>
    %cst_156 = arith.constant dense<0.000000e+00> : vector<4x256xf32>
    %184 = tpu.matmul %181, %183, %cst_156 {dimension_numbers = #tpu.dot_dimension_numbers<[1], [0], [0], [1], [0, 0, 1, 1], [], []>} : vector<4x1024xf32>, vector<1024x256xf32>, vector<4x256xf32> -> vector<4x256xf32>
    %c0_157 = arith.constant 0 : index
    %c0_158 = arith.constant 0 : index
    %185 = vector.load %arg8[%c0_157, %c0_158] : memref<1x256xf32, #tpu.memory_space<vmem>>, vector<1x256xf32>
    %186 = vector.broadcast %185 : vector<1x256xf32> to vector<4x256xf32>
    %187 = arith.addf %184, %186 : vector<4x256xf32>
    %cst_159 = arith.constant 0.000000e+00 : f32
    %188 = vector.broadcast %cst_159 : f32 to vector<4x256xf32>
    %189 = arith.maximumf %187, %188 : vector<4x256xf32>
    %c0_160 = arith.constant 0 : index
    %c0_161 = arith.constant 0 : index
    %190 = vector.load %arg9[%c0_160, %c0_161] : memref<256x128xbf16, #tpu.memory_space<vmem>>, vector<256x128xbf16>
    %191 = arith.extf %190 : vector<256x128xbf16> to vector<256x128xf32>
    %cst_162 = arith.constant dense<0.000000e+00> : vector<4x128xf32>
    %192 = tpu.matmul %189, %191, %cst_162 {dimension_numbers = #tpu.dot_dimension_numbers<[1], [0], [0], [1], [0, 0, 1, 1], [], []>} : vector<4x256xf32>, vector<256x128xf32>, vector<4x128xf32> -> vector<4x128xf32>
    %c0_163 = arith.constant 0 : index
    %c0_164 = arith.constant 0 : index
    %193 = vector.load %arg10[%c0_163, %c0_164] : memref<1x128xf32, #tpu.memory_space<vmem>>, vector<1x128xf32>
    %194 = vector.broadcast %193 : vector<1x128xf32> to vector<4x128xf32>
    %195 = arith.addf %192, %194 : vector<4x128xf32>
    %cst_165 = arith.constant 0.000000e+00 : f32
    %196 = vector.broadcast %cst_165 : f32 to vector<4x128xf32>
    %197 = arith.maximumf %195, %196 : vector<4x128xf32>
    %c0_166 = arith.constant 0 : index
    %c0_167 = arith.constant 0 : index
    %198 = vector.load %arg11[%c0_166, %c0_167] : memref<128x1xf32, #tpu.memory_space<vmem>>, vector<128x1xf32>
    %cst_168 = arith.constant dense<0.000000e+00> : vector<4x1xf32>
    %199 = tpu.matmul %197, %198, %cst_168 {dimension_numbers = #tpu.dot_dimension_numbers<[1], [0], [0], [1], [0, 0, 1, 1], [], []>} : vector<4x128xf32>, vector<128x1xf32>, vector<4x1xf32> -> vector<4x1xf32>
    %c0_169 = arith.constant 0 : index
    %c0_170 = arith.constant 0 : index
    %200 = vector.load %arg12[%c0_169, %c0_170] : memref<1x1xf32, #tpu.memory_space<vmem>>, vector<1x1xf32>
    %201 = vector.broadcast %200 : vector<1x1xf32> to vector<4x1xf32>
    %202 = arith.addf %199, %201 : vector<4x1xf32>
    %c0_171 = arith.constant 0 : index
    %c0_172 = arith.constant 0 : index
    %203 = vector.load %arg13[%c0_171, %c0_172] : memref<4x1xf32, #tpu.memory_space<vmem>>, vector<4x1xf32>
    tpu.vector_store %arg13[%c0_171, %c0_172], %202 {strides = array<i32>} : memref<4x1xf32, #tpu.memory_space<vmem>>, vector<4x1xf32>,
    return
  }
}

</mosaic_0001>

<bundles_post_ra>
// kernel: simple_cnn_forward.1
= control target key start
LH: loop header
LB: loop body
LE: loop exit
PB: predicated region body
PF: predicated region fallthrough
CT: control target
= control target key end

     0   :  { %s9057_s0 = inlined_call_operand.vmem [shape: f32[4,64,1], index: 0, kind: input, shape index: {}]   ;;  %s9058_s1 = inlined_call_operand.vmem [shape: f32[7,1,1,32], index: 1, kind: input, shape index: {}]   ;;  %s9059_s2 = inlined_call_operand.vmem [shape: f32[1,1,32], index: 2, kind: input, shape index: {}]   ;;  %s9060_s3 = inlined_call_operand.vmem [shape: bf16[5,32,64], index: 3, kind: input, shape index: {}]   ;;  %s9061_s4 = inlined_call_operand.vmem [shape: f32[1,64], index: 4, kind: input, shape index: {}]   ;;  %s9062_s5 = inlined_call_operand.vmem [shape: bf16[3,64,128], index: 5, kind: input, shape index: {}]   ;;  %s9063_s6 = inlined_call_operand.vmem [shape: f32[1,128], index: 6, kind: input, shape index: {}]   ;;  %s9064_s7 = inlined_call_operand.hbm [shape: bf16[1024,256], index: 7, kind: input, shape index: {}]   ;;  %s9065_s8 = inlined_call_operand.vmem [shape: f32[1,256], index: 8, kind: input, shape index: {}]   ;;  %s9066_s9 = inlined_call_operand.vmem [shape: bf16[256,128], index: 9, kind: input, shape index: {}]   ;;  %s9067_s10 = inlined_call_operand.vmem [shape: f32[1,128], index: 10, kind: input, shape index: {}]   ;;  %s9068_s11 = inlined_call_operand.vmem [shape: f32[128,1], index: 11, kind: input, shape index: {}]   ;;  %s9069_s12 = inlined_call_operand.<no memory space> [shape: f32[1,1], index: 12, kind: input, shape index: {}]   ;;  %s9070_s13 = inlined_call_operand.vmem [shape: f32[4,1], index: 13, kind: output, shape index: {}]  }
   0x1   :  { %v18_v0 = vstv %s9069_s12 }
   0x2   :  { %19 = vst [vmem:[#allocation6] sm:$0x1] %v18_v0 }
   0x3   :  { %20 = vsyncpa [#allocation8], 0  ;;  %s39_s29 = sshll.u32 %s9064_s7, 4  ;;  %s6817_s30 = smov [#allocation7]   ;;  %s40_s29 = int_to_ptr.hbm [resolvable:$true] %s39_s29 }
   0x4   :  { %s41_s14 = sshll.u32 %s6817_s30, 4  ;;  %s6818_s15 = smov 128   ;;  %s42_s14 = int_to_ptr.vmem [resolvable:$true] %s41_s14 }
   0x5   :  { %s6819_s16 = smov 8  }
   0x6   :  { %47 = dma.hbm_to_vmem [thread:$0]  %s40_s29, 16384, %s42_s14, [#allocation8], %s6818_s15, %s6818_s15, %s6819_s16  }
   0x7   :  { %6815 = dma.done.wait [#allocation8], 16384  }
   0x8   :  { %6816 = vsyncadd [#allocation8], 4294950912  ;;  %vm62_vm0 = vcmask 2048   ;;  %v6820_v1 = vmov 0   ;;  %v9071_v2 = vmov 0.0   ;;  %vm103_vm1 = vcmask 7168  }
   0x9   :  { %6711 = vset.pattern.permute.xlu2 %v6820_v1  ;;  %6710 = vset.pattern.permute.xlu1 %v6820_v1  ;;  %63 = vst.msk [vmem:[#allocation2] sm:$0x7] %vm62_vm0, %v9071_v2  ;;  %v74_v3 = vld [vmem:[%s9057_s0 + $0x18] sm:$0xff]  ;;  %v75_v4 = vld [vmem:[%s9057_s0 + $0x20] sm:$0xff]  ;;  %v72_v5 = vld [vmem:[%s9057_s0 + $0x8] sm:$0xff]  ;;  %vm2766_vm2 = vcmask 254976  }
   0xa   :  { %6709 = vset.pattern.permute.xlu0 %v6820_v1  ;;  %64 = vst.msk [vmem:[#allocation2 + $0x48] sm:$0x7] %vm62_vm0, %v9071_v2  ;;  %v73_v6 = vld [vmem:[%s9057_s0 + $0x10] sm:$0xff]  ;;  %v71_v7 = vld [vmem:[%s9057_s0] sm:$0xff]  ;;  %v76_v8 = vld [vmem:[%s9057_s0 + $0x28] sm:$0xff]  ;;  %vm3031_vm3 = vcmask 1041409  }
   0xb   :  { %65 = vst.msk [vmem:[#allocation2 + $0x90] sm:$0x7] %vm62_vm0, %v9071_v2  ;;  %v77_v9 = vld [vmem:[%s9057_s0 + $0x30] sm:$0xff]  ;;  %v78_v10 = vld [vmem:[%s9057_s0 + $0x38] sm:$0xff]  ;;  %v79_v11 = vld [vmem:[%s9057_s0 + $0x40] sm:$0xff]  ;;  %vm3033_vm4 = vcmask 1042434  }
   0xc   :  { %66 = vst.msk [vmem:[#allocation2 + $0xd8] sm:$0x7] %vm62_vm0, %v9071_v2  ;;  %v80_v12 = vld [vmem:[%s9057_s0 + $0x48] sm:$0xff]  ;;  %v81_v13 = vld [vmem:[%s9057_s0 + $0x50] sm:$0xff]  ;;  %v82_v15 = vld [vmem:[%s9057_s0 + $0x58] sm:$0xff]  ;;  %vm3035_vm5 = vcmask 1043459  }
   0xd   :  { %67 = vst.msk [vmem:[#allocation2 + $0x43] sm:$0x7] %vm62_vm0, %v9071_v2  ;;  %v83_v17 = vld [vmem:[%s9057_s0 + $0x60] sm:$0xff]  ;;  %v84_v19 = vld [vmem:[%s9057_s0 + $0x68] sm:$0xff]  ;;  %v85_v20 = vld [vmem:[%s9057_s0 + $0x70] sm:$0xff]  ;;  %vm3037_vm6 = vcmask 1044484  }
   0xe   :  { %68 = vst.msk [vmem:[#allocation2 + $0x8b] sm:$0x7] %vm62_vm0, %v9071_v2  ;;  %v87_v21 = vld [vmem:[%s9057_s0 + $0x80] sm:$0xff]  ;;  %v88_v23 = vld [vmem:[%s9057_s0 + $0x88] sm:$0xff]  ;;  %v86_v24 = vld [vmem:[%s9057_s0 + $0x78] sm:$0xff]  ;;  %vm3039_vm7 = vcmask 1045509  }
   0xf   :  { %69 = vst.msk [vmem:[#allocation2 + $0xd3] sm:$0x7] %vm62_vm0, %v9071_v2  ;;  %v89_v27 = vld [vmem:[%s9057_s0 + $0x90] sm:$0xff]  ;;  %v90_v28 = vld [vmem:[%s9057_s0 + $0x98] sm:$0xff]  ;;  %v91_v29 = vld [vmem:[%s9057_s0 + $0xa0] sm:$0xff]  ;;  %vm3041_vm8 = vcmask 1046534  }
  0x10   :  { %107 = vst.msk [vmem:[#allocation2 + $0x1b] sm:$0xff] %vm103_vm1, %v74_v3  ;;  %v92_v33 = vld [vmem:[%s9057_s0 + $0xa8] sm:$0xff]  ;;  %v93_v34 = vld [vmem:[%s9057_s0 + $0xb0] sm:$0xff]  ;;  %v94_v35 = vld [vmem:[%s9057_s0 + $0xb8] sm:$0xff]  ;;  %vm3043_vm9 = vcmask 1047559   ;;  %vm3166_vm10 = vcmask 261120  }
  0x11   :  { %108 = vst.msk [vmem:[#allocation2 + $0x23] sm:$0xff] %vm103_vm1, %v75_v4  ;;  %v95_v39 = vld [vmem:[%s9057_s0 + $0xc0] sm:$0xff]  ;;  %v96_v40 = vld [vmem:[%s9057_s0 + $0xc8] sm:$0xff]  ;;  %v97_v41 = vld [vmem:[%s9057_s0 + $0xd0] sm:$0xff]  ;;  %vm4324_vm11 = vcmask 516096   ;;  %vm4525_vm12 = vcmask 523264  }
  0x12   :  { %105 = vst.msk [vmem:[#allocation2 + $0xb] sm:$0xff] %vm103_vm1, %v72_v5  ;;  %v98_v45 = vld [vmem:[%s9057_s0 + $0xd8] sm:$0xff]  ;;  %v99_v46 = vld [vmem:[%s9057_s0 + $0xe0] sm:$0xff]  ;;  %v100_v47 = vld [vmem:[%s9057_s0 + $0xe8] sm:$0xff]  ;;  %vm6131_vm13 = vcmask 3072  }
  0x13   :  { %106 = vst.msk [vmem:[#allocation2 + $0x13] sm:$0xff] %vm103_vm1, %v73_v6  ;;  %v101_v51 = vld [vmem:[%s9057_s0 + $0xf0] sm:$0xff]  ;;  %v102_v52 = vld [vmem:[%s9057_s0 + $0xf8] sm:$0xff] }
  0x14   :  { %104 = vst.msk [vmem:[#allocation2 + $0x3] sm:$0xff] %vm103_vm1, %v71_v7 }
  0x15   :  { %70 = vst.msk [vmem:[#allocation2 + $0x11b] sm:$0x7] %vm62_vm0, %v9071_v2  ;;  %v7167_v2 = vld [vmem:[%s9058_s1 + $0x4] ss:$0 sm:$0xff] }
  0x16   :  { %109 = vst.msk [vmem:[#allocation2 + $0x2b] sm:$0xff] %vm103_vm1, %v76_v8 }
  0x17   :  { %110 = vst.msk [vmem:[#allocation2 + $0x33] sm:$0xff] %vm103_vm1, %v77_v9 }
  0x18   :  { %v140_v14 = vld [vmem:[#allocation2 + $0x20] sm:$0xff]  ;;  %111 = vst.msk [vmem:[#allocation2 + $0x3b] sm:$0xff] %vm103_vm1, %v78_v10 }
  0x19   :  { %191 = vperm.xlu2 %6711, %v140_v14   ;;  %112 = vst.msk [vmem:[#allocation2 + $0x4b] sm:$0xff] %vm103_vm1, %v79_v11  ;;  %v400_v11 = vld [vmem:[#allocation2 + $0x21] sm:$0xff] }
  0x1a   :  { %v138_v16 = vld [vmem:[#allocation2 + $0x10] sm:$0xff]  ;;  %113 = vst.msk [vmem:[#allocation2 + $0x53] sm:$0xff] %vm103_vm1, %v80_v12  ;;  %v139_v25 = vld [vmem:[#allocation2 + $0x18] sm:$0xff] }
  0x1b   :  { %181 = vperm.xlu1 %6710, %v138_v16   ;;  %v136_v18 = vld [vmem:[#allocation2] sm:$0xff]  ;;  %114 = vst.msk [vmem:[#allocation2 + $0x5b] sm:$0xff] %vm103_vm1, %v81_v13  ;;  %v137_v26 = vld [vmem:[#allocation2 + $0x8] sm:$0xff]  ;;  %v398_v6 = vld [vmem:[#allocation2 + $0x11] sm:$0xff] }
  0x1c   :  { %171 = vperm.xlu0 %6709, %v136_v18   ;;  %115 = vst.msk [vmem:[#allocation2 + $0x63] sm:$0xff] %vm103_vm1, %v82_v15  ;;  %v396_v1 = vld [vmem:[#allocation2 + $0x1] sm:$0xff]  ;;  %v399_v5 = vld [vmem:[#allocation2 + $0x19] sm:$0xff]  ;;  %v397_v7 = vld [vmem:[#allocation2 + $0x9] sm:$0xff] }
  0x1d   :  { %116 = vst.msk [vmem:[#allocation2 + $0x6b] sm:$0xff] %vm103_vm1, %v83_v17  ;;  %v141_v22 = vld [vmem:[#allocation2 + $0x28] sm:$0xff] }
  0x1e   :  { %117 = vst.msk [vmem:[#allocation2 + $0x73] sm:$0xff] %vm103_vm1, %v84_v19  ;;  %v142_v32 = vld [vmem:[#allocation2 + $0x30] sm:$0xff] }
  0x1f   :  { %118 = vst.msk [vmem:[#allocation2 + $0x7b] sm:$0xff] %vm103_vm1, %v85_v20  ;;  %v143_v31 = vld [vmem:[#allocation2 + $0x38] sm:$0xff]  ;;  %v401_v10 = vld [vmem:[#allocation2 + $0x29] sm:$0xff] }
  0x20   :  { %120 = vst.msk [vmem:[#allocation2 + $0x93] sm:$0xff] %vm103_vm1, %v87_v21  ;;  %v144_v30 = vld [vmem:[#allocation2 + $0x48] sm:$0xff]  ;;  %v402_v9 = vld [vmem:[#allocation2 + $0x31] sm:$0xff]  ;;  %v403_v15 = vld [vmem:[#allocation2 + $0x39] sm:$0xff] }
  0x21   :  { %196 = vperm.xlu2 %6711, %v141_v22   ;;  %121 = vst.msk [vmem:[#allocation2 + $0x9b] sm:$0xff] %vm103_vm1, %v88_v23  ;;  %v145_v38 = vld [vmem:[#allocation2 + $0x50] sm:$0xff] }
  0x22   :  { %119 = vst.msk [vmem:[#allocation2 + $0x83] sm:$0xff] %vm103_vm1, %v86_v24  ;;  %v146_v37 = vld [vmem:[#allocation2 + $0x58] sm:$0xff]  ;;  %v404_v14 = vld [vmem:[#allocation2 + $0x49] sm:$0xff] }
  0x23   :  { %186 = vperm.xlu1 %6710, %v139_v25   ;;  %122 = vst.msk [vmem:[#allocation2 + $0xa3] sm:$0xff] %vm103_vm1, %v89_v27  ;;  %v147_v36 = vld [vmem:[#allocation2 + $0x60] sm:$0xff]  ;;  %v405_v13 = vld [vmem:[#allocation2 + $0x51] sm:$0xff] }
  0x24   :  { %176 = vperm.xlu0 %6709, %v137_v26   ;;  %123 = vst.msk [vmem:[#allocation2 + $0xab] sm:$0xff] %vm103_vm1, %v90_v28  ;;  %v148_v44 = vld [vmem:[#allocation2 + $0x68] sm:$0xff]  ;;  %v406_v19 = vld [vmem:[#allocation2 + $0x59] sm:$0xff] }
  0x25   :  { %124 = vst.msk [vmem:[#allocation2 + $0xb3] sm:$0xff] %vm103_vm1, %v91_v29  ;;  %v149_v43 = vld [vmem:[#allocation2 + $0x70] sm:$0xff]  ;;  %v407_v18 = vld [vmem:[#allocation2 + $0x61] sm:$0xff] }
  0x26   :  { %125 = vst.msk [vmem:[#allocation2 + $0xbb] sm:$0xff] %vm103_vm1, %v92_v33  ;;  %v150_v42 = vld [vmem:[#allocation2 + $0x78] sm:$0xff]  ;;  %v408_v17 = vld [vmem:[#allocation2 + $0x69] sm:$0xff] }
  0x27   :  { %126 = vst.msk [vmem:[#allocation2 + $0xc3] sm:$0xff] %vm103_vm1, %v93_v34  ;;  %v152_v49 = vld [vmem:[#allocation2 + $0x90] sm:$0xff]  ;;  %v918_v24 = vld [vmem:[#allocation2 + $0x3] sm:$0xff] }
  0x28   :  { %127 = vst.msk [vmem:[#allocation2 + $0xcb] sm:$0xff] %vm103_vm1, %v94_v35  ;;  %v153_v48 = vld [vmem:[#allocation2 + $0x98] sm:$0xff]  ;;  %v658_v23 = vld [vmem:[#allocation2 + $0xa] sm:$0xff]  ;;  %v657_v25 = vld [vmem:[#allocation2 + $0x2] sm:$0xff] }
  0x29   :  { %211 = vperm.xlu2 %6711, %v144_v30   ;;  %128 = vst.msk [vmem:[#allocation2 + $0xdb] sm:$0xff] %vm103_vm1, %v95_v39  ;;  %v151_v50 = vld [vmem:[#allocation2 + $0x80] sm:$0xff]  ;;  %v919_v30 = vld [vmem:[#allocation2 + $0xb] sm:$0xff] }
  0x2a   :  { %129 = vst.msk [vmem:[#allocation2 + $0xe3] sm:$0xff] %vm103_vm1, %v96_v40  ;;  %v154_v55 = vld [vmem:[#allocation2 + $0xa0] sm:$0xff] }
  0x2b   :  { %206 = vperm.xlu1 %6710, %v143_v31   ;;  %130 = vst.msk [vmem:[#allocation2 + $0xeb] sm:$0xff] %vm103_vm1, %v97_v41  ;;  %v155_v54 = vld [vmem:[#allocation2 + $0xa8] sm:$0xff]  ;;  %v660_v41 = vld [vmem:[#allocation2 + $0x1a] sm:$0xff] }
  0x2c   :  { %201 = vperm.xlu0 %6709, %v142_v32   ;;  %131 = vst.msk [vmem:[#allocation2 + $0xf3] sm:$0xff] %vm103_vm1, %v98_v45  ;;  %v156_v53 = vld [vmem:[#allocation2 + $0xb0] sm:$0xff]  ;;  %v1440_v29 = vld [vmem:[#allocation2 + $0x5] sm:$0xff] }
  0x2d   :  { %132 = vst.msk [vmem:[#allocation2 + $0xfb] sm:$0xff] %vm103_vm1, %v99_v46  ;;  %v157_v58 = vld [vmem:[#allocation2 + $0xb8] sm:$0xff]  ;;  %v1179_v31 = vld [vmem:[#allocation2 + $0x4] sm:$0xff] }
  0x2e   :  { %133 = vst.msk [vmem:[#allocation2 + $0x103] sm:$0xff] %vm103_vm1, %v100_v47  ;;  %v158_v57 = vld [vmem:[#allocation2 + $0xc0] sm:$0xff] }
  0x2f   :  { %134 = vst.msk [vmem:[#allocation2 + $0x10b] sm:$0xff] %vm103_vm1, %v101_v51  ;;  %v159_v56 = vld [vmem:[#allocation2 + $0xc8] sm:$0xff]  ;;  %v921_v47 = vld [vmem:[#allocation2 + $0x1b] sm:$0xff] }
  0x30   :  { %135 = vst.msk [vmem:[#allocation2 + $0x113] sm:$0xff] %vm103_vm1, %v102_v52  ;;  %v160_v61 = vld [vmem:[#allocation2 + $0xd8] sm:$0xff]  ;;  %v1701_v35 = vld [vmem:[#allocation2 + $0x6] sm:$0xff] }
  0x31   :  { %226 = vperm.xlu2 %6711, %v147_v36   ;;  %v161_v60 = vld [vmem:[#allocation2 + $0xe0] sm:$0xff]  ;;  %v1180_v36 = vld [vmem:[#allocation2 + $0xc] sm:$0xff] }
  0x32   :  { %v162_v59 = vld [vmem:[#allocation2 + $0xe8] sm:$0xff] }
  0x33   :  { %221 = vperm.xlu1 %6710, %v146_v37   ;;  %v163_v0 = vld [vmem:[#allocation2 + $0xf0] sm:$0xff] }
  0x34   :  { %216 = vperm.xlu0 %6709, %v145_v38   ;;  %v164_v63 = vld [vmem:[#allocation2 + $0xf8] sm:$0xff] }
  0x35   :  { %v165_v62 = vld [vmem:[#allocation2 + $0x100] sm:$0xff]  ;;  %v659_v37 = vld [vmem:[#allocation2 + $0x12] sm:$0xff] }
  0x36   :  { %v166_v4 = vld [vmem:[#allocation2 + $0x108] sm:$0xff] }
  0x37   :  { %v167_v3 = vld [vmem:[#allocation2 + $0x110] sm:$0xff] }
  0x39   :  { %241 = vperm.xlu2 %6711, %v150_v42   ;;  %v1441_v42 = vld [vmem:[#allocation2 + $0xd] sm:$0xff] }
  0x3b   :  { %236 = vperm.xlu1 %6710, %v149_v43   ;;  %v920_v43 = vld [vmem:[#allocation2 + $0x13] sm:$0xff] }
  0x3c   :  { %231 = vperm.xlu0 %6709, %v148_v44  }
  0x41   :  { %256 = vperm.xlu2 %6711, %v153_v48   ;;  %v1702_v48 = vld [vmem:[#allocation2 + $0xe] sm:$0xff] }
  0x43   :  { %251 = vperm.xlu1 %6710, %v152_v49   ;;  %v1181_v49 = vld [vmem:[#allocation2 + $0x14] sm:$0xff] }
  0x44   :  { %246 = vperm.xlu0 %6709, %v151_v50  }
  0x49   :  { %271 = vperm.xlu2 %6711, %v156_v53   ;;  %v1182_v53 = vld [vmem:[#allocation2 + $0x1c] sm:$0xff] }
  0x4b   :  { %266 = vperm.xlu1 %6710, %v155_v54   ;;  %v661_v54 = vld [vmem:[#allocation2 + $0x22] sm:$0xff] }
  0x4c   :  { %261 = vperm.xlu0 %6709, %v154_v55   ;;  %v1442_v55 = vld [vmem:[#allocation2 + $0x15] sm:$0xff] }
  0x51   :  { %286 = vperm.xlu2 %6711, %v159_v56  }
  0x53   :  { %281 = vperm.xlu1 %6710, %v158_v57  }
  0x54   :  { %276 = vperm.xlu0 %6709, %v157_v58  }
  0x59   :  { %301 = vperm.xlu2 %6711, %v162_v59   ;;  %v1443_v59 = vld [vmem:[#allocation2 + $0x1d] sm:$0xff] }
  0x5b   :  { %296 = vperm.xlu1 %6710, %v161_v60   ;;  %v922_v60 = vld [vmem:[#allocation2 + $0x23] sm:$0xff] }
  0x5c   :  { %291 = vperm.xlu0 %6709, %v160_v61   ;;  %v1703_v61 = vld [vmem:[#allocation2 + $0x16] sm:$0xff] }
  0x61   :  { %316 = vperm.xlu2 %6711, %v165_v62  }
  0x63   :  { %311 = vperm.xlu1 %6710, %v164_v63  }
  0x64   :  { %306 = vperm.xlu0 %6709, %v163_v0  }
  0x69   :  { %432 = vperm.xlu2 %6711, %v396_v1   ;;  %v1704_v1 = vld [vmem:[#allocation2 + $0x1e] sm:$0xff] }
  0x6b   :  { %326 = vperm.xlu1 %6710, %v167_v3   ;;  %v1183_v3 = vld [vmem:[#allocation2 + $0x24] sm:$0xff] }
  0x6c   :  { %321 = vperm.xlu0 %6709, %v166_v4   ;;  %v662_v4 = vld [vmem:[#allocation2 + $0x2a] sm:$0xff] }
  0x71   :  { %447 = vperm.xlu2 %6711, %v399_v5  }
  0x73   :  { %442 = vperm.xlu1 %6710, %v398_v6   ;;  %v7043_v8 = vpop.permute.xlu2 %191 }
  0x74   :  { %437 = vperm.xlu0 %6709, %v397_v7  }
  0x79   :  { %462 = vperm.xlu2 %6711, %v402_v9   ;;  %v663_v9 = vld [vmem:[#allocation2 + $0x32] sm:$0xff] }
  0x7b   :  { %457 = vperm.xlu1 %6710, %v401_v10   ;;  %v7045_v12 = vpop.permute.xlu2 %196  ;;  %v1444_v10 = vld [vmem:[#allocation2 + $0x25] sm:$0xff] }
  0x7c   :  { %452 = vperm.xlu0 %6709, %v400_v11   ;;  %v923_v11 = vld [vmem:[#allocation2 + $0x2b] sm:$0xff] }
  0x81   :  { %477 = vperm.xlu2 %6711, %v405_v13  }
  0x83   :  { %472 = vperm.xlu1 %6710, %v404_v14   ;;  %v7047_v16 = vpop.permute.xlu2 %211 }
  0x84   :  { %467 = vperm.xlu0 %6709, %v403_v15  }
  0x89   :  { %492 = vperm.xlu2 %6711, %v408_v17   ;;  %v924_v17 = vld [vmem:[#allocation2 + $0x33] sm:$0xff] }
  0x8b   :  { %487 = vperm.xlu1 %6710, %v407_v18   ;;  %v7049_v20 = vpop.permute.xlu2 %226  ;;  %v1705_v18 = vld [vmem:[#allocation2 + $0x26] sm:$0xff] }
  0x8c   :  { %482 = vperm.xlu0 %6709, %v406_v19   ;;  %v1184_v19 = vld [vmem:[#allocation2 + $0x2c] sm:$0xff] }
  0x8d   :  { %v7051_v21 = vpop.permute.xlu1 %181 }
  0x8e   :  { %v7053_v22 = vpop.permute.xlu0 %171 }
  0x91   :  { %698 = vperm.xlu2 %6711, %v658_v23  }
  0x93   :  { %954 = vperm.xlu1 %6710, %v918_v24   ;;  %v7055_v26 = vpop.permute.xlu2 %241 }
  0x94   :  { %9108 = vst [vmem:[#allocation10_spill] sm:$0xff] %v7055_v26  ;;  %693 = vperm.xlu0 %6709, %v657_v25  }
  0x95   :  { %v7057_v27 = vpop.permute.xlu1 %186 }
  0x96   :  { %v7059_v28 = vpop.permute.xlu0 %176 }
  0x99   :  { %1476 = vperm.xlu2 %6711, %v1440_v29   ;;  %v1185_v29 = vld [vmem:[#allocation2 + $0x34] sm:$0xff] }
  0x9b   :  { %959 = vperm.xlu1 %6710, %v919_v30   ;;  %v7061_v32 = vpop.permute.xlu2 %256  ;;  %v664_v30 = vld [vmem:[#allocation2 + $0x3a] sm:$0xff] }
  0x9c   :  { %9109 = vst [vmem:[#allocation11_spill] sm:$0xff] %v7061_v32  ;;  %1215 = vperm.xlu0 %6709, %v1179_v31   ;;  %v1445_v31 = vld [vmem:[#allocation2 + $0x2d] sm:$0xff] }
  0x9d   :  { %v7063_v33 = vpop.permute.xlu1 %206 }
  0x9e   :  { %v7065_v34 = vpop.permute.xlu0 %201 }
  0xa1   :  { %1737 = vperm.xlu2 %6711, %v1701_v35  }
  0xa3   :  { %1220 = vperm.xlu1 %6710, %v1180_v36   ;;  %v7067_v38 = vpop.permute.xlu2 %271 }
  0xa4   :  { %9110 = vst [vmem:[#allocation12_spill] sm:$0xff] %v7067_v38  ;;  %703 = vperm.xlu0 %6709, %v659_v37  }
  0xa5   :  { %v7069_v39 = vpop.permute.xlu1 %221 }
  0xa6   :  { %v7071_v40 = vpop.permute.xlu0 %216 }
  0xa9   :  { %708 = vperm.xlu2 %6711, %v660_v41   ;;  %v1446_v41 = vld [vmem:[#allocation2 + $0x35] sm:$0xff] }
  0xab   :  { %1481 = vperm.xlu1 %6710, %v1441_v42   ;;  %v7073_v44 = vpop.permute.xlu2 %286  ;;  %v925_v42 = vld [vmem:[#allocation2 + $0x3b] sm:$0xff] }
  0xac   :  { %9111 = vst [vmem:[#allocation13_spill] sm:$0xff] %v7073_v44  ;;  %964 = vperm.xlu0 %6709, %v920_v43   ;;  %v1706_v43 = vld [vmem:[#allocation2 + $0x2e] sm:$0xff]  ;;  %v928_v44 = vld [vmem:[#allocation2 + $0x5b] sm:$0xff] }
  0xad   :  { %v7075_v45 = vpop.permute.xlu1 %236 }
  0xae   :  { %v7077_v46 = vpop.permute.xlu0 %231 }
  0xb1   :  { %969 = vperm.xlu2 %6711, %v921_v47  }
  0xb3   :  { %1742 = vperm.xlu1 %6710, %v1702_v48   ;;  %v7079_v50 = vpop.permute.xlu2 %301 }
  0xb4   :  { %9112 = vst [vmem:[#allocation14_spill] sm:$0xff] %v7079_v50  ;;  %1225 = vperm.xlu0 %6709, %v1181_v49  }
  0xb5   :  { %v7081_v51 = vpop.permute.xlu1 %251 }
  0xb6   :  { %9113 = vst [vmem:[#allocation15_spill] sm:$0xff] %v7081_v51  ;;  %v7083_v52 = vpop.permute.xlu0 %246 }
  0xb7   :  { %9114 = vst [vmem:[#allocation16_spill] sm:$0xff] %v7083_v52 }
  0xb9   :  { %1230 = vperm.xlu2 %6711, %v1182_v53   ;;  %v1707_v53 = vld [vmem:[#allocation2 + $0x36] sm:$0xff] }
  0xbb   :  { %713 = vperm.xlu1 %6710, %v661_v54   ;;  %v7085_v56 = vpop.permute.xlu2 %316  ;;  %v1186_v54 = vld [vmem:[#allocation2 + $0x3c] sm:$0xff] }
  0xbc   :  { %9115 = vst [vmem:[#allocation17_spill] sm:$0xff] %v7085_v56  ;;  %1486 = vperm.xlu0 %6709, %v1442_v55   ;;  %v665_v55 = vld [vmem:[#allocation2 + $0x4a] sm:$0xff] }
  0xbd   :  { %v7087_v57 = vpop.permute.xlu1 %266 }
  0xbe   :  { %9116 = vst [vmem:[#allocation18_spill] sm:$0xff] %v7087_v57  ;;  %v7089_v58 = vpop.permute.xlu0 %261 }
  0xbf   :  { %9117 = vst [vmem:[#allocation19_spill] sm:$0xff] %v7089_v58 }
  0xc1   :  { %1491 = vperm.xlu2 %6711, %v1443_v59  }
  0xc3   :  { %974 = vperm.xlu1 %6710, %v922_v60   ;;  %v7091_v62 = vpop.permute.xlu2 %432 }
  0xc4   :  { %1747 = vperm.xlu0 %6709, %v1703_v61  }
  0xc5   :  { %v7093_v63 = vpop.permute.xlu1 %281 }
  0xc6   :  { %9118 = vst [vmem:[#allocation20_spill] sm:$0xff] %v7093_v63  ;;  %v7095_v0 = vpop.permute.xlu0 %276  ;;  %v668_v63 = vld [vmem:[#allocation2 + $0x62] sm:$0xff] }
  0xc7   :  { %9119 = vst [vmem:[#allocation21_spill] sm:$0xff] %v7095_v0 }
  0xc9   :  { %1752 = vperm.xlu2 %6711, %v1704_v1   ;;  %v666_v1 = vld [vmem:[#allocation2 + $0x52] sm:$0xff] }
  0xcb   :  { %1235 = vperm.xlu1 %6710, %v1183_v3   ;;  %v7097_v5 = vpop.permute.xlu2 %447  ;;  %v1447_v3 = vld [vmem:[#allocation2 + $0x3d] sm:$0xff] }
  0xcc   :  { %718 = vperm.xlu0 %6709, %v662_v4   ;;  %v926_v4 = vld [vmem:[#allocation2 + $0x4b] sm:$0xff] }
  0xcd   :  { %v7099_v6 = vpop.permute.xlu1 %296 }
  0xce   :  { %9120 = vst [vmem:[#allocation22_spill] sm:$0xff] %v7099_v6  ;;  %v7101_v7 = vpop.permute.xlu0 %291 }
  0xcf   :  { %9121 = vst [vmem:[#allocation23_spill] sm:$0xff] %v7101_v7 }
  0xd1   :  { %723 = vperm.xlu2 %6711, %v663_v9  }
  0xd3   :  { %1496 = vperm.xlu1 %6710, %v1444_v10   ;;  %v7103_v13 = vpop.permute.xlu2 %462 }
  0xd4   :  { %979 = vperm.xlu0 %6709, %v923_v11  }
  0xd5   :  { %v7105_v14 = vpop.permute.xlu1 %311 }
  0xd6   :  { %9122 = vst [vmem:[#allocation24_spill] sm:$0xff] %v7105_v14  ;;  %v7107_v15 = vpop.permute.xlu0 %306  ;;  %v1450_v14 = vld [vmem:[#allocation2 + $0x5d] sm:$0xff] }
  0xd7   :  { %9123 = vst [vmem:[#allocation25_spill] sm:$0xff] %v7107_v15 }
  0xd9   :  { %984 = vperm.xlu2 %6711, %v924_v17   ;;  %v927_v17 = vld [vmem:[#allocation2 + $0x53] sm:$0xff] }
  0xdb   :  { %1757 = vperm.xlu1 %6710, %v1705_v18   ;;  %v7109_v23 = vpop.permute.xlu2 %477  ;;  %v1708_v18 = vld [vmem:[#allocation2 + $0x3e] sm:$0xff] }
  0xdc   :  { %1240 = vperm.xlu0 %6709, %v1184_v19   ;;  %v7138_v19 = vld [vmem:[%s9058_s1 + $0x1] ss:$0 sm:$0xff] }
  0xdd   :  { %v7111_v24 = vpop.permute.xlu1 %326 }
  0xde   :  { %9124 = vst [vmem:[#allocation26_spill] sm:$0xff] %v7111_v24  ;;  %v7113_v25 = vpop.permute.xlu0 %321  ;;  %v1709_v24 = vld [vmem:[#allocation2 + $0x4e] sm:$0xff] }
  0xdf   :  { %9125 = vst [vmem:[#allocation27_spill] sm:$0xff] %v7113_v25 }
  0xe1   :  { %1245 = vperm.xlu2 %6711, %v1185_v29   ;;  %v1187_v29 = vld [vmem:[#allocation2 + $0x4c] sm:$0xff] }
  0xe3   :  { %728 = vperm.xlu1 %6710, %v664_v30   ;;  %v7115_v35 = vpop.permute.xlu2 %492  ;;  %v7143_v30 = vld [vmem:[%s9058_s1] ss:$0 sm:$0xff] }
  0xe4   :  { %1501 = vperm.xlu0 %6709, %v1445_v31  }
  0xe5   :  { %v7117_v36 = vpop.permute.xlu1 %442 }
  0xe6   :  { %v7119_v37 = vpop.permute.xlu0 %437 }
  0xe9   :  { %1506 = vperm.xlu2 %6711, %v1446_v41   ;;  %v593_v41 = vmul.f32 %v7138_v19, %v7091_v62  ;;  %v1448_v62 = vld [vmem:[#allocation2 + $0x4d] sm:$0xff] }
  0xeb   :  { %989 = vperm.xlu1 %6710, %v925_v42   ;;  %v7121_v47 = vpop.permute.xlu2 %698  ;;  %v7152_v42 = vld [vmem:[%s9058_s1 + $0x2] ss:$0 sm:$0xff] }
  0xec   :  { %1762 = vperm.xlu0 %6709, %v1706_v43  }
  0xed   :  { %v7123_v48 = vpop.permute.xlu1 %457 }
  0xee   :  { %v7125_v49 = vpop.permute.xlu0 %452 }
  0xf1   :  { %1767 = vperm.xlu2 %6711, %v1707_v53  }
  0xf3   :  { %1250 = vperm.xlu1 %6710, %v1186_v54   ;;  %v1477_v59 = vpop.permute.xlu2 %1476  ;;  %v1188_v54 = vld [vmem:[#allocation2 + $0x54] sm:$0xff] }
  0xf4   :  { %733 = vperm.xlu0 %6709, %v665_v55   ;;  %v332_v55 = vmul.f32 %v7143_v30, %v7053_v22  ;;  %v7172_v22 = vld [vmem:[%s9058_s1 + $0x5] ss:$0 sm:$0xff] }
  0xf5   :  { %v7127_v60 = vpop.permute.xlu1 %472 }
  0xf6   :  { %v7129_v61 = vpop.permute.xlu0 %467 }
  0xf9   :  { %738 = vperm.xlu2 %6711, %v666_v1  }
  0xfb   :  { %1511 = vperm.xlu1 %6710, %v1447_v3   ;;  %v1738_v9 = vpop.permute.xlu2 %1737  ;;  %v667_v3 = vld [vmem:[#allocation2 + $0x5a] sm:$0xff] }
  0xfc   :  { %994 = vperm.xlu0 %6709, %v926_v4   ;;  %v625_v4 = vadd.f32 %v593_v41, %v332_v55  ;;  %v1449_v55 = vld [vmem:[#allocation2 + $0x55] sm:$0xff] }
  0xfd   :  { %v7131_v10 = vpop.permute.xlu1 %487 }
  0xfe   :  { %v7133_v11 = vpop.permute.xlu0 %482 }
 0x101   :  { %999 = vperm.xlu2 %6711, %v927_v17   ;;  %v7160_v17 = vld [vmem:[%s9058_s1 + $0x3] ss:$0 sm:$0xff] }
 0x103   :  { %1772 = vperm.xlu1 %6710, %v1708_v18   ;;  %v7145_v31 = vpop.permute.xlu2 %708 }
 0x104   :  { %1255 = vperm.xlu0 %6709, %v1187_v29  }
 0x105   :  { %v955_v43 = vpop.permute.xlu1 %954 }
 0x106   :  { %v694_v53 = vpop.permute.xlu0 %693  ;;  %v1115_v41 = vmul.f32 %v7160_v17, %v955_v43  ;;  %v7186_v43 = vld [vmem:[%s9059_s2] ss:$0 sm:$0xff] }
 0x107   :  { %v854_v1 = vmul.f32 %v7152_v42, %v694_v53 }
 0x109   :  { %1260 = vperm.xlu2 %6711, %v1188_v54   ;;  %v886_v18 = vadd.f32 %v854_v1, %v625_v4  ;;  %v7178_v1 = vld [vmem:[%s9058_s1 + $0x6] ss:$0 sm:$0xff] }
 0x10a   :  { %v1898_v7 = vmul.f32 %v7178_v1, %v1738_v9  ;;  %v594_v9 = vmul.f32 %v7138_v19, %v7119_v37 }
 0x10b   :  { %743 = vperm.xlu1 %6710, %v667_v3   ;;  %v7162_v29 = vpop.permute.xlu2 %969  ;;  %v1147_v3 = vadd.f32 %v1115_v41, %v886_v18 }
 0x10c   :  { %1516 = vperm.xlu0 %6709, %v1448_v62   ;;  %v1637_v62 = vmul.f32 %v7172_v22, %v1477_v59  ;;  %v1710_v59 = vld [vmem:[#allocation2 + $0x56] sm:$0xff] }
 0x10d   :  { %v960_v53 = vpop.permute.xlu1 %959 }
 0x10e   :  { %v1216_v54 = vpop.permute.xlu0 %1215  ;;  %v1116_v37 = vmul.f32 %v7160_v17, %v960_v53  ;;  %v929_v53 = vld [vmem:[#allocation2 + $0x63] sm:$0xff] }
 0x10f   :  { %v1376_v4 = vmul.f32 %v7167_v2, %v1216_v54 }
 0x111   :  { %v1408_v6 = vadd.f32 %v1376_v4, %v1147_v3  ;;  %1521 = vperm.xlu2 %6711, %v1449_v55   ;;  %v1189_v3 = vld [vmem:[#allocation2 + $0x5c] sm:$0xff] }
 0x113   :  { %v1669_v15 = vadd.f32 %v1637_v62, %v1408_v6  ;;  %1004 = vperm.xlu1 %6710, %v928_v44   ;;  %v7188_v56 = vpop.permute.xlu2 %1230  ;;  %v333_v44 = vmul.f32 %v7143_v30, %v7059_v28  ;;  %v855_v6 = vmul.f32 %v7152_v42, %v7121_v47  ;;  %v6658_v28 = vld [vmem:[%s9060_s3 + $0x18] sm:$0xff]  }
 0x114   :  { %1777 = vperm.xlu0 %6709, %v1709_v24   ;;  %v6519_v25 = vunpack.c.h.bf16 %v6658_v28 }
 0x115   :  { %v1930_v18 = vadd.f32 %v1898_v7, %v1669_v15  ;;  %v1221_v41 = vpop.permute.xlu1 %1220  ;;  %v626_v24 = vadd.f32 %v594_v9, %v333_v44  ;;  %v6518_v9 = vunpack.c.l.bf16 %v6658_v28 }
 0x116   :  { %v7190_v54 = vpop.permute.xlu0 %703  ;;  %v1377_v50 = vmul.f32 %v7167_v2, %v1221_v41  ;;  %3292 = vmatpush.msra.mxu0 %v6519_v25  ;;  %v9126_v41 = vmov 0.0   ;;  %6692 = vmatpush.msra.mxu2 %v6519_v25 }
 0x117   :  { %v1966_v55 = vadd.f32 %v7186_v43, %v1930_v18  ;;  %2767 = vst.msk [vmem:[#allocation3] sm:$0x3] %vm2766_vm2, %v9126_v41  ;;  %6691 = vmatpush.msra.mxu1 %v6519_v25  ;;  %6693 = vmatpush.msra.mxu3 %v6519_v25 }
 0x118   :  { %2768 = vst.msk [vmem:[#allocation3 + $0x28] sm:$0x3] %vm2766_vm2, %v9126_v41  ;;  %3293 = vmatpush.msra.mxu0 %v6518_v9  ;;  %6695 = vmatpush.msra.mxu2 %v6518_v9 }
 0x119   :  { %v7195_v4 = vmax.f32 %v1966_v55, 0.0  ;;  %1782 = vperm.xlu2 %6711, %v1710_v59   ;;  %v669_v59 = vld [vmem:[#allocation2 + $0x6a] sm:$0xff]  ;;  %v887_v55 = vadd.f32 %v855_v6, %v626_v24  ;;  %v857_v24 = vmul.f32 %v7152_v42, %v7145_v31  ;;  %2769 = vst.msk [vmem:[#allocation3 + $0x50] sm:$0x3] %vm2766_vm2, %v9126_v41  ;;  %6694 = vmatpush.msra.mxu1 %v6518_v9 }
 0x11a   :  { %v6657_v6 = vld [vmem:[%s9060_s3 + $0x10] sm:$0xff]   ;;  %2770 = vst.msk [vmem:[#allocation3 + $0x78] sm:$0x3] %vm2766_vm2, %v9126_v41  ;;  %6696 = vmatpush.msra.mxu3 %v6518_v9 }
 0x11b   :  { %1265 = vperm.xlu1 %6710, %v1189_v3   ;;  %v7201_v7 = vpop.permute.xlu2 %1491  ;;  %v2062_v15 = vrot.slane %v7195_v4, 2  ;;  %v2063_v47 = vrot.slane %v7195_v4, 4  ;;  %v1148_v44 = vadd.f32 %v1116_v37, %v887_v55  ;;  %v6144_v57 = vrot.slane %v7195_v4, 9  ;;  %2771 = vst.msk [vmem:[#allocation3 + $0x22] sm:$0x3] %vm2766_vm2, %v9126_v41 }
 0x11c   :  { %748 = vperm.xlu0 %6709, %v668_v63   ;;  %v596_v63 = vmul.f32 %v7138_v19, %v7097_v5  ;;  %v335_v5 = vmul.f32 %v7143_v30, %v7057_v27  ;;  %v6515_v28 = vunpack.c.h.bf16 %v6657_v6  ;;  %v1118_v27 = vmul.f32 %v7160_v17, %v7162_v29  ;;  %2772 = vst.msk [vmem:[#allocation3 + $0x4a] sm:$0x3] %vm2766_vm2, %v9126_v41 }
 0x11d   :  { %v1482_v62 = vpop.permute.xlu1 %1481  ;;  %v6145_v3 = vrot.slane %v2062_v15, 9  ;;  %v6146_v37 = vrot.slane %v2063_v47, 9  ;;  %v1409_v55 = vadd.f32 %v1377_v50, %v1148_v44  ;;  %v2064_v31 = vrot.slane %v7195_v4, 6  ;;  %2773 = vst.msk [vmem:[#allocation3 + $0x72] sm:$0x3] %vm2766_vm2, %v9126_v41 }
 0x11e   :  { %v7205_v18 = vpop.permute.xlu0 %964  ;;  %v1638_v0 = vmul.f32 %v7172_v22, %v1482_v62  ;;  %v628_v32 = vadd.f32 %v596_v63, %v335_v5  ;;  %v6514_v38 = vunpack.c.l.bf16 %v6657_v6  ;;  %v2638_v50 = vmax.f32 %v7195_v4, %v6144_v57  ;;  %v409_v63 = vld [vmem:[#allocation2 + $0x71] sm:$0xff]  ;;  %3294 = vmatpush.msra.mxu0 %v6515_v28  ;;  %6698 = vmatpush.msra.mxu2 %v6515_v28  ;;  %v1711_v4 = vld [vmem:[#allocation2 + $0x5e] sm:$0xff] }
 0x11f   :  { %v2639_v62 = vmax.f32 %v2062_v15, %v6145_v3  ;;  %v2640_v44 = vmax.f32 %v2063_v47, %v6146_v37  ;;  %v1379_v6 = vmul.f32 %v7167_v2, %v7188_v56  ;;  %v595_v57 = vmul.f32 %v7138_v19, %v7117_v36  ;;  %6697 = vmatpush.msra.mxu1 %v6515_v28  ;;  %v1190_v5 = vld [vmem:[#allocation2 + $0x64] sm:$0xff] }
 0x120   :  { %v1670_v15 = vadd.f32 %v1638_v0, %v1409_v55  ;;  %v889_v29 = vadd.f32 %v857_v24, %v628_v32  ;;  %3295 = vmatpush.msra.mxu0 %v6514_v38  ;;  %v6147_v47 = vrot.slane %v2064_v31, 9  ;;  %v1640_v56 = vmul.f32 %v7172_v22, %v7201_v7  ;;  %2774 = vst.msk [vmem:[#allocation3 + $0x9a] sm:$0x3] %vm2766_vm2, %v9126_v41 }
 0x121   :  { %753 = vperm.xlu2 %6711, %v669_v59   ;;  %v2904_v0 = vperm.slane %v2639_v62, 0  ;;  %6701 = vmatpush.msra.mxu2 %v6514_v38  ;;  %v2903_v36 = vperm.slane %v2638_v50, 0  ;;  %v334_v24 = vmul.f32 %v7143_v30, %v7051_v21  ;;  %v2905_v37 = vperm.slane %v2640_v44, 0 }
 0x122   :  { %v1150_v32 = vadd.f32 %v1118_v27, %v889_v29  ;;  %6699 = vmatpush.msra.mxu3 %v6515_v28  ;;  %6700 = vmatpush.msra.mxu1 %v6514_v38  ;;  %v856_v28 = vmul.f32 %v7152_v42, %v7190_v54 }
 0x123   :  { %1526 = vperm.xlu1 %6710, %v1450_v14   ;;  %v1753_v59 = vpop.permute.xlu2 %1752  ;;  %v3032_v27 = vsel %vm3031_vm3, %v2904_v0, %v2903_v36  ;;  %v627_v50 = vadd.f32 %v595_v57, %v334_v24  ;;  %v1117_v0 = vmul.f32 %v7160_v17, %v7205_v18 }
 0x124   :  { %1009 = vperm.xlu0 %6709, %v929_v53   ;;  %v1411_v62 = vadd.f32 %v1379_v6, %v1150_v32  ;;  %v1901_v55 = vmul.f32 %v7178_v1, %v1753_v59  ;;  %6702 = vmatpush.msra.mxu3 %v6514_v38  ;;  %v3034_v38 = vsel %vm3033_vm4, %v2905_v37, %v3032_v27 }
 0x125   :  { %v1743_v14 = vpop.permute.xlu1 %1742 }
 0x126   :  { %v1899_v3 = vmul.f32 %v7178_v1, %v1743_v14  ;;  %v7236_v53 = vpop.permute.xlu0 %1225 }
 0x127   :  { %v1378_v36 = vmul.f32 %v7167_v2, %v7236_v53 }
 0x128   :  { %v1931_v25 = vadd.f32 %v1899_v3, %v1670_v15  ;;  %v2641_v15 = vmax.f32 %v2064_v31, %v6147_v47  ;;  %v1672_v3 = vadd.f32 %v1640_v56, %v1411_v62  ;;  %v1451_v47 = vld [vmem:[#allocation2 + $0x65] sm:$0xff] }
 0x129   :  { %497 = vperm.xlu2 %6711, %v409_v63  }
 0x12a   :  { %v1967_v9 = vadd.f32 %v7186_v43, %v1931_v25  ;;  %v670_v25 = vld [vmem:[#allocation2 + $0x72] sm:$0xff]  ;;  %v1933_v57 = vadd.f32 %v1901_v55, %v1672_v3  ;;  %v2906_v56 = vperm.slane %v2641_v15, 0 }
 0x12b   :  { %1787 = vperm.xlu1 %6710, %v1711_v4   ;;  %v7256_v7 = vpop.permute.xlu2 %723 }
 0x12c   :  { %v1999_v14 = vmax.f32 %v1967_v9, 0.0  ;;  %1270 = vperm.xlu0 %6709, %v1190_v5   ;;  %v888_v5 = vadd.f32 %v856_v28, %v627_v50  ;;  %v930_v9 = vld [vmem:[#allocation2 + $0x6b] sm:$0xff]  ;;  %v3036_v37 = vsel %vm3035_vm5, %v2906_v56, %v3034_v38  ;;  %v1969_v53 = vadd.f32 %v7186_v43, %v1933_v57 }
 0x12d   :  { %v7261_v21 = vpop.permute.xlu1 %713 }
 0x12e   :  { %v2065_v63 = vrot.slane %v1999_v14, 2  ;;  %v2066_v29 = vrot.slane %v1999_v14, 4  ;;  %v2067_v59 = vrot.slane %v1999_v14, 6  ;;  %v6148_v44 = vrot.slane %v1999_v14, 9  ;;  %v1487_v6 = vpop.permute.xlu0 %1486 }
 0x12f   :  { %v1149_v51 = vadd.f32 %v1117_v0, %v888_v5  ;;  %v1639_v28 = vmul.f32 %v7172_v22, %v1487_v6  ;;  %v2001_v57 = vmax.f32 %v1969_v53, 0.0  ;;  %v1191_v6 = vld [vmem:[#allocation2 + $0x6c] sm:$0xff] }
 0x130   :  { %v6149_v31 = vrot.slane %v2065_v63, 9  ;;  %v6150_v4 = vrot.slane %v2066_v29, 9  ;;  %v6151_v32 = vrot.slane %v2067_v59, 9  ;;  %v2642_v54 = vmax.f32 %v1999_v14, %v6148_v44  ;;  %v410_v44 = vld [vmem:[#allocation2 + $0x79] sm:$0xff] }
 0x131   :  { %758 = vperm.xlu2 %6711, %v670_v25   ;;  %v1410_v15 = vadd.f32 %v1378_v36, %v1149_v51  ;;  %v2072_v5 = vrot.slane %v2001_v57, 4  ;;  %v2073_v36 = vrot.slane %v2001_v57, 6 }
 0x132   :  { %v2643_v24 = vmax.f32 %v2065_v63, %v6149_v31  ;;  %v2644_v62 = vmax.f32 %v2066_v29, %v6150_v4  ;;  %v2645_v18 = vmax.f32 %v2067_v59, %v6151_v32  ;;  %v2907_v41 = vperm.slane %v2642_v54, 0  ;;  %v1712_v31 = vld [vmem:[#allocation2 + $0x66] sm:$0xff] }
 0x133   :  { %1531 = vperm.xlu1 %6710, %v1451_v47   ;;  %v7269_v55 = vpop.permute.xlu2 %984  ;;  %v1671_v0 = vadd.f32 %v1639_v28, %v1410_v15  ;;  %v2071_v54 = vrot.slane %v2001_v57, 2  ;;  %v1452_v15 = vld [vmem:[#allocation2 + $0x6d] sm:$0xff] }
 0x134   :  { %v2908_v27 = vperm.slane %v2643_v24, 0  ;;  %v2909_v14 = vperm.slane %v2644_v62, 0  ;;  %v3038_v50 = vsel %vm3037_vm6, %v2907_v41, %v3036_v37  ;;  %1014 = vperm.xlu0 %6709, %v930_v9   ;;  %v2910_v63 = vperm.slane %v2645_v18, 0  ;;  %v671_v24 = vld [vmem:[#allocation2 + $0x7a] sm:$0xff] }
 0x135   :  { %v975_v3 = vpop.permute.xlu1 %974 }
 0x136   :  { %v3040_v29 = vsel %vm3039_vm7, %v2908_v27, %v3038_v50  ;;  %v1748_v59 = vpop.permute.xlu0 %1747  ;;  %v6157_v50 = vrot.slane %v2071_v54, 9 }
 0x137   :  { %v3042_v25 = vsel %vm3041_vm8, %v2909_v14, %v3040_v29  ;;  %v1900_v38 = vmul.f32 %v7178_v1, %v1748_v59  ;;  %v6156_v14 = vrot.slane %v2001_v57, 9 }
 0x138   :  { %v3044_v41 = vsel %vm3043_vm9, %v2910_v63, %v3042_v25  ;;  %v597_v25 = vmul.f32 %v7138_v19, %v7125_v49 }
 0x139   :  { %3167 = vst.msk [vmem:[#allocation3 + $0x2] sm:$0xff] %vm3166_vm10, %v3044_v41  ;;  %v1932_v51 = vadd.f32 %v1900_v38, %v1671_v0  ;;  %502 = vperm.xlu2 %6711, %v410_v44   ;;  %v931_v44 = vld [vmem:[#allocation2 + $0x73] sm:$0xff]  ;;  %v6158_v0 = vrot.slane %v2072_v5, 9  ;;  %v6159_v38 = vrot.slane %v2073_v36, 9  ;;  %v2650_v52 = vmax.f32 %v2001_v57, %v6156_v14 }
 0x13b   :  { %v1968_v4 = vadd.f32 %v7186_v43, %v1932_v51  ;;  %1792 = vperm.xlu1 %6710, %v1712_v31   ;;  %v7280_v32 = vpop.permute.xlu2 %1245  ;;  %v2915_v57 = vperm.slane %v2650_v52, 0 }
 0x13c   :  { %1275 = vperm.xlu0 %6709, %v1191_v6  }
 0x13d   :  { %v2000_v47 = vmax.f32 %v1968_v4, 0.0  ;;  %v1236_v56 = vpop.permute.xlu1 %1235  ;;  %v336_v4 = vmul.f32 %v7143_v30, %v7043_v8 }
 0x13e   :  { %v7282_v9 = vpop.permute.xlu0 %718 }
 0x13f   :  { %v2068_v62 = vrot.slane %v2000_v47, 2  ;;  %v2069_v18 = vrot.slane %v2000_v47, 4  ;;  %v2070_v37 = vrot.slane %v2000_v47, 6  ;;  %v6152_v27 = vrot.slane %v2000_v47, 9 }
 0x140   :  { %v3207_v53 = vld [vmem:[#allocation3 + $0x1] sm:$0xff]  ;;  %v629_v26 = vadd.f32 %v597_v25, %v336_v4 }
 0x141   :  { %v6153_v28 = vrot.slane %v2068_v62, 9  ;;  %v6154_v63 = vrot.slane %v2069_v18, 9  ;;  %v6155_v29 = vrot.slane %v2070_v37, 9  ;;  %v2646_v59 = vmax.f32 %v2000_v47, %v6152_v27  ;;  %6276 = vmatmul.msk.f32.vlgmr.msra.gmra.mxu0 %vm3166_vm10, %v3207_v53  ;;  %763 = vperm.xlu2 %6711, %v671_v24  }
 0x142   :  { %v858_v47 = vmul.f32 %v7152_v42, %v7261_v21  ;;  %v2651_v24 = vmax.f32 %v2071_v54, %v6157_v50  ;;  %v1380_v54 = vmul.f32 %v7167_v2, %v1236_v56  ;;  %v1713_v50 = vld [vmem:[#allocation2 + $0x6e] sm:$0xff] }
 0x143   :  { %v2647_v41 = vmax.f32 %v2068_v62, %v6153_v28  ;;  %v2648_v31 = vmax.f32 %v2069_v18, %v6154_v63  ;;  %v2649_v51 = vmax.f32 %v2070_v37, %v6155_v29  ;;  %1536 = vperm.xlu1 %6710, %v1452_v15   ;;  %v7287_v6 = vpop.permute.xlu2 %1506  ;;  %v2911_v27 = vperm.slane %v2646_v59, 0  ;;  %v411_v15 = vld [vmem:[#allocation2 + $0x81] sm:$0xff] }
 0x144   :  { %1019 = vperm.xlu0 %6709, %v931_v44   ;;  %v2652_v62 = vmax.f32 %v2072_v5, %v6158_v0  ;;  %v1119_v18 = vmul.f32 %v7160_v17, %v975_v3  ;;  %v2653_v28 = vmax.f32 %v2073_v36, %v6159_v38  ;;  %v890_v14 = vadd.f32 %v858_v47, %v629_v26  ;;  %v1192_v5 = vld [vmem:[#allocation2 + $0x74] sm:$0xff] }
 0x145   :  { %v2912_v53 = vperm.slane %v2647_v41, 0  ;;  %v2913_v49 = vperm.slane %v2648_v31, 0  ;;  %v1497_v58 = vpop.permute.xlu1 %1496  ;;  %v2914_v63 = vperm.slane %v2649_v51, 0  ;;  %v2916_v29 = vperm.slane %v2651_v24, 0  ;;  %v672_v24 = vld [vmem:[#allocation2 + $0x82] sm:$0xff] }
 0x146   :  { %v980_v37 = vpop.permute.xlu0 %979  ;;  %v2917_v44 = vperm.slane %v2652_v62, 0  ;;  %v1151_v3 = vadd.f32 %v1119_v18, %v890_v14  ;;  %v1641_v36 = vmul.f32 %v7172_v22, %v1497_v58  ;;  %v2918_v0 = vperm.slane %v2653_v28, 0 }
 0x147   :  { %v3045_v8 = vsel %vm3031_vm3, %v2912_v53, %v2911_v27  ;;  %v1453_v27 = vld [vmem:[#allocation2 + $0x75] sm:$0xff]  ;;  %v599_v53 = vmul.f32 %v7138_v19, %v7103_v13  ;;  %v338_v18 = vmul.f32 %v7143_v30, %v7065_v34  ;;  %v337_v34 = vmul.f32 %v7143_v30, %v7045_v12 }
 0x148   :  { %v3046_v21 = vsel %vm3033_vm4, %v2913_v49, %v3045_v8  ;;  %v1412_v56 = vadd.f32 %v1380_v54, %v1151_v3  ;;  %v932_v49 = vld [vmem:[#allocation2 + $0x7b] sm:$0xff]  ;;  %v1643_v12 = vmul.f32 %v7172_v22, %v7287_v6 }
 0x149   :  { %v3047_v59 = vsel %vm3035_vm5, %v2914_v63, %v3046_v21  ;;  %507 = vperm.xlu2 %6711, %v411_v15   ;;  %v860_v15 = vmul.f32 %v7152_v42, %v7256_v7  ;;  %v598_v63 = vmul.f32 %v7138_v19, %v7123_v48  ;;  %v631_v13 = vadd.f32 %v599_v53, %v338_v18  ;;  %v673_v53 = vld [vmem:[#allocation2 + $0x92] sm:$0xff] }
 0x14a   :  { %v3048_v25 = vsel %vm3037_vm6, %v2915_v57, %v3047_v59  ;;  %v1673_v51 = vadd.f32 %v1641_v36, %v1412_v56  ;;  %v1121_v57 = vmul.f32 %v7160_v17, %v7269_v55  ;;  %v859_v7 = vmul.f32 %v7152_v42, %v7282_v9 }
 0x14b   :  { %v3049_v52 = vsel %vm3039_vm7, %v2916_v29, %v3048_v25  ;;  %1797 = vperm.xlu1 %6710, %v1713_v50   ;;  %v1768_v26 = vpop.permute.xlu2 %1767  ;;  %v412_v50 = vld [vmem:[#allocation2 + $0x91] sm:$0xff]  ;;  %v892_v29 = vadd.f32 %v860_v15, %v631_v13  ;;  %v1382_v59 = vmul.f32 %v7167_v2, %v7280_v32  ;;  %v630_v55 = vadd.f32 %v598_v63, %v337_v34  ;;  %v1193_v25 = vld [vmem:[#allocation2 + $0x7c] sm:$0xff] }
 0x14c   :  { %v3050_v38 = vsel %vm3041_vm8, %v2917_v44, %v3049_v52  ;;  %1280 = vperm.xlu0 %6709, %v1192_v5   ;;  %v1120_v5 = vmul.f32 %v7160_v17, %v980_v37  ;;  %v1714_v44 = vld [vmem:[#allocation2 + $0x76] sm:$0xff]  ;;  %v1904_v56 = vmul.f32 %v7178_v1, %v1768_v26  ;;  %v933_v13 = vld [vmem:[#allocation2 + $0x83] sm:$0xff] }
 0x14d   :  { %v3051_v41 = vsel %vm3043_vm9, %v2918_v0, %v3050_v38  ;;  %v1758_v31 = vpop.permute.xlu1 %1757  ;;  %v1153_v3 = vadd.f32 %v1121_v57, %v892_v29  ;;  %v891_v36 = vadd.f32 %v859_v7, %v630_v55  ;;  %v1454_v15 = vld [vmem:[#allocation2 + $0x7d] sm:$0xff] }
 0x14e   :  { %3168 = vst.msk [vmem:[#allocation3 + $0xa] sm:$0xff] %vm3166_vm10, %v3051_v41  ;;  %v1902_v4 = vmul.f32 %v7178_v1, %v1758_v31  ;;  %v1241_v47 = vpop.permute.xlu0 %1240 }
 0x14f   :  { %v1381_v52 = vmul.f32 %v7167_v2, %v1241_v47  ;;  %v1414_v38 = vadd.f32 %v1382_v59, %v1153_v3  ;;  %v1152_v37 = vadd.f32 %v1120_v5, %v891_v36 }
 0x150   :  { %v1934_v58 = vadd.f32 %v1902_v4, %v1673_v51 }
 0x151   :  { %768 = vperm.xlu2 %6711, %v672_v24   ;;  %v1675_v31 = vadd.f32 %v1643_v12, %v1414_v38  ;;  %v600_v38 = vmul.f32 %v7138_v19, %v7129_v61 }
 0x152   :  { %v1970_v62 = vadd.f32 %v7186_v43, %v1934_v58  ;;  %v1413_v58 = vadd.f32 %v1381_v52, %v1152_v37  ;;  %v1715_v52 = vld [vmem:[#allocation2 + $0x7e] sm:$0xff] }
 0x153   :  { %1541 = vperm.xlu1 %6710, %v1453_v27   ;;  %v7312_v28 = vpop.permute.xlu2 %738  ;;  %v1194_v37 = vld [vmem:[#allocation2 + $0x84] sm:$0xff] }
 0x154   :  { %v7316_v8 = vmax.f32 %v1970_v62, 0.0  ;;  %1024 = vperm.xlu0 %6709, %v932_v49   ;;  %v1936_v49 = vadd.f32 %v1904_v56, %v1675_v31 }
 0x155   :  { %v7320_v14 = vpop.permute.xlu1 %728  ;;  %v3208_v21 = vld [vmem:[#allocation3 + $0x9] sm:$0xff] }
 0x156   :  { %v2074_v54 = vrot.slane %v7316_v8, 2  ;;  %6277 = vmatmul.msk.f32.gmra.mxu0 %vm3166_vm10, %v3208_v21  ;;  %v1502_v48 = vpop.permute.xlu0 %1501  ;;  %v2075_v9 = vrot.slane %v7316_v8, 4  ;;  %v6160_v41 = vrot.slane %v7316_v8, 9  ;;  %v2076_v47 = vrot.slane %v7316_v8, 6 }
 0x157   :  { %v1642_v51 = vmul.f32 %v7172_v22, %v1502_v48  ;;  %v1972_v7 = vadd.f32 %v7186_v43, %v1936_v49 }
 0x158   :  { %v6161_v0 = vrot.slane %v2074_v54, 9  ;;  %v6162_v6 = vrot.slane %v2075_v9, 9  ;;  %v2654_v26 = vmax.f32 %v7316_v8, %v6160_v41  ;;  %v6163_v34 = vrot.slane %v2076_v47, 9 }
 0x159   :  { %512 = vperm.xlu2 %6711, %v412_v50   ;;  %v1674_v62 = vadd.f32 %v1642_v51, %v1413_v58  ;;  %v7350_v12 = vmax.f32 %v1972_v7, 0.0 }
 0x15a   :  { %v2655_v24 = vmax.f32 %v2074_v54, %v6161_v0  ;;  %v2656_v63 = vmax.f32 %v2075_v9, %v6162_v6  ;;  %v2919_v48 = vperm.slane %v2654_v26, 0  ;;  %v2657_v3 = vmax.f32 %v2076_v47, %v6163_v34 }
 0x15b   :  { %1802 = vperm.xlu1 %6710, %v1714_v44   ;;  %v7336_v32 = vpop.permute.xlu2 %999  ;;  %v413_v44 = vld [vmem:[#allocation2 + $0x99] sm:$0xff]  ;;  %v2081_v7 = vrot.slane %v7350_v12, 4 }
 0x15c   :  { %1285 = vperm.xlu0 %6709, %v1193_v25   ;;  %v2920_v57 = vperm.slane %v2655_v24, 0  ;;  %v2921_v8 = vperm.slane %v2656_v63, 0  ;;  %v339_v24 = vmul.f32 %v7143_v30, %v7063_v33  ;;  %v2922_v58 = vperm.slane %v2657_v3, 0 }
 0x15d   :  { %v990_v4 = vpop.permute.xlu1 %989 }
 0x15e   :  { %v1763_v27 = vpop.permute.xlu0 %1762  ;;  %v3052_v59 = vsel %vm3031_vm3, %v2920_v57, %v2919_v48 }
 0x15f   :  { %v1903_v18 = vmul.f32 %v7178_v1, %v1763_v27  ;;  %v3053_v56 = vsel %vm3033_vm4, %v2921_v8, %v3052_v59  ;;  %v2080_v27 = vrot.slane %v7350_v12, 2 }
 0x161   :  { %773 = vperm.xlu2 %6711, %v673_v53   ;;  %v1935_v21 = vadd.f32 %v1903_v18, %v1674_v62  ;;  %v861_v53 = vmul.f32 %v7152_v42, %v7320_v14  ;;  %v632_v18 = vadd.f32 %v600_v38, %v339_v24  ;;  %v674_v14 = vld [vmem:[#allocation2 + $0x9a] sm:$0xff]  ;;  %v6169_v48 = vrot.slane %v2080_v27, 9 }
 0x162   :  { %v341_v38 = vmul.f32 %v7143_v30, %v7071_v40 }
 0x163   :  { %1546 = vperm.xlu1 %6710, %v1454_v15   ;;  %v7344_v54 = vpop.permute.xlu2 %1260  ;;  %v1971_v50 = vadd.f32 %v7186_v43, %v1935_v21  ;;  %v3054_v15 = vsel %vm3035_vm5, %v2922_v58, %v3053_v56  ;;  %v6170_v56 = vrot.slane %v2081_v7, 9 }
 0x164   :  { %1029 = vperm.xlu0 %6709, %v933_v13   ;;  %v1122_v13 = vmul.f32 %v7160_v17, %v990_v4  ;;  %v602_v4 = vmul.f32 %v7138_v19, %v7109_v23 }
 0x165   :  { %v1251_v29 = vpop.permute.xlu1 %1250  ;;  %v2003_v55 = vmax.f32 %v1971_v50, 0.0  ;;  %v893_v50 = vadd.f32 %v861_v53, %v632_v18 }
 0x166   :  { %v7348_v5 = vpop.permute.xlu0 %733 }
 0x167   :  { %v2077_v9 = vrot.slane %v2003_v55, 2  ;;  %v2078_v25 = vrot.slane %v2003_v55, 4  ;;  %v2079_v36 = vrot.slane %v2003_v55, 6  ;;  %v6164_v0 = vrot.slane %v2003_v55, 9 }
 0x169   :  { %517 = vperm.xlu2 %6711, %v413_v44   ;;  %v6165_v41 = vrot.slane %v2077_v9, 9  ;;  %v6166_v31 = vrot.slane %v2078_v25, 9  ;;  %v6167_v6 = vrot.slane %v2079_v36, 9  ;;  %v2658_v51 = vmax.f32 %v2003_v55, %v6164_v0  ;;  %v1455_v44 = vld [vmem:[#allocation2 + $0x85] sm:$0xff] }
 0x16a   :  { %v1383_v55 = vmul.f32 %v7167_v2, %v1251_v29  ;;  %v863_v29 = vmul.f32 %v7152_v42, %v7312_v28 }
 0x16b   :  { %1807 = vperm.xlu1 %6710, %v1715_v52   ;;  %v1522_v47 = vpop.permute.xlu2 %1521  ;;  %v2659_v61 = vmax.f32 %v2077_v9, %v6165_v41  ;;  %v2660_v49 = vmax.f32 %v2078_v25, %v6166_v31  ;;  %v2661_v26 = vmax.f32 %v2079_v36, %v6167_v6  ;;  %v2923_v62 = vperm.slane %v2658_v51, 0  ;;  %v934_v9 = vld [vmem:[#allocation2 + $0x93] sm:$0xff] }
 0x16c   :  { %1290 = vperm.xlu0 %6709, %v1194_v37   ;;  %v6168_v25 = vrot.slane %v7350_v12, 9  ;;  %v1154_v36 = vadd.f32 %v1122_v13, %v893_v50  ;;  %v2663_v37 = vmax.f32 %v2080_v27, %v6169_v48  ;;  %v634_v31 = vadd.f32 %v602_v4, %v341_v38 }
 0x16d   :  { %v1512_v63 = vpop.permute.xlu1 %1511  ;;  %v2924_v33 = vperm.slane %v2659_v61, 0  ;;  %v2925_v57 = vperm.slane %v2660_v49, 0  ;;  %v3055_v21 = vsel %vm3037_vm6, %v2923_v62, %v3054_v15  ;;  %v2926_v8 = vperm.slane %v2661_v26, 0  ;;  %v414_v61 = vld [vmem:[#allocation2 + $0xa1] sm:$0xff] }
 0x16e   :  { %v7363_v34 = vpop.permute.xlu0 %994  ;;  %v1644_v52 = vmul.f32 %v7172_v22, %v1512_v63  ;;  %v1415_v41 = vadd.f32 %v1383_v55, %v1154_v36  ;;  %v2082_v6 = vrot.slane %v7350_v12, 6  ;;  %v1124_v51 = vmul.f32 %v7160_v17, %v7336_v32  ;;  %v1716_v15 = vld [vmem:[#allocation2 + $0x86] sm:$0xff] }
 0x16f   :  { %v3056_v59 = vsel %vm3039_vm7, %v2924_v33, %v3055_v21  ;;  %v2662_v40 = vmax.f32 %v7350_v12, %v6168_v25  ;;  %v2664_v49 = vmax.f32 %v2081_v7, %v6170_v56  ;;  %v895_v26 = vadd.f32 %v863_v29, %v634_v31  ;;  %v1195_v33 = vld [vmem:[#allocation2 + $0x94] sm:$0xff] }
 0x170   :  { %v3057_v3 = vsel %vm3041_vm8, %v2925_v57, %v3056_v59  ;;  %v1676_v58 = vadd.f32 %v1644_v52, %v1415_v41  ;;  %v1385_v27 = vmul.f32 %v7167_v2, %v7344_v54  ;;  %v2928_v62 = vperm.slane %v2663_v37, 0 }
 0x171   :  { %778 = vperm.xlu2 %6711, %v674_v14   ;;  %v3058_v0 = vsel %vm3043_vm9, %v2926_v8, %v3057_v3  ;;  %v6171_v63 = vrot.slane %v2082_v6, 9  ;;  %v1156_v13 = vadd.f32 %v1124_v51, %v895_v26  ;;  %v1646_v32 = vmul.f32 %v7172_v22, %v1522_v47 }
 0x172   :  { %3169 = vst.msk [vmem:[#allocation3 + $0x12] sm:$0xff] %vm3166_vm10, %v3058_v0  ;;  %v2927_v12 = vperm.slane %v2662_v40, 0  ;;  %v601_v14 = vmul.f32 %v7138_v19, %v7127_v60  ;;  %v2929_v7 = vperm.slane %v2664_v49, 0  ;;  %v340_v59 = vmul.f32 %v7143_v30, %v7047_v16  ;;  %v675_v0 = vld [vmem:[#allocation2 + $0xa2] sm:$0xff] }
 0x173   :  { %1551 = vperm.xlu1 %6710, %v1455_v44   ;;  %v1783_v23 = vpop.permute.xlu2 %1782  ;;  %v1417_v48 = vadd.f32 %v1385_v27, %v1156_v13  ;;  %v2665_v55 = vmax.f32 %v2082_v6, %v6171_v63  ;;  %v862_v60 = vmul.f32 %v7152_v42, %v7348_v5  ;;  %v1123_v56 = vmul.f32 %v7160_v17, %v7363_v34  ;;  %v1456_v5 = vld [vmem:[#allocation2 + $0x95] sm:$0xff]  ;;  %v415_v13 = vld [vmem:[#allocation2 + $0xa9] sm:$0xff] }
 0x174   :  { %1034 = vperm.xlu0 %6709, %v934_v9   ;;  %v1907_v54 = vmul.f32 %v7178_v1, %v1783_v23  ;;  %v3059_v47 = vsel %vm3031_vm3, %v2928_v62, %v2927_v12  ;;  %v633_v52 = vadd.f32 %v601_v14, %v340_v59  ;;  %v935_v6 = vld [vmem:[#allocation2 + $0x9b] sm:$0xff] }
 0x175   :  { %v1773_v24 = vpop.permute.xlu1 %1772  ;;  %v1678_v19 = vadd.f32 %v1646_v32, %v1417_v48  ;;  %v3060_v38 = vsel %vm3033_vm4, %v2929_v7, %v3059_v47  ;;  %v2930_v37 = vperm.slane %v2665_v55, 0  ;;  %v1717_v14 = vld [vmem:[#allocation2 + $0x96] sm:$0xff] }
 0x176   :  { %v1905_v53 = vmul.f32 %v7178_v1, %v1773_v24  ;;  %v1256_v28 = vpop.permute.xlu0 %1255  ;;  %v894_v41 = vadd.f32 %v862_v60, %v633_v52 }
 0x177   :  { %v1939_v16 = vadd.f32 %v1907_v54, %v1678_v19  ;;  %v1384_v31 = vmul.f32 %v7167_v2, %v1256_v28  ;;  %v676_v19 = vld [vmem:[#allocation2 + $0xaa] sm:$0xff] }
 0x178   :  { %v1937_v18 = vadd.f32 %v1905_v53, %v1676_v58  ;;  %v3061_v53 = vsel %vm3035_vm5, %v2930_v37, %v3060_v38 }
 0x179   :  { %522 = vperm.xlu2 %6711, %v414_v61   ;;  %v3209_v21 = vld [vmem:[#allocation3 + $0x11] sm:$0xff]  ;;  %v1155_v61 = vadd.f32 %v1123_v56, %v894_v41  ;;  %v1975_v27 = vadd.f32 %v7186_v43, %v1939_v16 }
 0x17a   :  { %v1973_v57 = vadd.f32 %v7186_v43, %v1937_v18  ;;  %6278 = vmatmul.msk.f32.gmra.mxu0 %vm3166_vm10, %v3209_v21 }
 0x17b   :  { %1812 = vperm.xlu1 %6710, %v1716_v15   ;;  %v7392_v50 = vpop.permute.xlu2 %753  ;;  %v1416_v2 = vadd.f32 %v1384_v31, %v1155_v61  ;;  %v2007_v21 = vmax.f32 %v1975_v27, 0.0 }
 0x17c   :  { %v2005_v8 = vmax.f32 %v1973_v57, 0.0  ;;  %1295 = vperm.xlu0 %6709, %v1195_v33  }
 0x17d   :  { %v7399_v44 = vpop.permute.xlu1 %743  ;;  %v2089_v47 = vrot.slane %v2007_v21, 2  ;;  %v2090_v55 = vrot.slane %v2007_v21, 4 }
 0x17e   :  { %v2083_v4 = vrot.slane %v2005_v8, 2  ;;  %v2084_v3 = vrot.slane %v2005_v8, 4  ;;  %v2085_v9 = vrot.slane %v2005_v8, 6  ;;  %v6172_v25 = vrot.slane %v2005_v8, 9  ;;  %v1517_v36 = vpop.permute.xlu0 %1516 }
 0x17f   :  { %v1645_v28 = vmul.f32 %v7172_v22, %v1517_v36  ;;  %v1196_v22 = vld [vmem:[#allocation2 + $0x9c] sm:$0xff]  ;;  %v6180_v36 = vrot.slane %v2007_v21, 9 }
 0x180   :  { %v6173_v30 = vrot.slane %v2083_v4, 9  ;;  %v6174_v29 = vrot.slane %v2084_v3, 9  ;;  %v6175_v23 = vrot.slane %v2085_v9, 9  ;;  %v2666_v42 = vmax.f32 %v2005_v8, %v6172_v25 }
 0x181   :  { %783 = vperm.xlu2 %6711, %v675_v0   ;;  %v1677_v33 = vadd.f32 %v1645_v28, %v1416_v2  ;;  %v6181_v0 = vrot.slane %v2089_v47, 9 }
 0x182   :  { %v2667_v51 = vmax.f32 %v2083_v4, %v6173_v30  ;;  %v2668_v24 = vmax.f32 %v2084_v3, %v6174_v29  ;;  %v2669_v40 = vmax.f32 %v2085_v9, %v6175_v23  ;;  %v2931_v58 = vperm.slane %v2666_v42, 0  ;;  %v936_v29 = vld [vmem:[#allocation2 + $0xa3] sm:$0xff]  ;;  %v7427_v23 = vld [vmem:[%s9058_s1 + $0x1] ss:$0 sm:$0xff] }
 0x183   :  { %1556 = vperm.xlu1 %6710, %v1456_v5   ;;  %v7406_v17 = vpop.permute.xlu2 %497  ;;  %v603_v42 = vmul.f32 %v7427_v23, %v7133_v11  ;;  %v6182_v5 = vrot.slane %v2090_v55, 9  ;;  %v7443_v11 = vld [vmem:[%s9058_s1 + $0x2] ss:$0 sm:$0xff]  ;;  %v2675_v61 = vmax.f32 %v2089_v47, %v6181_v0 }
 0x184   :  { %v2932_v34 = vperm.slane %v2667_v51, 0  ;;  %v2933_v49 = vperm.slane %v2668_v24, 0  ;;  %v3062_v26 = vsel %vm3037_vm6, %v2931_v58, %v3061_v53  ;;  %1039 = vperm.xlu0 %6709, %v935_v6   ;;  %v2934_v18 = vperm.slane %v2669_v40, 0  ;;  %v7436_v24 = vld [vmem:[%s9058_s1] ss:$0 sm:$0xff] }
 0x185   :  { %v7411_v62 = vpop.permute.xlu1 %1004  ;;  %v342_v40 = vmul.f32 %v7436_v24, %v7069_v39  ;;  %v2674_v58 = vmax.f32 %v2007_v21, %v6180_v36  ;;  %v864_v53 = vmul.f32 %v7443_v11, %v7399_v44  ;;  %v2676_v28 = vmax.f32 %v2090_v55, %v6182_v5  ;;  %v7450_v39 = vld [vmem:[%s9058_s1 + $0x3] ss:$0 sm:$0xff] }
 0x186   :  { %v3063_v15 = vsel %vm3039_vm7, %v2932_v34, %v3062_v26  ;;  %v1778_v63 = vpop.permute.xlu0 %1777  ;;  %v604_v5 = vmul.f32 %v7427_v23, %v7131_v10 }
 0x187   :  { %v3064_v32 = vsel %vm3041_vm8, %v2933_v49, %v3063_v15  ;;  %v1906_v12 = vmul.f32 %v7178_v1, %v1778_v63  ;;  %v2091_v1 = vrot.slane %v2007_v21, 6  ;;  %v635_v2 = vadd.f32 %v603_v42, %v342_v40  ;;  %v416_v63 = vld [vmem:[#allocation2 + $0xb1] sm:$0xff]  ;;  %v7459_v21 = vld [vmem:[%s9058_s1 + $0x4] ss:$0 sm:$0xff] }
 0x188   :  { %v3065_v57 = vsel %vm3043_vm9, %v2934_v18, %v3064_v32  ;;  %v1125_v18 = vmul.f32 %v7450_v39, %v7411_v62  ;;  %v2941_v47 = vperm.slane %v2676_v28, 0  ;;  %v937_v42 = vld [vmem:[#allocation2 + $0xab] sm:$0xff] }
 0x189   :  { %3170 = vst.msk [vmem:[#allocation3 + $0x1a] sm:$0xff] %vm3166_vm10, %v3065_v57  ;;  %v1938_v7 = vadd.f32 %v1906_v12, %v1677_v33  ;;  %527 = vperm.xlu2 %6711, %v415_v13   ;;  %v6183_v37 = vrot.slane %v2091_v1, 9  ;;  %v2939_v33 = vperm.slane %v2674_v58, 0  ;;  %v896_v12 = vadd.f32 %v864_v53, %v635_v2 }
 0x18b   :  { %v1974_v48 = vadd.f32 %v7186_v43, %v1938_v7  ;;  %1817 = vperm.xlu1 %6710, %v1717_v14   ;;  %v7419_v54 = vpop.permute.xlu2 %758  ;;  %v1457_v43 = vld [vmem:[#allocation2 + $0x9d] sm:$0xff]  ;;  %v2677_v13 = vmax.f32 %v2091_v1, %v6183_v37  ;;  %v7487_v37 = vld [vmem:[%s9059_s2] ss:$0 sm:$0xff] }
 0x18c   :  { %1300 = vperm.xlu0 %6709, %v1196_v22   ;;  %v1718_v7 = vld [vmem:[#allocation2 + $0x9e] sm:$0xff]  ;;  %v2940_v22 = vperm.slane %v2675_v61, 0  ;;  %v7467_v1 = vld [vmem:[%s9058_s1 + $0x5] ss:$0 sm:$0xff] }
 0x18d   :  { %v2006_v8 = vmax.f32 %v1974_v48, 0.0  ;;  %v1266_v59 = vpop.permute.xlu1 %1265  ;;  %v1197_v48 = vld [vmem:[#allocation2 + $0xa4] sm:$0xff] }
 0x18e   :  { %v7421_v60 = vpop.permute.xlu0 %748  ;;  %v1386_v14 = vmul.f32 %v7459_v21, %v1266_v59 }
 0x18f   :  { %v2086_v4 = vrot.slane %v2006_v8, 2  ;;  %v2087_v3 = vrot.slane %v2006_v8, 4  ;;  %v2088_v9 = vrot.slane %v2006_v8, 6  ;;  %v6176_v25 = vrot.slane %v2006_v8, 9 }
 0x190   :  { %v3210_v52 = vld [vmem:[#allocation3 + $0x19] sm:$0xff]  ;;  %v865_v40 = vmul.f32 %v7443_v11, %v7421_v60  ;;  %v1198_v60 = vld [vmem:[#allocation2 + $0xac] sm:$0xff] }
 0x191   :  { %v6177_v38 = vrot.slane %v2086_v4, 9  ;;  %v6178_v56 = vrot.slane %v2087_v3, 9  ;;  %v6179_v16 = vrot.slane %v2088_v9, 9  ;;  %v2670_v30 = vmax.f32 %v2006_v8, %v6176_v25  ;;  %6279 = vmatmul.msk.f32.gmra.mxu0 %vm3166_vm10, %v3210_v52  ;;  %788 = vperm.xlu2 %6711, %v676_v19  }
 0x192   :  { %v1157_v8 = vadd.f32 %v1125_v18, %v896_v12 }
 0x193   :  { %v2671_v41 = vmax.f32 %v2086_v4, %v6177_v38  ;;  %v2672_v31 = vmax.f32 %v2087_v3, %v6178_v56  ;;  %v2673_v6 = vmax.f32 %v2088_v9, %v6179_v16  ;;  %1561 = vperm.xlu1 %6710, %v1457_v43   ;;  %v7431_v51 = vpop.permute.xlu2 %502  ;;  %v2935_v34 = vperm.slane %v2670_v30, 0  ;;  %v7479_v43 = vld [vmem:[%s9058_s1 + $0x6] ss:$0 sm:$0xff]  ;;  %v677_v16 = vld [vmem:[#allocation2 + $0xb2] sm:$0xff] }
 0x194   :  { %1044 = vperm.xlu0 %6709, %v936_v29   ;;  %v2942_v4 = vperm.slane %v2677_v13, 0  ;;  %v1418_v25 = vadd.f32 %v1386_v14, %v1157_v8  ;;  %v1458_v29 = vld [vmem:[#allocation2 + $0xa5] sm:$0xff] }
 0x195   :  { %v2936_v49 = vperm.slane %v2671_v41, 0  ;;  %v2937_v26 = vperm.slane %v2672_v31, 0  ;;  %v1527_v27 = vpop.permute.xlu1 %1526  ;;  %v2938_v44 = vperm.slane %v2673_v6, 0  ;;  %v343_v6 = vmul.f32 %v7436_v24, %v7049_v20  ;;  %v422_v8 = vld [vmem:[#allocation2 + $0xe9] sm:$0xff] }
 0x196   :  { %v1010_v15 = vpop.permute.xlu0 %1009  ;;  %v1647_v19 = vmul.f32 %v7467_v1, %v1527_v27  ;;  %v417_v27 = vld [vmem:[#allocation2 + $0xb9] sm:$0xff] }
 0x197   :  { %v3066_v32 = vsel %vm3031_vm3, %v2936_v49, %v2935_v34  ;;  %v636_v61 = vadd.f32 %v604_v5, %v343_v6  ;;  %v1126_v34 = vmul.f32 %v7450_v39, %v1010_v15 }
 0x198   :  { %v3067_v57 = vsel %vm3033_vm4, %v2937_v26, %v3066_v32  ;;  %v1679_v52 = vadd.f32 %v1647_v19, %v1418_v25 }
 0x199   :  { %v3068_v62 = vsel %vm3035_vm5, %v2938_v44, %v3067_v57  ;;  %532 = vperm.xlu2 %6711, %v416_v63   ;;  %v897_v28 = vadd.f32 %v865_v40, %v636_v61  ;;  %v1719_v63 = vld [vmem:[#allocation2 + $0xa6] sm:$0xff]  ;;  %v1199_v61 = vld [vmem:[#allocation2 + $0xb4] sm:$0xff] }
 0x19a   :  { %v3069_v55 = vsel %vm3037_vm6, %v2939_v33, %v3068_v62 }
 0x19b   :  { %v3070_v59 = vsel %vm3039_vm7, %v2940_v22, %v3069_v55  ;;  %1822 = vperm.xlu1 %6710, %v1718_v7   ;;  %v7471_v3 = vpop.permute.xlu2 %763  ;;  %v1158_v13 = vadd.f32 %v1126_v34, %v897_v28 }
 0x19c   :  { %v3071_v9 = vsel %vm3041_vm8, %v2941_v47, %v3070_v59  ;;  %1305 = vperm.xlu0 %6709, %v1197_v48   ;;  %v1459_v59 = vld [vmem:[#allocation2 + $0xad] sm:$0xff] }
 0x19d   :  { %v3072_v36 = vsel %vm3043_vm9, %v2942_v4, %v3071_v9  ;;  %v1788_v0 = vpop.permute.xlu1 %1787  ;;  %v605_v9 = vmul.f32 %v7427_v23, %v7115_v35 }
 0x19e   :  { %3171 = vst.msk [vmem:[#allocation3 + $0x2a] sm:$0xff] %vm3166_vm10, %v3072_v36  ;;  %v1908_v38 = vmul.f32 %v7479_v43, %v1788_v0  ;;  %v1271_v56 = vpop.permute.xlu0 %1270  ;;  %v938_v36 = vld [vmem:[#allocation2 + $0xb3] sm:$0xff] }
 0x19f   :  { %v1387_v20 = vmul.f32 %v7459_v21, %v1271_v56  ;;  %v866_v56 = vmul.f32 %v7443_v11, %v7392_v50 }
 0x1a0   :  { %v1940_v30 = vadd.f32 %v1908_v38, %v1679_v52  ;;  %v344_v38 = vmul.f32 %v7436_v24, %v7077_v46 }
 0x1a1   :  { %793 = vperm.xlu2 %6711, %v677_v16   ;;  %v1419_v57 = vadd.f32 %v1387_v20, %v1158_v13  ;;  %v678_v20 = vld [vmem:[#allocation2 + $0xba] sm:$0xff] }
 0x1a2   :  { %v1976_v41 = vadd.f32 %v7487_v37, %v1940_v30  ;;  %v637_v35 = vadd.f32 %v605_v9, %v344_v38  ;;  %v424_v13 = vld [vmem:[#allocation2 + $0xf9] sm:$0xff]  ;;  %v426_v9 = vld [vmem:[#allocation2 + $0x109] sm:$0xff] }
 0x1a3   :  { %1566 = vperm.xlu1 %6710, %v1458_v29   ;;  %v7490_v31 = vpop.permute.xlu2 %507  ;;  %v1720_v38 = vld [vmem:[#allocation2 + $0xae] sm:$0xff] }
 0x1a4   :  { %v2008_v58 = vmax.f32 %v1976_v41, 0.0  ;;  %1049 = vperm.xlu0 %6709, %v937_v42   ;;  %v898_v50 = vadd.f32 %v866_v56, %v637_v35  ;;  %v606_v56 = vmul.f32 %v7427_v23, %v7406_v17  ;;  %v867_v35 = vmul.f32 %v7443_v11, %v7419_v54  ;;  %v939_v17 = vld [vmem:[#allocation2 + $0xbb] sm:$0xff] }
 0x1a5   :  { %v1532_v53 = vpop.permute.xlu1 %1531  ;;  %v3211_v10 = vld [vmem:[#allocation3 + $0x29] sm:$0xff] }
 0x1a6   :  { %v2092_v49 = vrot.slane %v2008_v58, 2  ;;  %6280 = vmatmul.msk.f32.gmra.mxu0 %vm3166_vm10, %v3211_v10  ;;  %v1015_v26 = vpop.permute.xlu0 %1014  ;;  %v2093_v2 = vrot.slane %v2008_v58, 4  ;;  %v6184_v44 = vrot.slane %v2008_v58, 9  ;;  %v1648_v32 = vmul.f32 %v7467_v1, %v1532_v53 }
 0x1a7   :  { %v2094_v14 = vrot.slane %v2008_v58, 6  ;;  %v1127_v41 = vmul.f32 %v7450_v39, %v1015_v26 }
 0x1a8   :  { %v6185_v18 = vrot.slane %v2092_v49, 9  ;;  %v6186_v33 = vrot.slane %v2093_v2, 9  ;;  %v2678_v22 = vmax.f32 %v2008_v58, %v6184_v44  ;;  %v1680_v62 = vadd.f32 %v1648_v32, %v1419_v57 }
 0x1a9   :  { %537 = vperm.xlu2 %6711, %v417_v27   ;;  %v6187_v25 = vrot.slane %v2094_v14, 9 }
 0x1aa   :  { %v2679_v12 = vmax.f32 %v2092_v49, %v6185_v18  ;;  %v2680_v55 = vmax.f32 %v2093_v2, %v6186_v33  ;;  %v2943_v0 = vperm.slane %v2678_v22, 0 }
 0x1ab   :  { %1827 = vperm.xlu1 %6710, %v1719_v63   ;;  %v7500_v15 = vpop.permute.xlu2 %768  ;;  %v2681_v5 = vmax.f32 %v2094_v14, %v6187_v25 }
 0x1ac   :  { %1310 = vperm.xlu0 %6709, %v1198_v60   ;;  %v2944_v19 = vperm.slane %v2679_v12, 0  ;;  %v2945_v16 = vperm.slane %v2680_v55, 0  ;;  %v1159_v60 = vadd.f32 %v1127_v41, %v898_v50 }
 0x1ad   :  { %v1793_v7 = vpop.permute.xlu1 %1792  ;;  %v2946_v63 = vperm.slane %v2681_v5, 0 }
 0x1ae   :  { %v1909_v48 = vmul.f32 %v7479_v43, %v1793_v7  ;;  %v1276_v47 = vpop.permute.xlu0 %1275  ;;  %v3073_v29 = vsel %vm3031_vm3, %v2944_v19, %v2943_v0 }
 0x1af   :  { %v3074_v34 = vsel %vm3033_vm4, %v2945_v16, %v3073_v29  ;;  %v1388_v49 = vmul.f32 %v7459_v21, %v1276_v47 }
 0x1b0   :  { %v1941_v4 = vadd.f32 %v1909_v48, %v1680_v62  ;;  %v3075_v57 = vsel %vm3035_vm5, %v2946_v63, %v3074_v34 }
 0x1b1   :  { %562 = vperm.xlu2 %6711, %v422_v8   ;;  %v1420_v48 = vadd.f32 %v1388_v49, %v1159_v60 }
 0x1b2   :  { %v1977_v52 = vadd.f32 %v7487_v37, %v1941_v4 }
 0x1b3   :  { %1571 = vperm.xlu1 %6710, %v1459_v59   ;;  %v7510_v30 = vpop.permute.xlu2 %512 }
 0x1b4   :  { %v2009_v42 = vmax.f32 %v1977_v52, 0.0  ;;  %1054 = vperm.xlu0 %6709, %v938_v36   ;;  %v418_v52 = vld [vmem:[#allocation2 + $0xc1] sm:$0xff] }
 0x1b5   :  { %v1537_v6 = vpop.permute.xlu1 %1536 }
 0x1b6   :  { %v2095_v40 = vrot.slane %v2009_v42, 2  ;;  %v2096_v58 = vrot.slane %v2009_v42, 4  ;;  %v2097_v53 = vrot.slane %v2009_v42, 6  ;;  %v6188_v46 = vrot.slane %v2009_v42, 9  ;;  %v1020_v10 = vpop.permute.xlu0 %1019 }
 0x1b7   :  { %v1649_v26 = vmul.f32 %v7467_v1, %v1537_v6 }
 0x1b8   :  { %v6189_v27 = vrot.slane %v2095_v40, 9  ;;  %v6190_v2 = vrot.slane %v2096_v58, 9  ;;  %v6191_v28 = vrot.slane %v2097_v53, 9  ;;  %v2682_v18 = vmax.f32 %v2009_v42, %v6188_v46 }
 0x1b9   :  { %1315 = vperm.xlu2 %6711, %v1199_v61   ;;  %v1681_v19 = vadd.f32 %v1649_v26, %v1420_v48  ;;  %v345_v42 = vmul.f32 %v7436_v24, %v7075_v45  ;;  %v683_v45 = vld [vmem:[#allocation2 + $0xea] sm:$0xff]  ;;  %v607_v48 = vmul.f32 %v7427_v23, %v7431_v51 }
 0x1ba   :  { %v2683_v44 = vmax.f32 %v2095_v40, %v6189_v27  ;;  %v2684_v32 = vmax.f32 %v2096_v58, %v6190_v2  ;;  %v2685_v33 = vmax.f32 %v2097_v53, %v6191_v28  ;;  %v2947_v12 = vperm.slane %v2682_v18, 0  ;;  %v685_v27 = vld [vmem:[#allocation2 + $0xfa] sm:$0xff] }
 0x1bb   :  { %798 = vperm.xlu1 %6710, %v678_v20   ;;  %v7518_v14 = vpop.permute.xlu2 %773  ;;  %v638_v6 = vadd.f32 %v606_v56, %v345_v42  ;;  %v1128_v40 = vmul.f32 %v7450_v39, %v1020_v10 }
 0x1bc   :  { %v2948_v7 = vperm.slane %v2683_v44, 0  ;;  %v2949_v22 = vperm.slane %v2684_v32, 0  ;;  %v3076_v62 = vsel %vm3037_vm6, %v2947_v12, %v3075_v57  ;;  %572 = vperm.xlu0 %6709, %v424_v13   ;;  %v2950_v8 = vperm.slane %v2685_v33, 0  ;;  %v423_v12 = vld [vmem:[#allocation2 + $0xf1] sm:$0xff] }
 0x1bd   :  { %v1798_v47 = vpop.permute.xlu1 %1797  ;;  %v899_v61 = vadd.f32 %v867_v35, %v638_v6 }
 0x1be   :  { %v3077_v55 = vsel %vm3039_vm7, %v2948_v7, %v3076_v62  ;;  %v1910_v4 = vmul.f32 %v7479_v43, %v1798_v47  ;;  %v1281_v59 = vpop.permute.xlu0 %1280  ;;  %v420_v62 = vld [vmem:[#allocation2 + $0xd9] sm:$0xff] }
 0x1bf   :  { %v3078_v25 = vsel %vm3041_vm8, %v2949_v22, %v3077_v55  ;;  %v1389_v34 = vmul.f32 %v7459_v21, %v1281_v59  ;;  %v1160_v54 = vadd.f32 %v1128_v40, %v899_v61  ;;  %v687_v40 = vld [vmem:[#allocation2 + $0x10a] sm:$0xff] }
 0x1c0   :  { %v3079_v36 = vsel %vm3043_vm9, %v2950_v8, %v3078_v25  ;;  %v1942_v0 = vadd.f32 %v1910_v4, %v1681_v19  ;;  %v1460_v8 = vld [vmem:[#allocation2 + $0xb5] sm:$0xff]  ;;  %v9127_v4 = vld [vmem:[#allocation10_spill] sm:$0xff] }
 0x1c1   :  { %3172 = vst.msk [vmem:[#allocation3 + $0x32] sm:$0xff] %vm3166_vm10, %v3079_v36  ;;  %582 = vperm.xlu2 %6711, %v426_v9   ;;  %v1421_v63 = vadd.f32 %v1389_v34, %v1160_v54  ;;  %v346_v59 = vmul.f32 %v7436_v24, %v9127_v4  ;;  %v868_v9 = vmul.f32 %v7443_v11, %v7471_v3  ;;  %v1200_v4 = vld [vmem:[#allocation2 + $0xbc] sm:$0xff] }
 0x1c2   :  { %v1978_v16 = vadd.f32 %v7487_v37, %v1942_v0 }
 0x1c3   :  { %542 = vperm.xlu1 %6710, %v418_v52   ;;  %v7529_v29 = vpop.permute.xlu2 %517  ;;  %v639_v51 = vadd.f32 %v607_v48, %v346_v59 }
 0x1c4   :  { %v2010_v5 = vmax.f32 %v1978_v16, 0.0  ;;  %1832 = vperm.xlu0 %6709, %v1720_v38  }
 0x1c5   :  { %v1542_v41 = vpop.permute.xlu1 %1541 }
 0x1c6   :  { %v2098_v58 = vrot.slane %v2010_v5, 2  ;;  %v1025_v53 = vpop.permute.xlu0 %1024  ;;  %v2099_v46 = vrot.slane %v2010_v5, 4  ;;  %v6192_v2 = vrot.slane %v2010_v5, 9  ;;  %v1650_v28 = vmul.f32 %v7467_v1, %v1542_v41 }
 0x1c7   :  { %v2100_v60 = vrot.slane %v2010_v5, 6  ;;  %v1129_v56 = vmul.f32 %v7450_v39, %v1025_v53 }
 0x1c8   :  { %v6193_v50 = vrot.slane %v2098_v58, 9  ;;  %v3212_v49 = vld [vmem:[#allocation3 + $0x31] sm:$0xff]  ;;  %v6194_v18 = vrot.slane %v2099_v46, 9  ;;  %v2686_v13 = vmax.f32 %v2010_v5, %v6192_v2  ;;  %v1682_v44 = vadd.f32 %v1650_v28, %v1421_v63  ;;  %v425_v2 = vld [vmem:[#allocation2 + $0x101] sm:$0xff] }
 0x1c9   :  { %6281 = vmatmul.msk.f32.gmra.mxu0 %vm3166_vm10, %v3212_v49  ;;  %1059 = vperm.xlu2 %6711, %v939_v17   ;;  %v6195_v47 = vrot.slane %v2100_v60, 9  ;;  %v679_v49 = vld [vmem:[#allocation2 + $0xc2] sm:$0xff] }
 0x1ca   :  { %v2687_v20 = vmax.f32 %v2098_v58, %v6193_v50  ;;  %v2688_v57 = vmax.f32 %v2099_v46, %v6194_v18  ;;  %v2951_v55 = vperm.slane %v2686_v13, 0  ;;  %v900_v58 = vadd.f32 %v868_v9, %v639_v51 }
 0x1cb   :  { %833 = vperm.xlu1 %6710, %v685_v27   ;;  %v7539_v10 = vpop.permute.xlu2 %778  ;;  %v2689_v38 = vmax.f32 %v2100_v60, %v6195_v47  ;;  %v9128_v60 = vld [vmem:[#allocation19_spill] sm:$0xff]  ;;  %v608_v51 = vmul.f32 %v7427_v23, %v7490_v31  ;;  %v427_v31 = vld [vmem:[#allocation2 + $0x111] sm:$0xff] }
 0x1cc   :  { %823 = vperm.xlu0 %6709, %v683_v45   ;;  %v2952_v7 = vperm.slane %v2687_v20, 0  ;;  %v2953_v25 = vperm.slane %v2688_v57, 0  ;;  %v1161_v45 = vadd.f32 %v1129_v56, %v900_v58 }
 0x1cd   :  { %v1803_v26 = vpop.permute.xlu1 %1802  ;;  %v2954_v27 = vperm.slane %v2689_v38, 0 }
 0x1ce   :  { %v1911_v32 = vmul.f32 %v7479_v43, %v1803_v26  ;;  %v1286_v33 = vpop.permute.xlu0 %1285  ;;  %v3080_v0 = vsel %vm3031_vm3, %v2952_v7, %v2951_v55  ;;  %v350_v26 = vmul.f32 %v7436_v24, %v9128_v60 }
 0x1cf   :  { %v3081_v3 = vsel %vm3033_vm4, %v2953_v25, %v3080_v0  ;;  %v1390_v17 = vmul.f32 %v7459_v21, %v1286_v33  ;;  %v946_v0 = vld [vmem:[#allocation2 + $0xfb] sm:$0xff] }
 0x1d0   :  { %v1943_v22 = vadd.f32 %v1911_v32, %v1682_v44  ;;  %v3082_v13 = vsel %vm3035_vm5, %v2954_v27, %v3081_v3  ;;  %v419_v27 = vld [vmem:[#allocation2 + $0xc9] sm:$0xff] }
 0x1d1   :  { %567 = vperm.xlu2 %6711, %v423_v12   ;;  %v1422_v57 = vadd.f32 %v1390_v17, %v1161_v45 }
 0x1d2   :  { %v1979_v19 = vadd.f32 %v7487_v37, %v1943_v22 }
 0x1d3   :  { %552 = vperm.xlu1 %6710, %v420_v62   ;;  %v523_v36 = vpop.permute.xlu2 %522 }
 0x1d4   :  { %v2011_v52 = vmax.f32 %v1979_v19, 0.0  ;;  %1576 = vperm.xlu0 %6709, %v1460_v8   ;;  %v611_v54 = vmul.f32 %v7427_v23, %v523_v36 }
 0x1d5   :  { %v1547_v16 = vpop.permute.xlu1 %1546 }
 0x1d6   :  { %v2101_v42 = vrot.slane %v2011_v52, 2  ;;  %v2102_v35 = vrot.slane %v2011_v52, 4  ;;  %v2103_v5 = vrot.slane %v2011_v52, 6  ;;  %v6196_v41 = vrot.slane %v2011_v52, 9  ;;  %v1030_v6 = vpop.permute.xlu0 %1029 }
 0x1d7   :  { %v1651_v53 = vmul.f32 %v7467_v1, %v1547_v16  ;;  %v643_v7 = vadd.f32 %v611_v54, %v350_v26  ;;  %v9129_v16 = vld [vmem:[#allocation16_spill] sm:$0xff]  ;;  %v1130_v58 = vmul.f32 %v7450_v39, %v1030_v6 }
 0x1d8   :  { %v6197_v46 = vrot.slane %v2101_v42, 9  ;;  %v6198_v61 = vrot.slane %v2102_v35, 9  ;;  %v6199_v50 = vrot.slane %v2103_v5, 9  ;;  %v2690_v34 = vmax.f32 %v2011_v52, %v6196_v41  ;;  %v944_v52 = vld [vmem:[#allocation2 + $0xeb] sm:$0xff] }
 0x1d9   :  { %843 = vperm.xlu2 %6711, %v687_v40   ;;  %v1683_v8 = vadd.f32 %v1651_v53, %v1422_v57 }
 0x1da   :  { %v2691_v28 = vmax.f32 %v2101_v42, %v6197_v46  ;;  %v2692_v18 = vmax.f32 %v2102_v35, %v6198_v61  ;;  %v2693_v20 = vmax.f32 %v2103_v5, %v6199_v50  ;;  %v2955_v63 = vperm.slane %v2690_v34, 0 }
 0x1db   :  { %803 = vperm.xlu1 %6710, %v679_v49   ;;  %v784_v44 = vpop.permute.xlu2 %783  ;;  %v347_v42 = vmul.f32 %v7436_v24, %v9129_v16  ;;  %v869_v35 = vmul.f32 %v7443_v11, %v7500_v15  ;;  %v1721_v15 = vld [vmem:[#allocation2 + $0xb6] sm:$0xff] }
 0x1dc   :  { %v2956_v32 = vperm.slane %v2691_v28, 0  ;;  %v2957_v33 = vperm.slane %v2692_v18, 0  ;;  %v3083_v12 = vsel %vm3037_vm6, %v2955_v63, %v3082_v13  ;;  %577 = vperm.xlu0 %6709, %v425_v2   ;;  %v872_v62 = vmul.f32 %v7443_v11, %v784_v44 }
 0x1dd   :  { %v1808_v22 = vpop.permute.xlu1 %1807  ;;  %v2958_v48 = vperm.slane %v2693_v20, 0  ;;  %v640_v40 = vadd.f32 %v608_v51, %v347_v42 }
 0x1de   :  { %v3084_v47 = vsel %vm3039_vm7, %v2956_v32, %v3083_v12  ;;  %v1912_v55 = vmul.f32 %v7479_v43, %v1808_v22  ;;  %v1291_v19 = vpop.permute.xlu0 %1290  ;;  %v7563_v9 = vadd.f32 %v872_v62, %v643_v7  ;;  %v686_v32 = vld [vmem:[#allocation2 + $0x102] sm:$0xff]  ;;  %v684_v7 = vld [vmem:[#allocation2 + $0xf2] sm:$0xff]  ;;  %v609_v22 = vmul.f32 %v7427_v23, %v7510_v30 }
 0x1df   :  { %v3085_v59 = vsel %vm3041_vm8, %v2957_v33, %v3084_v47  ;;  %v901_v61 = vadd.f32 %v869_v35, %v640_v40  ;;  %v1391_v34 = vmul.f32 %v7459_v21, %v1291_v19  ;;  %v1205_v40 = vld [vmem:[#allocation2 + $0xec] sm:$0xff] }
 0x1e0   :  { %v3086_v25 = vsel %vm3043_vm9, %v2958_v48, %v3085_v59  ;;  %v1944_v36 = vadd.f32 %v1912_v55, %v1683_v8  ;;  %v681_v48 = vld [vmem:[#allocation2 + $0xda] sm:$0xff]  ;;  %v9130_v55 = vld [vmem:[#allocation15_spill] sm:$0xff] }
 0x1e1   :  { %3173 = vst.msk [vmem:[#allocation3 + $0x3a] sm:$0xff] %vm3166_vm10, %v3086_v25  ;;  %1320 = vperm.xlu2 %6711, %v1200_v4   ;;  %v1162_v45 = vadd.f32 %v1130_v58, %v901_v61  ;;  %v348_v19 = vmul.f32 %v7436_v24, %v9130_v55  ;;  %v870_v4 = vmul.f32 %v7443_v11, %v7518_v14 }
 0x1e2   :  { %v1980_v38 = vadd.f32 %v7487_v37, %v1944_v36 }
 0x1e3   :  { %1094 = vperm.xlu1 %6710, %v946_v0   ;;  %v7570_v56 = vpop.permute.xlu2 %527  ;;  %v1423_v18 = vadd.f32 %v1391_v34, %v1162_v45  ;;  %v641_v30 = vadd.f32 %v609_v22, %v348_v19  ;;  %v948_v34 = vld [vmem:[#allocation2 + $0x10b] sm:$0xff]  ;;  %v940_v45 = vld [vmem:[#allocation2 + $0xc3] sm:$0xff] }
 0x1e4   :  { %v2012_v5 = vmax.f32 %v1980_v38, 0.0  ;;  %1084 = vperm.xlu0 %6709, %v944_v52  }
 0x1e5   :  { %v1552_v41 = vpop.permute.xlu1 %1551  ;;  %v902_v58 = vadd.f32 %v870_v4, %v641_v30 }
 0x1e6   :  { %v2104_v3 = vrot.slane %v2012_v5, 2  ;;  %v1035_v17 = vpop.permute.xlu0 %1034  ;;  %v2105_v46 = vrot.slane %v2012_v5, 4  ;;  %v6200_v53 = vrot.slane %v2012_v5, 9  ;;  %v1652_v54 = vmul.f32 %v7467_v1, %v1552_v41 }
 0x1e7   :  { %v2106_v20 = vrot.slane %v2012_v5, 6  ;;  %v1131_v51 = vmul.f32 %v7450_v39, %v1035_v17 }
 0x1e8   :  { %v6201_v50 = vrot.slane %v2104_v3, 9  ;;  %v3213_v49 = vld [vmem:[#allocation3 + $0x39] sm:$0xff]  ;;  %v6202_v2 = vrot.slane %v2105_v46, 9  ;;  %v2694_v60 = vmax.f32 %v2012_v5, %v6200_v53  ;;  %v1684_v26 = vadd.f32 %v1652_v54, %v1423_v18  ;;  %v9131_v18 = vld [vmem:[#allocation12_spill] sm:$0xff] }
 0x1e9   :  { %6282 = vmatmul.msk.f32.gmra.mxu0 %vm3166_vm10, %v3213_v49  ;;  %587 = vperm.xlu2 %6711, %v427_v31   ;;  %v6203_v62 = vrot.slane %v2106_v20, 9 }
 0x1ea   :  { %v2695_v28 = vmax.f32 %v2104_v3, %v6201_v50  ;;  %v2696_v33 = vmax.f32 %v2105_v46, %v6202_v2  ;;  %v2959_v47 = vperm.slane %v2694_v60, 0 }
 0x1eb   :  { %547 = vperm.xlu1 %6710, %v419_v27   ;;  %v7580_v6 = vpop.permute.xlu2 %788  ;;  %v2697_v52 = vmax.f32 %v2106_v20, %v6203_v62  ;;  %v1163_v27 = vadd.f32 %v1131_v51, %v902_v58  ;;  %v352_v20 = vmul.f32 %v7436_v24, %v9131_v18  ;;  %v9132_v51 = vld [vmem:[#allocation11_spill] sm:$0xff] }
 0x1ec   :  { %1837 = vperm.xlu0 %6709, %v1721_v15   ;;  %v2960_v12 = vperm.slane %v2695_v28, 0  ;;  %v2961_v59 = vperm.slane %v2696_v33, 0 }
 0x1ed   :  { %v1813_v63 = vpop.permute.xlu1 %1812  ;;  %v2962_v49 = vperm.slane %v2697_v52, 0 }
 0x1ee   :  { %v1913_v13 = vmul.f32 %v7479_v43, %v1813_v63  ;;  %v1296_v44 = vpop.permute.xlu0 %1295  ;;  %v3087_v36 = vsel %vm3031_vm3, %v2960_v12, %v2959_v47 }
 0x1ef   :  { %v3088_v14 = vsel %vm3033_vm4, %v2961_v59, %v3087_v36  ;;  %v1392_v3 = vmul.f32 %v7459_v21, %v1296_v44  ;;  %v1207_v36 = vld [vmem:[#allocation2 + $0xfc] sm:$0xff] }
 0x1f0   :  { %v1945_v57 = vadd.f32 %v1913_v13, %v1684_v26  ;;  %v3089_v63 = vsel %vm3035_vm5, %v2962_v49, %v3088_v14 }
 0x1f1   :  { %838 = vperm.xlu2 %6711, %v686_v32   ;;  %v1424_v32 = vadd.f32 %v1392_v3, %v1163_v27 }
 0x1f2   :  { %v1981_v8 = vadd.f32 %v7487_v37, %v1945_v57 }
 0x1f3   :  { %828 = vperm.xlu1 %6710, %v684_v7   ;;  %v533_v25 = vpop.permute.xlu2 %532 }
 0x1f4   :  { %v2013_v0 = vmax.f32 %v1981_v8, 0.0  ;;  %813 = vperm.xlu0 %6709, %v681_v48   ;;  %v613_v15 = vmul.f32 %v7427_v23, %v533_v25  ;;  %v421_v8 = vld [vmem:[#allocation2 + $0xe1] sm:$0xff] }
 0x1f5   :  { %v1557_v38 = vpop.permute.xlu1 %1556  ;;  %v1461_v25 = vld [vmem:[#allocation2 + $0xbd] sm:$0xff] }
 0x1f6   :  { %v2107_v16 = vrot.slane %v2013_v0, 2  ;;  %v2108_v42 = vrot.slane %v2013_v0, 4  ;;  %v2109_v35 = vrot.slane %v2013_v0, 6  ;;  %v6204_v5 = vrot.slane %v2013_v0, 9  ;;  %v1040_v41 = vpop.permute.xlu0 %1039 }
 0x1f7   :  { %v1653_v17 = vmul.f32 %v7467_v1, %v1557_v38  ;;  %v645_v33 = vadd.f32 %v613_v15, %v352_v20  ;;  %v349_v38 = vmul.f32 %v7436_v24, %v9132_v51 }
 0x1f8   :  { %v6205_v31 = vrot.slane %v2107_v16, 9  ;;  %v6206_v46 = vrot.slane %v2108_v42, 9  ;;  %v6207_v61 = vrot.slane %v2109_v35, 9  ;;  %v2698_v50 = vmax.f32 %v2013_v0, %v6204_v5 }
 0x1f9   :  { %1345 = vperm.xlu2 %6711, %v1205_v40   ;;  %v1685_v62 = vadd.f32 %v1653_v17, %v1424_v32  ;;  %v610_v0 = vmul.f32 %v7427_v23, %v7529_v29  ;;  %v1132_v40 = vmul.f32 %v7450_v39, %v1040_v41  ;;  %v942_v29 = vld [vmem:[#allocation2 + $0xdb] sm:$0xff]  ;;  %v947_v32 = vld [vmem:[#allocation2 + $0x103] sm:$0xff] }
 0x1fa   :  { %v2699_v53 = vmax.f32 %v2107_v16, %v6205_v31  ;;  %v2700_v54 = vmax.f32 %v2108_v42, %v6206_v46  ;;  %v2701_v2 = vmax.f32 %v2109_v35, %v6207_v61  ;;  %v2963_v28 = vperm.slane %v2698_v50, 0 }
 0x1fb   :  { %1104 = vperm.xlu1 %6710, %v948_v34   ;;  %v794_v60 = vpop.permute.xlu2 %793  ;;  %v871_v16 = vmul.f32 %v7443_v11, %v7539_v10  ;;  %v642_v5 = vadd.f32 %v610_v0, %v349_v38  ;;  %v688_v34 = vld [vmem:[#allocation2 + $0x112] sm:$0xff]  ;;  %v680_v10 = vld [vmem:[#allocation2 + $0xca] sm:$0xff] }
 0x1fc   :  { %v2964_v26 = vperm.slane %v2699_v53, 0  ;;  %v2965_v13 = vperm.slane %v2700_v54, 0  ;;  %v3090_v44 = vsel %vm3037_vm6, %v2963_v28, %v3089_v63  ;;  %1064 = vperm.xlu0 %6709, %v940_v45   ;;  %v874_v57 = vmul.f32 %v7443_v11, %v794_v60  ;;  %v1201_v60 = vld [vmem:[#allocation2 + $0xc4] sm:$0xff] }
 0x1fd   :  { %v1818_v12 = vpop.permute.xlu1 %1817  ;;  %v2966_v7 = vperm.slane %v2701_v2, 0  ;;  %v903_v31 = vadd.f32 %v871_v16, %v642_v5 }
 0x1fe   :  { %v3091_v22 = vsel %vm3039_vm7, %v2964_v26, %v3090_v44  ;;  %v1914_v48 = vmul.f32 %v7479_v43, %v1818_v12  ;;  %v1301_v47 = vpop.permute.xlu0 %1300  ;;  %v7604_v19 = vadd.f32 %v874_v57, %v645_v33  ;;  %v945_v12 = vld [vmem:[#allocation2 + $0xf3] sm:$0xff] }
 0x1ff   :  { %v3092_v55 = vsel %vm3041_vm8, %v2965_v13, %v3091_v22  ;;  %v1393_v61 = vmul.f32 %v7459_v21, %v1301_v47  ;;  %v1164_v49 = vadd.f32 %v1132_v40, %v903_v31  ;;  %v1466_v40 = vld [vmem:[#allocation2 + $0xed] sm:$0xff] }
 0x200   :  { %v3093_v4 = vsel %vm3043_vm9, %v2966_v7, %v3092_v55  ;;  %v1946_v59 = vadd.f32 %v1914_v48, %v1685_v62 }
 0x201   :  { %3174 = vst.msk [vmem:[#allocation3 + $0x42] sm:$0xff] %vm3166_vm10, %v3093_v4  ;;  %557 = vperm.xlu2 %6711, %v421_v8   ;;  %v1425_v53 = vadd.f32 %v1393_v61, %v1164_v49 }
 0x202   :  { %v1982_v30 = vadd.f32 %v7487_v37, %v1946_v59 }
 0x203   :  { %1581 = vperm.xlu1 %6710, %v1461_v25   ;;  %v7611_v52 = vpop.permute.xlu2 %537 }
 0x204   :  { %v2014_v42 = vmax.f32 %v1982_v30, 0.0  ;;  %1355 = vperm.xlu0 %6709, %v1207_v36   ;;  %v1468_v30 = vld [vmem:[#allocation2 + $0xfd] sm:$0xff] }
 0x205   :  { %v1562_v35 = vpop.permute.xlu1 %1561 }
 0x206   :  { %v2110_v58 = vrot.slane %v2014_v42, 2  ;;  %v1045_v14 = vpop.permute.xlu0 %1044  ;;  %v2111_v3 = vrot.slane %v2014_v42, 4  ;;  %v6208_v27 = vrot.slane %v2014_v42, 9  ;;  %v1654_v17 = vmul.f32 %v7467_v1, %v1562_v35 }
 0x207   :  { %v2112_v54 = vrot.slane %v2014_v42, 6  ;;  %v1133_v38 = vmul.f32 %v7450_v39, %v1045_v14 }
 0x208   :  { %v6209_v46 = vrot.slane %v2110_v58, 9  ;;  %v3214_v50 = vld [vmem:[#allocation3 + $0x41] sm:$0xff]  ;;  %v6210_v15 = vrot.slane %v2111_v3, 9  ;;  %v2702_v28 = vmax.f32 %v2014_v42, %v6208_v27  ;;  %v1686_v18 = vadd.f32 %v1654_v17, %v1425_v53 }
 0x209   :  { %6283 = vmatmul.msk.f32.gmra.mxu0 %vm3166_vm10, %v3214_v50  ;;  %1074 = vperm.xlu2 %6711, %v942_v29   ;;  %v6211_v33 = vrot.slane %v2112_v54, 9 }
 0x20a   :  { %v2703_v45 = vmax.f32 %v2110_v58, %v6209_v46  ;;  %v2704_v26 = vmax.f32 %v2111_v3, %v6210_v15  ;;  %v2967_v57 = vperm.slane %v2702_v28, 0  ;;  %v1209_v3 = vld [vmem:[#allocation2 + $0x10c] sm:$0xff] }
 0x20b   :  { %848 = vperm.xlu1 %6710, %v688_v34   ;;  %v7621_v41 = vpop.permute.xlu2 %562  ;;  %v2705_v8 = vmax.f32 %v2112_v54, %v6211_v33 }
 0x20c   :  { %808 = vperm.xlu0 %6709, %v680_v10   ;;  %v2968_v13 = vperm.slane %v2703_v45, 0  ;;  %v2969_v22 = vperm.slane %v2704_v26, 0  ;;  %v1165_v10 = vadd.f32 %v1133_v38, %v7563_v9  ;;  %v682_v26 = vld [vmem:[#allocation2 + $0xe2] sm:$0xff] }
 0x20d   :  { %v1823_v2 = vpop.permute.xlu1 %1822  ;;  %v2970_v58 = vperm.slane %v2705_v8, 0 }
 0x20e   :  { %v1915_v20 = vmul.f32 %v7479_v43, %v1823_v2  ;;  %v1306_v63 = vpop.permute.xlu0 %1305  ;;  %v3094_v48 = vsel %vm3031_vm3, %v2968_v13, %v2967_v57 }
 0x20f   :  { %v3095_v51 = vsel %vm3033_vm4, %v2969_v22, %v3094_v48  ;;  %v1394_v29 = vmul.f32 %v7459_v21, %v1306_v63 }
 0x210   :  { %v1947_v44 = vadd.f32 %v1915_v20, %v1686_v18  ;;  %v3096_v34 = vsel %vm3035_vm5, %v2970_v58, %v3095_v51  ;;  %v941_v20 = vld [vmem:[#allocation2 + $0xcb] sm:$0xff] }
 0x211   :  { %1325 = vperm.xlu2 %6711, %v1201_v60   ;;  %v1426_v45 = vadd.f32 %v1394_v29, %v1165_v10  ;;  %v1208_v10 = vld [vmem:[#allocation2 + $0x104] sm:$0xff] }
 0x212   :  { %v1983_v7 = vadd.f32 %v7487_v37, %v1947_v44  ;;  %v1722_v44 = vld [vmem:[#allocation2 + $0xbe] sm:$0xff] }
 0x213   :  { %1099 = vperm.xlu1 %6710, %v947_v32   ;;  %v1316_v62 = vpop.permute.xlu2 %1315 }
 0x214   :  { %v2015_v47 = vmax.f32 %v1983_v7, 0.0  ;;  %1089 = vperm.xlu0 %6709, %v945_v12   ;;  %v1206_v7 = vld [vmem:[#allocation2 + $0xf4] sm:$0xff]  ;;  %v1396_v8 = vmul.f32 %v7459_v21, %v1316_v62 }
 0x215   :  { %v1567_v55 = vpop.permute.xlu1 %1566  ;;  %v9133_v62 = vld [vmem:[#allocation21_spill] sm:$0xff] }
 0x216   :  { %v2113_v4 = vrot.slane %v2015_v47, 2  ;;  %v2114_v59 = vrot.slane %v2015_v47, 4  ;;  %v2115_v25 = vrot.slane %v2015_v47, 6  ;;  %v6212_v36 = vrot.slane %v2015_v47, 9  ;;  %v7626_v0 = vpop.permute.xlu0 %1049 }
 0x217   :  { %v1655_v14 = vmul.f32 %v7467_v1, %v1567_v55  ;;  %v353_v38 = vmul.f32 %v7436_v24, %v9133_v62  ;;  %v1134_v29 = vmul.f32 %v7450_v39, %v7626_v0  ;;  %v7677_v0 = vld [vmem:[%s9058_s1] ss:$0 sm:$0xff] }
 0x218   :  { %v6213_v16 = vrot.slane %v2113_v4, 9  ;;  %v6214_v42 = vrot.slane %v2114_v59, 9  ;;  %v6215_v35 = vrot.slane %v2115_v25, 9  ;;  %v2706_v5 = vmax.f32 %v2015_v47, %v6212_v36  ;;  %v1203_v47 = vld [vmem:[#allocation2 + $0xdc] sm:$0xff] }
 0x219   :  { %1616 = vperm.xlu2 %6711, %v1468_v30   ;;  %v1687_v63 = vadd.f32 %v1655_v14, %v1426_v45  ;;  %v612_v36 = vmul.f32 %v7427_v23, %v7570_v56  ;;  %v9135_v14 = vld [vmem:[#allocation27_spill] sm:$0xff] }
 0x21a   :  { %v2707_v31 = vmax.f32 %v2113_v4, %v6213_v16  ;;  %v2708_v46 = vmax.f32 %v2114_v59, %v6214_v42  ;;  %v2709_v61 = vmax.f32 %v2115_v25, %v6215_v35  ;;  %v2971_v50 = vperm.slane %v2706_v5, 0  ;;  %v949_v59 = vld [vmem:[#allocation2 + $0x113] sm:$0xff] }
 0x21b   :  { %1606 = vperm.xlu1 %6710, %v1466_v40   ;;  %v583_v49 = vpop.permute.xlu2 %582  ;;  %v614_v25 = vmul.f32 %v7427_v23, %v7611_v52  ;;  %v873_v42 = vmul.f32 %v7443_v11, %v7580_v6  ;;  %v1470_v40 = vld [vmem:[#allocation2 + $0x10d] sm:$0xff] }
 0x21c   :  { %v2972_v27 = vperm.slane %v2707_v31, 0  ;;  %v2973_v17 = vperm.slane %v2708_v46, 0  ;;  %v3097_v15 = vsel %vm3037_vm6, %v2971_v50, %v3096_v34  ;;  %1365 = vperm.xlu0 %6709, %v1209_v3   ;;  %v2974_v54 = vperm.slane %v2709_v61, 0  ;;  %v1462_v61 = vld [vmem:[#allocation2 + $0xc5] sm:$0xff] }
 0x21d   :  { %v1828_v53 = vpop.permute.xlu1 %1827  ;;  %v646_v5 = vadd.f32 %v614_v25, %v353_v38  ;;  %v9137_v38 = vld [vmem:[#allocation14_spill] sm:$0xff] }
 0x21e   :  { %v3098_v2 = vsel %vm3039_vm7, %v2972_v27, %v3097_v15  ;;  %v1916_v28 = vmul.f32 %v7479_v43, %v1828_v53  ;;  %v1311_v18 = vpop.permute.xlu0 %1310  ;;  %v362_v27 = vmul.f32 %v7677_v0, %v9135_v14 }
 0x21f   :  { %v3099_v9 = vsel %vm3041_vm8, %v2973_v17, %v3098_v2  ;;  %v1395_v34 = vmul.f32 %v7459_v21, %v1311_v18 }
 0x220   :  { %v3100_v60 = vsel %vm3043_vm9, %v2974_v54, %v3099_v9  ;;  %v1948_v13 = vadd.f32 %v1916_v28, %v1687_v63  ;;  %v7686_v54 = vld [vmem:[%s9058_s1 + $0x2] ss:$0 sm:$0xff] }
 0x221   :  { %3175 = vst.msk [vmem:[#allocation3 + $0x52] sm:$0xff] %vm3166_vm10, %v3100_v60  ;;  %1069 = vperm.xlu2 %6711, %v941_v20   ;;  %v943_v60 = vld [vmem:[#allocation2 + $0xe3] sm:$0xff] }
 0x222   :  { %v1984_v33 = vadd.f32 %v7487_v37, %v1948_v13 }
 0x223   :  { %818 = vperm.xlu1 %6710, %v682_v26   ;;  %v1060_v32 = vpop.permute.xlu2 %1059 }
 0x224   :  { %1842 = vperm.xlu0 %6709, %v1722_v44   ;;  %v7643_v55 = vmax.f32 %v1984_v33, 0.0  ;;  %v1136_v31 = vmul.f32 %v7450_v39, %v1060_v32  ;;  %v1729_v33 = vld [vmem:[#allocation2 + $0xfe] sm:$0xff] }
 0x225   :  { %v1572_v12 = vpop.permute.xlu1 %1571 }
 0x226   :  { %v1055_v57 = vpop.permute.xlu0 %1054  ;;  %v2116_v52 = vrot.slane %v7643_v55, 2  ;;  %v2117_v3 = vrot.slane %v7643_v55, 4  ;;  %v1656_v15 = vmul.f32 %v7467_v1, %v1572_v12  ;;  %v2118_v9 = vrot.slane %v7643_v55, 6 }
 0x227   :  { %v1135_v22 = vmul.f32 %v7450_v39, %v1055_v57  ;;  %v6216_v39 = vrot.slane %v7643_v55, 9 }
 0x228   :  { %v3215_v48 = vld [vmem:[#allocation3 + $0x51] sm:$0xff]  ;;  %v6217_v50 = vrot.slane %v2116_v52, 9  ;;  %v6218_v53 = vrot.slane %v2117_v3, 9 }
 0x229   :  { %v1167_v4 = vadd.f32 %v1135_v22, %v7604_v19  ;;  %6284 = vmatmul.msk.f32.gmra.mxu0 %vm3166_vm10, %v3215_v48  ;;  %1350 = vperm.xlu2 %6711, %v1206_v7   ;;  %v9134_v19 = vld [vmem:[#allocation18_spill] sm:$0xff]  ;;  %v2710_v26 = vmax.f32 %v7643_v55, %v6216_v39  ;;  %v1727_v7 = vld [vmem:[#allocation2 + $0xee] sm:$0xff]  ;;  %v6219_v22 = vrot.slane %v2118_v9, 9 }
 0x22a   :  { %v351_v16 = vmul.f32 %v7436_v24, %v9134_v19  ;;  %v7669_v24 = vld [vmem:[%s9058_s1 + $0x1] ss:$0 sm:$0xff]  ;;  %v2711_v28 = vmax.f32 %v2116_v52, %v6217_v50  ;;  %v2712_v32 = vmax.f32 %v2117_v3, %v6218_v53 }
 0x22b   :  { %1335 = vperm.xlu1 %6710, %v1203_v47   ;;  %v7651_v30 = vpop.permute.xlu2 %567  ;;  %v7653_v51 = vadd.f32 %v1396_v8, %v1167_v4  ;;  %v623_v6 = vmul.f32 %v7669_v24, %v583_v49  ;;  %v2975_v47 = vperm.slane %v2710_v26, 0  ;;  %v2713_v52 = vmax.f32 %v2118_v9, %v6219_v22  ;;  %v1723_v26 = vld [vmem:[#allocation2 + $0xc6] sm:$0xff] }
 0x22c   :  { %1109 = vperm.xlu0 %6709, %v949_v59   ;;  %v644_v58 = vadd.f32 %v612_v36, %v351_v16  ;;  %v2976_v12 = vperm.slane %v2711_v28, 0  ;;  %v9136_v59 = vld [vmem:[#allocation24_spill] sm:$0xff]  ;;  %v2977_v25 = vperm.slane %v2712_v32, 0  ;;  %v7705_v36 = vld [vmem:[%s9058_s1 + $0x4] ss:$0 sm:$0xff] }
 0x22d   :  { %v799_v35 = vpop.permute.xlu1 %798  ;;  %v655_v21 = vadd.f32 %v623_v6, %v362_v27  ;;  %v360_v55 = vmul.f32 %v7677_v0, %v9136_v59  ;;  %v1202_v27 = vld [vmem:[#allocation2 + $0xcc] sm:$0xff]  ;;  %v7728_v32 = vld [vmem:[%s9058_s1 + $0x5] ss:$0 sm:$0xff] }
 0x22e   :  { %v875_v23 = vmul.f32 %v7443_v11, %v799_v35  ;;  %v573_v56 = vpop.permute.xlu0 %572  ;;  %v905_v11 = vadd.f32 %v873_v42, %v644_v58  ;;  %v3101_v19 = vsel %vm3031_vm3, %v2976_v12, %v2975_v47 }
 0x22f   :  { %v621_v48 = vmul.f32 %v7669_v24, %v573_v56  ;;  %v1464_v56 = vld [vmem:[#allocation2 + $0xdd] sm:$0xff] }
 0x230   :  { %v907_v46 = vadd.f32 %v875_v23, %v646_v5  ;;  %v1166_v49 = vadd.f32 %v1134_v29, %v905_v11  ;;  %v1210_v11 = vld [vmem:[#allocation2 + $0x114] sm:$0xff] }
 0x231   :  { %1626 = vperm.xlu2 %6711, %v1470_v40   ;;  %v653_v35 = vadd.f32 %v621_v48, %v360_v55  ;;  %v1467_v48 = vld [vmem:[#allocation2 + $0xf5] sm:$0xff] }
 0x232   :  { %v1168_v17 = vadd.f32 %v1136_v31, %v907_v46  ;;  %v1427_v18 = vadd.f32 %v1395_v34, %v1166_v49  ;;  %v3102_v31 = vsel %vm3033_vm4, %v2977_v25, %v3101_v19 }
 0x233   :  { %1586 = vperm.xlu1 %6710, %v1462_v61   ;;  %v844_v45 = vpop.permute.xlu2 %843 }
 0x234   :  { %1360 = vperm.xlu0 %6709, %v1208_v10   ;;  %v884_v2 = vmul.f32 %v7686_v54, %v844_v45  ;;  %v1688_v13 = vadd.f32 %v1656_v15, %v1427_v18 }
 0x235   :  { %v7689_v20 = vpop.permute.xlu1 %542 }
 0x236   :  { %v7692_v63 = vadd.f32 %v884_v2, %v655_v21  ;;  %v1833_v1 = vpop.permute.xlu0 %1832  ;;  %v615_v47 = vmul.f32 %v7669_v24, %v7689_v20 }
 0x237   :  { %v1917_v44 = vmul.f32 %v7479_v43, %v1833_v1  ;;  %v619_v43 = vmul.f32 %v7669_v24, %v7621_v41 }
 0x239   :  { %v1949_v57 = vadd.f32 %v1917_v44, %v1688_v13  ;;  %1079 = vperm.xlu2 %6711, %v943_v60  }
 0x23b   :  { %v1985_v8 = vadd.f32 %v7487_v37, %v1949_v57  ;;  %1877 = vperm.xlu1 %6710, %v1729_v33   ;;  %v1321_v4 = vpop.permute.xlu2 %1320  ;;  %v358_v37 = vmul.f32 %v7677_v0, %v9137_v38  ;;  %v1469_v57 = vld [vmem:[#allocation2 + $0x105] sm:$0xff]  ;;  %v9139_v38 = vld [vmem:[#allocation17_spill] sm:$0xff] }
 0x23c   :  { %1867 = vperm.xlu0 %6709, %v1727_v7   ;;  %v1397_v62 = vmul.f32 %v7705_v36, %v1321_v4  ;;  %v9138_v4 = vld [vmem:[#allocation20_spill] sm:$0xff] }
 0x23d   :  { %v2017_v16 = vmax.f32 %v1985_v8, 0.0  ;;  %v834_v42 = vpop.permute.xlu1 %833  ;;  %v651_v6 = vadd.f32 %v619_v43, %v358_v37  ;;  %v354_v59 = vmul.f32 %v7677_v0, %v9138_v4  ;;  %v361_v37 = vmul.f32 %v7677_v0, %v9139_v38 }
 0x23e   :  { %v882_v41 = vmul.f32 %v7686_v54, %v834_v42  ;;  %v7712_v5 = vadd.f32 %v1397_v62, %v1168_v17  ;;  %v824_v23 = vpop.permute.xlu0 %823  ;;  %v2978_v17 = vperm.slane %v2713_v52, 0 }
 0x23f   :  { %v2119_v40 = vrot.slane %v2017_v16, 2  ;;  %v2120_v58 = vrot.slane %v2017_v16, 4  ;;  %v2121_v29 = vrot.slane %v2017_v16, 6  ;;  %v6220_v3 = vrot.slane %v2017_v16, 9 }
 0x240   :  { %v7715_v46 = vadd.f32 %v882_v41, %v653_v35  ;;  %v880_v61 = vmul.f32 %v7686_v54, %v824_v23  ;;  %v3103_v2 = vsel %vm3035_vm5, %v2978_v17, %v3102_v31  ;;  %v647_v43 = vadd.f32 %v615_v47, %v354_v59  ;;  %v1731_v41 = vld [vmem:[#allocation2 + $0x10e] sm:$0xff] }
 0x241   :  { %v6221_v50 = vrot.slane %v2119_v40, 9  ;;  %v6222_v34 = vrot.slane %v2120_v58, 9  ;;  %v6223_v10 = vrot.slane %v2121_v29, 9  ;;  %v2714_v14 = vmax.f32 %v2017_v16, %v6220_v3  ;;  %1596 = vperm.xlu2 %6711, %v1464_v56   ;;  %v1204_v16 = vld [vmem:[#allocation2 + $0xe4] sm:$0xff] }
 0x242   :  { %v912_v49 = vadd.f32 %v880_v61, %v651_v6  ;;  %v1728_v6 = vld [vmem:[#allocation2 + $0xf6] sm:$0xff] }
 0x243   :  { %v2715_v39 = vmax.f32 %v2119_v40, %v6221_v50  ;;  %v2716_v15 = vmax.f32 %v2120_v58, %v6222_v34  ;;  %v2717_v45 = vmax.f32 %v2121_v29, %v6223_v10  ;;  %v2979_v53 = vperm.slane %v2714_v14, 0  ;;  %1370 = vperm.xlu1 %6710, %v1210_v11   ;;  %v7718_v21 = vpop.permute.xlu2 %587  ;;  %v7752_v58 = vld [vmem:[%s9058_s1 + $0x3] ss:$0 sm:$0xff]  ;;  %v1725_v11 = vld [vmem:[#allocation2 + $0xde] sm:$0xff] }
 0x244   :  { %1330 = vperm.xlu0 %6709, %v1202_v27   ;;  %v1471_v10 = vld [vmem:[#allocation2 + $0x115] sm:$0xff] }
 0x245   :  { %v2980_v28 = vperm.slane %v2715_v39, 0  ;;  %v2981_v18 = vperm.slane %v2716_v15, 0  ;;  %v3104_v9 = vsel %vm3037_vm6, %v2979_v53, %v3103_v2  ;;  %v7722_v1 = vpop.permute.xlu1 %552  ;;  %v2982_v13 = vperm.slane %v2717_v45, 0  ;;  %v1724_v15 = vld [vmem:[#allocation2 + $0xce] sm:$0xff]  ;;  %v1465_v45 = vld [vmem:[#allocation2 + $0xe5] sm:$0xff]  ;;  %v9140_v2 = vld [vmem:[#allocation25_spill] sm:$0xff] }
 0x246   :  { %v1577_v60 = vpop.permute.xlu0 %1576  ;;  %v1730_v53 = vld [vmem:[#allocation2 + $0x106] sm:$0xff] }
 0x247   :  { %v3105_v44 = vsel %vm3039_vm7, %v2980_v28, %v3104_v9  ;;  %v1657_v33 = vmul.f32 %v7728_v32, %v1577_v60  ;;  %v359_v28 = vmul.f32 %v7677_v0, %v9140_v2  ;;  %v9141_v60 = vld [vmem:[#allocation23_spill] sm:$0xff] }
 0x248   :  { %v3106_v12 = vsel %vm3041_vm8, %v2981_v18, %v3105_v44  ;;  %v617_v18 = vmul.f32 %v7669_v24, %v7722_v1 }
 0x249   :  { %v3107_v7 = vsel %vm3043_vm9, %v2982_v13, %v3106_v12  ;;  %v7734_v22 = vadd.f32 %v1657_v33, %v7653_v51  ;;  %1847 = vperm.xlu2 %6711, %v1723_v26   ;;  %v1463_v51 = vld [vmem:[#allocation2 + $0xcd] sm:$0xff]  ;;  %v356_v26 = vmul.f32 %v7677_v0, %v9141_v60 }
 0x24a   :  { %3176 = vst.msk [vmem:[#allocation3 + $0x5a] sm:$0xff] %vm3166_vm10, %v3107_v7  ;;  %v1726_v7 = vld [vmem:[#allocation2 + $0xe6] sm:$0xff] }
 0x24b   :  { %1621 = vperm.xlu1 %6710, %v1469_v57   ;;  %v839_v8 = vpop.permute.xlu2 %838  ;;  %v649_v12 = vadd.f32 %v617_v18, %v356_v26 }
 0x24c   :  { %1611 = vperm.xlu0 %6709, %v1467_v48   ;;  %v883_v42 = vmul.f32 %v7686_v54, %v839_v8  ;;  %v1732_v48 = vld [vmem:[#allocation2 + $0x116] sm:$0xff] }
 0x24d   :  { %v804_v55 = vpop.permute.xlu1 %803 }
 0x24e   :  { %v876_v25 = vmul.f32 %v7686_v54, %v804_v55  ;;  %v578_v62 = vpop.permute.xlu0 %577 }
 0x24f   :  { %v622_v19 = vmul.f32 %v7669_v24, %v578_v62 }
 0x250   :  { %v908_v20 = vadd.f32 %v876_v25, %v647_v43 }
 0x251   :  { %v654_v52 = vadd.f32 %v622_v19, %v361_v37  ;;  %v3216_v35 = vld [vmem:[#allocation3 + $0x59] sm:$0xff]  ;;  %1591 = vperm.xlu2 %6711, %v1463_v51  }
 0x252   :  { %6285 = vmatmul.msk.f32.gmra.mxu0 %vm3166_vm10, %v3216_v35 }
 0x253   :  { %1340 = vperm.xlu1 %6710, %v1204_v16   ;;  %v1346_v23 = vpop.permute.xlu2 %1345  ;;  %v7747_v56 = vadd.f32 %v883_v42, %v654_v52 }
 0x254   :  { %1887 = vperm.xlu0 %6709, %v1731_v41   ;;  %v1402_v50 = vmul.f32 %v7705_v36, %v1346_v23  ;;  %v624_v23 = vmul.f32 %v7669_v24, %v7718_v21 }
 0x255   :  { %v1095_v40 = vpop.permute.xlu1 %1094 }
 0x256   :  { %v1143_v29 = vmul.f32 %v7752_v58, %v1095_v40  ;;  %v1085_v3 = vpop.permute.xlu0 %1084 }
 0x257   :  { %v1141_v31 = vmul.f32 %v7752_v58, %v1085_v3  ;;  %v7798_v3 = vld [vmem:[%s9058_s1 + $0x6] ss:$0 sm:$0xff] }
 0x258   :  { %v1175_v61 = vadd.f32 %v1143_v29, %v7715_v46  ;;  %v620_v46 = vmul.f32 %v7669_v24, %v7651_v30 }
 0x259   :  { %v1173_v34 = vadd.f32 %v1141_v31, %v912_v49  ;;  %1872 = vperm.xlu2 %6711, %v1728_v6  }
 0x25a   :  { %v652_v13 = vadd.f32 %v620_v46, %v359_v28 }
 0x25b   :  { %1857 = vperm.xlu1 %6710, %v1725_v11   ;;  %v7758_v14 = vpop.permute.xlu2 %557  ;;  %v7760_v27 = vadd.f32 %v1402_v50, %v1173_v34 }
 0x25c   :  { %1631 = vperm.xlu0 %6709, %v1471_v10  }
 0x25d   :  { %v7762_v17 = vpop.permute.xlu1 %547 }
 0x25e   :  { %v1838_v39 = vpop.permute.xlu0 %1837 }
 0x25f   :  { %v1918_v6 = vmul.f32 %v7798_v3, %v1838_v39 }
 0x261   :  { %1852 = vperm.xlu2 %6711, %v1724_v15   ;;  %v1950_v34 = vadd.f32 %v1918_v6, %v7734_v22  ;;  %v7812_v15 = vld [vmem:[%s9059_s2] ss:$0 sm:$0xff] }
 0x263   :  { %1601 = vperm.xlu1 %6710, %v1465_v45   ;;  %v1075_v49 = vpop.permute.xlu2 %1074  ;;  %v1986_v45 = vadd.f32 %v7812_v15, %v1950_v34 }
 0x264   :  { %1882 = vperm.xlu0 %6709, %v1730_v53   ;;  %v1139_v47 = vmul.f32 %v7752_v58, %v1075_v49 }
 0x265   :  { %v829_v9 = vpop.permute.xlu1 %828  ;;  %v2018_v2 = vmax.f32 %v1986_v45, 0.0 }
 0x266   :  { %v881_v44 = vmul.f32 %v7686_v54, %v829_v9  ;;  %v814_v33 = vpop.permute.xlu0 %813 }
 0x267   :  { %v878_v30 = vmul.f32 %v7686_v54, %v814_v33  ;;  %v2122_v22 = vrot.slane %v2018_v2, 2  ;;  %v2123_v26 = vrot.slane %v2018_v2, 4 }
 0x268   :  { %v7773_v57 = vadd.f32 %v881_v44, %v652_v13 }
 0x269   :  { %v910_v8 = vadd.f32 %v878_v30, %v649_v12  ;;  %v6225_v13 = vrot.slane %v2122_v22, 9  ;;  %v618_v12 = vmul.f32 %v7669_v24, %v7758_v14  ;;  %v6224_v30 = vrot.slane %v2018_v2, 9 }
 0x26b   :  { %1862 = vperm.xlu1 %6710, %v1726_v7   ;;  %v1326_v1 = vpop.permute.xlu2 %1325  ;;  %v7777_v4 = vadd.f32 %v1139_v47, %v910_v8  ;;  %v9143_v47 = vld [vmem:[#allocation22_spill] sm:$0xff] }
 0x26c   :  { %1892 = vperm.xlu0 %6709, %v1732_v48   ;;  %v1398_v51 = vmul.f32 %v7705_v36, %v1326_v1  ;;  %v357_v8 = vmul.f32 %v7677_v0, %v9143_v47  ;;  %v6226_v1 = vrot.slane %v2123_v26, 9 }
 0x26d   :  { %v1105_v59 = vpop.permute.xlu1 %1104 }
 0x26e   :  { %v1145_v55 = vmul.f32 %v7752_v58, %v1105_v59  ;;  %v1065_v43 = vpop.permute.xlu0 %1064  ;;  %v2719_v59 = vmax.f32 %v2122_v22, %v6225_v13 }
 0x26f   :  { %v1137_v25 = vmul.f32 %v7752_v58, %v1065_v43  ;;  %v650_v43 = vadd.f32 %v618_v12, %v357_v8 }
 0x270   :  { %v1177_v62 = vadd.f32 %v1145_v55, %v7692_v63  ;;  %v9142_v63 = vld [vmem:[#allocation26_spill] sm:$0xff] }
 0x271   :  { %v1169_v38 = vadd.f32 %v1137_v25, %v908_v20  ;;  %v363_v20 = vmul.f32 %v7677_v0, %v9142_v63  ;;  %v2124_v25 = vrot.slane %v2018_v2, 6 }
 0x273   :  { %v1617_v37 = vpop.permute.xlu2 %1616  ;;  %v7783_v19 = vadd.f32 %v1398_v51, %v1169_v38  ;;  %v656_v11 = vadd.f32 %v624_v23, %v363_v20  ;;  %v2718_v38 = vmax.f32 %v2018_v2, %v6224_v30  ;;  %v6227_v23 = vrot.slane %v2124_v25, 9 }
 0x274   :  { %v1665_v35 = vmul.f32 %v7728_v32, %v1617_v37 }
 0x275   :  { %v1582_v16 = vpop.permute.xlu1 %1581  ;;  %v2983_v20 = vperm.slane %v2718_v38, 0  ;;  %v2721_v45 = vmax.f32 %v2124_v25, %v6227_v23  ;;  %v616_v23 = vmul.f32 %v7669_v24, %v7762_v17 }
 0x276   :  { %v1356_v42 = vpop.permute.xlu0 %1355 }
 0x277   :  { %v1404_v52 = vmul.f32 %v7705_v36, %v1356_v42 }
 0x279   :  { %v1436_v41 = vadd.f32 %v1404_v52, %v1175_v61 }
 0x27b   :  { %v7789_v40 = vpop.permute.xlu2 %1069  ;;  %v7791_v29 = vadd.f32 %v1665_v35, %v1436_v41  ;;  %v2984_v35 = vperm.slane %v2719_v59, 0 }
 0x27d   :  { %v849_v31 = vpop.permute.xlu1 %848 }
 0x27e   :  { %v885_v61 = vmul.f32 %v7686_v54, %v849_v31  ;;  %v7802_v50 = vpop.permute.xlu0 %808 }
 0x280   :  { %v7804_v21 = vadd.f32 %v885_v61, %v656_v11  ;;  %v3108_v61 = vsel %vm3031_vm3, %v2984_v35, %v2983_v20 }
 0x283   :  { %v7807_v10 = vpop.permute.xlu2 %1350 }
 0x285   :  { %v1100_v39 = vpop.permute.xlu1 %1099 }
 0x286   :  { %v1144_v53 = vmul.f32 %v7752_v58, %v1100_v39  ;;  %v7816_v46 = vpop.permute.xlu0 %1089 }
 0x288   :  { %v7819_v49 = vadd.f32 %v1144_v53, %v7747_v56  ;;  %v1658_v56 = vmul.f32 %v7728_v32, %v1582_v16  ;;  %v2720_v16 = vmax.f32 %v2123_v26, %v6226_v1 }
 0x28a   :  { %v1690_v14 = vadd.f32 %v1658_v56, %v7712_v5  ;;  %v2985_v11 = vperm.slane %v2720_v16, 0 }
 0x28b   :  { %v1627_v28 = vpop.permute.xlu2 %1626 }
 0x28c   :  { %v1667_v44 = vmul.f32 %v7728_v32, %v1627_v28 }
 0x28d   :  { %v7821_v18 = vpop.permute.xlu1 %1606 }
 0x28e   :  { %v1366_v9 = vpop.permute.xlu0 %1365  ;;  %v1663_v35 = vmul.f32 %v7728_v32, %v7821_v18 }
 0x28f   :  { %v1406_v60 = vmul.f32 %v7705_v36, %v1366_v9  ;;  %v3109_v9 = vsel %vm3033_vm4, %v2985_v11, %v3108_v61  ;;  %v877_v61 = vmul.f32 %v7686_v54, %v7802_v50 }
 0x291   :  { %v1438_v33 = vadd.f32 %v1406_v60, %v1177_v62 }
 0x293   :  { %v1080_v7 = vpop.permute.xlu2 %1079  ;;  %v7828_v48 = vadd.f32 %v1667_v44, %v1438_v33  ;;  %v2986_v33 = vperm.slane %v2721_v45, 0 }
 0x294   :  { %v1140_v52 = vmul.f32 %v7752_v58, %v1080_v7 }
 0x295   :  { %v819_v55 = vpop.permute.xlu1 %818  ;;  %v3110_v8 = vsel %vm3035_vm5, %v2986_v33, %v3109_v9 }
 0x296   :  { %v879_v51 = vmul.f32 %v7686_v54, %v819_v55  ;;  %v1843_v62 = vpop.permute.xlu0 %1842 }
 0x297   :  { %v1919_v37 = vmul.f32 %v7798_v3, %v1843_v62 }
 0x298   :  { %v911_v42 = vadd.f32 %v879_v51, %v650_v43 }
 0x299   :  { %v1951_v41 = vadd.f32 %v1919_v37, %v1690_v14 }
 0x29a   :  { %v7836_v63 = vadd.f32 %v1140_v52, %v911_v42 }
 0x29b   :  { %v1987_v6 = vadd.f32 %v7812_v15, %v1951_v41  ;;  %v7839_v31 = vpop.permute.xlu2 %1596 }
 0x29d   :  { %v2019_v5 = vmax.f32 %v1987_v6, 0.0  ;;  %v7842_v34 = vpop.permute.xlu1 %1335  ;;  %v9144_v6 = vld [vmem:[#allocation13_spill] sm:$0xff] }
 0x29e   :  { %v7844_v39 = vpop.permute.xlu0 %1109 }
 0x29f   :  { %v2125_v53 = vrot.slane %v2019_v5, 2  ;;  %v2126_v2 = vrot.slane %v2019_v5, 4  ;;  %v2127_v28 = vrot.slane %v2019_v5, 6  ;;  %v6228_v22 = vrot.slane %v2019_v5, 9 }
 0x2a1   :  { %v6229_v60 = vrot.slane %v2125_v53, 9  ;;  %v6230_v26 = vrot.slane %v2126_v2, 9  ;;  %v6231_v13 = vrot.slane %v2127_v28, 9  ;;  %v2722_v44 = vmax.f32 %v2019_v5, %v6228_v22 }
 0x2a2   :  { %v1142_v5 = vmul.f32 %v7752_v58, %v7816_v46 }
 0x2a3   :  { %v2723_v12 = vmax.f32 %v2125_v53, %v6229_v60  ;;  %v2724_v30 = vmax.f32 %v2126_v2, %v6230_v26  ;;  %v2725_v56 = vmax.f32 %v2127_v28, %v6231_v13  ;;  %v2987_v7 = vperm.slane %v2722_v44, 0  ;;  %v1848_v47 = vpop.permute.xlu2 %1847 }
 0x2a4   :  { %v1920_v16 = vmul.f32 %v7798_v3, %v1848_v47  ;;  %v1695_v2 = vadd.f32 %v1663_v35, %v7760_v27  ;;  %v1174_v50 = vadd.f32 %v1142_v5, %v7773_v57  ;;  %v1138_v27 = vmul.f32 %v7752_v58, %v7789_v40 }
 0x2a5   :  { %v2988_v1 = vperm.slane %v2723_v12, 0  ;;  %v2989_v59 = vperm.slane %v2724_v30, 0  ;;  %v3111_v55 = vsel %vm3037_vm6, %v2987_v7, %v3110_v8  ;;  %v1587_v43 = vpop.permute.xlu1 %1586  ;;  %v2990_v62 = vperm.slane %v2725_v56, 0 }
 0x2a6   :  { %v1659_v25 = vmul.f32 %v7728_v32, %v1587_v43  ;;  %v7850_v51 = vpop.permute.xlu0 %1360  ;;  %v1403_v26 = vmul.f32 %v7705_v36, %v7807_v10  ;;  %v1400_v40 = vmul.f32 %v7705_v36, %v7842_v34  ;;  %v7898_v10 = vmul.f32 %v7728_v32, %v7839_v31 }
 0x2a7   :  { %v3112_v38 = vsel %vm3039_vm7, %v2988_v1, %v3111_v55  ;;  %v1405_v5 = vmul.f32 %v7705_v36, %v7850_v51  ;;  %v7919_v51 = vld [vmem:[%s9060_s3 + $0x48] sm:$0xff]  }
 0x2a8   :  { %v3113_v14 = vsel %vm3041_vm8, %v2989_v59, %v3112_v38  ;;  %v1691_v37 = vadd.f32 %v1659_v25, %v7783_v19  ;;  %v355_v19 = vmul.f32 %v7677_v0, %v9144_v6  ;;  %v1435_v47 = vadd.f32 %v1403_v26, %v1174_v50 }
 0x2a9   :  { %v3114_v42 = vsel %vm3043_vm9, %v2990_v62, %v3113_v14  ;;  %v1146_v62 = vmul.f32 %v7752_v58, %v7844_v39 }
 0x2aa   :  { %3177 = vst.msk [vmem:[#allocation3 + $0x62] sm:$0xff] %vm3166_vm10, %v3114_v42  ;;  %v1952_v52 = vadd.f32 %v1920_v16, %v1691_v37  ;;  %v648_v17 = vadd.f32 %v616_v23, %v355_v19 }
 0x2ab   :  { %v7860_v41 = vpop.permute.xlu2 %1591  ;;  %v1178_v58 = vadd.f32 %v1146_v62, %v7804_v21 }
 0x2ac   :  { %v1988_v20 = vadd.f32 %v7812_v15, %v1952_v52  ;;  %v909_v54 = vadd.f32 %v877_v61, %v648_v17  ;;  %v1432_v52 = vadd.f32 %v1400_v40, %v7777_v4  ;;  %v1660_v4 = vmul.f32 %v7728_v32, %v7860_v41 }
 0x2ad   :  { %v1878_v11 = vpop.permute.xlu1 %1877 }
 0x2ae   :  { %v7871_v45 = vmax.f32 %v1988_v20, 0.0  ;;  %v1926_v18 = vmul.f32 %v7798_v3, %v1878_v11  ;;  %v1868_v53 = vpop.permute.xlu0 %1867  ;;  %v1170_v56 = vadd.f32 %v1138_v27, %v909_v54 }
 0x2af   :  { %v1924_v24 = vmul.f32 %v7798_v3, %v1868_v53 }
 0x2b0   :  { %v2128_v28 = vrot.slane %v7871_v45, 2  ;;  %v1958_v0 = vadd.f32 %v1926_v18, %v7791_v29  ;;  %v2129_v13 = vrot.slane %v7871_v45, 4  ;;  %v6232_v30 = vrot.slane %v7871_v45, 9 }
 0x2b1   :  { %v1956_v22 = vadd.f32 %v1924_v24, %v1695_v2  ;;  %v3217_v9 = vld [vmem:[#allocation3 + $0x61] sm:$0xff]  ;;  %v2130_v59 = vrot.slane %v7871_v45, 6 }
 0x2b2   :  { %6286 = vmatmul.msk.f32.gmra.mxu0 %vm3166_vm10, %v3217_v9  ;;  %v1994_v46 = vadd.f32 %v7812_v15, %v1958_v0  ;;  %v6233_v44 = vrot.slane %v2128_v28, 9  ;;  %v6234_v55 = vrot.slane %v2129_v13, 9  ;;  %v2726_v34 = vmax.f32 %v7871_v45, %v6232_v30 }
 0x2b3   :  { %v1992_v60 = vadd.f32 %v7812_v15, %v1956_v22  ;;  %v7887_v29 = vpop.permute.xlu2 %1872  ;;  %v6235_v6 = vrot.slane %v2130_v59, 9  ;;  %v6543_v30 = vunpack.c.h.bf16 %v7919_v51 }
 0x2b4   :  { %v2026_v33 = vmax.f32 %v1994_v46, 0.0  ;;  %v2727_v38 = vmax.f32 %v2128_v28, %v6233_v44  ;;  %v2728_v19 = vmax.f32 %v2129_v13, %v6234_v55  ;;  %v2991_v53 = vperm.slane %v2726_v34, 0 }
 0x2b5   :  { %v7889_v12 = vmax.f32 %v1992_v60, 0.0  ;;  %v7891_v57 = vpop.permute.xlu1 %1370  ;;  %v2729_v54 = vmax.f32 %v2130_v59, %v6235_v6  ;;  %3851 = vmatpush.msrb.mxu0 %v6543_v30 }
 0x2b6   :  { %v1331_v7 = vpop.permute.xlu0 %1330  ;;  %v2146_v8 = vrot.slane %v2026_v33, 2  ;;  %v2147_v1 = vrot.slane %v2026_v33, 4  ;;  %v6256_v14 = vrot.slane %v2026_v33, 9  ;;  %v2148_v35 = vrot.slane %v2026_v33, 6 }
 0x2b7   :  { %v2140_v43 = vrot.slane %v7889_v12, 2  ;;  %v2141_v25 = vrot.slane %v7889_v12, 4  ;;  %v6248_v31 = vrot.slane %v7889_v12, 9  ;;  %v2142_v11 = vrot.slane %v7889_v12, 6 }
 0x2b8   :  { %v6257_v37 = vrot.slane %v2146_v8, 9  ;;  %v6258_v16 = vrot.slane %v2147_v1, 9  ;;  %v2992_v39 = vperm.slane %v2727_v38, 0  ;;  %v2750_v45 = vmax.f32 %v2026_v33, %v6256_v14 }
 0x2b9   :  { %v6249_v42 = vrot.slane %v2140_v43, 9  ;;  %v6250_v20 = vrot.slane %v2141_v25, 9  ;;  %v2742_v24 = vmax.f32 %v7889_v12, %v6248_v31  ;;  %v6259_v0 = vrot.slane %v2148_v35, 9 }
 0x2ba   :  { %v2751_v23 = vmax.f32 %v2146_v8, %v6257_v37  ;;  %v2752_v2 = vmax.f32 %v2147_v1, %v6258_v16  ;;  %v1399_v21 = vmul.f32 %v7705_v36, %v1331_v7  ;;  %v2993_v50 = vperm.slane %v2728_v19, 0 }
 0x2bb   :  { %v2743_v61 = vmax.f32 %v2140_v43, %v6249_v42  ;;  %v1853_v17 = vpop.permute.xlu2 %1852  ;;  %v2744_v9 = vmax.f32 %v2141_v25, %v6250_v20  ;;  %v6251_v46 = vrot.slane %v2142_v11, 9  ;;  %v3115_v41 = vsel %vm3031_vm3, %v2992_v39, %v2991_v53 }
 0x2bc   :  { %v3016_v22 = vperm.slane %v2751_v23, 0  ;;  %v3015_v27 = vperm.slane %v2750_v45, 0  ;;  %v1431_v26 = vadd.f32 %v1399_v21, %v1170_v56  ;;  %v1921_v13 = vmul.f32 %v7798_v3, %v1853_v17 }
 0x2bd   :  { %v1622_v18 = vpop.permute.xlu1 %1621  ;;  %v3008_v60 = vperm.slane %v2743_v61, 0  ;;  %v3017_v44 = vperm.slane %v2752_v2, 0  ;;  %v3007_v33 = vperm.slane %v2742_v24, 0  ;;  %v2753_v7 = vmax.f32 %v2148_v35, %v6259_v0 }
 0x2be   :  { %v1612_v28 = vpop.permute.xlu0 %1611  ;;  %v3136_v40 = vsel %vm3031_vm3, %v3016_v22, %v3015_v27  ;;  %v3009_v8 = vperm.slane %v2744_v9, 0  ;;  %v1692_v1 = vadd.f32 %v1660_v4, %v1431_v26  ;;  %v2745_v59 = vmax.f32 %v2142_v11, %v6251_v46 }
 0x2bf   :  { %v1664_v12 = vmul.f32 %v7728_v32, %v1612_v28  ;;  %v3129_v55 = vsel %vm3031_vm3, %v3008_v60, %v3007_v33  ;;  %v1925_v43 = vmul.f32 %v7798_v3, %v7887_v29  ;;  %v3116_v25 = vsel %vm3033_vm4, %v2993_v50, %v3115_v41 }
 0x2c0   :  { %v1407_v62 = vmul.f32 %v7705_v36, %v7891_v57  ;;  %v1666_v38 = vmul.f32 %v7728_v32, %v1622_v18  ;;  %v1953_v14 = vadd.f32 %v1921_v13, %v1692_v1  ;;  %v2994_v34 = vperm.slane %v2729_v54, 0 }
 0x2c1   :  { %v1696_v56 = vadd.f32 %v1664_v12, %v1435_v47  ;;  %v1437_v16 = vadd.f32 %v1405_v5, %v7819_v49  ;;  %v3137_v31 = vsel %vm3033_vm4, %v3017_v44, %v3136_v40  ;;  %v3018_v23 = vperm.slane %v2753_v7, 0 }
 0x2c2   :  { %v3130_v29 = vsel %vm3033_vm4, %v3009_v8, %v3129_v55  ;;  %v1989_v47 = vadd.f32 %v7812_v15, %v1953_v14  ;;  %v1693_v57 = vadd.f32 %v7898_v10, %v1432_v52  ;;  %v3117_v6 = vsel %vm3035_vm5, %v2994_v34, %v3116_v25 }
 0x2c3   :  { %v1957_v42 = vadd.f32 %v1925_v43, %v1696_v56  ;;  %v3010_v19 = vperm.slane %v2745_v59, 0  ;;  %v7942_v49 = vsel %vm3035_vm5, %v3018_v23, %v3137_v31  ;;  %v1439_v61 = vadd.f32 %v1407_v62, %v1178_v58 }
 0x2c4   :  { %v7944_v39 = vadd.f32 %v1666_v38, %v1437_v16  ;;  %v2021_v5 = vmax.f32 %v1989_v47, 0.0 }
 0x2c5   :  { %v1341_v37 = vpop.permute.xlu1 %1340  ;;  %v1993_v11 = vadd.f32 %v7812_v15, %v1957_v42  ;;  %v3131_v45 = vsel %vm3035_vm5, %v3010_v19, %v3130_v29 }
 0x2c6   :  { %v1888_v35 = vpop.permute.xlu0 %1887  ;;  %v1401_v53 = vmul.f32 %v7705_v36, %v1341_v37  ;;  %v2131_v10 = vrot.slane %v2021_v5, 2  ;;  %v2132_v52 = vrot.slane %v2021_v5, 4  ;;  %v2133_v4 = vrot.slane %v2021_v5, 6 }
 0x2c7   :  { %v1928_v20 = vmul.f32 %v7798_v3, %v1888_v35  ;;  %v2025_v18 = vmax.f32 %v1993_v11, 0.0  ;;  %v6236_v24 = vrot.slane %v2021_v5, 9 }
 0x2c8   :  { %v6237_v9 = vrot.slane %v2131_v10, 9  ;;  %v6238_v58 = vrot.slane %v2132_v52, 9  ;;  %v6239_v21 = vrot.slane %v2133_v4, 9  ;;  %v1433_v59 = vadd.f32 %v1401_v53, %v7836_v63 }
 0x2c9   :  { %v1960_v2 = vadd.f32 %v1928_v20, %v7828_v48  ;;  %v2143_v17 = vrot.slane %v2025_v18, 2  ;;  %v2144_v28 = vrot.slane %v2025_v18, 4  ;;  %v2145_v0 = vrot.slane %v2025_v18, 6 }
 0x2ca   :  { %v6252_v22 = vrot.slane %v2025_v18, 9  ;;  %v2730_v54 = vmax.f32 %v2021_v5, %v6236_v24  ;;  %v2731_v26 = vmax.f32 %v2131_v10, %v6237_v9  ;;  %v2732_v48 = vmax.f32 %v2132_v52, %v6238_v58 }
 0x2cb   :  { %v6253_v46 = vrot.slane %v2143_v17, 9  ;;  %v6254_v60 = vrot.slane %v2144_v28, 9  ;;  %v6255_v41 = vrot.slane %v2145_v0, 9  ;;  %v2733_v13 = vmax.f32 %v2133_v4, %v6239_v21 }
 0x2cc   :  { %v2746_v27 = vmax.f32 %v2025_v18, %v6252_v22  ;;  %v2995_v44 = vperm.slane %v2730_v54, 0  ;;  %v2996_v40 = vperm.slane %v2731_v26, 0  ;;  %v2997_v8 = vperm.slane %v2732_v48, 0 }
 0x2cd   :  { %v1858_v50 = vpop.permute.xlu1 %1857  ;;  %v2747_v33 = vmax.f32 %v2143_v17, %v6253_v46  ;;  %v2748_v12 = vmax.f32 %v2144_v28, %v6254_v60  ;;  %v2749_v30 = vmax.f32 %v2145_v0, %v6255_v41  ;;  %v2998_v55 = vperm.slane %v2733_v13, 0 }
 0x2ce   :  { %v1632_v36 = vpop.permute.xlu0 %1631  ;;  %v3011_v7 = vperm.slane %v2746_v27, 0  ;;  %v3118_v1 = vsel %vm3037_vm6, %v2995_v44, %v3117_v6  ;;  %v1996_v38 = vadd.f32 %v7812_v15, %v1960_v2  ;;  %v1922_v14 = vmul.f32 %v7798_v3, %v1858_v50 }
 0x2cf   :  { %v3012_v43 = vperm.slane %v2747_v33, 0  ;;  %v3013_v56 = vperm.slane %v2748_v12, 0  ;;  %v3119_v62 = vsel %vm3039_vm7, %v2996_v40, %v3118_v1  ;;  %v1668_v37 = vmul.f32 %v7728_v32, %v1632_v36 }
 0x2d0   :  { %v3132_v25 = vsel %vm3037_vm6, %v3011_v7, %v3131_v45  ;;  %v3120_v34 = vsel %vm3041_vm8, %v2997_v8, %v3119_v62  ;;  %v3014_v16 = vperm.slane %v2749_v30, 0  ;;  %v6542_v63 = vunpack.c.l.bf16 %v7919_v51 }
 0x2d1   :  { %v3133_v31 = vsel %vm3039_vm7, %v3012_v43, %v3132_v25  ;;  %v3121_v42 = vsel %vm3043_vm9, %v2998_v55, %v3120_v34  ;;  %v2028_v23 = vmax.f32 %v1996_v38, 0.0  ;;  %v1954_v29 = vadd.f32 %v1922_v14, %v1693_v57  ;;  %v6660_v57 = vld [vmem:[%s9060_s3 + $0x28] sm:$0xff]  }
 0x2d2   :  { %v3134_v35 = vsel %vm3041_vm8, %v3013_v56, %v3133_v31  ;;  %3178 = vst.msk [vmem:[#allocation3 + $0x6a] sm:$0xff] %vm3166_vm10, %v3121_v42  ;;  %v7963_v6 = vadd.f32 %v1668_v37, %v1439_v61  ;;  %3852 = vmatpush.msrb.mxu0 %v6542_v63  ;;  %v6527_v10 = vunpack.c.h.bf16 %v6660_v57  ;;  %v6526_v9 = vunpack.c.l.bf16 %v6660_v57 }
 0x2d3   :  { %v3135_v20 = vsel %vm3043_vm9, %v3014_v16, %v3134_v35  ;;  %v2152_v51 = vrot.slane %v2028_v23, 2  ;;  %v2153_v5 = vrot.slane %v2028_v23, 4  ;;  %v2154_v45 = vrot.slane %v2028_v23, 6  ;;  %v6659_v16 = vld [vmem:[%s9060_s3 + $0x20] sm:$0xff]  }
 0x2d4   :  { %3180 = vst.msk [vmem:[#allocation3 + $0x82] sm:$0xff] %vm3166_vm10, %v3135_v20  ;;  %v6264_v18 = vrot.slane %v2028_v23, 9  ;;  %v1990_v53 = vadd.f32 %v7812_v15, %v1954_v29  ;;  %3543 = vmatpush.msrb.mxu2 %v6527_v10 }
 0x2d5   :  { %v1602_v47 = vpop.permute.xlu1 %1601  ;;  %v6265_v52 = vrot.slane %v2152_v51, 9  ;;  %v6266_v4 = vrot.slane %v2153_v5, 9  ;;  %v6267_v24 = vrot.slane %v2154_v45, 9 }
 0x2d6   :  { %v1662_v19 = vmul.f32 %v7728_v32, %v1602_v47  ;;  %v1883_v11 = vpop.permute.xlu0 %1882  ;;  %v7975_v32 = vld [vmem:[%s9060_s3 + $0x40] sm:$0xff]   ;;  %v2758_v17 = vmax.f32 %v2028_v23, %v6264_v18  ;;  %v2022_v28 = vmax.f32 %v1990_v53, 0.0  ;;  %3544 = vmatpush.msrb.mxu2 %v6526_v9  ;;  %v6656_v53 = vld [vmem:[%s9060_s3 + $0x8] sm:$0xff]  }
 0x2d7   :  { %v1927_v61 = vmul.f32 %v7798_v3, %v1883_v11  ;;  %v6539_v22 = vunpack.c.h.bf16 %v7975_v32  ;;  %v2759_v58 = vmax.f32 %v2152_v51, %v6265_v52  ;;  %v2760_v21 = vmax.f32 %v2153_v5, %v6266_v4 }
 0x2d8   :  { %v1694_v2 = vadd.f32 %v1662_v19, %v1433_v59  ;;  %v2761_v54 = vmax.f32 %v2154_v45, %v6267_v24  ;;  %v3023_v50 = vperm.slane %v2758_v17, 0  ;;  %v2134_v46 = vrot.slane %v2022_v28, 2 }
 0x2d9   :  { %v1959_v0 = vadd.f32 %v1927_v61, %v7944_v39  ;;  %v2135_v60 = vrot.slane %v2022_v28, 4  ;;  %v2136_v41 = vrot.slane %v2022_v28, 6  ;;  %v6240_v27 = vrot.slane %v2022_v28, 9  ;;  %3853 = vmatpush.msrb.mxu0 %v6539_v22  ;;  %v3218_v39 = vld [vmem:[#allocation3 + $0x69] sm:$0xff] }
 0x2da   :  { %v3024_v36 = vperm.slane %v2759_v58, 0  ;;  %v3025_v26 = vperm.slane %v2760_v21, 0  ;;  %v3026_v48 = vperm.slane %v2761_v54, 0  ;;  %v6241_v33 = vrot.slane %v2134_v46, 9  ;;  %6287 = vmatmul.msk.f32.gmra.mxu0 %vm3166_vm10, %v3218_v39 }
 0x2db   :  { %v1995_v13 = vadd.f32 %v7812_v15, %v1959_v0  ;;  %v6242_v12 = vrot.slane %v2135_v60, 9  ;;  %v6243_v30 = vrot.slane %v2136_v41, 9  ;;  %v2734_v7 = vmax.f32 %v2022_v28, %v6240_v27 }
 0x2dc   :  { %v3143_v8 = vsel %vm3031_vm3, %v3024_v36, %v3023_v50  ;;  %v2735_v56 = vmax.f32 %v2134_v46, %v6241_v33  ;;  %v6523_v51 = vunpack.c.h.bf16 %v6659_v16  ;;  %v6522_v28 = vunpack.c.l.bf16 %v6659_v16 }
 0x2dd   :  { %v1863_v44 = vpop.permute.xlu1 %1862  ;;  %v2027_v1 = vmax.f32 %v1995_v13, 0.0  ;;  %v3144_v43 = vsel %vm3033_vm4, %v3025_v26, %v3143_v8  ;;  %v2736_v25 = vmax.f32 %v2135_v60, %v6242_v12  ;;  %v2737_v62 = vmax.f32 %v2136_v41, %v6243_v30 }
 0x2de   :  { %v1893_v40 = vpop.permute.xlu0 %1892  ;;  %v1923_v59 = vmul.f32 %v7798_v3, %v1863_v44  ;;  %v7986_v38 = vsel %vm3035_vm5, %v3026_v48, %v3144_v43  ;;  %v2999_v14 = vperm.slane %v2734_v7, 0  ;;  %v3000_v31 = vperm.slane %v2735_v56, 0  ;;  %3545 = vmatpush.msrb.mxu2 %v6523_v51 }
 0x2df   :  { %v1929_v55 = vmul.f32 %v7798_v3, %v1893_v40  ;;  %v2149_v37 = vrot.slane %v2027_v1, 2  ;;  %v2150_v34 = vrot.slane %v2027_v1, 4  ;;  %v3001_v63 = vperm.slane %v2736_v25, 0 }
 0x2e0   :  { %v3002_v42 = vperm.slane %v2737_v62, 0  ;;  %v2151_v35 = vrot.slane %v2027_v1, 6  ;;  %v6260_v3 = vrot.slane %v2027_v1, 9  ;;  %v1955_v47 = vadd.f32 %v1923_v59, %v1694_v2  ;;  %3546 = vmatpush.msrb.mxu2 %v6522_v28  ;;  %v3459_v28 = vld [vmem:[#allocation3 + $0xa] sm:$0xff] }
 0x2e1   :  { %v6261_v23 = vrot.slane %v2149_v37, 9  ;;  %v6262_v29 = vrot.slane %v2150_v34, 9  ;;  %v3122_v20 = vsel %vm3031_vm3, %v3000_v31, %v2999_v14  ;;  %v1961_v11 = vadd.f32 %v1929_v55, %v7963_v6  ;;  %v6662_v6 = vld [vmem:[%s9060_s3 + $0x38] sm:$0xff]   ;;  %v6505_v14 = vld [vmem:[%s9060_s3] sm:$0xff]  }
 0x2e2   :  { %v6263_v19 = vrot.slane %v2151_v35, 9  ;;  %v3123_v5 = vsel %vm3033_vm4, %v3001_v63, %v3122_v20  ;;  %v2754_v45 = vmax.f32 %v2027_v1, %v6260_v3  ;;  %v1991_v2 = vadd.f32 %v7812_v15, %v1955_v47 }
 0x2e3   :  { %v2755_v18 = vmax.f32 %v2149_v37, %v6261_v23  ;;  %v2756_v57 = vmax.f32 %v2150_v34, %v6262_v29  ;;  %v3124_v61 = vsel %vm3035_vm5, %v3002_v42, %v3123_v5  ;;  %v1997_v52 = vadd.f32 %v7812_v15, %v1961_v11  ;;  %v6661_v37 = vld [vmem:[%s9060_s3 + $0x30] sm:$0xff]  }
 0x2e4   :  { %v2757_v10 = vmax.f32 %v2151_v35, %v6263_v19  ;;  %v3019_v4 = vperm.slane %v2754_v45, 0  ;;  %v2023_v22 = vmax.f32 %v1991_v2, 0.0  ;;  %v6511_v58 = vunpack.c.h.bf16 %v6656_v53 }
 0x2e5   :  { %v3020_v24 = vperm.slane %v2755_v18, 0  ;;  %v3021_v17 = vperm.slane %v2756_v57, 0  ;;  %v2029_v9 = vmax.f32 %v1997_v52, 0.0  ;;  %v6535_v54 = vunpack.c.h.bf16 %v6662_v6 }
 0x2e6   :  { %v3022_v0 = vperm.slane %v2757_v10, 0  ;;  %v3139_v21 = vsel %vm3037_vm6, %v3019_v4, %v7942_v49  ;;  %v6510_v50 = vunpack.c.l.bf16 %v6656_v53  ;;  %v6534_v15 = vunpack.c.l.bf16 %v6662_v6  ;;  %3405 = vmatpush.msrb.mxu1 %v6511_v58  ;;  %v3460_v58 = vld [vmem:[#allocation3 + $0x12] sm:$0xff] }
 0x2e7   :  { %v3140_v46 = vsel %vm3039_vm7, %v3020_v24, %v3139_v21  ;;  %v2137_v60 = vrot.slane %v2023_v22, 2  ;;  %v2138_v41 = vrot.slane %v2023_v22, 4  ;;  %v2139_v27 = vrot.slane %v2023_v22, 6  ;;  %3697 = vmatpush.msrb.mxu3 %v6535_v54  ;;  %v3183_v24 = vld [vmem:[#allocation3] sm:$0xff]  ;;  %v3613_v21 = vld [vmem:[#allocation3 + $0xb] sm:$0xff] }
 0x2e8   :  { %v3141_v36 = vsel %vm3041_vm8, %v3021_v17, %v3140_v46  ;;  %v6244_v26 = vrot.slane %v2023_v22, 9  ;;  %v2155_v48 = vrot.slane %v2029_v9, 2  ;;  %v2156_v13 = vrot.slane %v2029_v9, 4  ;;  %3406 = vmatpush.msrb.mxu1 %v6510_v50  ;;  %v3766_v17 = vld [vmem:[#allocation3 + $0x4] sm:$0xff]  ;;  %v3185_v54 = vld [vmem:[#allocation3 + $0x10] sm:$0xff] }
 0x2e9   :  { %v3142_v39 = vsel %vm3043_vm9, %v3022_v0, %v3141_v36  ;;  %v6245_v44 = vrot.slane %v2137_v60, 9  ;;  %v6246_v49 = vrot.slane %v2138_v41, 9  ;;  %v6247_v33 = vrot.slane %v2139_v27, 9  ;;  %3698 = vmatpush.msrb.mxu3 %v6534_v15  ;;  %v3612_v0 = vld [vmem:[#allocation3 + $0x3] sm:$0xff]  ;;  %v3768_v50 = vld [vmem:[#allocation3 + $0x14] sm:$0xff] }
 0x2ea   :  { %3181 = vst.msk [vmem:[#allocation3 + $0x8a] sm:$0xff] %vm3166_vm10, %v3142_v39  ;;  %v2738_v12 = vmax.f32 %v2023_v22, %v6244_v26  ;;  %v2157_v30 = vrot.slane %v2029_v9, 6  ;;  %v6268_v7 = vrot.slane %v2029_v9, 9  ;;  %v6269_v40 = vrot.slane %v2155_v48, 9  ;;  %v3184_v22 = vld [vmem:[#allocation3 + $0x8] sm:$0xff]  ;;  %v3461_v15 = vld [vmem:[#allocation3 + $0x1a] sm:$0xff] }
 0x2eb   :  { %v2739_v8 = vmax.f32 %v2137_v60, %v6245_v44  ;;  %v2740_v1 = vmax.f32 %v2138_v41, %v6246_v49  ;;  %v2741_v59 = vmax.f32 %v2139_v27, %v6247_v33  ;;  %v6270_v55 = vrot.slane %v2156_v13, 9  ;;  %v3614_v46 = vld [vmem:[#allocation3 + $0x13] sm:$0xff]  ;;  %v8044_v60 = vpop.f32.mrf.mxu0  ;;  %v3769_v27 = vld [vmem:[#allocation3 + $0x1c] sm:$0xff]  ;;  %v3462_v36 = vld [vmem:[#allocation3 + $0x2a] sm:$0xff] }
 0x2ec   :  { %v3003_v43 = vperm.slane %v2738_v12, 0  ;;  %v6271_v56 = vrot.slane %v2157_v30, 9  ;;  %v2762_v25 = vmax.f32 %v2029_v9, %v6268_v7  ;;  %v2763_v62 = vmax.f32 %v2155_v48, %v6269_v40  ;;  %v3767_v9 = vld [vmem:[#allocation3 + $0xc] sm:$0xff]  ;;  %v3186_v41 = vld [vmem:[#allocation3 + $0x18] sm:$0xff] }
 0x2ed   :  { %v3004_v34 = vperm.slane %v2739_v8, 0  ;;  %v3005_v16 = vperm.slane %v2740_v1, 0  ;;  %v3006_v31 = vperm.slane %v2741_v59, 0  ;;  %v2764_v63 = vmax.f32 %v2156_v13, %v6270_v55  ;;  %v3615_v26 = vld [vmem:[#allocation3 + $0x1b] sm:$0xff]  ;;  %v3187_v13 = vld [vmem:[#allocation3 + $0x28] sm:$0xff]  ;;  %v3463_v44 = vld [vmem:[#allocation3 + $0x32] sm:$0xff] }
 0x2ee   :  { %v3125_v42 = vsel %vm3037_vm6, %v3003_v43, %v3124_v61  ;;  %v2765_v35 = vmax.f32 %v2157_v30, %v6271_v56  ;;  %v3027_v3 = vperm.slane %v2762_v25, 0  ;;  %v3028_v23 = vperm.slane %v2763_v62, 0  ;;  %v3770_v39 = vld [vmem:[#allocation3 + $0x2c] sm:$0xff]  ;;  %v3771_v30 = vld [vmem:[#allocation3 + $0x34] sm:$0xff]  ;;  %v3772_v59 = vld [vmem:[#allocation3 + $0x3c] sm:$0xff] }
 0x2ef   :  { %v3126_v29 = vsel %vm3039_vm7, %v3004_v34, %v3125_v42  ;;  %v3029_v47 = vperm.slane %v2764_v63, 0  ;;  %v6507_v20 = vunpack.c.h.bf16 %v6505_v14  ;;  %v6531_v19 = vunpack.c.h.bf16 %v6661_v37  ;;  %v3616_v49 = vld [vmem:[#allocation3 + $0x2b] sm:$0xff]  ;;  %v3464_v7 = vld [vmem:[#allocation3 + $0x3a] sm:$0xff]  ;;  %v3465_v55 = vld [vmem:[#allocation3 + $0x42] sm:$0xff] }
 0x2f0   :  { %v3127_v11 = vsel %vm3041_vm8, %v3005_v16, %v3126_v29  ;;  %v3030_v51 = vperm.slane %v2765_v35, 0  ;;  %v3146_v5 = vsel %vm3037_vm6, %v3027_v3, %v7986_v38  ;;  %v6506_v45 = vunpack.c.l.bf16 %v6505_v14  ;;  %v3188_v12 = vld [vmem:[#allocation3 + $0x30] sm:$0xff]  ;;  %v3189_v1 = vld [vmem:[#allocation3 + $0x38] sm:$0xff]  ;;  %v3190_v25 = vld [vmem:[#allocation3 + $0x40] sm:$0xff] }
 0x2f1   :  { %v3128_v18 = vsel %vm3043_vm9, %v3006_v31, %v3127_v11  ;;  %v3147_v57 = vsel %vm3039_vm7, %v3028_v23, %v3146_v5  ;;  %v3221_v53 = vld [vmem:[#allocation3 + $0x89] sm:$0xff]  ;;  %3407 = vmatpush.msrb.mxu1 %v6507_v20  ;;  %3699 = vmatpush.msrb.mxu3 %v6531_v19  ;;  %v6530_v61 = vunpack.c.l.bf16 %v6661_v37  ;;  %v6538_v10 = vunpack.c.l.bf16 %v7975_v32  ;;  %v3617_v40 = vld [vmem:[#allocation3 + $0x33] sm:$0xff]  ;;  %v3618_v43 = vld [vmem:[#allocation3 + $0x3b] sm:$0xff] }
 0x2f2   :  { %3179 = vst.msk [vmem:[#allocation3 + $0x7a] sm:$0xff] %vm3166_vm10, %v3128_v18  ;;  %v3148_v2 = vsel %vm3041_vm8, %v3029_v47, %v3147_v57  ;;  %6290 = vmatmul.msk.f32.vlgmr.msra.gmra.mxu2 %vm3166_vm10, %v3221_v53  ;;  %v3458_v32 = vld [vmem:[#allocation3 + $0x2] sm:$0xff]  ;;  %v3466_v14 = vld [vmem:[#allocation3 + $0x52] sm:$0xff]  ;;  %v3467_v63 = vld [vmem:[#allocation3 + $0x5a] sm:$0xff] }
 0x2f3   :  { %v3149_v52 = vsel %vm3043_vm9, %v3030_v51, %v3148_v2  ;;  %3408 = vmatpush.msrb.mxu1 %v6506_v45  ;;  %3700 = vmatpush.msrb.mxu3 %v6530_v61  ;;  %v8050_v48 = vpop.f32.mrf.mxu0  ;;  %v3773_v62 = vld [vmem:[#allocation3 + $0x44] sm:$0xff]  ;;  %v3191_v16 = vld [vmem:[#allocation3 + $0x50] sm:$0xff]  ;;  %v3192_v3 = vld [vmem:[#allocation3 + $0x58] sm:$0xff] }
 0x2f4   :  { %3182 = vst.msk [vmem:[#allocation3 + $0x92] sm:$0xff] %vm3166_vm10, %v3149_v52  ;;  %3854 = vmatpush.msrb.mxu0 %v6538_v10  ;;  %v3619_v37 = vld [vmem:[#allocation3 + $0x43] sm:$0xff]  ;;  %v3774_v31 = vld [vmem:[#allocation3 + $0x54] sm:$0xff]  ;;  %v3777_v57 = vld [vmem:[#allocation3 + $0x6c] sm:$0xff] }
 0x2f5   :  { %v3620_v42 = vld [vmem:[#allocation3 + $0x53] sm:$0xff]  ;;  %v3775_v23 = vld [vmem:[#allocation3 + $0x5c] sm:$0xff]  ;;  %v3776_v11 = vld [vmem:[#allocation3 + $0x64] sm:$0xff] }
 0x2f6   :  { %v3468_v29 = vld [vmem:[#allocation3 + $0x62] sm:$0xff]  ;;  %v3469_v51 = vld [vmem:[#allocation3 + $0x6a] sm:$0xff] }
 0x2f7   :  { %v3621_v47 = vld [vmem:[#allocation3 + $0x5b] sm:$0xff]  ;;  %v3622_v5 = vld [vmem:[#allocation3 + $0x63] sm:$0xff]  ;;  %v3623_v61 = vld [vmem:[#allocation3 + $0x6b] sm:$0xff] }
 0x2f8   :  { %v3193_v19 = vld [vmem:[#allocation3 + $0x60] sm:$0xff]  ;;  %v3194_v18 = vld [vmem:[#allocation3 + $0x68] sm:$0xff] }
 0x2f9   :  { %v3219_v38 = vld [vmem:[#allocation3 + $0x79] sm:$0xff]  ;;  %v3220_v6 = vld [vmem:[#allocation3 + $0x81] sm:$0xff] }
 0x2fa   :  { %6288 = vmatmul.msk.f32.gmra.mxu0 %vm3166_vm10, %v3219_v38  ;;  %6289 = vmatmul.msk.f32.vlgmr.msra.gmra.mxu1 %vm3166_vm10, %v3220_v6  ;;  %v3470_v53 = vld [vmem:[#allocation3 + $0x7a] sm:$0xff]  ;;  %v3471_v38 = vld [vmem:[#allocation3 + $0x82] sm:$0xff] }
 0x2fb   :  { %v3222_v4 = vld [vmem:[#allocation3 + $0x91] sm:$0xff]  ;;  %6312 = vmatmul.msk.f32.vlgmr.msrb.gmra.mxu2 %vm3166_vm10, %v3458_v32  ;;  %v8056_v33 = vpop.f32.mrf.mxu0  ;;  %v3778_v52 = vld [vmem:[#allocation3 + $0x7c] sm:$0xff] }
 0x2fc   :  { %6291 = vmatmul.msk.f32.vlgmr.msra.gmra.mxu3 %vm3166_vm10, %v3222_v4  ;;  %v3195_v2 = vld [vmem:[#allocation3 + $0x78] sm:$0xff]  ;;  %v3196_v4 = vld [vmem:[#allocation3 + $0x80] sm:$0xff] }
 0x2fd   :  { %v3624_v6 = vld [vmem:[#allocation3 + $0x7b] sm:$0xff] }
 0x302   :  { %6292 = vmatmul.msk.f32.vlgmr.msrb.gmra.mxu1 %vm3166_vm10, %v3183_v24  ;;  %6352 = vmatmul.msk.f32.vlgmr.msrb.gmra.mxu0 %vm3166_vm10, %v3766_v17  ;;  %v3779_v24 = vld [vmem:[#allocation3 + $0x84] sm:$0xff] }
 0x303   :  { %6313 = vmatmul.msk.f32.gmra.mxu2 %vm3166_vm10, %v3459_v28  ;;  %v8062_v8 = vpop.f32.mrf.mxu0  ;;  %v3472_v17 = vld [vmem:[#allocation3 + $0x8a] sm:$0xff] }
 0x304   :  { %6332 = vmatmul.msk.f32.vlgmr.msrb.gmra.mxu3 %vm3166_vm10, %v3612_v0  ;;  %v3625_v28 = vld [vmem:[#allocation3 + $0x83] sm:$0xff] }
 0x30a   :  { %6293 = vmatmul.msk.f32.gmra.mxu1 %vm3166_vm10, %v3184_v22  ;;  %6353 = vmatmul.msk.f32.gmra.mxu0 %vm3166_vm10, %v3767_v9  ;;  %v3197_v22 = vld [vmem:[#allocation3 + $0x88] sm:$0xff] }
 0x30b   :  { %6314 = vmatmul.msk.f32.gmra.mxu2 %vm3166_vm10, %v3460_v58  ;;  %v8068_v56 = vpop.f32.mrf.mxu0  ;;  %v3780_v9 = vld [vmem:[#allocation3 + $0x8c] sm:$0xff] }
 0x30c   :  { %6333 = vmatmul.msk.f32.gmra.mxu3 %vm3166_vm10, %v3613_v21  ;;  %v3473_v58 = vld [vmem:[#allocation3 + $0x92] sm:$0xff] }
 0x30d   :  { %v3626_v21 = vld [vmem:[#allocation3 + $0x8b] sm:$0xff] }
 0x312   :  { %6294 = vmatmul.msk.f32.gmra.mxu1 %vm3166_vm10, %v3185_v54  ;;  %6354 = vmatmul.msk.f32.gmra.mxu0 %vm3166_vm10, %v3768_v50 }
 0x313   :  { %6315 = vmatmul.msk.f32.gmra.mxu2 %vm3166_vm10, %v3461_v15  ;;  %v8074_v34 = vpop.f32.mrf.mxu0 }
 0x314   :  { %6334 = vmatmul.msk.f32.gmra.mxu3 %vm3166_vm10, %v3614_v46  ;;  %v3198_v46 = vld [vmem:[#allocation3 + $0x90] sm:$0xff] }
 0x31a   :  { %6295 = vmatmul.msk.f32.gmra.mxu1 %vm3166_vm10, %v3186_v41  ;;  %6355 = vmatmul.msk.f32.gmra.mxu0 %vm3166_vm10, %v3769_v27  ;;  %v3781_v41 = vld [vmem:[#allocation3 + $0x94] sm:$0xff] }
 0x31b   :  { %6316 = vmatmul.msk.f32.gmra.mxu2 %vm3166_vm10, %v3462_v36  ;;  %v8080_v35 = vpop.f32.mrf.mxu0  ;;  %v6667_v27 = vld [vmem:[%s9062_s5 + $0x18] sm:$0xff]  }
 0x31c   :  { %6335 = vmatmul.msk.f32.gmra.mxu3 %vm3166_vm10, %v3615_v26  ;;  %v8130_v36 = vld [vmem:[%s9062_s5 + $0x58] sm:$0xff]  }
 0x31d   :  { %v6671_v26 = vld [vmem:[%s9062_s5 + $0x38] sm:$0xff]  }
 0x322   :  { %6296 = vmatmul.msk.f32.gmra.mxu1 %vm3166_vm10, %v3187_v13  ;;  %6356 = vmatmul.msk.f32.gmra.mxu0 %vm3166_vm10, %v3770_v39  ;;  %v3627_v13 = vld [vmem:[#allocation3 + $0x93] sm:$0xff]  ;;  %v6559_v39 = vunpack.c.h.bf16 %v6667_v27 }
 0x323   :  { %6317 = vmatmul.msk.f32.gmra.mxu2 %vm3166_vm10, %v3463_v44  ;;  %v8086_v20 = vpop.f32.mrf.mxu0  ;;  %v6591_v44 = vunpack.c.h.bf16 %v8130_v36 }
 0x324   :  { %6336 = vmatmul.msk.f32.gmra.mxu3 %vm3166_vm10, %v3616_v49  ;;  %v6575_v49 = vunpack.c.h.bf16 %v6671_v26  ;;  %4680 = vmatpush.msra.mxu2 %v6559_v39 }
 0x325   :  { %4770 = vmatpush.msra.mxu3 %v6591_v44 }
 0x326   :  { %4615 = vmatpush.msra.mxu1 %v6575_v49 }
 0x32a   :  { %6297 = vmatmul.msk.f32.gmra.mxu1 %vm3166_vm10, %v3188_v12  ;;  %6357 = vmatmul.msk.f32.gmra.mxu0 %vm3166_vm10, %v3771_v30 }
 0x32b   :  { %6318 = vmatmul.msk.f32.gmra.mxu2 %vm3166_vm10, %v3464_v7  ;;  %v8092_v45 = vpop.f32.mrf.mxu0 }
 0x32c   :  { %6337 = vmatmul.msk.f32.gmra.mxu3 %vm3166_vm10, %v3617_v40  ;;  %v6558_v40 = vunpack.c.l.bf16 %v6667_v27 }
 0x32e   :  { %4681 = vmatpush.msra.mxu2 %v6558_v40 }
 0x332   :  { %6298 = vmatmul.msk.f32.gmra.mxu1 %vm3166_vm10, %v3189_v1  ;;  %6358 = vmatmul.msk.f32.gmra.mxu0 %vm3166_vm10, %v3772_v59  ;;  %v6574_v1 = vunpack.c.l.bf16 %v6671_v26 }
 0x333   :  { %6319 = vmatmul.msk.f32.gmra.mxu2 %vm3166_vm10, %v3465_v55  ;;  %v8098_v10 = vpop.f32.mrf.mxu0  ;;  %v6670_v55 = vld [vmem:[%s9062_s5 + $0x30] sm:$0xff]  }
 0x334   :  { %6338 = vmatmul.msk.f32.gmra.mxu3 %vm3166_vm10, %v3618_v43  ;;  %v6666_v43 = vld [vmem:[%s9062_s5 + $0x10] sm:$0xff]   ;;  %4616 = vmatpush.msra.mxu1 %v6574_v1 }
 0x33a   :  { %6299 = vmatmul.msk.f32.gmra.mxu1 %vm3166_vm10, %v3190_v25  ;;  %6359 = vmatmul.msk.f32.gmra.mxu0 %vm3166_vm10, %v3773_v62  ;;  %v6571_v25 = vunpack.c.h.bf16 %v6670_v55  ;;  %v6555_v62 = vunpack.c.h.bf16 %v6666_v43 }
 0x33b   :  { %6320 = vmatmul.msk.f32.gmra.mxu2 %vm3166_vm10, %v3466_v14  ;;  %v8104_v32 = vpop.f32.mrf.mxu0 }
 0x33c   :  { %6339 = vmatmul.msk.f32.gmra.mxu3 %vm3166_vm10, %v3619_v37  ;;  %4617 = vmatpush.msra.mxu1 %v6571_v25  ;;  %v6570_v37 = vunpack.c.l.bf16 %v6670_v55 }
 0x33d   :  { %4682 = vmatpush.msra.mxu2 %v6555_v62  ;;  %v6673_v62 = vld [vmem:[%s9062_s5 + $0x48] sm:$0xff]  }
 0x33e   :  { %4618 = vmatpush.msra.mxu1 %v6570_v37  ;;  %v6583_v37 = vunpack.c.h.bf16 %v6673_v62 }
 0x342   :  { %6300 = vmatmul.msk.f32.gmra.mxu1 %vm3166_vm10, %v3191_v16  ;;  %6360 = vmatmul.msk.f32.gmra.mxu0 %vm3166_vm10, %v3774_v31  ;;  %v6554_v16 = vunpack.c.l.bf16 %v6666_v43  ;;  %v6669_v31 = vld [vmem:[%s9062_s5 + $0x28] sm:$0xff]  }
 0x343   :  { %6321 = vmatmul.msk.f32.gmra.mxu2 %vm3166_vm10, %v3467_v63  ;;  %v6665_v63 = vld [vmem:[%s9062_s5 + $0x8] sm:$0xff]  }
 0x344   :  { %6340 = vmatmul.msk.f32.gmra.mxu3 %vm3166_vm10, %v3620_v42  ;;  %4683 = vmatpush.msra.mxu2 %v6554_v16  ;;  %v6567_v42 = vunpack.c.h.bf16 %v6669_v31 }
 0x346   :  { %4619 = vmatpush.msra.mxu1 %v6567_v42 }
 0x34a   :  { %6301 = vmatmul.msk.f32.gmra.mxu1 %vm3166_vm10, %v3192_v3  ;;  %6361 = vmatmul.msk.f32.gmra.mxu0 %vm3166_vm10, %v3775_v23  ;;  %v6551_v3 = vunpack.c.h.bf16 %v6665_v63 }
 0x34b   :  { %6322 = vmatmul.msk.f32.gmra.mxu2 %vm3166_vm10, %v3468_v29 }
 0x34c   :  { %6341 = vmatmul.msk.f32.gmra.mxu3 %vm3166_vm10, %v3621_v47  ;;  %4684 = vmatpush.msra.mxu2 %v6551_v3 }
 0x352   :  { %6302 = vmatmul.msk.f32.gmra.mxu1 %vm3166_vm10, %v3193_v19  ;;  %6362 = vmatmul.msk.f32.gmra.mxu0 %vm3166_vm10, %v3776_v11  ;;  %v6566_v11 = vunpack.c.l.bf16 %v6669_v31 }
 0x353   :  { %6323 = vmatmul.msk.f32.gmra.mxu2 %vm3166_vm10, %v3469_v51  ;;  %v6550_v51 = vunpack.c.l.bf16 %v6665_v63 }
 0x354   :  { %6342 = vmatmul.msk.f32.gmra.mxu3 %vm3166_vm10, %v3622_v5  ;;  %4620 = vmatpush.msra.mxu1 %v6566_v11 }
 0x355   :  { %4685 = vmatpush.msra.mxu2 %v6550_v51  ;;  %v6672_v51 = vld [vmem:[%s9062_s5 + $0x40] sm:$0xff]  }
 0x357   :  { %v8110_v0 = vpop.f32.mrf.mxu0 }
 0x35a   :  { %6303 = vmatmul.msk.f32.gmra.mxu1 %vm3166_vm10, %v3194_v18  ;;  %6363 = vmatmul.msk.f32.gmra.mxu0 %vm3166_vm10, %v3777_v57  ;;  %v8159_v18 = vld [vmem:[%s9061_s4] ss:$0 sm:$0xff] }
 0x35b   :  { %6324 = vmatmul.msk.f32.gmra.mxu2 %vm3166_vm10, %v3470_v53  ;;  %v6668_v53 = vld [vmem:[%s9062_s5 + $0x20] sm:$0xff]  }
 0x35c   :  { %6343 = vmatmul.msk.f32.gmra.mxu3 %vm3166_vm10, %v3623_v61  ;;  %v6545_v61 = vld [vmem:[%s9062_s5] sm:$0xff]  }
 0x362   :  { %6304 = vmatmul.msk.f32.gmra.mxu1 %vm3166_vm10, %v3195_v2  ;;  %6364 = vmatmul.msk.f32.gmra.mxu0 %vm3166_vm10, %v3778_v52  ;;  %v6563_v2 = vunpack.c.h.bf16 %v6668_v53  ;;  %v6547_v52 = vunpack.c.h.bf16 %v6545_v61 }
 0x363   :  { %6325 = vmatmul.msk.f32.gmra.mxu2 %vm3166_vm10, %v3471_v38 }
 0x364   :  { %6344 = vmatmul.msk.f32.gmra.mxu3 %vm3166_vm10, %v3624_v6  ;;  %v6590_v6 = vunpack.c.l.bf16 %v8130_v36  ;;  %4621 = vmatpush.msra.mxu1 %v6563_v2 }
 0x365   :  { %4686 = vmatpush.msra.mxu2 %v6547_v52 }
 0x366   :  { %4771 = vmatpush.msra.mxu3 %v6590_v6 }
 0x36a   :  { %6305 = vmatmul.msk.f32.gmra.mxu1 %vm3166_vm10, %v3196_v4  ;;  %6365 = vmatmul.msk.f32.gmra.mxu0 %vm3166_vm10, %v3779_v24  ;;  %v6562_v24 = vunpack.c.l.bf16 %v6668_v53 }
 0x36b   :  { %6326 = vmatmul.msk.f32.gmra.mxu2 %vm3166_vm10, %v3472_v17  ;;  %v6546_v17 = vunpack.c.l.bf16 %v6545_v61 }
 0x36c   :  { %6345 = vmatmul.msk.f32.gmra.mxu3 %vm3166_vm10, %v3625_v28  ;;  %4622 = vmatpush.msra.mxu1 %v6562_v24 }
 0x36d   :  { %4687 = vmatpush.msra.mxu2 %v6546_v17  ;;  %v6579_v17 = vunpack.c.h.bf16 %v6672_v51 }
 0x372   :  { %6306 = vmatmul.msk.f32.gmra.mxu1 %vm3166_vm10, %v3197_v22  ;;  %6366 = vmatmul.msk.f32.gmra.mxu0 %vm3166_vm10, %v3780_v9 }
 0x373   :  { %6327 = vmatmul.msk.f32.gmra.mxu2 %vm3166_vm10, %v3473_v58 }
 0x374   :  { %6346 = vmatmul.msk.f32.gmra.mxu3 %vm3166_vm10, %v3626_v21 }
 0x375   :  { %v8116_v54 = vpop.f32.mrf.mxu2 }
 0x377   :  { %v8118_v50 = vpop.f32.mrf.mxu0  ;;  %v8120_v15 = vpop.f32.mrf.mxu1 }
 0x37a   :  { %6307 = vmatmul.msk.f32.gmra.mxu1 %vm3166_vm10, %v3198_v46  ;;  %6367 = vmatmul.msk.f32.gmra.mxu0 %vm3166_vm10, %v3781_v41 }
 0x37c   :  { %6347 = vmatmul.msk.f32.gmra.mxu3 %vm3166_vm10, %v3627_v13  ;;  %v6674_v13 = vld [vmem:[%s9062_s5 + $0x50] sm:$0xff]  }
 0x37d   :  { %v6587_v44 = vunpack.c.h.bf16 %v6674_v13 }
 0x37e   :  { %v3548_v12 = vpop.f32.mrf.mxu2 }
 0x37f   :  { %v8137_v30 = vpop.f32.mrf.mxu3  ;;  %v3410_v7 = vpop.f32.mrf.mxu1  ;;  %4772 = vmatpush.msra.mxu3 %v6587_v44 }
 0x380   :  { %v3856_v59 = vpop.f32.mrf.mxu0  ;;  %v3411_v14 = vadd.f32 %v3410_v7, %v8044_v60  ;;  %v9145_v60 = vmov 0.0  }
 0x381   :  { %4325 = vst.msk [vmem:[#allocation4] sm:$0x1] %vm4324_vm11, %v9145_v60 }
 0x382   :  { %v3596_v29 = vadd.f32 %v3548_v12, %v3411_v14  ;;  %4326 = vst.msk [vmem:[#allocation4 + $0x18] sm:$0x1] %vm4324_vm11, %v9145_v60 }
 0x383   :  { %4327 = vst.msk [vmem:[#allocation4 + $0x30] sm:$0x1] %vm4324_vm11, %v9145_v60 }
 0x384   :  { %4328 = vst.msk [vmem:[#allocation4 + $0x48] sm:$0x1] %vm4324_vm11, %v9145_v60 }
 0x385   :  { %4329 = vst.msk [vmem:[#allocation4 + $0x11] sm:$0x1] %vm4324_vm11, %v9145_v60 }
 0x386   :  { %v3551_v23 = vpop.f32.mrf.mxu2  ;;  %4330 = vst.msk [vmem:[#allocation4 + $0x29] sm:$0x1] %vm4324_vm11, %v9145_v60 }
 0x387   :  { %v3702_v47 = vpop.f32.mrf.mxu3  ;;  %v3413_v19 = vpop.f32.mrf.mxu1  ;;  %4331 = vst.msk [vmem:[#allocation4 + $0x41] sm:$0x1] %vm4324_vm11, %v9145_v60 }
 0x388   :  { %v3750_v5 = vadd.f32 %v3702_v47, %v3596_v29  ;;  %v3859_v57 = vpop.f32.mrf.mxu0  ;;  %v3414_v4 = vadd.f32 %v3413_v19, %v8050_v48  ;;  %4332 = vst.msk [vmem:[#allocation4 + $0x59] sm:$0x1] %vm4324_vm11, %v9145_v60  ;;  %v6582_v29 = vunpack.c.l.bf16 %v6673_v62 }
 0x38a   :  { %v3904_v38 = vadd.f32 %v3856_v59, %v3750_v5  ;;  %v3597_v9 = vadd.f32 %v3551_v23, %v3414_v4  ;;  %v6586_v59 = vunpack.c.l.bf16 %v6674_v13 }
 0x38c   :  { %v3924_v28 = vadd.f32 %v8159_v18, %v3904_v38  ;;  %4773 = vmatpush.msra.mxu3 %v6586_v59 }
 0x38e   :  { %v3940_v22 = vmax.f32 %v3924_v28, 0.0  ;;  %v3554_v48 = vpop.f32.mrf.mxu2  ;;  %4774 = vmatpush.msra.mxu3 %v6583_v37 }
 0x38f   :  { %v3705_v58 = vpop.f32.mrf.mxu3  ;;  %v3416_v21 = vpop.f32.mrf.mxu1 }
 0x390   :  { %v3972_v46 = vrot.slane %v3940_v22, 2  ;;  %v3973_v41 = vrot.slane %v3940_v22, 4  ;;  %v3974_v27 = vrot.slane %v3940_v22, 6  ;;  %v6368_v36 = vrot.slane %v3940_v22, 9  ;;  %v3862_v26 = vpop.f32.mrf.mxu0  ;;  %4775 = vmatpush.msra.mxu3 %v6582_v29 }
 0x391   :  { %v3751_v39 = vadd.f32 %v3705_v58, %v3597_v9  ;;  %v3417_v7 = vadd.f32 %v3416_v21, %v8056_v33  ;;  %v6578_v9 = vunpack.c.l.bf16 %v6672_v51 }
 0x392   :  { %v6369_v49 = vrot.slane %v3972_v46, 9  ;;  %v6370_v12 = vrot.slane %v3973_v41, 9  ;;  %v4260_v40 = vmax.f32 %v3940_v22, %v6368_v36  ;;  %v6371_v55 = vrot.slane %v3974_v27, 9  ;;  %4776 = vmatpush.msra.mxu3 %v6579_v17 }
 0x393   :  { %v3905_v1 = vadd.f32 %v3859_v57, %v3751_v39  ;;  %v3598_v63 = vadd.f32 %v3554_v48, %v3417_v7 }
 0x394   :  { %v4261_v43 = vmax.f32 %v3972_v46, %v6369_v49  ;;  %v4262_v25 = vmax.f32 %v3973_v41, %v6370_v12  ;;  %v4397_v42 = vperm.slane %v4260_v40, 0  ;;  %v4263_v60 = vmax.f32 %v3974_v27, %v6371_v55  ;;  %4777 = vmatpush.msra.mxu3 %v6578_v9 }
 0x395   :  { %v3925_v14 = vadd.f32 %v8159_v18, %v3905_v1 }
 0x396   :  { %v4398_v16 = vperm.slane %v4261_v43, 0  ;;  %v3557_v31 = vpop.f32.mrf.mxu2  ;;  %v4399_v47 = vperm.slane %v4262_v25, 0  ;;  %v4400_v58 = vperm.slane %v4263_v60, 0 }
 0x397   :  { %v3941_v33 = vmax.f32 %v3925_v14, 0.0  ;;  %v3708_v3 = vpop.f32.mrf.mxu3  ;;  %v3419_v23 = vpop.f32.mrf.mxu1 }
 0x398   :  { %v3752_v19 = vadd.f32 %v3708_v3, %v3598_v63  ;;  %v3865_v11 = vpop.f32.mrf.mxu0  ;;  %v4461_v5 = vsel %vm3031_vm3, %v4398_v16, %v4397_v42  ;;  %v3420_v38 = vadd.f32 %v3419_v23, %v8062_v8 }
 0x399   :  { %v3975_v57 = vrot.slane %v3941_v33, 2  ;;  %v3976_v53 = vrot.slane %v3941_v33, 4  ;;  %v3977_v61 = vrot.slane %v3941_v33, 6  ;;  %v6372_v2 = vrot.slane %v3941_v33, 9 }
 0x39a   :  { %v3906_v52 = vadd.f32 %v3862_v26, %v3752_v19  ;;  %v4462_v28 = vsel %vm3033_vm4, %v4399_v47, %v4461_v5  ;;  %v3599_v44 = vadd.f32 %v3557_v31, %v3420_v38 }
 0x39b   :  { %v6373_v6 = vrot.slane %v3975_v57, 9  ;;  %v6374_v4 = vrot.slane %v3976_v53, 9  ;;  %v6375_v24 = vrot.slane %v3977_v61, 9  ;;  %v4264_v22 = vmax.f32 %v3941_v33, %v6372_v2 }
 0x39c   :  { %v3926_v48 = vadd.f32 %v8159_v18, %v3906_v52  ;;  %v4463_v8 = vsel %vm3035_vm5, %v4400_v58, %v4462_v28 }
 0x39d   :  { %v4265_v21 = vmax.f32 %v3975_v57, %v6373_v6  ;;  %v4266_v46 = vmax.f32 %v3976_v53, %v6374_v4  ;;  %v4267_v41 = vmax.f32 %v3977_v61, %v6375_v24  ;;  %v4401_v27 = vperm.slane %v4264_v22, 0 }
 0x39e   :  { %v3942_v36 = vmax.f32 %v3926_v48, 0.0  ;;  %v3560_v26 = vpop.f32.mrf.mxu2 }
 0x39f   :  { %v4402_v13 = vperm.slane %v4265_v21, 0  ;;  %v4403_v39 = vperm.slane %v4266_v46, 0  ;;  %v3711_v49 = vpop.f32.mrf.mxu3  ;;  %v3422_v12 = vpop.f32.mrf.mxu1  ;;  %v4464_v7 = vsel %vm3037_vm6, %v4401_v27, %v4463_v8  ;;  %v4404_v43 = vperm.slane %v4267_v41, 0 }
 0x3a0   :  { %v3978_v40 = vrot.slane %v3942_v36, 2  ;;  %v3979_v1 = vrot.slane %v3942_v36, 4  ;;  %v3980_v59 = vrot.slane %v3942_v36, 6  ;;  %v3868_v55 = vpop.f32.mrf.mxu0  ;;  %v6376_v62 = vrot.slane %v3942_v36, 9 }
 0x3a1   :  { %v4465_v25 = vsel %vm3039_vm7, %v4402_v13, %v4464_v7  ;;  %v3753_v14 = vadd.f32 %v3711_v49, %v3599_v44  ;;  %v3423_v31 = vadd.f32 %v3422_v12, %v8068_v56 }
 0x3a2   :  { %v4466_v37 = vsel %vm3041_vm8, %v4403_v39, %v4465_v25  ;;  %v6377_v16 = vrot.slane %v3978_v40, 9  ;;  %v6378_v63 = vrot.slane %v3979_v1, 9  ;;  %v4268_v33 = vmax.f32 %v3942_v36, %v6376_v62 }
 0x3a3   :  { %v4467_v42 = vsel %vm3043_vm9, %v4404_v43, %v4466_v37  ;;  %v3907_v3 = vadd.f32 %v3865_v11, %v3753_v14  ;;  %v6379_v23 = vrot.slane %v3980_v59, 9  ;;  %v3600_v5 = vadd.f32 %v3560_v26, %v3423_v31 }
 0x3a4   :  { %4526 = vst.msk [vmem:[#allocation4 + $0x1] sm:$0xff] %vm4525_vm12, %v4467_v42  ;;  %v4269_v29 = vmax.f32 %v3978_v40, %v6377_v16  ;;  %v4270_v60 = vmax.f32 %v3979_v1, %v6378_v63  ;;  %v4405_v57 = vperm.slane %v4268_v33, 0 }
 0x3a5   :  { %v3927_v47 = vadd.f32 %v8159_v18, %v3907_v3  ;;  %v4271_v52 = vmax.f32 %v3980_v59, %v6379_v23 }
 0x3a6   :  { %v4406_v19 = vperm.slane %v4269_v29, 0  ;;  %v3563_v51 = vpop.f32.mrf.mxu2  ;;  %v4407_v56 = vperm.slane %v4270_v60, 0 }
 0x3a7   :  { %v3943_v53 = vmax.f32 %v3927_v47, 0.0  ;;  %v3714_v61 = vpop.f32.mrf.mxu3  ;;  %v3425_v2 = vpop.f32.mrf.mxu1  ;;  %v4408_v8 = vperm.slane %v4271_v52, 0 }
 0x3a8   :  { %v3754_v38 = vadd.f32 %v3714_v61, %v3600_v5  ;;  %v3871_v6 = vpop.f32.mrf.mxu0  ;;  %v4468_v11 = vsel %vm3031_vm3, %v4406_v19, %v4405_v57  ;;  %v3426_v21 = vadd.f32 %v3425_v2, %v8074_v34 }
 0x3a9   :  { %v3981_v4 = vrot.slane %v3943_v53, 2  ;;  %v3982_v24 = vrot.slane %v3943_v53, 4  ;;  %v3983_v17 = vrot.slane %v3943_v53, 6  ;;  %v6380_v28 = vrot.slane %v3943_v53, 9 }
 0x3aa   :  { %v3908_v22 = vadd.f32 %v3868_v55, %v3754_v38  ;;  %v4469_v27 = vsel %vm3033_vm4, %v4407_v56, %v4468_v11  ;;  %v3601_v59 = vadd.f32 %v3563_v51, %v3426_v21 }
 0x3ab   :  { %v6381_v48 = vrot.slane %v3981_v4, 9  ;;  %v6382_v9 = vrot.slane %v3982_v24, 9  ;;  %v6383_v58 = vrot.slane %v3983_v17, 9  ;;  %v4558_v46 = vld [vmem:[#allocation4 + $0x1] sm:$0xff]  ;;  %v4272_v36 = vmax.f32 %v3943_v53, %v6380_v28 }
 0x3ac   :  { %v4534_v41 = vld [vmem:[#allocation4] sm:$0xff]  ;;  %v3928_v26 = vadd.f32 %v8159_v18, %v3908_v22  ;;  %6440 = vmatmul.msk.f32.vlgmr.msra.gmra.mxu1 %vm4525_vm12, %v4558_v46  ;;  %v4470_v34 = vsel %vm3035_vm5, %v4408_v8, %v4469_v27 }
 0x3ad   :  { %6448 = vmatmul.msk.f32.vlgmr.msra.gmra.mxu2 %vm4525_vm12, %v4534_v41  ;;  %v4273_v13 = vmax.f32 %v3981_v4, %v6381_v48  ;;  %v4274_v39 = vmax.f32 %v3982_v24, %v6382_v9  ;;  %v4275_v44 = vmax.f32 %v3983_v17, %v6383_v58  ;;  %v4409_v49 = vperm.slane %v4272_v36, 0 }
 0x3ae   :  { %v3944_v12 = vmax.f32 %v3928_v26, 0.0  ;;  %v3566_v7 = vpop.f32.mrf.mxu2 }
 0x3af   :  { %v4410_v40 = vperm.slane %v4273_v13, 0  ;;  %v4411_v1 = vperm.slane %v4274_v39, 0  ;;  %v3717_v55 = vpop.f32.mrf.mxu3  ;;  %v3428_v43 = vpop.f32.mrf.mxu1  ;;  %v4471_v25 = vsel %vm3037_vm6, %v4409_v49, %v4470_v34  ;;  %v4412_v63 = vperm.slane %v4275_v44, 0 }
 0x3b0   :  { %v3984_v62 = vrot.slane %v3944_v12, 2  ;;  %v3985_v14 = vrot.slane %v3944_v12, 4  ;;  %v3986_v37 = vrot.slane %v3944_v12, 6  ;;  %v3874_v16 = vpop.f32.mrf.mxu0  ;;  %v6384_v42 = vrot.slane %v3944_v12, 9 }
 0x3b1   :  { %v4472_v31 = vsel %vm3039_vm7, %v4410_v40, %v4471_v25  ;;  %v3755_v33 = vadd.f32 %v3717_v55, %v3601_v59  ;;  %v3429_v60 = vadd.f32 %v3428_v43, %v8080_v35 }
 0x3b2   :  { %v4473_v3 = vsel %vm3041_vm8, %v4411_v1, %v4472_v31  ;;  %v6385_v23 = vrot.slane %v3984_v62, 9  ;;  %v6386_v29 = vrot.slane %v3985_v14, 9  ;;  %v4276_v19 = vmax.f32 %v3944_v12, %v6384_v42 }
 0x3b3   :  { %v4474_v47 = vsel %vm3043_vm9, %v4412_v63, %v4473_v3  ;;  %v3909_v51 = vadd.f32 %v3871_v6, %v3755_v33  ;;  %v6387_v5 = vrot.slane %v3986_v37, 9  ;;  %v3602_v56 = vadd.f32 %v3566_v7, %v3429_v60 }
 0x3b4   :  { %4527 = vst.msk [vmem:[#allocation4 + $0x9] sm:$0xff] %vm4525_vm12, %v4474_v47  ;;  %v4277_v57 = vmax.f32 %v3984_v62, %v6385_v23  ;;  %v4278_v53 = vmax.f32 %v3985_v14, %v6386_v29  ;;  %v4413_v38 = vperm.slane %v4276_v19, 0 }
 0x3b5   :  { %v3929_v61 = vadd.f32 %v8159_v18, %v3909_v51  ;;  %v4279_v17 = vmax.f32 %v3986_v37, %v6387_v5 }
 0x3b6   :  { %v4414_v2 = vperm.slane %v4277_v57, 0  ;;  %v3569_v52 = vpop.f32.mrf.mxu2  ;;  %v4415_v35 = vperm.slane %v4278_v53, 0 }
 0x3b7   :  { %v3945_v11 = vmax.f32 %v3929_v61, 0.0  ;;  %v3720_v4 = vpop.f32.mrf.mxu3  ;;  %v3431_v24 = vpop.f32.mrf.mxu1  ;;  %v4416_v7 = vperm.slane %v4279_v17, 0 }
 0x3b8   :  { %v3756_v28 = vadd.f32 %v3720_v4, %v3602_v56  ;;  %v3877_v22 = vpop.f32.mrf.mxu0  ;;  %v4475_v6 = vsel %vm3031_vm3, %v4414_v2, %v4413_v38  ;;  %v3432_v26 = vadd.f32 %v3431_v24, %v8086_v20 }
 0x3b9   :  { %v3987_v48 = vrot.slane %v3945_v11, 2  ;;  %v3988_v9 = vrot.slane %v3945_v11, 4  ;;  %v3989_v58 = vrot.slane %v3945_v11, 6  ;;  %v6388_v21 = vrot.slane %v3945_v11, 9 }
 0x3ba   :  { %v3910_v46 = vadd.f32 %v3874_v16, %v3756_v28  ;;  %v4476_v44 = vsel %vm3033_vm4, %v4415_v35, %v4475_v6  ;;  %v3603_v14 = vadd.f32 %v3569_v52, %v3432_v26 }
 0x3bb   :  { %v6389_v41 = vrot.slane %v3987_v48, 9  ;;  %v6390_v27 = vrot.slane %v3988_v9, 9  ;;  %v6391_v36 = vrot.slane %v3989_v58, 9  ;;  %v4559_v8 = vld [vmem:[#allocation4 + $0x9] sm:$0xff]  ;;  %v4280_v49 = vmax.f32 %v3945_v11, %v6388_v21 }
 0x3bc   :  { %v4535_v13 = vld [vmem:[#allocation4 + $0x8] sm:$0xff]  ;;  %v3930_v12 = vadd.f32 %v8159_v18, %v3910_v46  ;;  %6441 = vmatmul.msk.f32.gmra.mxu1 %vm4525_vm12, %v4559_v8  ;;  %v4477_v62 = vsel %vm3035_vm5, %v4416_v7, %v4476_v44 }
 0x3bd   :  { %v4713_v39 = vld [vmem:[#allocation4 + $0x2] sm:$0xff]  ;;  %6449 = vmatmul.msk.f32.gmra.mxu2 %vm4525_vm12, %v4535_v13  ;;  %v4281_v34 = vmax.f32 %v3987_v48, %v6389_v41  ;;  %v4282_v40 = vmax.f32 %v3988_v9, %v6390_v27  ;;  %v4283_v1 = vmax.f32 %v3989_v58, %v6391_v36  ;;  %v4417_v59 = vperm.slane %v4280_v49, 0  ;;  %v4714_v11 = vld [vmem:[#allocation4 + $0xa] sm:$0xff] }
 0x3be   :  { %6464 = vmatmul.msk.f32.vlgmr.msra.gmra.mxu3 %vm4525_vm12, %v4713_v39  ;;  %v3946_v20 = vmax.f32 %v3930_v12, 0.0  ;;  %v3572_v55 = vpop.f32.mrf.mxu2 }
 0x3bf   :  { %v4418_v43 = vperm.slane %v4281_v34, 0  ;;  %v4419_v25 = vperm.slane %v4282_v40, 0  ;;  %v3723_v37 = vpop.f32.mrf.mxu3  ;;  %v3434_v16 = vpop.f32.mrf.mxu1  ;;  %v4478_v63 = vsel %vm3037_vm6, %v4417_v59, %v4477_v62  ;;  %v4420_v23 = vperm.slane %v4283_v1, 0 }
 0x3c0   :  { %v3990_v31 = vrot.slane %v3946_v20, 2  ;;  %v3991_v42 = vrot.slane %v3946_v20, 4  ;;  %v3992_v33 = vrot.slane %v3946_v20, 6  ;;  %v3880_v3 = vpop.f32.mrf.mxu0  ;;  %v6392_v60 = vrot.slane %v3946_v20, 9 }
 0x3c1   :  { %v4479_v29 = vsel %vm3039_vm7, %v4418_v43, %v4478_v63  ;;  %v3757_v47 = vadd.f32 %v3723_v37, %v3603_v14  ;;  %v3435_v57 = vadd.f32 %v3434_v16, %v8092_v45 }
 0x3c2   :  { %v4480_v19 = vsel %vm3041_vm8, %v4419_v25, %v4479_v29  ;;  %v6393_v51 = vrot.slane %v3990_v31, 9  ;;  %v6394_v5 = vrot.slane %v3991_v42, 9  ;;  %v4284_v61 = vmax.f32 %v3946_v20, %v6392_v60 }
 0x3c3   :  { %v4481_v53 = vsel %vm3043_vm9, %v4420_v23, %v4480_v19  ;;  %v3911_v2 = vadd.f32 %v3877_v22, %v3757_v47  ;;  %v6395_v52 = vrot.slane %v3992_v33, 9  ;;  %v3604_v35 = vadd.f32 %v3572_v55, %v3435_v57 }
 0x3c4   :  { %4528 = vst.msk [vmem:[#allocation4 + $0x19] sm:$0xff] %vm4525_vm12, %v4481_v53  ;;  %v4285_v56 = vmax.f32 %v3990_v31, %v6393_v51  ;;  %v4286_v38 = vmax.f32 %v3991_v42, %v6394_v5  ;;  %v4421_v28 = vperm.slane %v4284_v61, 0 }
 0x3c5   :  { %v3931_v4 = vadd.f32 %v8159_v18, %v3911_v2  ;;  %v4287_v9 = vmax.f32 %v3992_v33, %v6395_v52 }
 0x3c6   :  { %6465 = vmatmul.msk.f32.gmra.mxu3 %vm4525_vm12, %v4714_v11  ;;  %v4422_v24 = vperm.slane %v4285_v56, 0  ;;  %v3575_v17 = vpop.f32.mrf.mxu2  ;;  %v4423_v58 = vperm.slane %v4286_v38, 0 }
 0x3c7   :  { %v3947_v6 = vmax.f32 %v3931_v4, 0.0  ;;  %v3726_v45 = vpop.f32.mrf.mxu3  ;;  %v3437_v48 = vpop.f32.mrf.mxu1  ;;  %v4424_v59 = vperm.slane %v4287_v9, 0 }
 0x3c8   :  { %v3758_v22 = vadd.f32 %v3726_v45, %v3604_v35  ;;  %v3883_v21 = vpop.f32.mrf.mxu0  ;;  %v4482_v46 = vsel %vm3031_vm3, %v4422_v24, %v4421_v28  ;;  %v3438_v49 = vadd.f32 %v3437_v48, %v8098_v10 }
 0x3c9   :  { %v3993_v41 = vrot.slane %v3947_v6, 2  ;;  %v3994_v27 = vrot.slane %v3947_v6, 4  ;;  %v3995_v36 = vrot.slane %v3947_v6, 6  ;;  %v6396_v26 = vrot.slane %v3947_v6, 9 }
 0x3ca   :  { %v3912_v8 = vadd.f32 %v3880_v3, %v3758_v22  ;;  %v4483_v34 = vsel %vm3033_vm4, %v4423_v58, %v4482_v46  ;;  %v3605_v63 = vadd.f32 %v3575_v17, %v3438_v49 }
 0x3cb   :  { %v6397_v13 = vrot.slane %v3993_v41, 9  ;;  %v6398_v39 = vrot.slane %v3994_v27, 9  ;;  %v6399_v44 = vrot.slane %v3995_v36, 9  ;;  %v4560_v12 = vld [vmem:[#allocation4 + $0x19] sm:$0xff]  ;;  %v4288_v40 = vmax.f32 %v3947_v6, %v6396_v26 }
 0x3cc   :  { %v4536_v7 = vld [vmem:[#allocation4 + $0x18] sm:$0xff]  ;;  %v3932_v1 = vadd.f32 %v8159_v18, %v3912_v8  ;;  %6442 = vmatmul.msk.f32.gmra.mxu1 %vm4525_vm12, %v4560_v12  ;;  %v4484_v10 = vsel %vm3035_vm5, %v4424_v59, %v4483_v34 }
 0x3cd   :  { %6450 = vmatmul.msk.f32.gmra.mxu2 %vm4525_vm12, %v4536_v7  ;;  %v4289_v20 = vmax.f32 %v3993_v41, %v6397_v13  ;;  %v4290_v55 = vmax.f32 %v3994_v27, %v6398_v39  ;;  %v4291_v43 = vmax.f32 %v3995_v36, %v6399_v44  ;;  %v4425_v25 = vperm.slane %v4288_v40, 0 }
 0x3ce   :  { %v3948_v62 = vmax.f32 %v3932_v1, 0.0  ;;  %v3578_v14 = vpop.f32.mrf.mxu2 }
 0x3cf   :  { %v4426_v37 = vperm.slane %v4289_v20, 0  ;;  %v4427_v16 = vperm.slane %v4290_v55, 0  ;;  %v3729_v31 = vpop.f32.mrf.mxu3  ;;  %v3440_v42 = vpop.f32.mrf.mxu1  ;;  %v4485_v33 = vsel %vm3037_vm6, %v4425_v25, %v4484_v10  ;;  %v4428_v47 = vperm.slane %v4291_v43, 0 }
 0x3d0   :  { %v3996_v3 = vrot.slane %v3948_v62, 2  ;;  %v3997_v23 = vrot.slane %v3948_v62, 4  ;;  %v3998_v29 = vrot.slane %v3948_v62, 6  ;;  %v3886_v60 = vpop.f32.mrf.mxu0  ;;  %v6400_v51 = vrot.slane %v3948_v62, 9 }
 0x3d1   :  { %v4486_v19 = vsel %vm3039_vm7, %v4426_v37, %v4485_v33  ;;  %v3759_v5 = vadd.f32 %v3729_v31, %v3605_v63  ;;  %v3441_v2 = vadd.f32 %v3440_v42, %v8104_v32 }
 0x3d2   :  { %v4487_v57 = vsel %vm3041_vm8, %v4427_v16, %v4486_v19  ;;  %v6401_v53 = vrot.slane %v3996_v3, 9  ;;  %v6402_v61 = vrot.slane %v3997_v23, 9  ;;  %v4292_v56 = vmax.f32 %v3948_v62, %v6400_v51 }
 0x3d3   :  { %v4488_v52 = vsel %vm3043_vm9, %v4428_v47, %v4487_v57  ;;  %v3913_v38 = vadd.f32 %v3883_v21, %v3759_v5  ;;  %v6403_v11 = vrot.slane %v3998_v29, 9  ;;  %v3606_v6 = vadd.f32 %v3578_v14, %v3441_v2 }
 0x3d4   :  { %4529 = vst.msk [vmem:[#allocation4 + $0x21] sm:$0xff] %vm4525_vm12, %v4488_v52  ;;  %v4293_v4 = vmax.f32 %v3996_v3, %v6401_v53  ;;  %v4294_v24 = vmax.f32 %v3997_v23, %v6402_v61  ;;  %v4429_v45 = vperm.slane %v4292_v56, 0 }
 0x3d5   :  { %v3933_v17 = vadd.f32 %v8159_v18, %v3913_v38  ;;  %v4295_v22 = vmax.f32 %v3998_v29, %v6403_v11 }
 0x3d6   :  { %v4430_v35 = vperm.slane %v4293_v4, 0  ;;  %v3581_v28 = vpop.f32.mrf.mxu2  ;;  %v4431_v32 = vperm.slane %v4294_v24, 0 }
 0x3d7   :  { %v3949_v48 = vmax.f32 %v3933_v17, 0.0  ;;  %v3732_v9 = vpop.f32.mrf.mxu3  ;;  %v3443_v58 = vpop.f32.mrf.mxu1  ;;  %v4432_v55 = vperm.slane %v4295_v22, 0 }
 0x3d8   :  { %v3760_v46 = vadd.f32 %v3732_v9, %v3606_v6  ;;  %v4489_v41 = vsel %vm3031_vm3, %v4430_v35, %v4429_v45  ;;  %v3889_v13 = vpop.f32.mrf.mxu0  ;;  %v3444_v12 = vadd.f32 %v3443_v58, %v8110_v0 }
 0x3d9   :  { %v3999_v21 = vrot.slane %v3949_v48, 2  ;;  %v4000_v27 = vrot.slane %v3949_v48, 4  ;;  %v4001_v36 = vrot.slane %v3949_v48, 6  ;;  %v6404_v26 = vrot.slane %v3949_v48, 9 }
 0x3da   :  { %v3914_v8 = vadd.f32 %v3886_v60, %v3760_v46  ;;  %v4490_v1 = vsel %vm3033_vm4, %v4431_v32, %v4489_v41  ;;  %v3607_v63 = vadd.f32 %v3581_v28, %v3444_v12 }
 0x3db   :  { %v6405_v39 = vrot.slane %v3999_v21, 9  ;;  %v6406_v44 = vrot.slane %v4000_v27, 9  ;;  %v6407_v49 = vrot.slane %v4001_v36, 9  ;;  %v4561_v7 = vld [vmem:[#allocation4 + $0x21] sm:$0xff]  ;;  %v4296_v59 = vmax.f32 %v3949_v48, %v6404_v26 }
 0x3dc   :  { %v4537_v34 = vld [vmem:[#allocation4 + $0x20] sm:$0xff]  ;;  %v3934_v20 = vadd.f32 %v8159_v18, %v3914_v8  ;;  %6443 = vmatmul.msk.f32.gmra.mxu1 %vm4525_vm12, %v4561_v7  ;;  %v4491_v10 = vsel %vm3035_vm5, %v4432_v55, %v4490_v1 }
 0x3dd   :  { %v4715_v40 = vld [vmem:[#allocation4 + $0x1a] sm:$0xff]  ;;  %6451 = vmatmul.msk.f32.gmra.mxu2 %vm4525_vm12, %v4537_v34  ;;  %v4297_v43 = vmax.f32 %v3999_v21, %v6405_v39  ;;  %v4298_v25 = vmax.f32 %v4000_v27, %v6406_v44  ;;  %v4299_v62 = vmax.f32 %v4001_v36, %v6407_v49  ;;  %v4433_v14 = vperm.slane %v4296_v59, 0  ;;  %v4716_v35 = vld [vmem:[#allocation4 + $0x22] sm:$0xff] }
 0x3de   :  { %6466 = vmatmul.msk.f32.gmra.mxu3 %vm4525_vm12, %v4715_v40  ;;  %v3950_v0 = vmax.f32 %v3934_v20, 0.0  ;;  %v3584_v60 = vpop.f32.mrf.mxu2 }
 0x3df   :  { %v4434_v37 = vperm.slane %v4297_v43, 0  ;;  %v4435_v16 = vperm.slane %v4298_v25, 0  ;;  %v3735_v31 = vpop.f32.mrf.mxu3  ;;  %v3446_v42 = vpop.f32.mrf.mxu1  ;;  %v4492_v33 = vsel %vm3037_vm6, %v4433_v14, %v4491_v10  ;;  %v4436_v47 = vperm.slane %v4299_v62, 0 }
 0x3e0   :  { %v4002_v3 = vrot.slane %v3950_v0, 2  ;;  %v4003_v23 = vrot.slane %v3950_v0, 4  ;;  %v4004_v29 = vrot.slane %v3950_v0, 6  ;;  %v6408_v51 = vrot.slane %v3950_v0, 9  ;;  %v3892_v17 = vpop.f32.mrf.mxu0 }
 0x3e1   :  { %v4493_v19 = vsel %vm3039_vm7, %v4434_v37, %v4492_v33  ;;  %v3761_v5 = vadd.f32 %v3735_v31, %v3607_v63  ;;  %v3447_v2 = vadd.f32 %v3446_v42, %v8118_v50 }
 0x3e2   :  { %v4494_v57 = vsel %vm3041_vm8, %v4435_v16, %v4493_v19  ;;  %v6409_v53 = vrot.slane %v4002_v3, 9  ;;  %v6410_v61 = vrot.slane %v4003_v23, 9  ;;  %v4300_v56 = vmax.f32 %v3950_v0, %v6408_v51 }
 0x3e3   :  { %v4495_v52 = vsel %vm3043_vm9, %v4436_v47, %v4494_v57  ;;  %v3915_v38 = vadd.f32 %v3889_v13, %v3761_v5  ;;  %v6411_v11 = vrot.slane %v4004_v29, 9  ;;  %v3608_v45 = vadd.f32 %v3584_v60, %v3447_v2 }
 0x3e4   :  { %4530 = vst.msk [vmem:[#allocation4 + $0x31] sm:$0xff] %vm4525_vm12, %v4495_v52  ;;  %v4301_v4 = vmax.f32 %v4002_v3, %v6409_v53  ;;  %v4302_v24 = vmax.f32 %v4003_v23, %v6410_v61  ;;  %v4437_v48 = vperm.slane %v4300_v56, 0 }
 0x3e5   :  { %v3935_v28 = vadd.f32 %v8159_v18, %v3915_v38  ;;  %v4303_v22 = vmax.f32 %v4004_v29, %v6411_v11 }
 0x3e6   :  { %6467 = vmatmul.msk.f32.gmra.mxu3 %vm4525_vm12, %v4716_v35  ;;  %v4438_v6 = vperm.slane %v4301_v4, 0  ;;  %v4439_v32 = vperm.slane %v4302_v24, 0  ;;  %v3587_v8 = vpop.f32.mrf.mxu2 }
 0x3e7   :  { %v3951_v9 = vmax.f32 %v3935_v28, 0.0  ;;  %v3738_v50 = vpop.f32.mrf.mxu3  ;;  %v3449_v58 = vpop.f32.mrf.mxu1  ;;  %v4440_v20 = vperm.slane %v4303_v22, 0 }
 0x3e8   :  { %v3762_v46 = vadd.f32 %v3738_v50, %v3608_v45  ;;  %v4496_v41 = vsel %vm3031_vm3, %v4438_v6, %v4437_v48  ;;  %v3450_v12 = vadd.f32 %v3449_v58, %v8120_v15  ;;  %v3895_v0 = vpop.f32.mrf.mxu0 }
 0x3e9   :  { %v4005_v21 = vrot.slane %v3951_v9, 2  ;;  %v4006_v27 = vrot.slane %v3951_v9, 4  ;;  %v4007_v36 = vrot.slane %v3951_v9, 6  ;;  %v6412_v26 = vrot.slane %v3951_v9, 9 }
 0x3ea   :  { %v3916_v13 = vadd.f32 %v3892_v17, %v3762_v46  ;;  %v4497_v40 = vsel %vm3033_vm4, %v4439_v32, %v4496_v41  ;;  %v3609_v16 = vadd.f32 %v3587_v8, %v3450_v12 }
 0x3eb   :  { %v6413_v39 = vrot.slane %v4005_v21, 9  ;;  %v6414_v44 = vrot.slane %v4006_v27, 9  ;;  %v6415_v49 = vrot.slane %v4007_v36, 9  ;;  %v4562_v7 = vld [vmem:[#allocation4 + $0x31] sm:$0xff]  ;;  %v4304_v1 = vmax.f32 %v3951_v9, %v6412_v26 }
 0x3ec   :  { %v4538_v34 = vld [vmem:[#allocation4 + $0x30] sm:$0xff]  ;;  %v3936_v59 = vadd.f32 %v8159_v18, %v3916_v13  ;;  %6444 = vmatmul.msk.f32.gmra.mxu1 %vm4525_vm12, %v4562_v7  ;;  %v4498_v15 = vsel %vm3035_vm5, %v4440_v20, %v4497_v40 }
 0x3ed   :  { %6452 = vmatmul.msk.f32.gmra.mxu2 %vm4525_vm12, %v4538_v34  ;;  %v4305_v55 = vmax.f32 %v4005_v21, %v6413_v39  ;;  %v4306_v43 = vmax.f32 %v4006_v27, %v6414_v44  ;;  %v4307_v25 = vmax.f32 %v4007_v36, %v6415_v49  ;;  %v4441_v62 = vperm.slane %v4304_v1, 0 }
 0x3ee   :  { %v3952_v14 = vmax.f32 %v3936_v59, 0.0  ;;  %v3590_v4 = vpop.f32.mrf.mxu2 }
 0x3ef   :  { %v4442_v10 = vperm.slane %v4305_v55, 0  ;;  %v4443_v37 = vperm.slane %v4306_v43, 0  ;;  %v3741_v63 = vpop.f32.mrf.mxu3  ;;  %v3452_v31 = vpop.f32.mrf.mxu1  ;;  %v4499_v42 = vsel %vm3037_vm6, %v4441_v62, %v4498_v15  ;;  %v4444_v29 = vperm.slane %v4307_v25, 0 }
 0x3f0   :  { %v4008_v33 = vrot.slane %v3952_v14, 2  ;;  %v4009_v3 = vrot.slane %v3952_v14, 4  ;;  %v4010_v23 = vrot.slane %v3952_v14, 6  ;;  %v6416_v47 = vrot.slane %v3952_v14, 9 }
 0x3f1   :  { %v4500_v60 = vsel %vm3039_vm7, %v4442_v10, %v4499_v42  ;;  %v3763_v19 = vadd.f32 %v3741_v63, %v3609_v16  ;;  %v3453_v53 = vadd.f32 %v3452_v31, %v8116_v54  ;;  %v3898_v54 = vpop.f32.mrf.mxu0 }
 0x3f2   :  { %v4501_v51 = vsel %vm3041_vm8, %v4443_v37, %v4500_v60  ;;  %v6417_v5 = vrot.slane %v4008_v33, 9  ;;  %v6418_v57 = vrot.slane %v4009_v3, 9  ;;  %v4308_v2 = vmax.f32 %v3952_v14, %v6416_v47 }
 0x3f3   :  { %v4502_v61 = vsel %vm3043_vm9, %v4444_v29, %v4501_v51  ;;  %v3917_v52 = vadd.f32 %v3895_v0, %v3763_v19  ;;  %v6419_v56 = vrot.slane %v4010_v23, 9  ;;  %v3610_v35 = vadd.f32 %v3590_v4, %v3453_v53 }
 0x3f4   :  { %4531 = vst.msk [vmem:[#allocation4 + $0x39] sm:$0xff] %vm4525_vm12, %v4502_v61  ;;  %v4309_v38 = vmax.f32 %v4008_v33, %v6417_v5  ;;  %v4310_v11 = vmax.f32 %v4009_v3, %v6418_v57  ;;  %v4445_v28 = vperm.slane %v4308_v2, 0 }
 0x3f5   :  { %v3937_v24 = vadd.f32 %v8159_v18, %v3917_v52  ;;  %v4311_v48 = vmax.f32 %v4010_v23, %v6419_v56 }
 0x3f6   :  { %v4446_v17 = vperm.slane %v4309_v38, 0  ;;  %v4447_v9 = vperm.slane %v4310_v11, 0 }
 0x3f7   :  { %v3953_v6 = vmax.f32 %v3937_v24, 0.0  ;;  %v3744_v45 = vpop.f32.mrf.mxu3  ;;  %v3455_v58 = vpop.f32.mrf.mxu1  ;;  %v4448_v40 = vperm.slane %v4311_v48, 0 }
 0x3f8   :  { %v3764_v50 = vadd.f32 %v3744_v45, %v3610_v35  ;;  %v4503_v22 = vsel %vm3031_vm3, %v4446_v17, %v4445_v28  ;;  %v3456_v13 = vadd.f32 %v3455_v58, %v8137_v30  ;;  %v3593_v30 = vpop.f32.mrf.mxu2 }
 0x3f9   :  { %v4011_v32 = vrot.slane %v3953_v6, 2  ;;  %v4012_v46 = vrot.slane %v3953_v6, 4  ;;  %v4013_v41 = vrot.slane %v3953_v6, 6  ;;  %v6420_v21 = vrot.slane %v3953_v6, 9  ;;  %v3901_v47 = vpop.f32.mrf.mxu0 }
 0x3fa   :  { %v3918_v27 = vadd.f32 %v3898_v54, %v3764_v50  ;;  %v4504_v12 = vsel %vm3033_vm4, %v4447_v9, %v4503_v22  ;;  %v3611_v0 = vadd.f32 %v3593_v30, %v3456_v13  ;;  %v5354_v30 = vld [vmem:[#allocation7 + $0x378] sm:$0xff] }
 0x3fb   :  { %v6421_v36 = vrot.slane %v4011_v32, 9  ;;  %v6422_v26 = vrot.slane %v4012_v46, 9  ;;  %v6423_v8 = vrot.slane %v4013_v41, 9  ;;  %v4563_v39 = vld [vmem:[#allocation4 + $0x39] sm:$0xff]  ;;  %v4312_v7 = vmax.f32 %v3953_v6, %v6420_v21 }
 0x3fc   :  { %v4539_v44 = vld [vmem:[#allocation4 + $0x38] sm:$0xff]  ;;  %v3938_v34 = vadd.f32 %v8159_v18, %v3918_v27  ;;  %6445 = vmatmul.msk.f32.gmra.mxu1 %vm4525_vm12, %v4563_v39  ;;  %v4505_v25 = vsel %vm3035_vm5, %v4448_v40, %v4504_v12 }
 0x3fd   :  { %v4717_v49 = vld [vmem:[#allocation4 + $0x32] sm:$0xff]  ;;  %6453 = vmatmul.msk.f32.gmra.mxu2 %vm4525_vm12, %v4539_v44  ;;  %v4313_v1 = vmax.f32 %v4011_v32, %v6421_v36  ;;  %v4314_v59 = vmax.f32 %v4012_v46, %v6422_v26  ;;  %v4315_v20 = vmax.f32 %v4013_v41, %v6423_v8  ;;  %v4449_v55 = vperm.slane %v4312_v7, 0  ;;  %v4718_v2 = vld [vmem:[#allocation4 + $0x3a] sm:$0xff] }
 0x3fe   :  { %6468 = vmatmul.msk.f32.gmra.mxu3 %vm4525_vm12, %v4717_v49  ;;  %v3954_v43 = vmax.f32 %v3938_v34, 0.0 }
 0x3ff   :  { %v4450_v62 = vperm.slane %v4313_v1, 0  ;;  %v4451_v14 = vperm.slane %v4314_v59, 0  ;;  %v3747_v15 = vpop.f32.mrf.mxu3  ;;  %v4506_v10 = vsel %vm3037_vm6, %v4449_v55, %v4505_v25  ;;  %v4452_v31 = vperm.slane %v4315_v20, 0 }
 0x400   :  { %v4014_v37 = vrot.slane %v3954_v43, 2  ;;  %v4015_v16 = vrot.slane %v3954_v43, 4  ;;  %v4016_v63 = vrot.slane %v3954_v43, 6  ;;  %v6424_v33 = vrot.slane %v3954_v43, 9 }
 0x401   :  { %v4507_v42 = vsel %vm3039_vm7, %v4450_v62, %v4506_v10  ;;  %v3765_v3 = vadd.f32 %v3747_v15, %v3611_v0  ;;  %v5593_v25 = vunpack.c.l.bf16 %v5354_v30 }
 0x402   :  { %v4508_v23 = vsel %vm3041_vm8, %v4451_v14, %v4507_v42  ;;  %v6425_v29 = vrot.slane %v4014_v37, 9  ;;  %v6426_v60 = vrot.slane %v4015_v16, 9  ;;  %v4316_v51 = vmax.f32 %v3954_v43, %v6424_v33  ;;  %v8311_v14 = vld [vmem:[%s9063_s6] ss:$0 sm:$0xff]  ;;  %v8314_v42 = vld [vmem:[#allocation7 + $0x178] sm:$0xff] }
 0x403   :  { %v4509_v19 = vsel %vm3043_vm9, %v4452_v31, %v4508_v23  ;;  %v3919_v5 = vadd.f32 %v3901_v47, %v3765_v3  ;;  %v6427_v57 = vrot.slane %v4016_v63, 9  ;;  %5780 = vmatpush.msra.mxu0 %v5593_v25  ;;  %v5274_v31 = vld [vmem:[#allocation7 + $0xf8] sm:$0xff]  ;;  %v5465_v23 = vunpack.c.l.bf16 %v8314_v42  ;;  %v5273_v47 = vld [vmem:[#allocation7 + $0xf0] sm:$0xff] }
 0x404   :  { %4532 = vst.msk [vmem:[#allocation4 + $0x49] sm:$0xff] %vm4525_vm12, %v4509_v19  ;;  %v4317_v53 = vmax.f32 %v4014_v37, %v6425_v29  ;;  %v4318_v61 = vmax.f32 %v4015_v16, %v6426_v60  ;;  %v4453_v38 = vperm.slane %v4316_v51, 0  ;;  %v5433_v3 = vunpack.c.l.bf16 %v5274_v31  ;;  %v5257_v60 = vld [vmem:[#allocation7 + $0x70] sm:$0xff] }
 0x405   :  { %v3939_v52 = vadd.f32 %v8159_v18, %v3919_v5  ;;  %v4319_v4 = vmax.f32 %v4016_v63, %v6427_v57  ;;  %v5258_v63 = vld [vmem:[#allocation7 + $0x78] sm:$0xff]  ;;  %v8317_v19 = vld [vmem:[#allocation7 + $0x170] sm:$0xff]  ;;  %v5399_v5 = vunpack.c.l.bf16 %v5257_v60  ;;  %v5431_v57 = vunpack.c.l.bf16 %v5273_v47  ;;  %5700 = vmatpush.msrb.mxu3 %v5465_v23  ;;  %v5267_v23 = vld [vmem:[#allocation7 + $0xc0] sm:$0xff] }
 0x406   :  { %6469 = vmatmul.msk.f32.gmra.mxu3 %vm4525_vm12, %v4718_v2  ;;  %v4454_v56 = vperm.slane %v4317_v53, 0  ;;  %v4455_v24 = vperm.slane %v4318_v61, 0  ;;  %v5401_v33 = vunpack.c.l.bf16 %v5258_v63  ;;  %5680 = vmatpush.msrb.mxu2 %v5433_v3  ;;  %v5463_v53 = vunpack.c.l.bf16 %v8317_v19  ;;  %v5256_v61 = vld [vmem:[#allocation7 + $0x68] sm:$0xff]  ;;  %v8343_v25 = vld [vmem:[#allocation7 + $0x150] sm:$0xff]  ;;  %v5251_v3 = vld [vmem:[#allocation7 + $0x40] sm:$0xff] }
 0x407   :  { %v3955_v11 = vmax.f32 %v3939_v52, 0.0  ;;  %v4456_v32 = vperm.slane %v4319_v4, 0  ;;  %v5272_v2 = vld [vmem:[#allocation7 + $0xe8] sm:$0xff]  ;;  %v5455_v60 = vunpack.c.l.bf16 %v8343_v25 }
 0x408   :  { %v4510_v17 = vsel %vm3031_vm3, %v4454_v56, %v4453_v38  ;;  %5660 = vmatpush.msrb.mxu1 %v5401_v33  ;;  %v8322_v52 = vld [vmem:[#allocation7 + $0x168] sm:$0xff]  ;;  %5681 = vmatpush.msrb.mxu2 %v5431_v57  ;;  %v5429_v4 = vunpack.c.l.bf16 %v5272_v2 }
 0x409   :  { %v4017_v35 = vrot.slane %v3955_v11, 2  ;;  %v4018_v28 = vrot.slane %v3955_v11, 4  ;;  %v4019_v6 = vrot.slane %v3955_v11, 6  ;;  %v6428_v45 = vrot.slane %v3955_v11, 9  ;;  %5701 = vmatpush.msrb.mxu3 %v5463_v53  ;;  %v8353_v33 = vld [vmem:[#allocation7 + $0x148] sm:$0xff] }
 0x40a   :  { %v4511_v18 = vsel %vm3033_vm4, %v4455_v24, %v4510_v17  ;;  %5661 = vmatpush.msrb.mxu1 %v5399_v5  ;;  %v5461_v24 = vunpack.c.l.bf16 %v8322_v52  ;;  %v5255_v17 = vld [vmem:[#allocation7 + $0x60] sm:$0xff]  ;;  %5682 = vmatpush.msrb.mxu2 %v5429_v4 }
 0x40b   :  { %v6429_v48 = vrot.slane %v4017_v35, 9  ;;  %v6430_v9 = vrot.slane %v4018_v28, 9  ;;  %v6431_v54 = vrot.slane %v4019_v6, 9  ;;  %v4564_v50 = vld [vmem:[#allocation4 + $0x49] sm:$0xff]  ;;  %v4320_v22 = vmax.f32 %v3955_v11, %v6428_v45  ;;  %v8358_v5 = vld [vmem:[#allocation7 + $0x140] sm:$0xff] }
 0x40c   :  { %v4540_v58 = vld [vmem:[#allocation4 + $0x48] sm:$0xff]  ;;  %6446 = vmatmul.msk.f32.gmra.mxu1 %vm4525_vm12, %v4564_v50  ;;  %v4512_v36 = vsel %vm3035_vm5, %v4456_v32, %v4511_v18  ;;  %v5397_v11 = vunpack.c.l.bf16 %v5256_v61  ;;  %5702 = vmatpush.msrb.mxu3 %v5461_v24 }
 0x40d   :  { %6454 = vmatmul.msk.f32.gmra.mxu2 %vm4525_vm12, %v4540_v58  ;;  %v4321_v46 = vmax.f32 %v4017_v35, %v6429_v48  ;;  %v4322_v41 = vmax.f32 %v4018_v28, %v6430_v9  ;;  %v4323_v21 = vmax.f32 %v4019_v6, %v6431_v54  ;;  %v4457_v27 = vperm.slane %v4320_v22, 0  ;;  %v5271_v35 = vld [vmem:[#allocation7 + $0xe0] sm:$0xff] }
 0x40e   :  { %v8326_v28 = vld [vmem:[#allocation7 + $0x160] sm:$0xff]  ;;  %v6822_v9 = vmov 572653568   ;;  %5662 = vmatpush.msrb.mxu1 %v5397_v11  ;;  %v5395_v22 = vunpack.c.l.bf16 %v5255_v17  ;;  %v5427_v32 = vunpack.c.l.bf16 %v5271_v35  ;;  %v5266_v11 = vld [vmem:[#allocation7 + $0xb8] sm:$0xff]  ;;  %v5453_v17 = vunpack.c.l.bf16 %v8353_v33 }
 0x40f   :  { %v4458_v26 = vperm.slane %v4321_v46, 0  ;;  %v4459_v8 = vperm.slane %v4322_v41, 0  ;;  %v4513_v13 = vsel %vm3037_vm6, %v4457_v27, %v4512_v36  ;;  %v4460_v39 = vperm.slane %v4323_v21, 0  ;;  %v5254_v41 = vld [vmem:[#allocation7 + $0x58] sm:$0xff] }
 0x410   :  { %v5020_v54 = vunpack.c.l.s4 %v6822_v9  ;;  %v5459_v46 = vunpack.c.l.bf16 %v8326_v28  ;;  %v5270_v21 = vld [vmem:[#allocation7 + $0xd8] sm:$0xff]  ;;  %5663 = vmatpush.msrb.mxu1 %v5395_v22  ;;  %5683 = vmatpush.msrb.mxu2 %v5427_v32  ;;  %v5387_v35 = vunpack.c.l.bf16 %v5251_v3 }
 0x411   :  { %v4514_v44 = vsel %vm3039_vm7, %v4458_v26, %v4513_v13  ;;  %v8333_v27 = vld [vmem:[#allocation7 + $0x158] sm:$0xff]  ;;  %v5393_v13 = vunpack.c.l.bf16 %v5254_v41 }
 0x412   :  { %v4515_v49 = vsel %vm3041_vm8, %v4459_v8, %v4514_v44  ;;  %v5353_v8 = vld [vmem:[#allocation7 + $0x370] sm:$0xff]  ;;  %v5457_v44 = vunpack.c.l.bf16 %v8333_v27  ;;  %5703 = vmatpush.msrb.mxu3 %v5459_v46 }
 0x413   :  { %v4516_v12 = vsel %vm3043_vm9, %v4460_v39, %v4515_v49  ;;  %v5425_v39 = vunpack.c.l.bf16 %v5270_v21  ;;  %v5253_v49 = vld [vmem:[#allocation7 + $0x50] sm:$0xff]  ;;  %5664 = vmatpush.msrb.mxu1 %v5393_v13  ;;  %v5417_v21 = vunpack.c.l.bf16 %v5266_v11  ;;  %v5246_v11 = vld [vmem:[#allocation7 + $0x18] sm:$0xff] }
 0x414   :  { %4533 = vst.msk [vmem:[#allocation4 + $0x51] sm:$0xff] %vm4525_vm12, %v4516_v12  ;;  %v5269_v12 = vld [vmem:[#allocation7 + $0xd0] sm:$0xff]  ;;  %v5391_v30 = vunpack.c.l.bf16 %v5253_v49  ;;  %5704 = vmatpush.msrb.mxu3 %v5457_v44 }
 0x415   :  { %5684 = vmatpush.msrb.mxu2 %v5425_v39 }
 0x416   :  { %5665 = vmatpush.msrb.mxu1 %v5391_v30  ;;  %5705 = vmatpush.msrb.mxu3 %v5455_v60 }
 0x418   :  { %5706 = vmatpush.msrb.mxu3 %v5453_v17 }
 0x41b   :  { %v4565_v7 = vld [vmem:[#allocation4 + $0x51] sm:$0xff] }
 0x41c   :  { %v4541_v34 = vld [vmem:[#allocation4 + $0x50] sm:$0xff]  ;;  %6447 = vmatmul.msk.f32.gmra.mxu1 %vm4525_vm12, %v4565_v7 }
 0x41d   :  { %v4719_v40 = vld [vmem:[#allocation4 + $0x4a] sm:$0xff]  ;;  %6455 = vmatmul.msk.f32.gmra.mxu2 %vm4525_vm12, %v4541_v34  ;;  %v4720_v1 = vld [vmem:[#allocation4 + $0x52] sm:$0xff] }
 0x41e   :  { %6470 = vmatmul.msk.f32.gmra.mxu3 %vm4525_vm12, %v4719_v40 }
 0x426   :  { %6471 = vmatmul.msk.f32.gmra.mxu3 %vm4525_vm12, %v4720_v1 }
 0x429   :  { %v4624_v55 = vpop.f32.mrf.mxu1 }
 0x430   :  { %v4689_v59 = vpop.f32.mrf.mxu2 }
 0x431   :  { %v4690_v43 = vadd.f32 %v4689_v59, %v4624_v55  ;;  %v5591_v55 = vunpack.c.l.bf16 %v5353_v8  ;;  %v8375_v8 = vld [vmem:[#allocation7 + $0x130] sm:$0xff] }
 0x433   :  { %5781 = vmatpush.msra.mxu0 %v5591_v55 }
 0x439   :  { %v4627_v15 = vpop.f32.mrf.mxu1 }
 0x440   :  { %v4692_v0 = vpop.f32.mrf.mxu2 }
 0x441   :  { %v4779_v20 = vpop.f32.mrf.mxu3  ;;  %v4693_v16 = vadd.f32 %v4692_v0, %v4627_v15  ;;  %v5252_v0 = vld [vmem:[#allocation7 + $0x48] sm:$0xff] }
 0x442   :  { %v4803_v62 = vadd.f32 %v4779_v20, %v4690_v43  ;;  %v8341_v20 = vunpack.c.0.s8 %v5020_v54  ;;  %v5423_v43 = vunpack.c.l.bf16 %v5269_v12 }
 0x444   :  { %v4815_v10 = vadd.f32 %v8311_v14, %v4803_v62  ;;  %v5352_v62 = vld [vmem:[#allocation7 + $0x368] sm:$0xff]  ;;  %5685 = vmatpush.msrb.mxu2 %v5423_v43 }
 0x445   :  { %v5589_v47 = vunpack.c.l.bf16 %v5352_v62  ;;  %v8389_v62 = vld [vmem:[#allocation7 + $0x128] sm:$0xff] }
 0x446   :  { %v8319_v51 = vmax.f32 %v4815_v10, 0.0  ;;  %v5268_v10 = vld [vmem:[#allocation7 + $0xc8] sm:$0xff] }
 0x447   :  { %v5421_v2 = vunpack.c.l.bf16 %v5268_v10  ;;  %5782 = vmatpush.msra.mxu0 %v5589_v47  ;;  %v5247_v10 = vld [vmem:[#allocation7 + $0x20] sm:$0xff] }
 0x448   :  { %v4839_v6 = vrot.slane %v8319_v51, 2  ;;  %v4840_v45 = vrot.slane %v8319_v51, 4  ;;  %v4841_v48 = vrot.slane %v8319_v51, 6  ;;  %v6472_v50 = vrot.slane %v8319_v51, 9  ;;  %v8394_v47 = vld [vmem:[#allocation7 + $0x120] sm:$0xff] }
 0x449   :  { %v4782_v37 = vpop.f32.mrf.mxu3  ;;  %v4630_v58 = vpop.f32.mrf.mxu1  ;;  %5686 = vmatpush.msrb.mxu2 %v5421_v2 }
 0x44a   :  { %v4804_v29 = vadd.f32 %v4782_v37, %v4693_v16  ;;  %v6473_v7 = vrot.slane %v4839_v6, 9  ;;  %v6474_v34 = vrot.slane %v4840_v45, 9  ;;  %v6475_v40 = vrot.slane %v4841_v48, 9 }
 0x44b   :  { %v8339_v59 = vmax.f32 %v8319_v51, %v6472_v50  ;;  %v5389_v51 = vunpack.c.l.bf16 %v5252_v0  ;;  %v5451_v50 = vunpack.c.l.bf16 %v8358_v5  ;;  %v5348_v0 = vld [vmem:[#allocation7 + $0x348] sm:$0xff] }
 0x44c   :  { %v4816_v56 = vadd.f32 %v8311_v14, %v4804_v29  ;;  %v8346_v37 = vmax.f32 %v4839_v6, %v6473_v7  ;;  %v8348_v16 = vmax.f32 %v4840_v45, %v6474_v34  ;;  %v8350_v63 = vmax.f32 %v4841_v48, %v6475_v40  ;;  %v8364_v45 = vld [vmem:[#allocation7 + $0x138] sm:$0xff]  ;;  %v5349_v7 = vld [vmem:[#allocation7 + $0x350] sm:$0xff]  ;;  %v5248_v34 = vld [vmem:[#allocation7 + $0x28] sm:$0xff] }
 0x44d   :  { %v5022_v29 = vperm.slane %v8339_v59, %v8341_v20  ;;  %v5419_v6 = vunpack.c.l.bf16 %v5267_v23  ;;  %5666 = vmatpush.msrb.mxu1 %v5389_v51  ;;  %v5449_v12 = vunpack.c.l.bf16 %v8364_v45  ;;  %v5264_v40 = vld [vmem:[#allocation7 + $0xa8] sm:$0xff]  ;;  %5707 = vmatpush.msrb.mxu3 %v5451_v50  ;;  %v5347_v51 = vld [vmem:[#allocation7 + $0x340] sm:$0xff]  ;;  %v8399_v50 = vld [vmem:[#allocation7 + $0x118] sm:$0xff] }
 0x44e   :  { %v8335_v26 = vmax.f32 %v4816_v56, 0.0  ;;  %v5351_v56 = vld [vmem:[#allocation7 + $0x360] sm:$0xff]  ;;  %v5050_v48 = vperm.slane %v8346_v37, %v8341_v20  ;;  %v5078_v9 = vperm.slane %v8348_v16, %v8341_v20  ;;  %v5106_v22 = vperm.slane %v8350_v63, %v8341_v20  ;;  %v8526_v37 = vld [vmem:[#allocation7 + $0x1d0] sm:$0xff] }
 0x44f   :  { %v5587_v46 = vunpack.c.l.bf16 %v5351_v56  ;;  %5667 = vmatpush.msrb.mxu1 %v5387_v35  ;;  %5687 = vmatpush.msrb.mxu2 %v5419_v6  ;;  %v5447_v56 = vunpack.c.l.bf16 %v8375_v8  ;;  %v5413_v17 = vunpack.c.l.bf16 %v5264_v40  ;;  %v5445_v35 = vunpack.c.l.bf16 %v8389_v62 }
 0x450   :  { %v4695_v38 = vpop.f32.mrf.mxu2  ;;  %v4842_v15 = vrot.slane %v8335_v26, 2  ;;  %v4843_v57 = vrot.slane %v8335_v26, 4  ;;  %v4844_v53 = vrot.slane %v8335_v26, 6  ;;  %v6476_v61 = vrot.slane %v8335_v26, 9  ;;  %5708 = vmatpush.msrb.mxu3 %v5449_v12 }
 0x451   :  { %v4696_v36 = vadd.f32 %v4695_v38, %v4630_v58  ;;  %v5250_v38 = vld [vmem:[#allocation7 + $0x38] sm:$0xff]  ;;  %5783 = vmatpush.msra.mxu0 %v5587_v46  ;;  %5688 = vmatpush.msrb.mxu2 %v5417_v21  ;;  %v5581_v6 = vunpack.c.l.bf16 %v5348_v0  ;;  %v5579_v21 = vunpack.c.l.bf16 %v5347_v51 }
 0x452   :  { %v6477_v4 = vrot.slane %v4842_v15, 9  ;;  %v5350_v58 = vld [vmem:[#allocation7 + $0x358] sm:$0xff]  ;;  %v5385_v41 = vunpack.c.l.bf16 %v5250_v38  ;;  %v6478_v13 = vrot.slane %v4843_v57, 9  ;;  %v8381_v39 = vrot.slane %v4844_v53, 9  ;;  %5709 = vmatpush.msrb.mxu3 %v5447_v56 }
 0x453   :  { %v8384_v44 = vmax.f32 %v8335_v26, %v6476_v61  ;;  %v5585_v30 = vunpack.c.l.bf16 %v5350_v58  ;;  %v5583_v38 = vunpack.c.l.bf16 %v5349_v7  ;;  %v5346_v58 = vld [vmem:[#allocation7 + $0x338] sm:$0xff] }
 0x454   :  { %5668 = vmatpush.msrb.mxu1 %v5385_v41  ;;  %v5443_v41 = vunpack.c.l.bf16 %v8394_v47  ;;  %v8404_v12 = vmax.f32 %v4843_v57, %v6478_v13  ;;  %5710 = vmatpush.msrb.mxu3 %v5445_v35  ;;  %v5441_v57 = vunpack.c.l.bf16 %v8399_v50  ;;  %v5577_v13 = vunpack.c.l.bf16 %v5346_v58  ;;  %v5243_v58 = vld [vmem:[#allocation7] sm:$0xff] }
 0x455   :  { %5784 = vmatpush.msra.mxu0 %v5585_v30  ;;  %v5345_v30 = vld [vmem:[#allocation7 + $0x330] sm:$0xff] }
 0x456   :  { %5711 = vmatpush.msrb.mxu3 %v5443_v41 }
 0x457   :  { %5785 = vmatpush.msra.mxu0 %v5583_v38 }
 0x458   :  { %5712 = vmatpush.msrb.mxu3 %v5441_v57 }
 0x459   :  { %v4633_v32 = vpop.f32.mrf.mxu1  ;;  %5786 = vmatpush.msra.mxu0 %v5581_v6  ;;  %v5575_v6 = vunpack.c.l.bf16 %v5345_v30 }
 0x45b   :  { %5787 = vmatpush.msra.mxu0 %v5579_v21 }
 0x45d   :  { %5788 = vmatpush.msra.mxu0 %v5577_v13 }
 0x45f   :  { %5789 = vmatpush.msra.mxu0 %v5575_v6  ;;  %v8455_v6 = vld [vmem:[#allocation7 + $0x310] sm:$0xff] }
 0x460   :  { %v4698_v24 = vpop.f32.mrf.mxu2 }
 0x461   :  { %v4785_v18 = vpop.f32.mrf.mxu3  ;;  %v4699_v55 = vadd.f32 %v4698_v24, %v4633_v32  ;;  %v5381_v24 = vunpack.c.l.bf16 %v5248_v34  ;;  %v5379_v32 = vunpack.c.l.bf16 %v5247_v10  ;;  %v5377_v34 = vunpack.c.l.bf16 %v5246_v11 }
 0x462   :  { %v4805_v1 = vadd.f32 %v4785_v18, %v4696_v36  ;;  %v5249_v18 = vld [vmem:[#allocation7 + $0x30] sm:$0xff] }
 0x463   :  { %v5265_v36 = vld [vmem:[#allocation7 + $0xb0] sm:$0xff]  ;;  %v5383_v43 = vunpack.c.l.bf16 %v5249_v18 }
 0x464   :  { %v4817_v31 = vadd.f32 %v8311_v14, %v4805_v1  ;;  %v8387_v1 = vmax.f32 %v4842_v15, %v6477_v4  ;;  %v5415_v60 = vunpack.c.l.bf16 %v5265_v36  ;;  %v5263_v15 = vld [vmem:[#allocation7 + $0xa0] sm:$0xff]  ;;  %v5262_v4 = vld [vmem:[#allocation7 + $0x98] sm:$0xff]  ;;  %v5245_v36 = vld [vmem:[#allocation7 + $0x10] sm:$0xff] }
 0x465   :  { %5669 = vmatpush.msrb.mxu1 %v5383_v43  ;;  %v5411_v46 = vunpack.c.l.bf16 %v5263_v15  ;;  %v5409_v40 = vunpack.c.l.bf16 %v5262_v4  ;;  %v5260_v15 = vld [vmem:[#allocation7 + $0x88] sm:$0xff]  ;;  %v5375_v38 = vunpack.c.l.bf16 %v5245_v36  ;;  %v5343_v36 = vld [vmem:[#allocation7 + $0x320] sm:$0xff] }
 0x466   :  { %v8370_v54 = vmax.f32 %v4817_v31, 0.0  ;;  %5689 = vmatpush.msrb.mxu2 %v5415_v60  ;;  %v5244_v60 = vld [vmem:[#allocation7 + $0x8] sm:$0xff]  ;;  %v5571_v13 = vunpack.c.l.bf16 %v5343_v36 }
 0x467   :  { %5670 = vmatpush.msrb.mxu1 %v5381_v24  ;;  %v8415_v4 = vld [vmem:[#allocation7 + $0x108] sm:$0xff]  ;;  %v5373_v26 = vunpack.c.l.bf16 %v5244_v60 }
 0x468   :  { %v4845_v31 = vrot.slane %v8370_v54, 2  ;;  %v4846_v3 = vrot.slane %v8370_v54, 4  ;;  %v4847_v23 = vrot.slane %v8370_v54, 6  ;;  %v6480_v61 = vrot.slane %v8370_v54, 9  ;;  %5690 = vmatpush.msrb.mxu2 %v5413_v17  ;;  %v5344_v24 = vld [vmem:[#allocation7 + $0x328] sm:$0xff] }
 0x469   :  { %v4788_v49 = vpop.f32.mrf.mxu3  ;;  %v4636_v10 = vpop.f32.mrf.mxu1  ;;  %5671 = vmatpush.msrb.mxu1 %v5379_v32  ;;  %v5573_v30 = vunpack.c.l.bf16 %v5344_v24 }
 0x46a   :  { %v4806_v2 = vadd.f32 %v4788_v49, %v4699_v55  ;;  %v5261_v49 = vld [vmem:[#allocation7 + $0x90] sm:$0xff]  ;;  %v6481_v7 = vrot.slane %v4845_v31, 9  ;;  %v6482_v43 = vrot.slane %v4846_v3, 9  ;;  %v4991_v0 = vmax.f32 %v8370_v54, %v6480_v61  ;;  %5691 = vmatpush.msrb.mxu2 %v5411_v46 }
 0x46b   :  { %v8408_v55 = vld [vmem:[#allocation7 + $0x110] sm:$0xff]  ;;  %v5407_v11 = vunpack.c.l.bf16 %v5261_v49  ;;  %v8420_v61 = vmax.f32 %v4844_v53, %v8381_v39  ;;  %v6483_v17 = vrot.slane %v4847_v23, 9  ;;  %5672 = vmatpush.msrb.mxu1 %v5377_v34  ;;  %v5405_v53 = vunpack.c.l.bf16 %v5260_v15  ;;  %v8427_v39 = vld [vmem:[#allocation7 + $0x100] sm:$0xff]  ;;  %v5338_v15 = vld [vmem:[#allocation7 + $0x2f8] sm:$0xff]  ;;  %5790 = vmatpush.msra.mxu0 %v5573_v30 }
 0x46c   :  { %v4818_v51 = vadd.f32 %v8311_v14, %v4806_v2  ;;  %v5439_v2 = vunpack.c.l.bf16 %v8408_v55  ;;  %v4992_v32 = vmax.f32 %v4845_v31, %v6481_v7  ;;  %5692 = vmatpush.msrb.mxu2 %v5409_v40  ;;  %v4993_v41 = vmax.f32 %v4846_v3, %v6482_v43  ;;  %v5322_v31 = vld [vmem:[#allocation7 + $0x278] sm:$0xff]  ;;  %v8471_v30 = vld [vmem:[#allocation7 + $0x2e8] sm:$0xff] }
 0x46d   :  { %v5026_v21 = vperm.slane %v4991_v0, %v8341_v20  ;;  %v5437_v49 = vunpack.c.l.bf16 %v8415_v4  ;;  %5673 = vmatpush.msrb.mxu1 %v5375_v38  ;;  %v5371_v40 = vunpack.c.l.bf16 %v5243_v58  ;;  %v5342_v3 = vld [vmem:[#allocation7 + $0x318] sm:$0xff]  ;;  %v4994_v0 = vmax.f32 %v4847_v23, %v6483_v17  ;;  %v5337_v58 = vld [vmem:[#allocation7 + $0x2f0] sm:$0xff]  ;;  %5791 = vmatpush.msra.mxu0 %v5571_v13  ;;  %9146 = vst [vmem:[#allocation10_spill] sm:$0xff] %v8471_v30  ;;  %v8498_v13 = vld [vmem:[#allocation7 + $0x2e0] sm:$0xff] }
 0x46e   :  { %v8435_v34 = vmax.f32 %v4818_v51, 0.0  ;;  %5693 = vmatpush.msrb.mxu2 %v5407_v11  ;;  %5713 = vmatpush.msrb.mxu3 %v5439_v2  ;;  %v5435_v57 = vunpack.c.l.bf16 %v8427_v39  ;;  %v8443_v51 = vperm.slane %v4992_v32, %v8341_v20  ;;  %v5529_v24 = vunpack.c.l.bf16 %v5322_v31  ;;  %9150 = vst [vmem:[#allocation12_spill] sm:$0xff] %v8498_v13  ;;  %v8520_v32 = vld [vmem:[#allocation7 + $0x2d8] sm:$0xff] }
 0x46f   :  { %5674 = vmatpush.msrb.mxu1 %v5373_v26  ;;  %v5035_v54 = vsel %vm3031_vm3, %v5026_v21, %v5022_v29  ;;  %v8453_v23 = vperm.slane %v4993_v41, %v8341_v20  ;;  %v5561_v17 = vunpack.c.l.bf16 %v5338_v15  ;;  %v5569_v2 = vunpack.c.l.bf16 %v5342_v3  ;;  %v8462_v29 = vld [vmem:[#allocation7 + $0x1e8] sm:$0xff]  ;;  %v8486_v3 = vld [vmem:[#allocation7 + $0x1e0] sm:$0xff]  ;;  %9153 = vst [vmem:[#allocation18_spill] sm:$0xff] %v8520_v32 }
 0x470   :  { %v4701_v18 = vpop.f32.mrf.mxu2  ;;  %5694 = vmatpush.msrb.mxu2 %v5405_v53  ;;  %5714 = vmatpush.msrb.mxu3 %v5437_v49  ;;  %v8464_v26 = vld [vmem:[#allocation7 + $0x268] sm:$0xff]  ;;  %v8467_v53 = vperm.slane %v4994_v0, %v8341_v20  ;;  %v9074_v36 = vrot.slane %v8435_v34, 4  ;;  %v5559_v49 = vunpack.c.l.bf16 %v5337_v58  ;;  %v8476_v31 = vsel %vm3039_vm7, %v5026_v21, %v5035_v54  ;;  %9148 = vst [vmem:[#allocation16_spill] sm:$0xff] %v8486_v3  ;;  %v8488_v0 = vld [vmem:[#allocation7 + $0x260] sm:$0xff]  ;;  %v8507_v58 = vld [vmem:[#allocation7 + $0x258] sm:$0xff] }
 0x471   :  { %v4702_v56 = vadd.f32 %v4701_v18, %v4636_v10  ;;  %v5259_v18 = vld [vmem:[#allocation7 + $0x80] sm:$0xff]  ;;  %v5306_v10 = vld [vmem:[#allocation7 + $0x1f8] sm:$0xff]  ;;  %5675 = vmatpush.msrb.mxu1 %v5371_v40  ;;  %v5063_v40 = vsel %vm3031_vm3, %v8443_v51, %v5050_v48  ;;  %v5567_v15 = vunpack.c.l.bf16 %v8455_v6  ;;  %9149 = vst [vmem:[#allocation15_spill] sm:$0xff] %v8488_v0  ;;  %v5091_v21 = vsel %vm3031_vm3, %v8453_v23, %v5078_v9 }
 0x472   :  { %v5403_v60 = vunpack.c.l.bf16 %v5259_v18  ;;  %v5497_v11 = vunpack.c.l.bf16 %v5306_v10  ;;  %5715 = vmatpush.msrb.mxu3 %v5435_v57  ;;  %v8473_v10 = vld [vmem:[#allocation7 + $0x308] sm:$0xff]  ;;  %5792 = vmatpush.msra.mxu0 %v5569_v2  ;;  %v5493_v48 = vunpack.c.l.bf16 %v8462_v29  ;;  %v5525_v57 = vunpack.c.l.bf16 %v8464_v26  ;;  %9152 = vst [vmem:[#allocation21_spill] sm:$0xff] %v8507_v58 }
 0x473   :  { %9147 = vst [vmem:[#allocation19_spill] sm:$0xff] %v8473_v10  ;;  %v5557_v16 = vunpack.c.l.bf16 %v8471_v30  ;;  %v5565_v9 = vunpack.c.l.bf16 %v8473_v10  ;;  %v8514_v54 = vsel %vm3031_vm3, %v8467_v53, %v5106_v22  ;;  %v5491_v2 = vunpack.c.l.bf16 %v8486_v3 }
 0x474   :  { %5695 = vmatpush.msrb.mxu2 %v5403_v60  ;;  %5720 = vmatpush.msra.mxu1 %v5497_v11  ;;  %v5555_v22 = vunpack.c.l.bf16 %v8498_v13  ;;  %v5521_v3 = vunpack.c.l.bf16 %v8507_v58  ;;  %v5553_v30 = vunpack.c.l.bf16 %v8520_v32 }
 0x475   :  { %5760 = vmatpush.msra.mxu3 %v5561_v17  ;;  %v6486_v17 = vrot.slane %v9074_v36, 9  ;;  %5793 = vmatpush.msra.mxu0 %v5567_v15 }
 0x476   :  { %5740 = vmatpush.msra.mxu2 %v5529_v24  ;;  %v8505_v24 = vld [vmem:[#allocation7 + $0x1d8] sm:$0xff] }
 0x477   :  { %5761 = vmatpush.msra.mxu3 %v5559_v49  ;;  %v9154_v49 = vrot.slane %v8435_v34, 6  ;;  %5794 = vmatpush.msra.mxu0 %v5565_v9 }
 0x479   :  { %v6487_v36 = vrot.slane %v9154_v49, 9  ;;  %v4639_v10 = vpop.f32.mrf.mxu1  ;;  %5762 = vmatpush.msra.mxu3 %v5557_v16  ;;  %v8541_v49 = vld [vmem:[#allocation7 + $0x2d0] sm:$0xff]  ;;  %v9155_v16 = vrot.slane %v8435_v34, 4 }
 0x47b   :  { %5763 = vmatpush.msra.mxu3 %v5555_v22 }
 0x47d   :  { %5764 = vmatpush.msra.mxu3 %v5553_v30 }
 0x480   :  { %v4704_v18 = vpop.f32.mrf.mxu2 }
 0x481   :  { %v4791_v35 = vpop.f32.mrf.mxu3 }
 0x482   :  { %v4807_v46 = vadd.f32 %v4791_v35, %v4702_v56  ;;  %v5305_v56 = vld [vmem:[#allocation7 + $0x1f0] sm:$0xff] }
 0x483   :  { %v8446_v35 = vld [vmem:[#allocation7 + $0x270] sm:$0xff]  ;;  %v5495_v59 = vunpack.c.l.bf16 %v5305_v56  ;;  %v8500_v56 = vld [vmem:[#allocation7 + $0x300] sm:$0xff] }
 0x484   :  { %v4819_v38 = vadd.f32 %v8311_v14, %v4807_v46  ;;  %v4848_v46 = vrot.slane %v8435_v34, 2  ;;  %v5527_v41 = vunpack.c.l.bf16 %v8446_v35  ;;  %9151 = vst [vmem:[#allocation11_spill] sm:$0xff] %v8500_v56  ;;  %v5563_v7 = vunpack.c.l.bf16 %v8500_v56 }
 0x485   :  { %5721 = vmatpush.msra.mxu1 %v5495_v59  ;;  %v5523_v59 = vunpack.c.l.bf16 %v8488_v0  ;;  %v5489_v0 = vunpack.c.l.bf16 %v8505_v24 }
 0x486   :  { %v8483_v60 = vmax.f32 %v4819_v38, 0.0  ;;  %v6484_v38 = vrot.slane %v8435_v34, 9  ;;  %v6485_v11 = vrot.slane %v4848_v46, 9  ;;  %5741 = vmatpush.msra.mxu2 %v5527_v41  ;;  %v8530_v41 = vsel %vm3039_vm7, %v8443_v51, %v5063_v40  ;;  %v8539_v40 = vld [vmem:[#allocation7 + $0x250] sm:$0xff]  ;;  %5795 = vmatpush.msra.mxu0 %v5563_v7 }
 0x487   :  { %5722 = vmatpush.msra.mxu1 %v5493_v48  ;;  %v5466_v51 = vunpack.c.h.bf16 %v8314_v42  ;;  %v8545_v48 = vsel %vm3039_vm7, %v8453_v23, %v5091_v21  ;;  %v4997_v42 = vmax.f32 %v9155_v16, %v6486_v17  ;;  %v8555_v23 = vld [vmem:[#allocation7 + $0x248] sm:$0xff]  ;;  %v5519_v21 = vunpack.c.l.bf16 %v8539_v40 }
 0x488   :  { %v4851_v43 = vrot.slane %v8483_v60, 2  ;;  %v6488_v63 = vrot.slane %v8483_v60, 9  ;;  %5742 = vmatpush.msra.mxu2 %v5525_v57  ;;  %v4995_v15 = vmax.f32 %v8435_v34, %v6484_v38  ;;  %v4996_v13 = vmax.f32 %v4848_v46, %v6485_v11  ;;  %v8549_v11 = vld [vmem:[#allocation7 + $0x1c8] sm:$0xff] }
 0x489   :  { %v4794_v56 = vpop.f32.mrf.mxu3  ;;  %v4705_v57 = vadd.f32 %v4704_v18, %v4639_v10  ;;  %v9083_v38 = vrot.slane %v8483_v60, 4  ;;  %5723 = vmatpush.msra.mxu1 %v5491_v2  ;;  %v5487_v46 = vunpack.c.l.bf16 %v8526_v37  ;;  %v4853_v9 = vrot.slane %v8483_v60, 6  ;;  %v8557_v18 = vld [vmem:[#allocation7 + $0x2c8] sm:$0xff]  ;;  %5860 = vmatpush.msrb.mxu0 %v5466_v51 }
 0x48a   :  { %5743 = vmatpush.msra.mxu2 %v5523_v59  ;;  %v6489_v32 = vrot.slane %v4851_v43, 9  ;;  %v4999_v58 = vmax.f32 %v8483_v60, %v6488_v63  ;;  %9156 = vst [vmem:[#allocation27_spill] sm:$0xff] %v8557_v18  ;;  %v5551_v2 = vunpack.c.l.bf16 %v8541_v49  ;;  %v5464_v17 = vunpack.c.h.bf16 %v8317_v19  ;;  %v8562_v59 = vld [vmem:[#allocation7 + $0x1c0] sm:$0xff] }
 0x48b   :  { %v4808_v10 = vadd.f32 %v4794_v56, %v4705_v57  ;;  %5724 = vmatpush.msra.mxu1 %v5489_v0  ;;  %v9157_v16 = vrot.slane %v8435_v34, 6  ;;  %v8567_v7 = vperm.slane %v4995_v15, %v8341_v20  ;;  %v8570_v22 = vperm.slane %v4996_v13, %v8341_v20  ;;  %v8573_v0 = vld [vmem:[#allocation7 + $0x240] sm:$0xff]  ;;  %v8582_v15 = vld [vmem:[#allocation7 + $0x1b8] sm:$0xff] }
 0x48c   :  { %5744 = vmatpush.msra.mxu2 %v5521_v3  ;;  %v5485_v3 = vunpack.c.l.bf16 %v8549_v11  ;;  %v8575_v56 = vld [vmem:[#allocation7 + $0x2c0] sm:$0xff]  ;;  %v6490_v19 = vrot.slane %v9083_v38, 9  ;;  %v5517_v34 = vunpack.c.l.bf16 %v8555_v23  ;;  %v5462_v13 = vunpack.c.h.bf16 %v8322_v52  ;;  %9159 = vst [vmem:[#allocation14_spill] sm:$0xff] %v8582_v15  ;;  %5765 = vmatpush.msra.mxu3 %v5551_v2  ;;  %v8588_v38 = vld [vmem:[#allocation7 + $0x238] sm:$0xff] }
 0x48d   :  { %v4998_v63 = vmax.f32 %v9157_v16, %v6487_v36  ;;  %9158 = vst [vmem:[#allocation24_spill] sm:$0xff] %v8575_v56  ;;  %5725 = vmatpush.msra.mxu1 %v5487_v46  ;;  %v5549_v36 = vunpack.c.l.bf16 %v8557_v18  ;;  %v6491_v30 = vrot.slane %v4853_v9, 9  ;;  %v5000_v51 = vmax.f32 %v4851_v43, %v6489_v32  ;;  %5861 = vmatpush.msrb.mxu0 %v5464_v17  ;;  %v8590_v46 = vld [vmem:[#allocation7 + $0x2b8] sm:$0xff] }
 0x48e   :  { %5745 = vmatpush.msra.mxu2 %v5519_v21  ;;  %v8585_v57 = vperm.slane %v4999_v58, %v8341_v20  ;;  %v5483_v16 = vunpack.c.l.bf16 %v8562_v59  ;;  %9160 = vst [vmem:[#allocation20_spill] sm:$0xff] %v8588_v38  ;;  %v4820_v21 = vadd.f32 %v8311_v14, %v4808_v10  ;;  %v5515_v52 = vunpack.c.l.bf16 %v8573_v0 }
 0x48f   :  { %9161 = vst [vmem:[#allocation17_spill] sm:$0xff] %v8590_v46  ;;  %5726 = vmatpush.msra.mxu1 %v5485_v3  ;;  %v5547_v18 = vunpack.c.l.bf16 %v8575_v56  ;;  %v5460_v43 = vunpack.c.h.bf16 %v8326_v28  ;;  %v8599_v32 = vsel %vm3039_vm7, %v8467_v53, %v8514_v54  ;;  %v9162_v58 = vperm.slane %v8384_v44, %v8341_v20  ;;  %5766 = vmatpush.msra.mxu3 %v5549_v36  ;;  %v8612_v28 = vld [vmem:[#allocation7 + $0x1b0] sm:$0xff] }
 0x490   :  { %5746 = vmatpush.msra.mxu2 %v5517_v34  ;;  %v8609_v10 = vperm.slane %v4997_v42, %v8341_v20  ;;  %5862 = vmatpush.msrb.mxu0 %v5462_v13  ;;  %v5481_v17 = vunpack.c.l.bf16 %v8582_v15  ;;  %v8614_v3 = vld [vmem:[#allocation7 + $0x230] sm:$0xff]  ;;  %v9163_v53 = vperm.slane %v8387_v1, %v8341_v20  ;;  %v8624_v54 = vperm.slane %v4998_v63, %v8341_v20  ;;  %v8630_v13 = vld [vmem:[#allocation7 + $0x1a8] sm:$0xff] }
 0x491   :  { %v8606_v2 = vsel %vm3031_vm3, %v8567_v7, %v9162_v58  ;;  %5727 = vmatpush.msra.mxu1 %v5483_v16  ;;  %v5513_v42 = vunpack.c.l.bf16 %v8588_v38  ;;  %v5545_v34 = vunpack.c.l.bf16 %v8590_v46  ;;  %v8628_v36 = vld [vmem:[#allocation7 + $0x2b0] sm:$0xff]  ;;  %9165 = vst [vmem:[#allocation23_spill] sm:$0xff] %v8630_v13  ;;  %v8632_v58 = vld [vmem:[#allocation7 + $0x228] sm:$0xff]  ;;  %v9167_v1 = vrot.slane %v8483_v60, 4  ;;  %5767 = vmatpush.msra.mxu3 %v5547_v18  ;;  %v8642_v46 = vld [vmem:[#allocation7 + $0x1a0] sm:$0xff] }
 0x492   :  { %v8621_v44 = vsel %vm3031_vm3, %v8570_v22, %v9163_v53  ;;  %5747 = vmatpush.msra.mxu2 %v5515_v52  ;;  %9164 = vst [vmem:[#allocation25_spill] sm:$0xff] %v8628_v36  ;;  %v5002_v53 = vmax.f32 %v4853_v9, %v6491_v30  ;;  %v5037_v63 = vsel %vm3033_vm4, %v8585_v57, %v8476_v31  ;;  %v5458_v16 = vunpack.c.h.bf16 %v8333_v27  ;;  %v8640_v52 = vld [vmem:[#allocation7 + $0x2a8] sm:$0xff]  ;;  %v8644_v38 = vld [vmem:[#allocation7 + $0x220] sm:$0xff] }
 0x493   :  { %9166 = vst [vmem:[#allocation26_spill] sm:$0xff] %v8632_v58  ;;  %v5001_v15 = vmax.f32 %v9167_v1, %v6490_v19  ;;  %5863 = vmatpush.msrb.mxu0 %v5460_v43  ;;  %v8647_v56 = vperm.slane %v5000_v51, %v8341_v20  ;;  %v8649_v60 = vmax.f32 %v4820_v21, 0.0  ;;  %5728 = vmatpush.msra.mxu1 %v5481_v17  ;;  %v5479_v9 = vunpack.c.l.bf16 %v8612_v28  ;;  %v8653_v18 = vld [vmem:[#allocation7 + $0x2a0] sm:$0xff]  ;;  %v8659_v21 = vld [vmem:[#allocation7 + $0x198] sm:$0xff]  ;;  %v4707_v17 = vpop.f32.mrf.mxu2 }
 0x494   :  { %9168 = vst [vmem:[#allocation22_spill] sm:$0xff] %v8640_v52  ;;  %5748 = vmatpush.msra.mxu2 %v5513_v42  ;;  %v5511_v31 = vunpack.c.l.bf16 %v8614_v3  ;;  %5768 = vmatpush.msra.mxu3 %v5545_v34  ;;  %v5543_v27 = vunpack.c.l.bf16 %v8628_v36  ;;  %v5456_v19 = vunpack.c.h.bf16 %v8343_v25  ;;  %v5477_v30 = vunpack.c.l.bf16 %v8630_v13  ;;  %v8661_v43 = vld [vmem:[#allocation7 + $0x218] sm:$0xff]  ;;  %v8705_v36 = vld [vmem:[#allocation7 + $0x188] sm:$0xff] }
 0x495   :  { %9169 = vst [vmem:[#allocation13_spill] sm:$0xff] %v8642_v46  ;;  %5864 = vmatpush.msrb.mxu0 %v5458_v16  ;;  %v5509_v51 = vunpack.c.l.bf16 %v8632_v58  ;;  %5729 = vmatpush.msra.mxu1 %v5479_v9  ;;  %v5541_v42 = vunpack.c.l.bf16 %v8640_v52  ;;  %v5454_v34 = vunpack.c.h.bf16 %v8353_v33  ;;  %v5475_v1 = vunpack.c.l.bf16 %v8642_v46  ;;  %v8667_v25 = vld [vmem:[#allocation7 + $0x298] sm:$0xff]  ;;  %v8681_v46 = vld [vmem:[#allocation7 + $0x190] sm:$0xff] }
 0x496   :  { %9170 = vst [vmem:[#allocation28_spill] sm:$0xff] %v8644_v38  ;;  %5749 = vmatpush.msra.mxu2 %v5511_v31  ;;  %v5507_v16 = vunpack.c.l.bf16 %v8644_v38  ;;  %v9175_v58 = vperm.slane %v8404_v12, %v8341_v20  ;;  %v8677_v9 = vperm.slane %v5001_v15, %v8341_v20  ;;  %5769 = vmatpush.msra.mxu3 %v5543_v27  ;;  %v5539_v33 = vunpack.c.l.bf16 %v8653_v18  ;;  %v8683_v38 = vld [vmem:[#allocation7 + $0x210] sm:$0xff]  ;;  %v4642_v27 = vpop.f32.mrf.mxu1 }
 0x497   :  { %9171 = vst [vmem:[#allocation29_spill] sm:$0xff] %v8653_v18  ;;  %5865 = vmatpush.msrb.mxu0 %v5456_v19  ;;  %v5452_v31 = vunpack.c.h.bf16 %v8358_v5  ;;  %v9178_v12 = vperm.slane %v8420_v61, %v8341_v20  ;;  %v8693_v15 = vperm.slane %v5002_v53, %v8341_v20  ;;  %5730 = vmatpush.msra.mxu1 %v5477_v30  ;;  %v5473_v19 = vunpack.c.l.bf16 %v8659_v21  ;;  %v8697_v18 = vld [vmem:[#allocation7 + $0x290] sm:$0xff]  ;;  %v8707_v30 = vld [vmem:[#allocation7 + $0x208] sm:$0xff] }
 0x498   :  { %9172 = vst [vmem:[#allocation30_spill] sm:$0xff] %v8659_v21  ;;  %v8674_v13 = vsel %vm3031_vm3, %v8609_v10, %v9175_v58  ;;  %5750 = vmatpush.msra.mxu2 %v5509_v51  ;;  %v5505_v5 = vunpack.c.l.bf16 %v8661_v43  ;;  %v8701_v52 = vsel %vm3041_vm8, %v8585_v57, %v5037_v63  ;;  %v4708_v61 = vadd.f32 %v4707_v17, %v4642_v27  ;;  %v8715_v17 = vld [vmem:[#allocation7 + $0x288] sm:$0xff]  ;;  %v8722_v27 = vld [vmem:[#allocation7 + $0x180] sm:$0xff] }
 0x499   :  { %9173 = vst [vmem:[#allocation31_spill] sm:$0xff] %v8661_v43  ;;  %v8690_v58 = vsel %vm3031_vm3, %v8624_v54, %v9178_v12  ;;  %5770 = vmatpush.msra.mxu3 %v5541_v42  ;;  %5866 = vmatpush.msrb.mxu0 %v5454_v34  ;;  %v5537_v12 = vunpack.c.l.bf16 %v8667_v25  ;;  %v5450_v53 = vunpack.c.h.bf16 %v8364_v45  ;;  %v5065_v51 = vsel %vm3033_vm4, %v8647_v56, %v8530_v41 }
 0x49a   :  { %9174 = vst [vmem:[#allocation32_spill] sm:$0xff] %v8667_v25  ;;  %v4854_v43 = vrot.slane %v8649_v60, 2  ;;  %5731 = vmatpush.msra.mxu1 %v5475_v1  ;;  %5751 = vmatpush.msra.mxu2 %v5507_v16  ;;  %v5471_v57 = vunpack.c.l.bf16 %v8681_v46  ;;  %v5503_v63 = vunpack.c.l.bf16 %v8683_v38  ;;  %v5093_v45 = vsel %vm3033_vm4, %v8677_v9, %v8545_v48  ;;  %v8724_v1 = vld [vmem:[#allocation7 + $0x200] sm:$0xff] }
 0x49b   :  { %9176 = vst [vmem:[#allocation33_spill] sm:$0xff] %v8681_v46  ;;  %5771 = vmatpush.msra.mxu3 %v5539_v33  ;;  %5867 = vmatpush.msrb.mxu0 %v5452_v31  ;;  %v5535_v41 = vunpack.c.l.bf16 %v8697_v18  ;;  %v5448_v34 = vunpack.c.h.bf16 %v8375_v8  ;;  %v4855_v16 = vrot.slane %v8649_v60, 4  ;;  %v5469_v46 = vunpack.c.l.bf16 %v8705_v36 }
 0x49c   :  { %9177 = vst [vmem:[#allocation34_spill] sm:$0xff] %v8683_v38  ;;  %v4856_v38 = vrot.slane %v8649_v60, 6  ;;  %5732 = vmatpush.msra.mxu1 %v5473_v19  ;;  %5752 = vmatpush.msra.mxu2 %v5505_v5  ;;  %v5501_v48 = vunpack.c.l.bf16 %v8707_v30  ;;  %v5121_v8 = vsel %vm3033_vm4, %v8693_v15, %v8599_v32  ;;  %v5533_v31 = vunpack.c.l.bf16 %v8715_v17 }
 0x49d   :  { %9179 = vst [vmem:[#allocation35_spill] sm:$0xff] %v8697_v18  ;;  %5772 = vmatpush.msra.mxu3 %v5537_v12  ;;  %5868 = vmatpush.msrb.mxu0 %v5450_v53  ;;  %v6492_v19 = vrot.slane %v8649_v60, 9  ;;  %v6493_v5 = vrot.slane %v4854_v43, 9  ;;  %v5066_v32 = vsel %vm3041_vm8, %v8647_v56, %v5065_v51  ;;  %v5094_v53 = vsel %vm3041_vm8, %v8677_v9, %v5093_v45 }
 0x49e   :  { %9180 = vst [vmem:[#allocation36_spill] sm:$0xff] %v8705_v36  ;;  %5733 = vmatpush.msra.mxu1 %v5471_v57  ;;  %5753 = vmatpush.msra.mxu2 %v5503_v63  ;;  %v5499_v36 = vunpack.c.l.bf16 %v8724_v1  ;;  %v6494_v57 = vrot.slane %v4855_v16, 9  ;;  %v6495_v63 = vrot.slane %v4856_v38, 9  ;;  %v5440_v9 = vunpack.c.h.bf16 %v8408_v55 }
 0x49f   :  { %9181 = vst [vmem:[#allocation37_spill] sm:$0xff] %v8707_v30  ;;  %v5467_v30 = vunpack.c.l.bf16 %v8722_v27  ;;  %5773 = vmatpush.msra.mxu3 %v5535_v41  ;;  %5869 = vmatpush.msrb.mxu0 %v5448_v34  ;;  %v5003_v41 = vmax.f32 %v8649_v60, %v6492_v19  ;;  %v5004_v34 = vmax.f32 %v4854_v43, %v6493_v5 }
 0x4a0   :  { %9182 = vst [vmem:[#allocation38_spill] sm:$0xff] %v8715_v17  ;;  %v4710_v18 = vpop.f32.mrf.mxu2  ;;  %5734 = vmatpush.msra.mxu1 %v5469_v46  ;;  %5754 = vmatpush.msra.mxu2 %v5501_v48  ;;  %v5122_v17 = vsel %vm3041_vm8, %v8693_v15, %v5121_v8  ;;  %v5438_v15 = vunpack.c.h.bf16 %v8415_v4 }
 0x4a1   :  { %v4797_v21 = vpop.f32.mrf.mxu3  ;;  %9183 = vst [vmem:[#allocation39_spill] sm:$0xff] %v8722_v27  ;;  %5774 = vmatpush.msra.mxu3 %v5533_v31  ;;  %v5005_v31 = vmax.f32 %v4855_v16, %v6494_v57  ;;  %v5142_v55 = vperm.slane %v5003_v41, %v8341_v20 }
 0x4a2   :  { %v4809_v42 = vadd.f32 %v4797_v21, %v4708_v61  ;;  %9184 = vst [vmem:[#allocation40_spill] sm:$0xff] %v8724_v1  ;;  %v8730_v21 = vld [vmem:[#allocation7 + $0x280] sm:$0xff]  ;;  %v5446_v61 = vunpack.c.h.bf16 %v8389_v62  ;;  %v5444_v62 = vunpack.c.h.bf16 %v8394_v47  ;;  %v4645_v1 = vpop.f32.mrf.mxu1  ;;  %5735 = vmatpush.msra.mxu1 %v5467_v30  ;;  %5755 = vmatpush.msra.mxu2 %v5499_v36  ;;  %v5170_v36 = vperm.slane %v5004_v34, %v8341_v20 }
 0x4a3   :  { %9185 = vst [vmem:[#allocation41_spill] sm:$0xff] %v8730_v21  ;;  %v5531_v12 = vunpack.c.l.bf16 %v8730_v21  ;;  %v4711_v47 = vadd.f32 %v4710_v18, %v4645_v1  ;;  %v6740_v1 = vld [vmem:[%s9063_s6] ss:$0 sm:$0xff]  ;;  %v5198_v8 = vperm.slane %v5005_v31, %v8341_v20 }
 0x4a4   :  { %v4821_v33 = vadd.f32 %v8311_v14, %v4809_v42  ;;  %v5442_v42 = vunpack.c.h.bf16 %v8399_v50  ;;  %5870 = vmatpush.msrb.mxu0 %v5446_v61  ;;  %v5006_v61 = vmax.f32 %v4856_v38, %v6495_v63 }
 0x4a5   :  { %5775 = vmatpush.msra.mxu3 %v5531_v12  ;;  %v5436_v12 = vunpack.c.h.bf16 %v8427_v39 }
 0x4a6   :  { %v4829_v14 = vmax.f32 %v4821_v33, 0.0  ;;  %5871 = vmatpush.msrb.mxu0 %v5444_v62 }
 0x4a8   :  { %v4857_v27 = vrot.slane %v4829_v14, 2  ;;  %v4858_v56 = vrot.slane %v4829_v14, 4  ;;  %v4859_v51 = vrot.slane %v4829_v14, 6  ;;  %v6496_v33 = vrot.slane %v4829_v14, 9  ;;  %5872 = vmatpush.msrb.mxu0 %v5442_v42 }
 0x4a9   :  { %v4800_v21 = vpop.f32.mrf.mxu3 }
 0x4aa   :  { %v6497_v46 = vrot.slane %v4857_v27, 9  ;;  %v6498_v45 = vrot.slane %v4858_v56, 9  ;;  %v6499_v48 = vrot.slane %v4859_v51, 9  ;;  %v5007_v50 = vmax.f32 %v4829_v14, %v6496_v33  ;;  %5873 = vmatpush.msrb.mxu0 %v5440_v9 }
 0x4ab   :  { %v4810_v25 = vadd.f32 %v4800_v21, %v4711_v47 }
 0x4ac   :  { %v5008_v60 = vmax.f32 %v4857_v27, %v6497_v46  ;;  %v5009_v43 = vmax.f32 %v4858_v56, %v6498_v45  ;;  %v5010_v18 = vmax.f32 %v4859_v51, %v6499_v48  ;;  %v5034_v30 = vperm.slane %v5007_v50, %v8341_v20  ;;  %5874 = vmatpush.msrb.mxu0 %v5438_v15 }
 0x4ad   :  { %v4822_v19 = vadd.f32 %v6740_v1, %v4810_v25  ;;  %v5226_v56 = vperm.slane %v5006_v61, %v8341_v20 }
 0x4ae   :  { %v5039_v38 = vsel %vm3035_vm5, %v5034_v30, %v8701_v52  ;;  %v5062_v27 = vperm.slane %v5008_v60, %v8341_v20  ;;  %v5090_v16 = vperm.slane %v5009_v43, %v8341_v20  ;;  %v5118_v21 = vperm.slane %v5010_v18, %v8341_v20  ;;  %5875 = vmatpush.msrb.mxu0 %v5436_v12 }
 0x4af   :  { %v5040_v5 = vsel %vm3043_vm9, %v5034_v30, %v5039_v38  ;;  %v4830_v14 = vmax.f32 %v4822_v19, 0.0 }
 0x4b0   :  { %5042 = vst [vmem:[#allocation5] sm:$0xf] %v5040_v5  ;;  %v5067_v4 = vsel %vm3035_vm5, %v5062_v27, %v5066_v32  ;;  %v5095_v25 = vsel %vm3035_vm5, %v5090_v16, %v5094_v53  ;;  %v5123_v52 = vsel %vm3035_vm5, %v5118_v21, %v5122_v17  ;;  %v5148_v32 = vsel %vm3039_vm7, %v8567_v7, %v8606_v2 }
 0x4b1   :  { %v5068_v62 = vsel %vm3043_vm9, %v5062_v27, %v5067_v4  ;;  %v5096_v57 = vsel %vm3043_vm9, %v5090_v16, %v5095_v25  ;;  %v5124_v63 = vsel %vm3043_vm9, %v5118_v21, %v5123_v52  ;;  %v4860_v42 = vrot.slane %v4830_v14, 2  ;;  %v8806_v16 = vld [vmem:[#allocation7 + $0x3f8] sm:$0xff]  ;;  %v8808_v21 = vld [vmem:[#allocation7 + $0x3f0] sm:$0xff]  ;;  %v8811_v52 = vld [vmem:[#allocation7 + $0x3e8] sm:$0xff] }
 0x4b2   :  { %5070 = vst [vmem:[#allocation5 + $0x4] sm:$0xf] %v5068_v62  ;;  %v4861_v51 = vrot.slane %v4830_v14, 4  ;;  %v4862_v39 = vrot.slane %v4830_v14, 6  ;;  %v6500_v33 = vrot.slane %v4830_v14, 9  ;;  %v5176_v17 = vsel %vm3039_vm7, %v8570_v22, %v8621_v44  ;;  %v6742_v4 = vld [vmem:[#allocation7 + $0xf8] sm:$0xff] }
 0x4b3   :  { %v5204_v53 = vsel %vm3039_vm7, %v8609_v10, %v8674_v13  ;;  %5098 = vst [vmem:[#allocation5 + $0x8] sm:$0xf] %v5096_v57  ;;  %v6501_v41 = vrot.slane %v4860_v42, 9  ;;  %v5149_v34 = vsel %vm3033_vm4, %v5142_v55, %v5148_v32  ;;  %v5232_v7 = vsel %vm3039_vm7, %v8624_v54, %v8690_v58 }
 0x4b4   :  { %5126 = vst [vmem:[#allocation5 + $0xc] sm:$0xf] %v5124_v63  ;;  %v6502_v47 = vrot.slane %v4861_v51, 9  ;;  %v6503_v9 = vrot.slane %v4862_v39, 9  ;;  %v5011_v46 = vmax.f32 %v4830_v14, %v6500_v33  ;;  %v5177_v2 = vsel %vm3033_vm4, %v5170_v36, %v5176_v17  ;;  %v6741_v14 = vld [vmem:[#allocation7 + $0x78] sm:$0xff]  ;;  %v6744_v33 = vld [vmem:[#allocation7 + $0xf0] sm:$0xff] }
 0x4b5   :  { %v5205_v22 = vsel %vm3033_vm4, %v5198_v8, %v5204_v53  ;;  %v5012_v44 = vmax.f32 %v4860_v42, %v6501_v41  ;;  %v5233_v45 = vsel %vm3033_vm4, %v5226_v56, %v5232_v7  ;;  %v5150_v50 = vsel %vm3041_vm8, %v5142_v55, %v5149_v34  ;;  %v8822_v17 = vld [vmem:[#allocation7 + $0x3e0] sm:$0xff]  ;;  %v6745_v41 = vld [vmem:[#allocation7 + $0x68] sm:$0xff] }
 0x4b6   :  { %v5013_v10 = vmax.f32 %v4861_v51, %v6502_v47  ;;  %v5014_v13 = vmax.f32 %v4862_v39, %v6503_v9  ;;  %v5146_v48 = vperm.slane %v5011_v46, %v8341_v20  ;;  %v5178_v61 = vsel %vm3041_vm8, %v5170_v36, %v5177_v2  ;;  %v6743_v51 = vld [vmem:[#allocation7 + $0x70] sm:$0xff]  ;;  %v6746_v47 = vld [vmem:[#allocation7 + $0xe8] sm:$0xff]  ;;  %v6747_v7 = vld [vmem:[#allocation7 + $0x60] sm:$0xff] }
 0x4b7   :  { %v5174_v31 = vperm.slane %v5012_v44, %v8341_v20  ;;  %v5206_v43 = vsel %vm3041_vm8, %v5198_v8, %v5205_v22  ;;  %v5234_v18 = vsel %vm3041_vm8, %v5226_v56, %v5233_v45  ;;  %v5625_v5 = vunpack.c.l.bf16 %v8806_v16  ;;  %v6748_v22 = vld [vmem:[#allocation7 + $0xe0] sm:$0xff]  ;;  %v8827_v45 = vld [vmem:[#allocation7 + $0x3d8] sm:$0xff] }
 0x4b8   :  { %v5151_v60 = vsel %vm3035_vm5, %v5146_v48, %v5150_v50  ;;  %v5202_v54 = vperm.slane %v5013_v10, %v8341_v20  ;;  %v5230_v58 = vperm.slane %v5014_v13, %v8341_v20  ;;  %v5402_v12 = vunpack.c.h.bf16 %v6741_v14  ;;  %v8831_v13 = vld [vmem:[#allocation7 + $0x3d0] sm:$0xff]  ;;  %v6755_v14 = vld [vmem:[#allocation7 + $0x48] sm:$0xff] }
 0x4b9   :  { %v5152_v30 = vsel %vm3043_vm9, %v5146_v48, %v5151_v60  ;;  %v5179_v1 = vsel %vm3035_vm5, %v5174_v31, %v5178_v61  ;;  %v5239_v38 = vld [vmem:[#allocation5] sm:$0xff]  ;;  %v5434_v25 = vunpack.c.h.bf16 %v6742_v4  ;;  %v5623_v42 = vunpack.c.l.bf16 %v8808_v21  ;;  %v8836_v60 = vld [vmem:[#allocation7 + $0x3c8] sm:$0xff] }
 0x4ba   :  { %5154 = vst [vmem:[#allocation5 + $0x10] sm:$0xf] %v5152_v30  ;;  %v5180_v55 = vsel %vm3043_vm9, %v5174_v31, %v5179_v1  ;;  %v5207_v19 = vsel %vm3035_vm5, %v5202_v54, %v5206_v43  ;;  %v5235_v36 = vsel %vm3035_vm5, %v5230_v58, %v5234_v18  ;;  %v5400_v39 = vunpack.c.h.bf16 %v6743_v51  ;;  %v6749_v31 = vld [vmem:[#allocation7 + $0x58] sm:$0xff]  ;;  %v6756_v4 = vld [vmem:[#allocation7 + $0xc8] sm:$0xff] }
 0x4bb   :  { %5182 = vst [vmem:[#allocation5 + $0x14] sm:$0xf] %v5180_v55  ;;  %v5208_v15 = vsel %vm3043_vm9, %v5202_v54, %v5207_v19  ;;  %v5236_v20 = vsel %vm3043_vm9, %v5230_v58, %v5235_v36  ;;  %v5240_v27 = vld [vmem:[#allocation5 + $0x8] sm:$0xff]  ;;  %v5432_v32 = vunpack.c.h.bf16 %v6744_v33  ;;  %v5621_v53 = vunpack.c.l.bf16 %v8811_v52  ;;  %v6750_v43 = vld [vmem:[#allocation7 + $0xd8] sm:$0xff]  ;;  %v6752_v19 = vld [vmem:[#allocation7 + $0x50] sm:$0xff] }
 0x4bc   :  { %5210 = vst [vmem:[#allocation5 + $0x18] sm:$0xf] %v5208_v15  ;;  %v5398_v34 = vunpack.c.h.bf16 %v6745_v41  ;;  %v5430_v9 = vunpack.c.h.bf16 %v6746_v47  ;;  %v5619_v46 = vunpack.c.l.bf16 %v8822_v17  ;;  %v5396_v2 = vunpack.c.h.bf16 %v6747_v7  ;;  %v6751_v30 = vld [vmem:[#allocation7 + $0x378] sm:$0xff]  ;;  %v6753_v15 = vld [vmem:[#allocation7 + $0xd0] sm:$0xff]  ;;  %v6758_v33 = vld [vmem:[#allocation7 + $0x40] sm:$0xff] }
 0x4bd   :  { %5238 = vst [vmem:[#allocation5 + $0x1c] sm:$0xf] %v5236_v20  ;;  %v5428_v44 = vunpack.c.h.bf16 %v6748_v22  ;;  %v5617_v50 = vunpack.c.l.bf16 %v8827_v45  ;;  %v5394_v61 = vunpack.c.h.bf16 %v6749_v31  ;;  %v5426_v18 = vunpack.c.h.bf16 %v6750_v43  ;;  %v8850_v51 = vld [vmem:[#allocation7 + $0x3b8] sm:$0xff] }
 0x4be   :  { %5637 = vst [vmem:[#allocation1] ss:$2 sm:$0xff] %v5239_v38  ;;  %v5594_v1 = vunpack.c.h.bf16 %v6751_v30  ;;  %v5615_v55 = vunpack.c.l.bf16 %v8831_v13  ;;  %v5392_v36 = vunpack.c.h.bf16 %v6752_v19  ;;  %v5424_v20 = vunpack.c.h.bf16 %v6753_v15  ;;  %v6754_v38 = vld [vmem:[#allocation7 + $0x370] sm:$0xff]  ;;  %v6761_v7 = vld [vmem:[#allocation7 + $0x38] sm:$0xff]  ;;  %v8859_v19 = vld [vmem:[#allocation7 + $0x3a0] sm:$0xff] }
 0x4bf   :  { %5639 = vst [vmem:[#allocation1 + $0x10] ss:$2 sm:$0xff] %v5240_v27  ;;  %v5592_v27 = vunpack.c.h.bf16 %v6754_v38  ;;  %v6762_v22 = vld [vmem:[#allocation7 + $0xb8] sm:$0xff]  ;;  %v6767_v38 = vld [vmem:[#allocation7 + $0x28] sm:$0xff] }
 0x4c0   :  { %v6763_v31 = vld [vmem:[#allocation7 + $0x358] sm:$0xff] }
 0x4c2   :  { %v5241_v8 = vld [vmem:[#allocation5 + $0x10] sm:$0xff] }
 0x4c3   :  { %5641 = vst [vmem:[#allocation1 + $0x20] ss:$2 sm:$0xff] %v5241_v8  ;;  %v8847_v8 = vld [vmem:[#allocation7 + $0x3c0] sm:$0xff] }
 0x4c4   :  { %v5242_v62 = vld [vmem:[#allocation5 + $0x18] sm:$0xff] }
 0x4c5   :  { %v8813_v57 = vld.sshfl [vmem:[#allocation1] sm:$0xff pattern:$0x75316420]  ;;  %v8815_v63 = vld.sshfl [vmem:[#allocation1 + $0x8] sm:$0xff pattern:$0x75316420] }
 0x4c6   :  { %5676 = vmatmul.f32.vlgmr.msrb.gmra.mxu1 %v8813_v57  ;;  %5696 = vmatmul.f32.vlgmr.msrb.gmra.mxu2 %v8815_v63  ;;  %v8820_v56 = vld.sshfl [vmem:[#allocation1 + $0x10] sm:$0xff pattern:$0x75316420]  ;;  %5643 = vst [vmem:[#allocation1 + $0x30] ss:$2 sm:$0xff] %v5242_v62 }
 0x4c7   :  { %5716 = vmatmul.f32.vlgmr.msrb.gmra.mxu3 %v8820_v56  ;;  %5800 = vmatpush.msrb.mxu1 %v5625_v5  ;;  %v8838_v54 = vld.sshfl [vmem:[#allocation1 + $0x18] sm:$0xff pattern:$0x75316420]  ;;  %v5613_v5 = vunpack.c.l.bf16 %v8836_v60 }
 0x4c8   :  { %5820 = vmatpush.msrb.mxu2 %v5402_v12  ;;  %5840 = vmatpush.msrb.mxu3 %v5434_v25  ;;  %v5390_v12 = vunpack.c.h.bf16 %v6755_v14  ;;  %v5422_v25 = vunpack.c.h.bf16 %v6756_v4  ;;  %v6757_v62 = vld [vmem:[#allocation7 + $0x368] sm:$0xff] }
 0x4c9   :  { %5801 = vmatpush.msrb.mxu1 %v5623_v42  ;;  %v5590_v42 = vunpack.c.h.bf16 %v6757_v62  ;;  %v6769_v4 = vld [vmem:[#allocation7 + $0x348] sm:$0xff]  ;;  %v5603_v62 = vunpack.c.l.bf16 %v8859_v19 }
 0x4ca   :  { %5821 = vmatpush.msrb.mxu2 %v5400_v39  ;;  %5841 = vmatpush.msrb.mxu3 %v5432_v32  ;;  %v8829_v10 = vld.sshfl [vmem:[#allocation1 + $0x20] sm:$0xff pattern:$0x75316420]  ;;  %v8833_v48 = vld.sshfl [vmem:[#allocation1 + $0x28] sm:$0xff pattern:$0x75316420]  ;;  %v5611_v39 = vunpack.c.l.bf16 %v8847_v8  ;;  %v5388_v32 = vunpack.c.h.bf16 %v6758_v33 }
 0x4cb   :  { %5802 = vmatpush.msrb.mxu1 %v5621_v53  ;;  %v6759_v53 = vld [vmem:[#allocation7 + $0xc0] sm:$0xff] }
 0x4cc   :  { %5822 = vmatpush.msrb.mxu2 %v5398_v34  ;;  %5842 = vmatpush.msrb.mxu3 %v5430_v9  ;;  %v5420_v41 = vunpack.c.h.bf16 %v6759_v53  ;;  %v6760_v34 = vld [vmem:[#allocation7 + $0x360] sm:$0xff]  ;;  %v8853_v9 = vld [vmem:[#allocation7 + $0x3b0] sm:$0xff] }
 0x4cd   :  { %5803 = vmatpush.msrb.mxu1 %v5619_v46  ;;  %v8840_v58 = vld.sshfl [vmem:[#allocation1 + $0x30] sm:$0xff pattern:$0x75316420]  ;;  %v5588_v47 = vunpack.c.h.bf16 %v6760_v34  ;;  %v5609_v46 = vunpack.c.l.bf16 %v8850_v51  ;;  %v5607_v43 = vunpack.c.l.bf16 %v8853_v9  ;;  %v8866_v53 = vld [vmem:[#allocation7 + $0x390] sm:$0xff] }
 0x4ce   :  { %5823 = vmatpush.msrb.mxu2 %v5396_v2  ;;  %5843 = vmatpush.msrb.mxu3 %v5428_v44  ;;  %v5386_v2 = vunpack.c.h.bf16 %v6761_v7  ;;  %v5418_v44 = vunpack.c.h.bf16 %v6762_v22  ;;  %v6771_v33 = vld [vmem:[#allocation7 + $0xa0] sm:$0xff]  ;;  %v6774_v7 = vld [vmem:[#allocation7 + $0x98] sm:$0xff]  ;;  %v8869_v22 = vld [vmem:[#allocation7 + $0x388] sm:$0xff] }
 0x4cf   :  { %5736 = vmatmul.f32.vlgmr.msra.gmra.mxu1 %v8838_v54  ;;  %5756 = vmatmul.f32.vlgmr.msra.gmra.mxu2 %v8829_v10 }
 0x4d0   :  { %5776 = vmatmul.f32.vlgmr.msra.gmra.mxu3 %v8833_v48  ;;  %5796 = vmatmul.f32.vlgmr.msra.gmra.mxu0 %v8840_v58 }
 0x4d1   :  { %5804 = vmatpush.msrb.mxu1 %v5617_v50  ;;  %5824 = vmatpush.msrb.mxu2 %v5394_v61  ;;  %v8856_v50 = vld [vmem:[#allocation7 + $0x3a8] sm:$0xff]  ;;  %v5586_v61 = vunpack.c.h.bf16 %v6763_v31 }
 0x4d2   :  { %5844 = vmatpush.msrb.mxu3 %v5426_v18  ;;  %5940 = vmatpush.msra.mxu0 %v5594_v1  ;;  %v6764_v18 = vld [vmem:[#allocation7 + $0x30] sm:$0xff] }
 0x4d3   :  { %5805 = vmatpush.msrb.mxu1 %v5615_v55  ;;  %5825 = vmatpush.msrb.mxu2 %v5392_v36  ;;  %v5384_v30 = vunpack.c.h.bf16 %v6764_v18  ;;  %v6765_v1 = vld [vmem:[#allocation7 + $0xb0] sm:$0xff] }
 0x4d4   :  { %5845 = vmatpush.msrb.mxu3 %v5424_v20  ;;  %5941 = vmatpush.msra.mxu0 %v5592_v27  ;;  %v5416_v55 = vunpack.c.h.bf16 %v6765_v1  ;;  %v6766_v36 = vld [vmem:[#allocation7 + $0x350] sm:$0xff]  ;;  %v5605_v20 = vunpack.c.l.bf16 %v8856_v50  ;;  %v5382_v27 = vunpack.c.h.bf16 %v6767_v38  ;;  %v6779_v38 = vld [vmem:[#allocation7 + $0x8] sm:$0xff] }
 0x4d5   :  { %5806 = vmatpush.msrb.mxu1 %v5613_v5  ;;  %5826 = vmatpush.msrb.mxu2 %v5390_v12  ;;  %v5584_v15 = vunpack.c.h.bf16 %v6766_v36  ;;  %v6768_v5 = vld [vmem:[#allocation7 + $0xa8] sm:$0xff]  ;;  %v8863_v12 = vld [vmem:[#allocation7 + $0x398] sm:$0xff]  ;;  %v6778_v36 = vld [vmem:[#allocation7 + $0x330] sm:$0xff] }
 0x4d6   :  { %5846 = vmatpush.msrb.mxu3 %v5422_v25  ;;  %5942 = vmatpush.msra.mxu0 %v5590_v42  ;;  %v5414_v14 = vunpack.c.h.bf16 %v6768_v5  ;;  %v5582_v25 = vunpack.c.h.bf16 %v6769_v4  ;;  %v6770_v42 = vld [vmem:[#allocation7 + $0x20] sm:$0xff]  ;;  %v5601_v34 = vunpack.c.l.bf16 %v8863_v12  ;;  %v6780_v5 = vld [vmem:[#allocation7 + $0x88] sm:$0xff] }
 0x4d7   :  { %5807 = vmatpush.msrb.mxu1 %v5611_v39  ;;  %5827 = vmatpush.msrb.mxu2 %v5388_v32  ;;  %v5380_v39 = vunpack.c.h.bf16 %v6770_v42  ;;  %v5412_v32 = vunpack.c.h.bf16 %v6771_v33  ;;  %v6781_v4 = vld [vmem:[#allocation7 + $0x328] sm:$0xff]  ;;  %v6782_v42 = vld [vmem:[#allocation7] sm:$0xff] }
 0x4d8   :  { %5847 = vmatpush.msrb.mxu3 %v5420_v41  ;;  %5943 = vmatpush.msra.mxu0 %v5588_v47  ;;  %v6773_v47 = vld [vmem:[#allocation7 + $0x18] sm:$0xff]  ;;  %v6783_v33 = vld [vmem:[#allocation7 + $0x80] sm:$0xff] }
 0x4d9   :  { %5808 = vmatpush.msrb.mxu1 %v5609_v46  ;;  %5828 = vmatpush.msrb.mxu2 %v5386_v2  ;;  %v5378_v46 = vunpack.c.h.bf16 %v6773_v47  ;;  %v5410_v2 = vunpack.c.h.bf16 %v6774_v7 }
 0x4da   :  { %5848 = vmatpush.msrb.mxu3 %v5418_v44  ;;  %5876 = vmatmul.f32.vlgmr.msrb.gmra.mxu0 %v8820_v56  ;;  %v6772_v56 = vld [vmem:[#allocation7 + $0x340] sm:$0xff]  ;;  %v6775_v44 = vld [vmem:[#allocation7 + $0x338] sm:$0xff] }
 0x4db   :  { %5944 = vmatpush.msra.mxu0 %v5586_v61  ;;  %5809 = vmatpush.msrb.mxu1 %v5607_v43  ;;  %v5580_v41 = vunpack.c.h.bf16 %v6772_v56  ;;  %v5578_v31 = vunpack.c.h.bf16 %v6775_v44  ;;  %v5599_v61 = vunpack.c.l.bf16 %v8866_v53  ;;  %v6776_v43 = vld [vmem:[#allocation7 + $0x10] sm:$0xff]  ;;  %v6784_v56 = vld [vmem:[#allocation7 + $0x320] sm:$0xff]  ;;  %v6787_v44 = vld [vmem:[#allocation7 + $0x2f8] sm:$0xff] }
 0x4dc   :  { %5829 = vmatpush.msrb.mxu2 %v5384_v30  ;;  %5849 = vmatpush.msrb.mxu3 %v5416_v55  ;;  %v5376_v18 = vunpack.c.h.bf16 %v6776_v43  ;;  %v6777_v30 = vld [vmem:[#allocation7 + $0x90] sm:$0xff]  ;;  %v8872_v55 = vld [vmem:[#allocation7 + $0x380] sm:$0xff] }
 0x4dd   :  { %5945 = vmatpush.msra.mxu0 %v5584_v15  ;;  %5810 = vmatpush.msrb.mxu1 %v5605_v20  ;;  %v5408_v1 = vunpack.c.h.bf16 %v6777_v30  ;;  %v5576_v15 = vunpack.c.h.bf16 %v6778_v36  ;;  %v5597_v20 = vunpack.c.l.bf16 %v8869_v22  ;;  %v6790_v36 = vld [vmem:[#allocation7 + $0x2f0] sm:$0xff] }
 0x4de   :  { %5830 = vmatpush.msrb.mxu2 %v5382_v27  ;;  %5850 = vmatpush.msrb.mxu3 %v5414_v14  ;;  %v5374_v27 = vunpack.c.h.bf16 %v6779_v38  ;;  %v5406_v14 = vunpack.c.h.bf16 %v6780_v5  ;;  %v5494_v38 = vunpack.c.h.bf16 %v8462_v29  ;;  %v9186_v5 = vld [vmem:[#allocation10_spill] sm:$0xff] }
 0x4df   :  { %5946 = vmatpush.msra.mxu0 %v5582_v25  ;;  %5811 = vmatpush.msrb.mxu1 %v5603_v62  ;;  %v5574_v25 = vunpack.c.h.bf16 %v6781_v4  ;;  %v5595_v62 = vunpack.c.l.bf16 %v8872_v55  ;;  %v9187_v4 = vld [vmem:[#allocation19_spill] sm:$0xff] }
 0x4e0   :  { %5831 = vmatpush.msrb.mxu2 %v5380_v39  ;;  %5851 = vmatpush.msrb.mxu3 %v5412_v32  ;;  %v5372_v39 = vunpack.c.h.bf16 %v6782_v42  ;;  %v5404_v32 = vunpack.c.h.bf16 %v6783_v33  ;;  %v9192_v33 = vld [vmem:[#allocation21_spill] sm:$0xff] }
 0x4e1   :  { %5947 = vmatpush.msra.mxu0 %v5580_v41  ;;  %5812 = vmatpush.msrb.mxu1 %v5601_v34  ;;  %v5572_v41 = vunpack.c.h.bf16 %v6784_v56  ;;  %v6785_v34 = vld [vmem:[#allocation7 + $0x1f8] sm:$0xff]  ;;  %v9193_v56 = vld [vmem:[#allocation18_spill] sm:$0xff] }
 0x4e2   :  { %5832 = vmatpush.msrb.mxu2 %v5378_v46  ;;  %5852 = vmatpush.msrb.mxu3 %v5410_v2  ;;  %v5498_v47 = vunpack.c.h.bf16 %v6785_v34  ;;  %v6786_v46 = vld [vmem:[#allocation7 + $0x278] sm:$0xff]  ;;  %v8876_v2 = vld.sshfl [vmem:[#allocation1 + $0x38] sm:$0xff pattern:$0x75316420]  ;;  %v5488_v34 = vunpack.c.h.bf16 %v8526_v37  ;;  %v5484_v37 = vunpack.c.h.bf16 %v8562_v59  ;;  %v5512_v59 = vunpack.c.h.bf16 %v8614_v3 }
 0x4e3   :  { %5948 = vmatpush.msra.mxu0 %v5578_v31  ;;  %5813 = vmatpush.msrb.mxu1 %v5599_v61  ;;  %v5530_v7 = vunpack.c.h.bf16 %v6786_v46  ;;  %v5562_v31 = vunpack.c.h.bf16 %v6787_v44  ;;  %v6788_v61 = vld [vmem:[#allocation7 + $0x318] sm:$0xff]  ;;  %v5552_v46 = vunpack.c.h.bf16 %v8541_v49  ;;  %v9194_v44 = vld [vmem:[#allocation27_spill] sm:$0xff] }
 0x4e4   :  { %5833 = vmatpush.msrb.mxu2 %v5376_v18  ;;  %5853 = vmatpush.msrb.mxu3 %v5408_v1  ;;  %v5570_v43 = vunpack.c.h.bf16 %v6788_v61  ;;  %v6789_v18 = vld [vmem:[#allocation7 + $0x1f0] sm:$0xff]  ;;  %v5528_v1 = vunpack.c.h.bf16 %v8446_v35  ;;  %v5566_v35 = vunpack.c.h.bf16 %v9187_v4  ;;  %v9203_v4 = vld [vmem:[#allocation13_spill] sm:$0xff] }
 0x4e5   :  { %5949 = vmatpush.msra.mxu0 %v5576_v15  ;;  %5814 = vmatpush.msrb.mxu1 %v5597_v20  ;;  %v5496_v30 = vunpack.c.h.bf16 %v6789_v18  ;;  %v5560_v15 = vunpack.c.h.bf16 %v6790_v36  ;;  %v5568_v20 = vunpack.c.h.bf16 %v8455_v6  ;;  %v9190_v6 = vld [vmem:[#allocation12_spill] sm:$0xff]  ;;  %v9205_v3 = vld [vmem:[#allocation29_spill] sm:$0xff] }
 0x4e6   :  { %5834 = vmatpush.msrb.mxu2 %v5374_v27  ;;  %5854 = vmatpush.msrb.mxu3 %v5406_v14  ;;  %v5526_v27 = vunpack.c.h.bf16 %v8464_v26  ;;  %v5558_v14 = vunpack.c.h.bf16 %v9186_v5  ;;  %v5556_v42 = vunpack.c.h.bf16 %v9190_v6  ;;  %v5490_v26 = vunpack.c.h.bf16 %v8505_v24  ;;  %v9195_v61 = vld [vmem:[#allocation24_spill] sm:$0xff]  ;;  %v9202_v5 = vld [vmem:[#allocation22_spill] sm:$0xff]  ;;  %v9207_v6 = vld [vmem:[#allocation31_spill] sm:$0xff] }
 0x4e7   :  { %5950 = vmatpush.msra.mxu0 %v5574_v25  ;;  %5815 = vmatpush.msrb.mxu1 %v5595_v62  ;;  %v9189_v25 = vld [vmem:[#allocation15_spill] sm:$0xff]  ;;  %v5486_v24 = vunpack.c.h.bf16 %v8549_v11  ;;  %v5548_v49 = vunpack.c.h.bf16 %v9195_v61  ;;  %v9197_v18 = vld [vmem:[#allocation20_spill] sm:$0xff] }
 0x4e8   :  { %5835 = vmatpush.msrb.mxu2 %v5372_v39  ;;  %5855 = vmatpush.msrb.mxu3 %v5404_v32  ;;  %v5524_v62 = vunpack.c.h.bf16 %v9189_v25  ;;  %v9191_v39 = vld [vmem:[#allocation11_spill] sm:$0xff]  ;;  %v5522_v32 = vunpack.c.h.bf16 %v9192_v33  ;;  %v9206_v25 = vld [vmem:[#allocation30_spill] sm:$0xff]  ;;  %v9216_v61 = vld [vmem:[#allocation40_spill] sm:$0xff] }
 0x4e9   :  { %5951 = vmatpush.msra.mxu0 %v5572_v41  ;;  %5816 = vmatmul.f32.vlgmr.msrb.gmra.mxu1 %v8876_v2  ;;  %v5564_v29 = vunpack.c.h.bf16 %v9191_v39  ;;  %v5554_v41 = vunpack.c.h.bf16 %v9193_v56  ;;  %v9208_v39 = vld [vmem:[#allocation32_spill] sm:$0xff] }
 0x4ea   :  { %5836 = vmatmul.f32.vlgmr.msrb.gmra.mxu2 %v8813_v57  ;;  %5856 = vmatmul.f32.vlgmr.msrb.gmra.mxu3 %v8815_v63  ;;  %v9188_v57 = vld [vmem:[#allocation16_spill] sm:$0xff] }
 0x4eb   :  { %5880 = vmatpush.msra.mxu1 %v5498_v47  ;;  %5900 = vmatpush.msra.mxu2 %v5530_v7  ;;  %v5492_v63 = vunpack.c.h.bf16 %v9188_v57  ;;  %v5520_v47 = vunpack.c.h.bf16 %v8539_v40  ;;  %v5518_v7 = vunpack.c.h.bf16 %v8555_v23  ;;  %v5516_v40 = vunpack.c.h.bf16 %v8573_v0  ;;  %v9199_v0 = vld [vmem:[#allocation25_spill] sm:$0xff]  ;;  %v9204_v57 = vld [vmem:[#allocation28_spill] sm:$0xff] }
 0x4ec   :  { %5920 = vmatpush.msra.mxu3 %v5562_v31  ;;  %5952 = vmatpush.msra.mxu0 %v5570_v43  ;;  %v5550_v31 = vunpack.c.h.bf16 %v9194_v44  ;;  %v9196_v43 = vld [vmem:[#allocation14_spill] sm:$0xff]  ;;  %v5514_v23 = vunpack.c.h.bf16 %v9197_v18  ;;  %v5544_v36 = vunpack.c.h.bf16 %v9199_v0  ;;  %v5626_v18 = vunpack.c.h.bf16 %v8806_v16  ;;  %v6678_v0 = vld [vmem:[%s9066_s9 + $0x18] sm:$0xff]  }
 0x4ed   :  { %5881 = vmatpush.msra.mxu1 %v5496_v30  ;;  %5901 = vmatpush.msra.mxu2 %v5528_v1  ;;  %v5482_v11 = vunpack.c.h.bf16 %v9196_v43  ;;  %v9198_v30 = vld [vmem:[#allocation17_spill] sm:$0xff]  ;;  %v5480_v1 = vunpack.c.h.bf16 %v8612_v28  ;;  %v5508_v28 = vunpack.c.h.bf16 %v9204_v57  ;;  %v9214_v44 = vld [vmem:[#allocation38_spill] sm:$0xff]  ;;  %v5618_v16 = vunpack.c.h.bf16 %v8827_v45 }
 0x4ee   :  { %5921 = vmatpush.msra.mxu3 %v5560_v15  ;;  %5953 = vmatpush.msra.mxu0 %v5568_v20  ;;  %v9200_v15 = vld [vmem:[#allocation23_spill] sm:$0xff]  ;;  %v9217_v43 = vld [vmem:[#allocation41_spill] sm:$0xff]  ;;  %v5604_v45 = vunpack.c.h.bf16 %v8859_v19 }
 0x4ef   :  { %5882 = vmatpush.msra.mxu1 %v5494_v38  ;;  %5902 = vmatpush.msra.mxu2 %v5526_v27  ;;  %v5478_v20 = vunpack.c.h.bf16 %v9200_v15  ;;  %v9201_v38 = vld [vmem:[#allocation26_spill] sm:$0xff] }
 0x4f0   :  { %5922 = vmatpush.msra.mxu3 %v5558_v14  ;;  %5954 = vmatpush.msra.mxu0 %v5566_v35  ;;  %v5510_v27 = vunpack.c.h.bf16 %v9201_v38  ;;  %v5542_v14 = vunpack.c.h.bf16 %v9202_v5  ;;  %v5476_v35 = vunpack.c.h.bf16 %v9203_v4  ;;  %v6681_v19 = vld [vmem:[%s9066_s9 + $0x30] sm:$0xff]  }
 0x4f1   :  { %5883 = vmatpush.msra.mxu1 %v5492_v63  ;;  %5903 = vmatpush.msra.mxu2 %v5524_v62  ;;  %v5540_v63 = vunpack.c.h.bf16 %v9205_v3  ;;  %v5474_v62 = vunpack.c.h.bf16 %v9206_v25  ;;  %v6677_v38 = vld [vmem:[%s9066_s9 + $0x10] sm:$0xff]   ;;  %v8975_v3 = vld [vmem:[%s9065_s8] sm:$0x3] }
 0x4f2   :  { %5923 = vmatpush.msra.mxu3 %v5556_v42  ;;  %5955 = vmatpush.msra.mxu0 %v5564_v29  ;;  %v5506_v42 = vunpack.c.h.bf16 %v9207_v6  ;;  %v5538_v29 = vunpack.c.h.bf16 %v9208_v39  ;;  %v6603_v5 = vunpack.c.h.bf16 %v6677_v38  ;;  %v6602_v4 = vunpack.c.l.bf16 %v6677_v38 }
 0x4f3   :  { %5884 = vmatpush.msra.mxu1 %v5490_v26  ;;  %5904 = vmatpush.msra.mxu2 %v5522_v32  ;;  %v9209_v26 = vld [vmem:[#allocation33_spill] sm:$0xff]  ;;  %v9210_v32 = vld [vmem:[#allocation34_spill] sm:$0xff] }
 0x4f4   :  { %5924 = vmatpush.msra.mxu3 %v5554_v41  ;;  %5956 = vmatmul.f32.vlgmr.msra.gmra.mxu0 %v8840_v58  ;;  %v5546_v58 = vunpack.c.h.bf16 %v9198_v30  ;;  %v5472_v33 = vunpack.c.h.bf16 %v9209_v26  ;;  %v5504_v56 = vunpack.c.h.bf16 %v9210_v32  ;;  %v9211_v41 = vld [vmem:[#allocation35_spill] sm:$0xff]  ;;  %v5622_v30 = vunpack.c.h.bf16 %v8811_v52 }
 0x4f5   :  { %5885 = vmatpush.msra.mxu1 %v5488_v34  ;;  %5905 = vmatpush.msra.mxu2 %v5520_v47  ;;  %v5536_v34 = vunpack.c.h.bf16 %v9211_v41  ;;  %v9212_v47 = vld [vmem:[#allocation36_spill] sm:$0xff]  ;;  %v5608_v52 = vunpack.c.h.bf16 %v8853_v9  ;;  %v5596_v9 = vunpack.c.h.bf16 %v8872_v55 }
 0x4f6   :  { %5925 = vmatpush.msra.mxu3 %v5552_v46  ;;  %v5470_v46 = vunpack.c.h.bf16 %v9212_v47 }
 0x4f7   :  { %5886 = vmatpush.msra.mxu1 %v5486_v24  ;;  %5906 = vmatpush.msra.mxu2 %v5518_v7  ;;  %v9213_v24 = vld [vmem:[#allocation37_spill] sm:$0xff] }
 0x4f8   :  { %5926 = vmatpush.msra.mxu3 %v5550_v31  ;;  %v5502_v7 = vunpack.c.h.bf16 %v9213_v24  ;;  %v5534_v31 = vunpack.c.h.bf16 %v9214_v44 }
 0x4f9   :  { %5887 = vmatpush.msra.mxu1 %v5484_v37  ;;  %5907 = vmatpush.msra.mxu2 %v5516_v40  ;;  %v9215_v37 = vld [vmem:[#allocation39_spill] sm:$0xff] }
 0x4fa   :  { %5927 = vmatpush.msra.mxu3 %v5548_v49  ;;  %v5468_v40 = vunpack.c.h.bf16 %v9215_v37  ;;  %v5500_v49 = vunpack.c.h.bf16 %v9216_v61  ;;  %v6690_v37 = vld [vmem:[%s9066_s9 + $0x78] sm:$0xff]  }
 0x4fb   :  { %5888 = vmatpush.msra.mxu1 %v5482_v11  ;;  %5908 = vmatpush.msra.mxu2 %v5514_v23  ;;  %v5532_v11 = vunpack.c.h.bf16 %v9217_v43  ;;  %v5624_v23 = vunpack.c.h.bf16 %v8808_v21  ;;  %v5612_v21 = vunpack.c.h.bf16 %v8847_v8  ;;  %v6682_v8 = vld [vmem:[%s9066_s9 + $0x38] sm:$0xff]   ;;  %v6655_v61 = vunpack.c.h.bf16 %v6690_v37  ;;  %v6689_v43 = vld [vmem:[%s9066_s9 + $0x70] sm:$0xff]  }
 0x4fc   :  { %5928 = vmatpush.msra.mxu3 %v5546_v58  ;;  %v5620_v58 = vunpack.c.h.bf16 %v8822_v17  ;;  %v5606_v17 = vunpack.c.h.bf16 %v8856_v50  ;;  %v6622_v50 = vunpack.c.l.bf16 %v6682_v8 }
 0x4fd   :  { %5889 = vmatpush.msra.mxu1 %v5480_v1  ;;  %5909 = vmatpush.msra.mxu2 %v5512_v59  ;;  %v5616_v1 = vunpack.c.h.bf16 %v8831_v13  ;;  %v5602_v13 = vunpack.c.h.bf16 %v8863_v12  ;;  %v6680_v12 = vld [vmem:[%s9066_s9 + $0x28] sm:$0xff]  }
 0x4fe   :  { %5929 = vmatpush.msra.mxu3 %v5544_v36  ;;  %v6615_v59 = vunpack.c.h.bf16 %v6680_v12  ;;  %v6614_v55 = vunpack.c.l.bf16 %v6680_v12 }
 0x4ff   :  { %5890 = vmatpush.msra.mxu1 %v5478_v20  ;;  %5910 = vmatpush.msra.mxu2 %v5510_v27  ;;  %v6607_v20 = vunpack.c.h.bf16 %v6678_v0  ;;  %v6606_v27 = vunpack.c.l.bf16 %v6678_v0 }
 0x500   :  { %5930 = vmatpush.msra.mxu3 %v5542_v14  ;;  %v6676_v14 = vld [vmem:[%s9066_s9 + $0x8] sm:$0xff]  }
 0x501   :  { %5891 = vmatpush.msra.mxu1 %v5476_v35  ;;  %5911 = vmatpush.msra.mxu2 %v5508_v28  ;;  %v6599_v35 = vunpack.c.h.bf16 %v6676_v14  ;;  %v6598_v57 = vunpack.c.l.bf16 %v6676_v14  ;;  %v6593_v28 = vld [vmem:[%s9066_s9] sm:$0xff]  }
 0x502   :  { %5931 = vmatpush.msra.mxu3 %v5540_v63  ;;  %v6595_v63 = vunpack.c.h.bf16 %v6593_v28  ;;  %v6594_v25 = vunpack.c.l.bf16 %v6593_v28  ;;  %v6106_v28 = vld [vmem:[%s9068_s11 + $0x78] sm:$0xff] }
 0x503   :  { %5892 = vmatpush.msra.mxu1 %v5474_v62  ;;  %5912 = vmatpush.msra.mxu2 %v5506_v42  ;;  %v5629_v62 = vperm.slane %v8975_v3, 0 }
 0x504   :  { %5932 = vmatpush.msra.mxu3 %v5538_v29  ;;  %6111 = vmatpush.msrb.mxu0 %v6106_v28 }
 0x505   :  { %5893 = vmatpush.msra.mxu1 %v5472_v33  ;;  %5913 = vmatpush.msra.mxu2 %v5504_v56 }
 0x506   :  { %5933 = vmatpush.msra.mxu3 %v5536_v34 }
 0x507   :  { %5894 = vmatpush.msra.mxu1 %v5470_v46  ;;  %5914 = vmatpush.msra.mxu2 %v5502_v7 }
 0x508   :  { %5934 = vmatpush.msra.mxu3 %v5534_v31 }
 0x509   :  { %5895 = vmatpush.msra.mxu1 %v5468_v40  ;;  %5915 = vmatpush.msra.mxu2 %v5500_v49  ;;  %v6654_v49 = vunpack.c.l.bf16 %v6690_v37 }
 0x50a   :  { %5935 = vmatpush.msra.mxu3 %v5532_v11  ;;  %5896 = vmatmul.f32.vlgmr.msra.gmra.mxu1 %v8838_v54  ;;  %v5614_v54 = vunpack.c.h.bf16 %v8836_v60  ;;  %v5598_v60 = vunpack.c.h.bf16 %v8869_v22  ;;  %v6618_v22 = vunpack.c.l.bf16 %v6681_v19  ;;  %v6651_v11 = vunpack.c.h.bf16 %v6689_v43 }
 0x50b   :  { %5916 = vmatmul.f32.vlgmr.msra.gmra.mxu2 %v8829_v10  ;;  %5936 = vmatmul.f32.vlgmr.msra.gmra.mxu3 %v8833_v48  ;;  %v5610_v10 = vunpack.c.h.bf16 %v8850_v51  ;;  %v5600_v48 = vunpack.c.h.bf16 %v8866_v53  ;;  %v6623_v51 = vunpack.c.h.bf16 %v6682_v8  ;;  %v6619_v53 = vunpack.c.h.bf16 %v6681_v19 }
 0x50c   :  { %5960 = vmatpush.msrb.mxu1 %v5626_v18  ;;  %6070 = vmatpush.msrb.mxu3 %v6655_v61  ;;  %v6650_v18 = vunpack.c.l.bf16 %v6689_v43  ;;  %v5630_v19 = vperm.slane %v8975_v3, 1  ;;  %v6105_v3 = vld [vmem:[%s9068_s11 + $0x70] sm:$0xff] }
 0x50d   :  { %6050 = vmatpush.msrb.mxu2 %v6623_v51  ;;  %v6683_v51 = vld [vmem:[%s9066_s9 + $0x40] sm:$0xff]   ;;  %6112 = vmatpush.msrb.mxu0 %v6105_v3 }
 0x50e   :  { %5961 = vmatpush.msrb.mxu1 %v5624_v23  ;;  %6071 = vmatpush.msrb.mxu3 %v6654_v49  ;;  %v6688_v23 = vld [vmem:[%s9066_s9 + $0x68] sm:$0xff]  }
 0x50f   :  { %6051 = vmatpush.msrb.mxu2 %v6622_v50  ;;  %v6626_v50 = vunpack.c.l.bf16 %v6683_v51 }
 0x510   :  { %5962 = vmatpush.msrb.mxu1 %v5622_v30  ;;  %6072 = vmatpush.msrb.mxu3 %v6651_v11  ;;  %v6647_v30 = vunpack.c.h.bf16 %v6688_v23 }
 0x511   :  { %6052 = vmatpush.msrb.mxu2 %v6619_v53 }
 0x512   :  { %5963 = vmatpush.msrb.mxu1 %v5620_v58  ;;  %v6687_v58 = vld [vmem:[%s9066_s9 + $0x60] sm:$0xff]   ;;  %6073 = vmatpush.msrb.mxu3 %v6650_v18 }
 0x513   :  { %6053 = vmatpush.msrb.mxu2 %v6618_v22 }
 0x514   :  { %5964 = vmatpush.msrb.mxu1 %v5618_v16  ;;  %v6646_v16 = vunpack.c.l.bf16 %v6688_v23  ;;  %6074 = vmatpush.msrb.mxu3 %v6647_v30 }
 0x515   :  { %6054 = vmatpush.msrb.mxu2 %v6615_v59 }
 0x516   :  { %5965 = vmatpush.msrb.mxu1 %v5616_v1  ;;  %v6643_v1 = vunpack.c.h.bf16 %v6687_v58  ;;  %6075 = vmatpush.msrb.mxu3 %v6646_v16 }
 0x517   :  { %6055 = vmatpush.msrb.mxu2 %v6614_v55 }
 0x518   :  { %5966 = vmatpush.msrb.mxu1 %v5614_v54  ;;  %v6686_v54 = vld [vmem:[%s9066_s9 + $0x58] sm:$0xff]   ;;  %6076 = vmatpush.msrb.mxu3 %v6643_v1 }
 0x51a   :  { %5967 = vmatpush.msrb.mxu1 %v5612_v21  ;;  %v6642_v21 = vunpack.c.l.bf16 %v6687_v58 }
 0x51c   :  { %5968 = vmatpush.msrb.mxu1 %v5610_v10  ;;  %v6639_v10 = vunpack.c.h.bf16 %v6686_v54  ;;  %6077 = vmatpush.msrb.mxu3 %v6642_v21 }
 0x51e   :  { %5969 = vmatpush.msrb.mxu1 %v5608_v52  ;;  %v6685_v52 = vld [vmem:[%s9066_s9 + $0x50] sm:$0xff]   ;;  %6078 = vmatpush.msrb.mxu3 %v6639_v10 }
 0x520   :  { %5970 = vmatpush.msrb.mxu1 %v5606_v17  ;;  %v6638_v17 = vunpack.c.l.bf16 %v6686_v54 }
 0x522   :  { %5971 = vmatpush.msrb.mxu1 %v5604_v45  ;;  %v6635_v45 = vunpack.c.h.bf16 %v6685_v52  ;;  %6079 = vmatpush.msrb.mxu3 %v6638_v17 }
 0x524   :  { %5972 = vmatpush.msrb.mxu1 %v5602_v13  ;;  %v6684_v13 = vld [vmem:[%s9066_s9 + $0x48] sm:$0xff]   ;;  %6080 = vmatpush.msrb.mxu3 %v6635_v45 }
 0x525   :  { %v6630_v8 = vunpack.c.l.bf16 %v6684_v13 }
 0x526   :  { %5973 = vmatpush.msrb.mxu1 %v5600_v48  ;;  %v6634_v48 = vunpack.c.l.bf16 %v6685_v52 }
 0x528   :  { %5974 = vmatpush.msrb.mxu1 %v5598_v60  ;;  %v6631_v60 = vunpack.c.h.bf16 %v6684_v13  ;;  %6081 = vmatpush.msrb.mxu3 %v6634_v48 }
 0x52a   :  { %5975 = vmatpush.msrb.mxu1 %v5596_v9  ;;  %6082 = vmatpush.msrb.mxu3 %v6631_v60  ;;  %v6627_v9 = vunpack.c.h.bf16 %v6683_v51 }
 0x52b   :  { %5976 = vmatmul.f32.vlgmr.msrb.gmra.mxu1 %v8876_v2  ;;  %v6679_v2 = vld [vmem:[%s9066_s9 + $0x20] sm:$0xff]  }
 0x52c   :  { %v6611_v36 = vunpack.c.h.bf16 %v6679_v2  ;;  %v6610_v15 = vunpack.c.l.bf16 %v6679_v2  ;;  %6083 = vmatpush.msrb.mxu3 %v6630_v8 }
 0x52e   :  { %6056 = vmatpush.msrb.mxu2 %v6611_v36  ;;  %6084 = vmatpush.msrb.mxu3 %v6627_v9 }
 0x530   :  { %6057 = vmatpush.msrb.mxu2 %v6610_v15  ;;  %6085 = vmatpush.msrb.mxu3 %v6626_v50 }
 0x532   :  { %6058 = vmatpush.msrb.mxu2 %v6607_v20 }
 0x534   :  { %6059 = vmatpush.msrb.mxu2 %v6606_v27 }
 0x536   :  { %6060 = vmatpush.msrb.mxu2 %v6603_v5 }
 0x538   :  { %6061 = vmatpush.msrb.mxu2 %v6602_v4 }
 0x53a   :  { %6062 = vmatpush.msrb.mxu2 %v6599_v35 }
 0x53c   :  { %6063 = vmatpush.msrb.mxu2 %v6598_v57 }
 0x53e   :  { %6064 = vmatpush.msrb.mxu2 %v6595_v63  ;;  %v6104_v63 = vld [vmem:[%s9068_s11 + $0x68] sm:$0xff] }
 0x53f   :  { %6113 = vmatpush.msrb.mxu0 %v6104_v63 }
 0x540   :  { %6065 = vmatpush.msrb.mxu2 %v6594_v25  ;;  %v6103_v25 = vld [vmem:[%s9068_s11 + $0x60] sm:$0xff] }
 0x541   :  { %6114 = vmatpush.msrb.mxu0 %v6103_v25 }
 0x543   :  { %v5677_v6 = vpop.f32.mrf.mxu1 }
 0x544   :  { %v5678_v39 = vadd.f32 %v5677_v6, %v5629_v62  ;;  %v6102_v62 = vld [vmem:[%s9068_s11 + $0x58] sm:$0xff]  ;;  %v6101_v6 = vld [vmem:[%s9068_s11 + $0x50] sm:$0xff] }
 0x545   :  { %6115 = vmatpush.msrb.mxu0 %v6102_v62 }
 0x547   :  { %6116 = vmatpush.msrb.mxu0 %v6101_v6 }
 0x549   :  { %v5697_v42 = vpop.f32.mrf.mxu2 }
 0x54a   :  { %v5698_v29 = vadd.f32 %v5697_v42, %v5678_v39  ;;  %v5717_v26 = vpop.f32.mrf.mxu3  ;;  %v6100_v42 = vld [vmem:[%s9068_s11 + $0x48] sm:$0xff]  ;;  %v6099_v39 = vld [vmem:[%s9068_s11 + $0x40] sm:$0xff] }
 0x54b   :  { %6117 = vmatpush.msrb.mxu0 %v6100_v42 }
 0x54c   :  { %v5718_v33 = vadd.f32 %v5717_v26, %v5698_v29  ;;  %v5737_v32 = vpop.f32.mrf.mxu1  ;;  %v6098_v29 = vld [vmem:[%s9068_s11 + $0x38] sm:$0xff]  ;;  %v6097_v26 = vld [vmem:[%s9068_s11 + $0x30] sm:$0xff] }
 0x54d   :  { %v5797_v24 = vpop.f32.mrf.mxu0  ;;  %6118 = vmatpush.msrb.mxu0 %v6099_v39 }
 0x54e   :  { %v5738_v41 = vadd.f32 %v5737_v32, %v5718_v33  ;;  %v6096_v33 = vld [vmem:[%s9068_s11 + $0x28] sm:$0xff]  ;;  %v6095_v32 = vld [vmem:[%s9068_s11 + $0x20] sm:$0xff] }
 0x54f   :  { %6119 = vmatpush.msrb.mxu0 %v6098_v29 }
 0x551   :  { %6120 = vmatpush.msrb.mxu0 %v6097_v26 }
 0x552   :  { %v5757_v56 = vpop.f32.mrf.mxu2 }
 0x553   :  { %v5758_v34 = vadd.f32 %v5757_v56, %v5738_v41  ;;  %v5777_v47 = vpop.f32.mrf.mxu3  ;;  %6121 = vmatpush.msrb.mxu0 %v6096_v33  ;;  %v6094_v56 = vld [vmem:[%s9068_s11 + $0x18] sm:$0xff]  ;;  %v6093_v41 = vld [vmem:[%s9068_s11 + $0x10] sm:$0xff] }
 0x555   :  { %v5778_v46 = vadd.f32 %v5777_v47, %v5758_v34  ;;  %6122 = vmatpush.msrb.mxu0 %v6095_v32  ;;  %v6092_v34 = vld [vmem:[%s9068_s11 + $0x8] sm:$0xff]  ;;  %v6091_v47 = vld [vmem:[%s9068_s11] sm:$0xff] }
 0x557   :  { %v5798_v7 = vadd.f32 %v5797_v24, %v5778_v46  ;;  %v5877_v55 = vpop.f32.mrf.mxu0  ;;  %6123 = vmatpush.msrb.mxu0 %v6094_v56  ;;  %v6722_v46 = vld [vmem:[%s9067_s10] ss:$0 sm:$0xff] }
 0x559   :  { %6124 = vmatpush.msrb.mxu0 %v6093_v41 }
 0x55b   :  { %6125 = vmatpush.msrb.mxu0 %v6092_v34 }
 0x55d   :  { %6126 = vmatpush.msrb.mxu0 %v6091_v47 }
 0x566   :  { %v5817_v44 = vpop.f32.mrf.mxu1 }
 0x567   :  { %v5818_v31 = vadd.f32 %v5817_v44, %v5798_v7 }
 0x569   :  { %v5980_v40 = vmax.f32 %v5818_v31, 0.0 }
 0x56b   :  { %6066 = vmatmul.f32.vlgmr.msrb.gmra.mxu2 %v5980_v40  ;;  %v6723_v40 = vld [vmem:[#allocation6] ss:$0 sm:$0xff] }
 0x56d   :  { %v5837_v12 = vpop.f32.mrf.mxu2  ;;  %v5857_v22 = vpop.f32.mrf.mxu3 }
 0x56e   :  { %v5838_v53 = vadd.f32 %v5837_v12, %v5630_v19 }
 0x570   :  { %v5858_v59 = vadd.f32 %v5857_v22, %v5838_v53 }
 0x571   :  { %v5957_v5 = vpop.f32.mrf.mxu0 }
 0x572   :  { %v5878_v0 = vadd.f32 %v5877_v55, %v5858_v59 }
 0x587   :  { %v5897_v2 = vpop.f32.mrf.mxu1 }
 0x588   :  { %v5898_v15 = vadd.f32 %v5897_v2, %v5878_v0 }
 0x58e   :  { %v5917_v36 = vpop.f32.mrf.mxu2  ;;  %v5937_v38 = vpop.f32.mrf.mxu3 }
 0x58f   :  { %v5918_v20 = vadd.f32 %v5917_v36, %v5898_v15 }
 0x591   :  { %v5938_v27 = vadd.f32 %v5937_v38, %v5918_v20 }
 0x593   :  { %v5958_v14 = vadd.f32 %v5957_v5, %v5938_v27 }
 0x5a8   :  { %v5977_v4 = vpop.f32.mrf.mxu1 }
 0x5a9   :  { %v5978_v35 = vadd.f32 %v5977_v4, %v5958_v14 }
 0x5ab   :  { %v5981_v57 = vmax.f32 %v5978_v35, 0.0 }
 0x5ad   :  { %6086 = vmatmul.f32.vlgmr.msrb.gmra.mxu3 %v5981_v57 }
 0x5ee   :  { %v6067_v24 = vpop.f32.mrf.mxu2 }
 0x5ef   :  { %v6068_v7 = vadd.f32 %v6722_v46, %v6067_v24 }
 0x630   :  { %v6087_v44 = vpop.f32.mrf.mxu3 }
 0x631   :  { %v6088_v31 = vadd.f32 %v6087_v44, %v6068_v7 }
 0x633   :  { %v6090_v37 = vmax.f32 %v6088_v31, 0.0 }
 0x635   :  { %6127 = vmatmul.f32.vlgmr.msrb.gmra.mxu0 %v6090_v37 }
 0x6b2   :  { %v6128_v61 = vpop.f32.mrf.mxu0 }
 0x6b3   :  { %v6129_v49 = vadd.f32 %v6723_v40, %v6128_v61 }
 0x6b5   :  { %6132 = vst.msk [vmem:[%s9070_s13] sm:$0xf] %vm6131_vm13, %v6129_v49 }
 0x6b6   :  { %6137 = vsyncpa [#allocation8], 1 }

</bundles_post_ra>
